<compile_context>
chip_gen: v7x
topology: tpu7x:2x2x1
jax: 0.10.0
libtpu: 0.0.40
codegen_flags: <defaults>
</compile_context>

<pallas_src>
import functools

import jax
import jax.numpy as jnp
from jax.experimental import pallas as pl
from jax.experimental.pallas import tpu as pltpu

NUM_CLASSES = 53
NUM_CLASSES_PAD = 128         # pad classifier width 53 -> 128 (fully lane-dense store)
STEM_CH = 32
HEAD_CH = 1280                # enet_out_size in the PyTorch module
K_RAW = 3 * 3 * 3             # im2col patch size for the stem conv
K_PAD = 32                    # pad contraction dim 27 -> 32


def _silu(x):
    # Exact SiLU via tanh identity: x * sigmoid(x) == x * 0.5 * (1 + tanh(x/2)).
    # One EUP op per element (tanh) instead of exp + reciprocal.
    return x * (0.5 * (jnp.tanh(0.5 * x) + 1.0))


# ---------------------------------------------------------------------------
# Fused kernel: stem conv + BN + SiLU  ->  1x1 head conv + BN + SiLU
#               -> global-avg-pool accumulate -> (last step) classifier Linear
# ---------------------------------------------------------------------------
def fused_kernel(x_ref, ws_ref, bs_ref, wh_ref, bh_ref, wc_ref, bc_ref,
                 o_ref, acc_ref):
    # x:  (B, TP, Kp) bf16 im2col patches tile       ws: (Kp, 32) bf16 (BN scale folded)
    # bs: (1, 32) f32                                wh: (32, 1280) bf16 (BN scale folded)
    # bh: (1, 1280) f32                              wc: (1280, 128) f32 (1/P folded)
    # bc: (1, 128) f32
    # o:  (B, 128) f32 logits (padded)               acc: VMEM (B, 1280) f32 pool accumulator
    p = pl.program_id(0)

    @pl.when(p == 0)
    def _():
        acc_ref[...] = jnp.zeros_like(acc_ref)

    # conv_stem (im2col matmul) + folded BN bias + SiLU   -- keep the batch dim (no reshapes)
    h1 = jnp.einsum("btk,ks->bts", x_ref[...], ws_ref[...],
                    preferred_element_type=jnp.float32)            # (B, TP, 32) f32
    h1 = _silu(h1 + bs_ref[...])
    # conv_head (1x1 conv) + folded BN bias + SiLU
    h2 = jnp.einsum("bts,sf->btf", h1.astype(jnp.bfloat16), wh_ref[...],
                    preferred_element_type=jnp.float32)            # (B, TP, 1280) f32
    h2 = _silu(h2 + bh_ref[...])
    # global average pool: accumulate per-batch partial sums (f32); 1/P is folded into w_cls
    acc_ref[...] += jnp.sum(h2, axis=1)

    @pl.when(p == pl.num_programs(0) - 1)
    def _():
        logits = jnp.dot(acc_ref[...], wc_ref[...],
                         preferred_element_type=jnp.float32) + bc_ref[...]
        o_ref[...] = logits.astype(o_ref.dtype)


def fused_forward(patches, w_stem, b_stem, w_head, b_head, w_cls, b_cls, tp):
    B, P, Kp = patches.shape
    F = w_head.shape[1]
    NCp = w_cls.shape[1]
    n_steps = P // tp

    # VMEM budget: f32 head intermediate + SiLU temps, double-buffered patch tiles,
    # resident (double-buffered) weights, accumulator, output, plus headroom.
    vmem_bytes = (3 * B * tp * F * 4
                  + 2 * B * tp * Kp * 2
                  + 2 * (Kp * STEM_CH * 2 + STEM_CH * F * 2 + F * NCp * 4
                         + (STEM_CH + F + NCp) * 4)
                  + B * F * 4 + B * NCp * 4
                  + (8 << 20))
    vmem_bytes = int(min(vmem_bytes, 56 << 20))   # stay under v7x 64 MiB physical VMEM

    return pl.pallas_call(
        fused_kernel,
        out_shape=jax.ShapeDtypeStruct((B, NCp), jnp.float32),
        grid_spec=pltpu.PrefetchScalarGridSpec(
            num_scalar_prefetch=0,
            grid=(n_steps,),
            in_specs=[
                pl.BlockSpec((B, tp, Kp), lambda i: (0, i, 0)),
                pl.BlockSpec((Kp, STEM_CH), lambda i: (0, 0)),
                pl.BlockSpec((1, STEM_CH), lambda i: (0, 0)),
                pl.BlockSpec((STEM_CH, F), lambda i: (0, 0)),
                pl.BlockSpec((1, F), lambda i: (0, 0)),
                pl.BlockSpec((F, NCp), lambda i: (0, 0)),
                pl.BlockSpec((1, NCp), lambda i: (0, 0)),
            ],
            out_specs=pl.BlockSpec((B, NCp), lambda i: (0, 0)),
            scratch_shapes=[pltpu.VMEM((B, F), jnp.float32)],
        ),
        compiler_params=pltpu.CompilerParams(
            dimension_semantics=("arbitrary",),
            vmem_limit_bytes=vmem_bytes),
    )(patches, w_stem, b_stem, w_head, b_head, w_cls, b_cls)


# ---------------------------------------------------------------------------
# Glue: im2col for the 3x3 stride-2 pad-1 stem conv (NHWC), BN folding, params
# ---------------------------------------------------------------------------
def im2col_3x3_s2_pad1(x_nhwc, k_pad):
    """Single-materialization, K-padded im2col.  x_nhwc should already be bf16."""
    B, H, W, C = x_nhwc.shape
    Ho, Wo = (H + 1) // 2, (W + 1) // 2          # matches Conv2d(k=3, s=2, p=1)
    xp = jnp.pad(x_nhwc, ((0, 0), (1, 1), (1, 1), (0, 0)))
    cols = []
    for kh in range(3):                          # (kh, kw, c) ordering matches HWIO reshape
        for kw in range(3):
            cols.append(xp[:, kh:kh + 2 * Ho:2, kw:kw + 2 * Wo:2, :])
    if k_pad > 9 * C:                            # fold K padding into the same concat
        cols.append(jnp.zeros((B, Ho, Wo, k_pad - 9 * C), x_nhwc.dtype))
    patches = jnp.concatenate(cols, axis=-1)     # (B, Ho, Wo, k_pad)
    return patches.reshape(B, Ho * Wo, k_pad), (Ho, Wo)


def fold_bn(gamma, beta, mean, var, eps=1e-5):
    scale = gamma / jnp.sqrt(var + eps)
    bias = beta - mean * scale
    return scale[None, :], bias[None, :]         # (1, C)


def init_params(key):
    ks = jax.random.split(key, 8)
    p = {}
    # conv_stem: PyTorch weight (32, 3, 3, 3) -> stored HWIO (3, 3, 3, 32)
    p["w_stem"] = 0.1 * jax.random.normal(ks[0], (3, 3, 3, STEM_CH), jnp.float32)
    p["bn1"] = (1.0 + 0.01 * jax.random.normal(ks[1], (STEM_CH,), jnp.float32),   # gamma
                0.01 * jax.random.normal(ks[2], (STEM_CH,), jnp.float32),         # beta
                jnp.zeros((STEM_CH,), jnp.float32),                               # mean
                jnp.ones((STEM_CH,), jnp.float32))                                # var
    # conv_head: 1x1 conv, torch (F, Cin, 1, 1) -> stored (Cin, F)
    p["w_head"] = 0.05 * jax.random.normal(ks[3], (STEM_CH, HEAD_CH), jnp.float32)
    p["bn2"] = (1.0 + 0.01 * jax.random.normal(ks[4], (HEAD_CH,), jnp.float32),
                0.01 * jax.random.normal(ks[5], (HEAD_CH,), jnp.float32),
                jnp.zeros((HEAD_CH,), jnp.float32),
                jnp.ones((HEAD_CH,), jnp.float32))
    # classifier: nn.Linear(1280, 53): torch weight (53, 1280) -> stored transposed (1280, 53)
    p["w_cls"] = 0.02 * jax.random.normal(ks[6], (HEAD_CH, NUM_CLASSES), jnp.float32)
    p["b_cls"] = 0.01 * jax.random.normal(ks[7], (1, NUM_CLASSES), jnp.float32)
    return p


def prepare_inference_params(params):
    """Fold BN scales into weights, pad K (27->32) and classes (53->128), cast MXU operands bf16."""
    sc1, bi1 = fold_bn(*params["bn1"])
    w_stem = params["w_stem"].reshape(K_RAW, STEM_CH) * sc1              # fold BN scale
    w_stem = jnp.pad(w_stem, ((0, K_PAD - K_RAW), (0, 0))).astype(jnp.bfloat16)
    b_stem = bi1.astype(jnp.float32)                                     # (1, 32)

    sc2, bi2 = fold_bn(*params["bn2"])
    w_head = (params["w_head"] * sc2).astype(jnp.bfloat16)               # (32, 1280)
    b_head = bi2.astype(jnp.float32)                                     # (1, 1280)

    w_cls = jnp.pad(params["w_cls"], ((0, 0), (0, NUM_CLASSES_PAD - NUM_CLASSES)))
    b_cls = jnp.pad(params["b_cls"], ((0, 0), (0, NUM_CLASSES_PAD - NUM_CLASSES)))
    return dict(w_stem=w_stem, b_stem=b_stem, w_head=w_head, b_head=b_head,
                w_cls=w_cls.astype(jnp.float32), b_cls=b_cls.astype(jnp.float32))


def _choose_tile(P, target=512):
    # Largest divisor of P that is <= target and sublane-friendly (mult of 8), else P itself.
    # target ~512 amortizes the ~0.35us per-grid-step overhead while keeping the f32 head
    # intermediate (B*tp*1280*4 B) well inside VMEM on all generations.
    for tp in range(min(P, target), 0, -1):
        if P % tp == 0 and (tp % 8 == 0 or tp == P):
            return tp
    return P


@functools.partial(jax.jit, static_argnames=("tp",))
def simple_card_classifier(x_nchw, prep, tp):
    # PyTorch NCHW -> NHWC, cast to bf16 BEFORE im2col (halves wrapper HBM traffic)
    x = jnp.transpose(x_nchw, (0, 2, 3, 1)).astype(jnp.bfloat16)
    patches, (Ho, Wo) = im2col_3x3_s2_pad1(x, K_PAD)                     # (B, P, 32) bf16
    # TODO(synk): pretrained EfficientNet-B0 MBConv block stack omitted (needs checkpoint).
    inv_p = 1.0 / (Ho * Wo)
    w_cls = prep["w_cls"] * inv_p          # fold mean-pool divisor into classifier weights
    logits_pad = fused_forward(patches, prep["w_stem"], prep["b_stem"],
                               prep["w_head"], prep["b_head"],
                               w_cls, prep["b_cls"], tp)                 # (B, 128)
    return logits_pad[:, :NUM_CLASSES]


if __name__ == "__main__":
    key = jax.random.PRNGKey(0)
    k_x, k_p = jax.random.split(key)
    x = jax.random.normal(k_x, (2, 3, 32, 32), jnp.float32)              # small NCHW input
    params = init_params(k_p)
    prep = prepare_inference_params(params)

    H, W = x.shape[2], x.shape[3]
    P = ((H + 1) // 2) * ((W + 1) // 2)
    tp = _choose_tile(P)

    logits = simple_card_classifier(x, prep, tp=tp)
    logits = jax.block_until_ready(logits)
    assert logits.shape == (2, NUM_CLASSES) and logits.dtype == jnp.float32
    assert bool(jnp.all(jnp.isfinite(logits)))
    print("KERNEL_OK")
</pallas_src>

<mosaic_0001>
module attributes {stable_mosaic.version = 11 : i64} {
  func.func @fused_kernel(%arg0: i32, %arg1: memref<2x256x32xbf16, #tpu.memory_space<vmem>>, %arg2: memref<32x32xbf16, #tpu.memory_space<vmem>>, %arg3: memref<1x32xf32, #tpu.memory_space<vmem>>, %arg4: memref<32x1280xbf16, #tpu.memory_space<vmem>>, %arg5: memref<1x1280xf32, #tpu.memory_space<vmem>>, %arg6: memref<1280x128xf32, #tpu.memory_space<vmem>>, %arg7: memref<1x128xf32, #tpu.memory_space<vmem>>, %arg8: memref<2x128xf32, #tpu.memory_space<vmem>>, %arg9: memref<2x1280xf32, #tpu.memory_space<vmem>>) attributes {dimension_semantics = [#tpu.dimension_semantics<arbitrary>], iteration_bounds = array<i64: 1>, scalar_prefetch = 0 : i64, scratch_operands = 1 : i64, tpu.core_type = #tpu.core_type<tc>, window_params = [{transform_indices = @transform_0, window_bounds = array<i64: 2, 256, 32>}, {pipeline_mode = #tpu.pipeline_mode<synchronous>, transform_indices = @transform_1, window_bounds = array<i64: 32, 32>}, {pipeline_mode = #tpu.pipeline_mode<synchronous>, transform_indices = @transform_2, window_bounds = array<i64: 1, 32>}, {pipeline_mode = #tpu.pipeline_mode<synchronous>, transform_indices = @transform_3, window_bounds = array<i64: 32, 1280>}, {pipeline_mode = #tpu.pipeline_mode<synchronous>, transform_indices = @transform_4, window_bounds = array<i64: 1, 1280>}, {pipeline_mode = #tpu.pipeline_mode<synchronous>, transform_indices = @transform_5, window_bounds = array<i64: 1280, 128>}, {pipeline_mode = #tpu.pipeline_mode<synchronous>, transform_indices = @transform_6, window_bounds = array<i64: 1, 128>}, {pipeline_mode = #tpu.pipeline_mode<synchronous>, transform_indices = @transform_7, window_bounds = array<i64: 2, 128>}]} {
    %c0_i32 = arith.constant 0 : i32
    %0 = arith.cmpi eq, %arg0, %c0_i32 : i32
    %1 = arith.extui %0 : i1 to i32
    %c0_i32_0 = arith.constant 0 : i32
    %2 = arith.cmpi ne, %1, %c0_i32_0 : i32
    scf.if %2 {
      %cst_25 = arith.constant 0.000000e+00 : f32
      %40 = vector.broadcast %cst_25 : f32 to vector<2x1280xf32>
      %c0_26 = arith.constant 0 : index
      %c0_27 = arith.constant 0 : index
      %41 = vector.load %arg9[%c0_26, %c0_27] : memref<2x1280xf32, #tpu.memory_space<vmem>>, vector<2x1280xf32>
      tpu.vector_store %arg9[%c0_26, %c0_27], %40 {strides = array<i32>} : memref<2x1280xf32, #tpu.memory_space<vmem>>, vector<2x1280xf32>,
    } else {
    }
    %c0 = arith.constant 0 : index
    %c0_1 = arith.constant 0 : index
    %c0_2 = arith.constant 0 : index
    %3 = vector.load %arg1[%c0, %c0_1, %c0_2] : memref<2x256x32xbf16, #tpu.memory_space<vmem>>, vector<2x256x32xbf16>
    %c0_3 = arith.constant 0 : index
    %c0_4 = arith.constant 0 : index
    %4 = vector.load %arg2[%c0_3, %c0_4] : memref<32x32xbf16, #tpu.memory_space<vmem>>, vector<32x32xbf16>
    "tpu.trace_start"() <{level = 10 : i32, message = "btk,ks->bts"}> : () -> ()
    %cst = arith.constant dense<0.000000e+00> : vector<2x256x32xf32>
    %5 = tpu.matmul %3, %4, %cst {dimension_numbers = #tpu.dot_dimension_numbers<[2], [0], [0, 1], [1], [0, 0, 0, 1, 1, 1], [], []>} : vector<2x256x32xbf16>, vector<32x32xbf16>, vector<2x256x32xf32> -> vector<2x256x32xf32>
    "tpu.trace_stop"() : () -> ()
    %c0_5 = arith.constant 0 : index
    %c0_6 = arith.constant 0 : index
    %6 = vector.load %arg3[%c0_5, %c0_6] : memref<1x32xf32, #tpu.memory_space<vmem>>, vector<1x32xf32>
    %7 = vector.shape_cast %6 : vector<1x32xf32> to vector<1x1x32xf32>
    %8 = vector.broadcast %7 : vector<1x1x32xf32> to vector<2x256x32xf32>
    %9 = arith.addf %5, %8 : vector<2x256x32xf32>
    %cst_7 = arith.constant 5.000000e-01 : f32
    %10 = vector.broadcast %cst_7 : f32 to vector<2x256x32xf32>
    %11 = arith.mulf %10, %9 : vector<2x256x32xf32>
    %12 = math.tanh %11 : vector<2x256x32xf32>
    %cst_8 = arith.constant 1.000000e+00 : f32
    %13 = vector.broadcast %cst_8 : f32 to vector<2x256x32xf32>
    %14 = arith.addf %12, %13 : vector<2x256x32xf32>
    %cst_9 = arith.constant 5.000000e-01 : f32
    %15 = vector.broadcast %cst_9 : f32 to vector<2x256x32xf32>
    %16 = arith.mulf %15, %14 : vector<2x256x32xf32>
    %17 = arith.mulf %9, %16 : vector<2x256x32xf32>
    %18 = arith.truncf %17 : vector<2x256x32xf32> to vector<2x256x32xbf16>
    %c0_10 = arith.constant 0 : index
    %c0_11 = arith.constant 0 : index
    %19 = vector.load %arg4[%c0_10, %c0_11] : memref<32x1280xbf16, #tpu.memory_space<vmem>>, vector<32x1280xbf16>
    "tpu.trace_start"() <{level = 10 : i32, message = "bts,sf->btf"}> : () -> ()
    %cst_12 = arith.constant dense<0.000000e+00> : vector<2x256x1280xf32>
    %20 = tpu.matmul %18, %19, %cst_12 {dimension_numbers = #tpu.dot_dimension_numbers<[2], [0], [0, 1], [1], [0, 0, 0, 1, 1, 1], [], []>} : vector<2x256x32xbf16>, vector<32x1280xbf16>, vector<2x256x1280xf32> -> vector<2x256x1280xf32>
    "tpu.trace_stop"() : () -> ()
    %c0_13 = arith.constant 0 : index
    %c0_14 = arith.constant 0 : index
    %21 = vector.load %arg5[%c0_13, %c0_14] : memref<1x1280xf32, #tpu.memory_space<vmem>>, vector<1x1280xf32>
    %22 = vector.shape_cast %21 : vector<1x1280xf32> to vector<1x1x1280xf32>
    %23 = vector.broadcast %22 : vector<1x1x1280xf32> to vector<2x256x1280xf32>
    %24 = arith.addf %20, %23 : vector<2x256x1280xf32>
    %cst_15 = arith.constant 5.000000e-01 : f32
    %25 = vector.broadcast %cst_15 : f32 to vector<2x256x1280xf32>
    %26 = arith.mulf %25, %24 : vector<2x256x1280xf32>
    %27 = math.tanh %26 : vector<2x256x1280xf32>
    %cst_16 = arith.constant 1.000000e+00 : f32
    %28 = vector.broadcast %cst_16 : f32 to vector<2x256x1280xf32>
    %29 = arith.addf %27, %28 : vector<2x256x1280xf32>
    %cst_17 = arith.constant 5.000000e-01 : f32
    %30 = vector.broadcast %cst_17 : f32 to vector<2x256x1280xf32>
    %31 = arith.mulf %30, %29 : vector<2x256x1280xf32>
    %32 = arith.mulf %24, %31 : vector<2x256x1280xf32>
    %c0_18 = arith.constant 0 : index
    %c0_19 = arith.constant 0 : index
    %33 = vector.load %arg9[%c0_18, %c0_19] : memref<2x1280xf32, #tpu.memory_space<vmem>>, vector<2x1280xf32>
    %cst_20 = arith.constant dense<0.000000e+00> : vector<2x1280xf32>
    %34 = vector.multi_reduction <add>, %32, %cst_20 [1] : vector<2x256x1280xf32> to vector<2x1280xf32>
    %35 = arith.addf %33, %34 : vector<2x1280xf32>
    %c0_21 = arith.constant 0 : index
    %c0_22 = arith.constant 0 : index
    %36 = vector.load %arg9[%c0_21, %c0_22] : memref<2x1280xf32, #tpu.memory_space<vmem>>, vector<2x1280xf32>
    tpu.vector_store %arg9[%c0_21, %c0_22], %35 {strides = array<i32>} : memref<2x1280xf32, #tpu.memory_space<vmem>>, vector<2x1280xf32>,
    %c0_i32_23 = arith.constant 0 : i32
    %37 = arith.cmpi eq, %arg0, %c0_i32_23 : i32
    %38 = arith.extui %37 : i1 to i32
    %c0_i32_24 = arith.constant 0 : i32
    %39 = arith.cmpi ne, %38, %c0_i32_24 : i32
    scf.if %39 {
      %c0_25 = arith.constant 0 : index
      %c0_26 = arith.constant 0 : index
      %40 = vector.load %arg9[%c0_25, %c0_26] : memref<2x1280xf32, #tpu.memory_space<vmem>>, vector<2x1280xf32>
      %c0_27 = arith.constant 0 : index
      %c0_28 = arith.constant 0 : index
      %41 = vector.load %arg6[%c0_27, %c0_28] : memref<1280x128xf32, #tpu.memory_space<vmem>>, vector<1280x128xf32>
      %cst_29 = arith.constant dense<0.000000e+00> : vector<2x128xf32>
      %42 = tpu.matmul %40, %41, %cst_29 {dimension_numbers = #tpu.dot_dimension_numbers<[1], [0], [0], [1], [0, 0, 1, 1], [], []>} : vector<2x1280xf32>, vector<1280x128xf32>, vector<2x128xf32> -> vector<2x128xf32>
      %c0_30 = arith.constant 0 : index
      %c0_31 = arith.constant 0 : index
      %43 = vector.load %arg7[%c0_30, %c0_31] : memref<1x128xf32, #tpu.memory_space<vmem>>, vector<1x128xf32>
      %44 = vector.broadcast %43 : vector<1x128xf32> to vector<2x128xf32>
      %45 = arith.addf %42, %44 : vector<2x128xf32>
      %c0_32 = arith.constant 0 : index
      %c0_33 = arith.constant 0 : index
      %46 = vector.load %arg8[%c0_32, %c0_33] : memref<2x128xf32, #tpu.memory_space<vmem>>, vector<2x128xf32>
      tpu.vector_store %arg8[%c0_32, %c0_33], %45 {strides = array<i32>} : memref<2x128xf32, #tpu.memory_space<vmem>>, vector<2x128xf32>,
    } else {
    }
    return
  }
  func.func @transform_0(%arg0: i32) -> (i32, i32, i32) {
    %c0_i32 = arith.constant 0 : i32
    %c0_i32_0 = arith.constant 0 : i32
    %c0_i32_1 = arith.constant 0 : i32
    return %c0_i32, %arg0, %c0_i32_0 : i32, i32, i32
  }
  func.func @transform_1(%arg0: i32) -> (i32, i32) {
    %c0_i32 = arith.constant 0 : i32
    %c0_i32_0 = arith.constant 0 : i32
    %c0_i32_1 = arith.constant 0 : i32
    return %c0_i32, %c0_i32_0 : i32, i32
  }
  func.func @transform_2(%arg0: i32) -> (i32, i32) {
    %c0_i32 = arith.constant 0 : i32
    %c0_i32_0 = arith.constant 0 : i32
    %c0_i32_1 = arith.constant 0 : i32
    return %c0_i32, %c0_i32_0 : i32, i32
  }
  func.func @transform_3(%arg0: i32) -> (i32, i32) {
    %c0_i32 = arith.constant 0 : i32
    %c0_i32_0 = arith.constant 0 : i32
    %c0_i32_1 = arith.constant 0 : i32
    return %c0_i32, %c0_i32_0 : i32, i32
  }
  func.func @transform_4(%arg0: i32) -> (i32, i32) {
    %c0_i32 = arith.constant 0 : i32
    %c0_i32_0 = arith.constant 0 : i32
    %c0_i32_1 = arith.constant 0 : i32
    return %c0_i32, %c0_i32_0 : i32, i32
  }
  func.func @transform_5(%arg0: i32) -> (i32, i32) {
    %c0_i32 = arith.constant 0 : i32
    %c0_i32_0 = arith.constant 0 : i32
    %c0_i32_1 = arith.constant 0 : i32
    return %c0_i32, %c0_i32_0 : i32, i32
  }
  func.func @transform_6(%arg0: i32) -> (i32, i32) {
    %c0_i32 = arith.constant 0 : i32
    %c0_i32_0 = arith.constant 0 : i32
    %c0_i32_1 = arith.constant 0 : i32
    return %c0_i32, %c0_i32_0 : i32, i32
  }
  func.func @transform_7(%arg0: i32) -> (i32, i32) {
    %c0_i32 = arith.constant 0 : i32
    %c0_i32_0 = arith.constant 0 : i32
    %c0_i32_1 = arith.constant 0 : i32
    return %c0_i32, %c0_i32_0 : i32, i32
  }
}

</mosaic_0001>

<bundles_post_ra>
// kernel: simple_card_classifier.1
= control target key start
LH: loop header
LB: loop body
LE: loop exit
PB: predicated region body
PF: predicated region fallthrough
CT: control target
= control target key end

     0   :  { %vm282_vm0 = vcmask 261120   ;;  %s17104_s0 = inlined_call_operand.vmem [shape: bf16[2,256,32], index: 0, kind: input, shape index: {}]   ;;  %s17105_s1 = inlined_call_operand.vmem [shape: bf16[32,32], index: 1, kind: input, shape index: {}]   ;;  %s17106_s2 = inlined_call_operand.vmem [shape: f32[1,32], index: 2, kind: input, shape index: {}]   ;;  %s17107_s3 = inlined_call_operand.vmem [shape: bf16[32,1280], index: 3, kind: input, shape index: {}]   ;;  %s17108_s4 = inlined_call_operand.vmem [shape: f32[1,1280], index: 4, kind: input, shape index: {}]   ;;  %s17109_s5 = inlined_call_operand.vmem [shape: f32[1280,128], index: 5, kind: input, shape index: {}]   ;;  %s17110_s6 = inlined_call_operand.vmem [shape: f32[1,128], index: 6, kind: input, shape index: {}]   ;;  %s17111_s7 = inlined_call_operand.hbm [shape: f32[2,128], index: 7, kind: output, shape index: {}]  }
   0x1   :  { %v8421_v0 = vld [vmem:[%s17105_s1] sm:$0xff]   ;;  %v8422_v1 = vld [vmem:[%s17105_s1 + $0x8] sm:$0xff]   ;;  %v8425_v4 = vld [vmem:[%s17104_s0 + $0x10] sm:$0xff]  }
   0x2   :  { %8189 = vmatprep.subr.bf16.mxu0 %v8421_v0  ;;  %v8423_v2 = vld [vmem:[%s17104_s0] sm:$0xff]   ;;  %v8424_v3 = vld [vmem:[%s17104_s0 + $0x8] sm:$0xff]   ;;  %v8426_v5 = vld [vmem:[%s17104_s0 + $0x18] sm:$0xff]  }
   0x3   :  { %8190 = vmatpush3.bf16.msra.mxu0 %v8421_v0  ;;  %8193 = vmatprep.mubr.msk.bf16.mxu0 %vm282_vm0, %v8423_v2  ;;  %v8427_v6 = vld [vmem:[%s17104_s0 + $0x20] sm:$0xff]   ;;  %v8428_v7 = vld [vmem:[%s17104_s0 + $0x28] sm:$0xff]   ;;  %v8429_v8 = vld [vmem:[%s17104_s0 + $0x30] sm:$0xff]  }
   0x4   :  { %8191 = vmatprep.subr.bf16.mxu0 %v8422_v1  ;;  %v8430_v9 = vld [vmem:[%s17104_s0 + $0x38] sm:$0xff]   ;;  %v8431_v10 = vld [vmem:[%s17104_s0 + $0x40] sm:$0xff]   ;;  %v8432_v11 = vld [vmem:[%s17104_s0 + $0x48] sm:$0xff]  }
   0x5   :  { %v8433_v12 = vld [vmem:[%s17104_s0 + $0x50] sm:$0xff]  }
   0x7   :  { %8192 = vmatpush3.bf16.msra.mxu0 %v8422_v1 }
   0xa   :  { %8194 = vmatmul.mubr.msk.bf16.vlgmr.msra.gmra.mrb[0].mxu0 %vm282_vm0, %v8424_v3 }
   0xb   :  { %8197 = vmatprep.mubr.msk.bf16.mxu0 %vm282_vm0, %v8425_v4 }
  0x12   :  { %8198 = vmatmul.mubr.msk.bf16.gmra.mrb[4].mxu0 %vm282_vm0, %v8426_v5 }
  0x13   :  { %8201 = vmatprep.mubr.msk.bf16.mxu0 %vm282_vm0, %v8427_v6 }
  0x1a   :  { %8202 = vmatmul.mubr.msk.bf16.gmra.mrb[8].mxu0 %vm282_vm0, %v8428_v7 }
  0x1b   :  { %8205 = vmatprep.mubr.msk.bf16.mxu0 %vm282_vm0, %v8429_v8 }
  0x22   :  { %8206 = vmatmul.mubr.msk.bf16.gmra.mrb[12].mxu0 %vm282_vm0, %v8430_v9 }
  0x23   :  { %8209 = vmatprep.mubr.msk.bf16.mxu0 %vm282_vm0, %v8431_v10 }
  0x24   :  { %12 = vsyncpa [#allocation4], 0  ;;  %v8434_v13 = vld [vmem:[%s17104_s0 + $0x58] sm:$0xff]   ;;  %v8435_v14 = vld [vmem:[%s17104_s0 + $0x60] sm:$0xff]   ;;  %v17124_v41 = vmov 0   ;;  %vm7107_vm1 = vcmask 1041409  }
  0x25   :  { %v8436_v15 = vld [vmem:[%s17104_s0 + $0x68] sm:$0xff]   ;;  %v8437_v16 = vld [vmem:[%s17104_s0 + $0x70] sm:$0xff]   ;;  %v8438_v17 = vld [vmem:[%s17104_s0 + $0x78] sm:$0xff]   ;;  %1322 = vmatprep.mubr.bf16.mxu1 %v17124_v41  ;;  %vm7109_vm2 = vcmask 1043459   ;;  %vm7111_vm3 = vcmask 1045509   ;;  %vm7113_vm4 = vcmask 1047559  }
  0x26   :  { %v8439_v18 = vld [vmem:[%s17104_s0 + $0x80] sm:$0xff]   ;;  %v8440_v19 = vld [vmem:[%s17104_s0 + $0x88] sm:$0xff]   ;;  %v8441_v20 = vld [vmem:[%s17104_s0 + $0x90] sm:$0xff]  }
  0x27   :  { %v8442_v21 = vld [vmem:[%s17104_s0 + $0x98] sm:$0xff]   ;;  %v8443_v22 = vld [vmem:[%s17104_s0 + $0xa0] sm:$0xff]   ;;  %v8444_v23 = vld [vmem:[%s17104_s0 + $0xa8] sm:$0xff]  }
  0x28   :  { %v8445_v24 = vld [vmem:[%s17104_s0 + $0xb0] sm:$0xff]   ;;  %v8446_v25 = vld [vmem:[%s17104_s0 + $0xb8] sm:$0xff]   ;;  %v8447_v26 = vld [vmem:[%s17104_s0 + $0xc0] sm:$0xff]  }
  0x29   :  { %v8448_v27 = vld [vmem:[%s17104_s0 + $0xc8] sm:$0xff]   ;;  %v8449_v28 = vld [vmem:[%s17104_s0 + $0xd0] sm:$0xff]   ;;  %v8450_v29 = vld [vmem:[%s17104_s0 + $0xd8] sm:$0xff]  }
  0x2a   :  { %8210 = vmatmul.mubr.msk.bf16.gmra.mrb[16].mxu0 %vm282_vm0, %v8432_v11  ;;  %v8455_v30 = vld [vmem:[%s17107_s3 + $0x4] ss:$40 sps:$4 sm:$0xff]   ;;  %v8457_v33 = vld [vmem:[%s17107_s3] ss:$40 sps:$4 sm:$0xff]   ;;  %v8461_v35 = vld [vmem:[%s17107_s3 + $0x54] ss:$40 sps:$4 sm:$0xff]  }
  0x2b   :  { %8213 = vmatprep.mubr.msk.bf16.mxu0 %vm282_vm0, %v8433_v12  ;;  %v8460_v31 = vld [vmem:[%s17107_s3 + $0xc] ss:$40 sps:$4 sm:$0xff]   ;;  %v8451_v32 = vld [vmem:[%s17104_s0 + $0xe0] sm:$0xff]   ;;  %v8458_v34 = vld [vmem:[%s17107_s3 + $0x8] ss:$40 sps:$4 sm:$0xff]   ;;  %1290 = vmatprep.subr.bf16.mxu1 %v8455_v30 }
  0x2c   :  { %1643 = vmatprep.subr.bf16.mxu0 %v8460_v31  ;;  %1291 = vmatpush1.bf16.msra.mxu1 %v8457_v33  ;;  %v8466_v36 = vld [vmem:[%s17107_s3 + $0x5c] ss:$40 sps:$4 sm:$0xff]   ;;  %v8463_v37 = vld [vmem:[%s17107_s3 + $0x50] ss:$40 sps:$4 sm:$0xff]   ;;  %v8452_v39 = vld [vmem:[%s17104_s0 + $0xe8] sm:$0xff]  }
  0x2d   :  { %1644 = vmatpush1.bf16.msra.mxu0 %v8458_v34  ;;  %v8464_v38 = vld [vmem:[%s17107_s3 + $0x58] ss:$40 sps:$4 sm:$0xff]   ;;  %1292 = vmatprep.subr.bf16.mxu1 %v8461_v35  ;;  %v8453_v40 = vld [vmem:[%s17104_s0 + $0xf0] sm:$0xff]  }
  0x2e   :  { %1645 = vmatprep.subr.bf16.mxu0 %v8466_v36  ;;  %v8454_v42 = vld [vmem:[%s17104_s0 + $0xf8] sm:$0xff]   ;;  %v10130_v44 = vld [vmem:[%s17106_s2] ss:$0 sm:$0xff] }
  0x2f   :  { %v8469_v43 = vld [vmem:[%s17107_s3 + $0x14] ss:$40 sps:$4 sm:$0xff]  }
  0x30   :  { %1293 = vmatpush1.bf16.msra.mxu1 %v8463_v37  ;;  %v8467_v37 = vld [vmem:[%s17107_s3 + $0x10] ss:$40 sps:$4 sm:$0xff]  }
  0x31   :  { %1646 = vmatpush1.bf16.msra.mxu0 %v8464_v38  ;;  %1996 = vmatprep.subr.bf16.mxu1 %v8469_v43 }
  0x32   :  { %8214 = vmatmul.mubr.msk.bf16.gmra.mrb[20].mxu0 %vm282_vm0, %v8434_v13 }
  0x33   :  { %8217 = vmatprep.mubr.msk.bf16.mxu0 %vm282_vm0, %v8435_v14 }
  0x3a   :  { %8218 = vmatmul.mubr.msk.bf16.gmra.mrb[24].mxu0 %vm282_vm0, %v8436_v15 }
  0x3b   :  { %8221 = vmatprep.mubr.msk.bf16.mxu0 %vm282_vm0, %v8437_v16 }
  0x42   :  { %8222 = vmatmul.mubr.msk.bf16.gmra.mrb[28].mxu0 %vm282_vm0, %v8438_v17 }
  0x43   :  { %8225 = vmatprep.mubr.msk.bf16.mxu0 %vm282_vm0, %v8439_v18 }
  0x4a   :  { %8226 = vmatmul.mubr.msk.bf16.gmra.mrb[32].mxu0 %vm282_vm0, %v8440_v19 }
  0x4b   :  { %8229 = vmatprep.mubr.msk.bf16.mxu0 %vm282_vm0, %v8441_v20 }
  0x52   :  { %8230 = vmatmul.mubr.msk.bf16.gmra.mrb[36].mxu0 %vm282_vm0, %v8442_v21 }
  0x53   :  { %8233 = vmatprep.mubr.msk.bf16.mxu0 %vm282_vm0, %v8443_v22 }
  0x5a   :  { %8234 = vmatmul.mubr.msk.bf16.gmra.mrb[40].mxu0 %vm282_vm0, %v8444_v23 }
  0x5b   :  { %8237 = vmatprep.mubr.msk.bf16.mxu0 %vm282_vm0, %v8445_v24 }
  0x62   :  { %8238 = vmatmul.mubr.msk.bf16.gmra.mrb[44].mxu0 %vm282_vm0, %v8446_v25 }
  0x63   :  { %8241 = vmatprep.mubr.msk.bf16.mxu0 %vm282_vm0, %v8447_v26 }
  0x6a   :  { %8242 = vmatmul.mubr.msk.bf16.gmra.mrb[48].mxu0 %vm282_vm0, %v8448_v27 }
  0x6b   :  { %8245 = vmatprep.mubr.msk.bf16.mxu0 %vm282_vm0, %v8449_v28 }
  0x72   :  { %8246 = vmatmul.mubr.msk.bf16.gmra.mrb[52].mxu0 %vm282_vm0, %v8450_v29 }
  0x73   :  { %8249 = vmatprep.mubr.msk.bf16.mxu0 %vm282_vm0, %v8451_v32 }
  0x7a   :  { %8250 = vmatmul.mubr.msk.bf16.gmra.mrb[56].mxu0 %vm282_vm0, %v8452_v39 }
  0x7b   :  { %8253 = vmatprep.mubr.msk.bf16.mxu0 %vm282_vm0, %v8453_v40 }
  0x82   :  { %8254 = vmatmul.mubr.msk.bf16.gmra.mrb[60].mxu0 %vm282_vm0, %v8454_v42 }
  0x83   :  { %1675 = vmatprep.mubr.bf16.mxu0 %v17124_v41 }
  0xdd   :  { %v8195_v45 = vpop.f32.mrb[0].mxu0 }
  0xde   :  { %v422_v46 = vadd.f32 %v8195_v45, %v10130_v44  ;;  %v413_v47 = vpop.f32.mrb[1].mxu0 }
  0xdf   :  { %v414_v48 = vadd.f32 %v10130_v44, %v413_v47  ;;  %v8196_v49 = vpop.f32.mrb[2].mxu0 }
  0xe0   :  { %v670_v50 = vmul.f32 0.5, %v422_v46  ;;  %v425_v51 = vadd.f32 %v8196_v49, %v10130_v44  ;;  %v416_v52 = vpop.f32.mrb[3].mxu0 }
  0xe1   :  { %v668_v53 = vmul.f32 0.5, %v414_v48  ;;  %v417_v54 = vadd.f32 %v10130_v44, %v416_v52 }
  0xe2   :  { %8486 = vtanh.f32 %v670_v50  ;;  %v671_v55 = vmul.f32 0.5, %v425_v51 }
  0xe3   :  { %8488 = vtanh.f32 %v668_v53  ;;  %v669_v56 = vmul.f32 0.5, %v417_v54 }
  0xe4   :  { %8490 = vtanh.f32 %v671_v55 }
  0xe5   :  { %8492 = vtanh.f32 %v669_v56  ;;  %v8199_v57 = vpop.f32.mrb[4].mxu0 }
  0xe6   :  { %v10137_v58 = vadd.f32 %v8199_v57, %v10130_v44  ;;  %v429_v59 = vpop.f32.mrb[5].mxu0 }
  0xe7   :  { %v10140_v60 = vadd.f32 %v10130_v44, %v429_v59  ;;  %v8200_v61 = vpop.f32.mrb[6].mxu0 }
  0xe8   :  { %v674_v62 = vmul.f32 0.5, %v10137_v58  ;;  %v10144_v63 = vadd.f32 %v8200_v61, %v10130_v44  ;;  %v432_v0 = vpop.f32.mrb[7].mxu0 }
  0xe9   :  { %v672_v1 = vmul.f32 0.5, %v10140_v60  ;;  %v10148_v2 = vadd.f32 %v10130_v44, %v432_v0 }
  0xea   :  { %8494 = vtanh.f32 %v674_v62  ;;  %v675_v3 = vmul.f32 0.5, %v10144_v63  ;;  %v8470_v62 = vld [vmem:[%s17107_s3 + $0x60] ss:$40 sps:$4 sm:$0xff]  }
  0xeb   :  { %8496 = vtanh.f32 %v672_v1  ;;  %v673_v4 = vmul.f32 0.5, %v10148_v2 }
  0xec   :  { %v8487_v5 = vpop.eup %8486  ;;  %8498 = vtanh.f32 %v675_v3 }
  0xed   :  { %v8489_v6 = vpop.eup %8488  ;;  %v798_v7 = vadd.f32 1.0, %v8487_v5  ;;  %8500 = vtanh.f32 %v673_v4  ;;  %v8203_v8 = vpop.f32.mrb[8].mxu0 }
  0xee   :  { %v8491_v9 = vpop.eup %8490  ;;  %v796_v10 = vadd.f32 1.0, %v8489_v6  ;;  %v10153_v11 = vadd.f32 %v8203_v8, %v10130_v44  ;;  %v445_v12 = vpop.f32.mrb[9].mxu0 }
  0xef   :  { %v8493_v13 = vpop.eup %8492  ;;  %v862_v14 = vmul.f32 0.5, %v798_v7  ;;  %v799_v15 = vadd.f32 1.0, %v8491_v9  ;;  %v10156_v16 = vadd.f32 %v10130_v44, %v445_v12  ;;  %v8204_v17 = vpop.f32.mrb[10].mxu0 }
  0xf0   :  { %v860_v18 = vmul.f32 0.5, %v796_v10  ;;  %v797_v19 = vadd.f32 1.0, %v8493_v13  ;;  %v678_v20 = vmul.f32 0.5, %v10153_v11  ;;  %v10160_v21 = vadd.f32 %v8204_v17, %v10130_v44  ;;  %v448_v22 = vpop.f32.mrb[11].mxu0 }
  0xf1   :  { %v863_v23 = vmul.f32 0.5, %v799_v15  ;;  %v676_v24 = vmul.f32 0.5, %v10156_v16  ;;  %v10164_v25 = vadd.f32 %v10130_v44, %v448_v22  ;;  %v926_v28 = vmul.f32 %v862_v14, %v422_v46  ;;  %v8472_v46 = vld [vmem:[%s17107_s3 + $0x64] ss:$40 sps:$4 sm:$0xff]  }
  0xf2   :  { %v861_v26 = vmul.f32 0.5, %v797_v19  ;;  %8502 = vtanh.f32 %v678_v20  ;;  %v679_v27 = vmul.f32 0.5, %v10160_v21  ;;  %v924_v32 = vmul.f32 %v860_v18, %v414_v48 }
  0xf3   :  { %v927_v29 = vmul.f32 %v863_v23, %v425_v51  ;;  %8504 = vtanh.f32 %v676_v24  ;;  %v677_v30 = vmul.f32 0.5, %v10164_v25 }
  0xf4   :  { %v8495_v31 = vpop.eup %8494  ;;  %v925_v33 = vmul.f32 %v861_v26, %v417_v54  ;;  %8506 = vtanh.f32 %v679_v27 }
  0xf5   :  { %v8497_v34 = vpop.eup %8496  ;;  %v10168_v35 = vpack.c.bf16 %v927_v29, %v926_v28  ;;  %v802_v36 = vadd.f32 1.0, %v8495_v31  ;;  %8508 = vtanh.f32 %v677_v30  ;;  %v8207_v38 = vpop.f32.mrb[12].mxu0 }
  0xf6   :  { %v8499_v39 = vpop.eup %8498  ;;  %v10173_v40 = vpack.c.bf16 %v925_v33, %v924_v32  ;;  %v800_v42 = vadd.f32 1.0, %v8497_v34  ;;  %v10176_v43 = vadd.f32 %v8207_v38, %v10130_v44  ;;  %v461_v45 = vpop.f32.mrb[13].mxu0 }
  0xf7   :  { %17225 = vst [vmem:[#allocation6_spill] sm:$0xff] %v10168_v35  ;;  %v8501_v47 = vpop.eup %8500  ;;  %v866_v48 = vmul.f32 0.5, %v802_v36  ;;  %v803_v49 = vadd.f32 1.0, %v8499_v39  ;;  %v10182_v50 = vadd.f32 %v10130_v44, %v461_v45  ;;  %v8208_v51 = vpop.f32.mrb[14].mxu0 }
  0xf8   :  { %17226 = vst [vmem:[#allocation7_spill] sm:$0xff] %v10173_v40  ;;  %v864_v52 = vmul.f32 0.5, %v800_v42  ;;  %v801_v53 = vadd.f32 1.0, %v8501_v47  ;;  %7818 = vmatmul.mubr.msk.bf16.vlgmr.msra.gmra.mrb[0].mxu1 %vm282_vm0, %v10173_v40  ;;  %7850 = vmatmul.mubr.msk.bf16.vlgmr.msra.gmra.mrb[64].mxu0 %vm282_vm0, %v10173_v40  ;;  %v682_v54 = vmul.f32 0.5, %v10176_v43  ;;  %v10190_v55 = vadd.f32 %v8208_v51, %v10130_v44  ;;  %v464_v56 = vpop.f32.mrb[15].mxu0 }
  0xf9   :  { %v867_v57 = vmul.f32 0.5, %v803_v49  ;;  %1997 = vmatpush1.bf16.msra.mxu1 %v8467_v37  ;;  %v680_v59 = vmul.f32 0.5, %v10182_v50  ;;  %v10194_v61 = vadd.f32 %v10130_v44, %v464_v56  ;;  %1332 = vmatprep.mubr.bf16.mxu1 %v17124_v41  ;;  %v930_v3 = vmul.f32 %v866_v48, %v10137_v58 }
  0xfa   :  { %v865_v0 = vmul.f32 0.5, %v801_v53  ;;  %8510 = vtanh.f32 %v682_v54  ;;  %v683_v1 = vmul.f32 0.5, %v10190_v55  ;;  %1685 = vmatprep.mubr.bf16.mxu0 %v17124_v41  ;;  %1998 = vmatprep.subr.bf16.mxu1 %v8472_v46  ;;  %v928_v7 = vmul.f32 %v864_v52, %v10140_v60 }
  0xfb   :  { %v931_v4 = vmul.f32 %v867_v57, %v10144_v63  ;;  %8512 = vtanh.f32 %v680_v59  ;;  %v681_v5 = vmul.f32 0.5, %v10194_v61 }
  0xfc   :  { %v8503_v6 = vpop.eup %8502  ;;  %v929_v8 = vmul.f32 %v865_v0, %v10148_v2  ;;  %8514 = vtanh.f32 %v683_v1 }
  0xfd   :  { %v8505_v9 = vpop.eup %8504  ;;  %v10207_v10 = vpack.c.bf16 %v931_v4, %v930_v3  ;;  %v806_v12 = vadd.f32 1.0, %v8503_v6  ;;  %8516 = vtanh.f32 %v681_v5  ;;  %v8211_v13 = vpop.f32.mrb[16].mxu0  ;;  %1999 = vmatpush1.bf16.msra.mxu1 %v8470_v62 }
  0xfe   :  { %v8507_v14 = vpop.eup %8506  ;;  %v10209_v58 = vpack.c.bf16 %v929_v8, %v928_v7  ;;  %v804_v63 = vadd.f32 1.0, %v8505_v9  ;;  %v10212_v15 = vadd.f32 %v8211_v13, %v10130_v44  ;;  %v477_v17 = vpop.f32.mrb[17].mxu0 }
  0xff   :  { %17227 = vst [vmem:[#allocation8_spill] sm:$0xff] %v10207_v10  ;;  %v8509_v18 = vpop.eup %8508  ;;  %v870_v60 = vmul.f32 0.5, %v806_v12  ;;  %v807_v19 = vadd.f32 1.0, %v8507_v14  ;;  %v10215_v2 = vadd.f32 %v10130_v44, %v477_v17  ;;  %v8212_v20 = vpop.f32.mrb[18].mxu0 }
 0x100   :  { %17228 = vst [vmem:[#allocation9_spill] sm:$0xff] %v10209_v58  ;;  %v868_v22 = vmul.f32 0.5, %v804_v63  ;;  %v805_v23 = vadd.f32 1.0, %v8509_v18  ;;  %7819 = vmatmul.mubr.msk.bf16.gmra.mrb[4].mxu1 %vm282_vm0, %v10168_v35  ;;  %7851 = vmatmul.mubr.msk.bf16.gmra.mrb[68].mxu0 %vm282_vm0, %v10168_v35  ;;  %v686_v24 = vmul.f32 0.5, %v10212_v15  ;;  %v10223_v26 = vadd.f32 %v8212_v20, %v10130_v44  ;;  %v480_v27 = vpop.f32.mrb[19].mxu0 }
 0x101   :  { %v871_v28 = vmul.f32 0.5, %v807_v19  ;;  %1342 = vmatprep.mubr.bf16.mxu1 %v17124_v41  ;;  %1695 = vmatprep.mubr.bf16.mxu0 %v17124_v41  ;;  %v684_v29 = vmul.f32 0.5, %v10215_v2  ;;  %v10229_v30 = vadd.f32 %v10130_v44, %v480_v27  ;;  %v934_v33 = vmul.f32 %v870_v60, %v10153_v11 }
 0x102   :  { %v869_v31 = vmul.f32 0.5, %v805_v23  ;;  %8518 = vtanh.f32 %v686_v24  ;;  %v687_v32 = vmul.f32 0.5, %v10223_v26  ;;  %v932_v38 = vmul.f32 %v868_v22, %v10156_v16 }
 0x103   :  { %v935_v34 = vmul.f32 %v871_v28, %v10160_v21  ;;  %8520 = vtanh.f32 %v684_v29  ;;  %v685_v36 = vmul.f32 0.5, %v10229_v30 }
 0x104   :  { %v8511_v37 = vpop.eup %8510  ;;  %v933_v39 = vmul.f32 %v869_v31, %v10164_v25  ;;  %8522 = vtanh.f32 %v687_v32 }
 0x105   :  { %v8513_v42 = vpop.eup %8512  ;;  %v10237_v45 = vpack.c.bf16 %v935_v34, %v934_v33  ;;  %v810_v46 = vadd.f32 1.0, %v8511_v37  ;;  %8524 = vtanh.f32 %v685_v36  ;;  %v8215_v47 = vpop.f32.mrb[20].mxu0 }
 0x106   :  { %v8515_v48 = vpop.eup %8514  ;;  %v10239_v49 = vpack.c.bf16 %v933_v39, %v932_v38  ;;  %v808_v11 = vadd.f32 1.0, %v8513_v42  ;;  %v10242_v21 = vadd.f32 %v8215_v47, %v10130_v44  ;;  %v493_v51 = vpop.f32.mrb[21].mxu0 }
 0x107   :  { %17229 = vst [vmem:[#allocation10_spill] sm:$0xff] %v10237_v45  ;;  %v8517_v52 = vpop.eup %8516  ;;  %v874_v53 = vmul.f32 0.5, %v810_v46  ;;  %v811_v16 = vadd.f32 1.0, %v8515_v48  ;;  %v10245_v25 = vadd.f32 %v10130_v44, %v493_v51  ;;  %v8216_v54 = vpop.f32.mrb[22].mxu0 }
 0x108   :  { %17230 = vst [vmem:[#allocation11_spill] sm:$0xff] %v10239_v49  ;;  %v872_v56 = vmul.f32 0.5, %v808_v11  ;;  %v809_v57 = vadd.f32 1.0, %v8517_v52  ;;  %7820 = vmatmul.mubr.msk.bf16.gmra.mrb[8].mxu1 %vm282_vm0, %v10209_v58  ;;  %7852 = vmatmul.mubr.msk.bf16.gmra.mrb[72].mxu0 %vm282_vm0, %v10209_v58  ;;  %v690_v59 = vmul.f32 0.5, %v10242_v21  ;;  %v10253_v62 = vadd.f32 %v8216_v54, %v10130_v44  ;;  %v496_v0 = vpop.f32.mrb[23].mxu0 }
 0x109   :  { %v938_v1 = vmul.f32 %v874_v53, %v10176_v43  ;;  %v875_v3 = vmul.f32 0.5, %v811_v16  ;;  %1352 = vmatprep.mubr.bf16.mxu1 %v17124_v41  ;;  %1705 = vmatprep.mubr.bf16.mxu0 %v17124_v41  ;;  %v688_v4 = vmul.f32 0.5, %v10245_v25  ;;  %v10260_v5 = vadd.f32 %v10130_v44, %v496_v0 }
 0x10a   :  { %v936_v6 = vmul.f32 %v872_v56, %v10182_v50  ;;  %v873_v7 = vmul.f32 0.5, %v809_v57  ;;  %8526 = vtanh.f32 %v690_v59  ;;  %v691_v8 = vmul.f32 0.5, %v10253_v62 }
 0x10b   :  { %v939_v9 = vmul.f32 %v875_v3, %v10190_v55  ;;  %8528 = vtanh.f32 %v688_v4  ;;  %v689_v43 = vmul.f32 0.5, %v10260_v5 }
 0x10c   :  { %v8519_v12 = vpop.eup %8518  ;;  %v937_v13 = vmul.f32 %v873_v7, %v10194_v61  ;;  %8530 = vtanh.f32 %v691_v8 }
 0x10d   :  { %v8521_v14 = vpop.eup %8520  ;;  %v10267_v63 = vpack.c.bf16 %v939_v9, %v938_v1  ;;  %v814_v17 = vadd.f32 1.0, %v8519_v12  ;;  %8532 = vtanh.f32 %v689_v43  ;;  %v8219_v18 = vpop.f32.mrb[24].mxu0 }
 0x10e   :  { %v8523_v50 = vpop.eup %8522  ;;  %v10269_v60 = vpack.c.bf16 %v937_v13, %v936_v6  ;;  %v812_v19 = vadd.f32 1.0, %v8521_v14  ;;  %v10272_v20 = vadd.f32 %v8219_v18, %v10130_v44  ;;  %v509_v55 = vpop.f32.mrb[25].mxu0 }
 0x10f   :  { %17231 = vst [vmem:[#allocation12_spill] sm:$0xff] %v10267_v63  ;;  %v8525_v22 = vpop.eup %8524  ;;  %v878_v23 = vmul.f32 0.5, %v814_v17  ;;  %v815_v24 = vadd.f32 1.0, %v8523_v50  ;;  %v10275_v61 = vadd.f32 %v10130_v44, %v509_v55  ;;  %v8220_v27 = vpop.f32.mrb[26].mxu0 }
 0x110   :  { %17232 = vst [vmem:[#allocation13_spill] sm:$0xff] %v10269_v60  ;;  %v876_v28 = vmul.f32 0.5, %v812_v19  ;;  %v813_v29 = vadd.f32 1.0, %v8525_v22  ;;  %7821 = vmatmul.mubr.msk.bf16.gmra.mrb[12].mxu1 %vm282_vm0, %v10207_v10  ;;  %7853 = vmatmul.mubr.msk.bf16.gmra.mrb[76].mxu0 %vm282_vm0, %v10207_v10  ;;  %v694_v31 = vmul.f32 0.5, %v10272_v20  ;;  %v10283_v32 = vadd.f32 %v8220_v27, %v10130_v44  ;;  %v512_v33 = vpop.f32.mrb[27].mxu0 }
 0x111   :  { %v942_v34 = vmul.f32 %v878_v23, %v10212_v15  ;;  %v879_v36 = vmul.f32 0.5, %v815_v24  ;;  %1362 = vmatprep.mubr.bf16.mxu1 %v17124_v41  ;;  %1715 = vmatprep.mubr.bf16.mxu0 %v17124_v41  ;;  %v692_v37 = vmul.f32 0.5, %v10275_v61  ;;  %v10290_v38 = vadd.f32 %v10130_v44, %v512_v33 }
 0x112   :  { %v940_v39 = vmul.f32 %v876_v28, %v10215_v2  ;;  %v877_v42 = vmul.f32 0.5, %v813_v29  ;;  %8534 = vtanh.f32 %v694_v31  ;;  %v695_v46 = vmul.f32 0.5, %v10283_v32 }
 0x113   :  { %v943_v47 = vmul.f32 %v879_v36, %v10223_v26  ;;  %8536 = vtanh.f32 %v692_v37  ;;  %v693_v15 = vmul.f32 0.5, %v10290_v38 }
 0x114   :  { %v8527_v48 = vpop.eup %8526  ;;  %v941_v11 = vmul.f32 %v877_v42, %v10229_v30  ;;  %8538 = vtanh.f32 %v695_v46 }
 0x115   :  { %v8529_v51 = vpop.eup %8528  ;;  %v10297_v52 = vpack.c.bf16 %v943_v47, %v942_v34  ;;  %v818_v53 = vadd.f32 1.0, %v8527_v48  ;;  %8540 = vtanh.f32 %v693_v15  ;;  %v8223_v16 = vpop.f32.mrb[28].mxu0 }
 0x116   :  { %v8531_v2 = vpop.eup %8530  ;;  %v10299_v54 = vpack.c.bf16 %v941_v11, %v940_v39  ;;  %v816_v56 = vadd.f32 1.0, %v8529_v51  ;;  %v10302_v57 = vadd.f32 %v8223_v16, %v10130_v44  ;;  %v525_v26 = vpop.f32.mrb[29].mxu0 }
 0x117   :  { %17233 = vst [vmem:[#allocation14_spill] sm:$0xff] %v10297_v52  ;;  %v8533_v59 = vpop.eup %8532  ;;  %v882_v0 = vmul.f32 0.5, %v818_v53  ;;  %v819_v1 = vadd.f32 1.0, %v8531_v2  ;;  %v10305_v30 = vadd.f32 %v10130_v44, %v525_v26  ;;  %v8224_v3 = vpop.f32.mrb[30].mxu0 }
 0x118   :  { %17234 = vst [vmem:[#allocation15_spill] sm:$0xff] %v10299_v54  ;;  %7822 = vmatmul.mubr.msk.bf16.gmra.mrb[16].mxu1 %vm282_vm0, %v10239_v49  ;;  %7854 = vmatmul.mubr.msk.bf16.gmra.mrb[80].mxu0 %vm282_vm0, %v10239_v49  ;;  %v880_v4 = vmul.f32 0.5, %v816_v56  ;;  %v817_v6 = vadd.f32 1.0, %v8533_v59  ;;  %v698_v7 = vmul.f32 0.5, %v10302_v57  ;;  %v10313_v8 = vadd.f32 %v8224_v3, %v10130_v44  ;;  %v528_v9 = vpop.f32.mrb[31].mxu0 }
 0x119   :  { %v946_v43 = vmul.f32 %v882_v0, %v10242_v21  ;;  %v883_v12 = vmul.f32 0.5, %v819_v1  ;;  %1372 = vmatprep.mubr.bf16.mxu1 %v17124_v41  ;;  %1725 = vmatprep.mubr.bf16.mxu0 %v17124_v41  ;;  %v696_v13 = vmul.f32 0.5, %v10305_v30  ;;  %v10320_v14 = vadd.f32 %v10130_v44, %v528_v9 }
 0x11a   :  { %v944_v17 = vmul.f32 %v880_v4, %v10245_v25  ;;  %v881_v18 = vmul.f32 0.5, %v817_v6  ;;  %8542 = vtanh.f32 %v698_v7  ;;  %v699_v50 = vmul.f32 0.5, %v10313_v8 }
 0x11b   :  { %v947_v19 = vmul.f32 %v883_v12, %v10253_v62  ;;  %8544 = vtanh.f32 %v696_v13  ;;  %v697_v21 = vmul.f32 0.5, %v10320_v14 }
 0x11c   :  { %v8535_v55 = vpop.eup %8534  ;;  %v945_v22 = vmul.f32 %v881_v18, %v10260_v5  ;;  %8546 = vtanh.f32 %v699_v50 }
 0x11d   :  { %v8537_v23 = vpop.eup %8536  ;;  %v10327_v24 = vpack.c.bf16 %v947_v19, %v946_v43  ;;  %v822_v27 = vadd.f32 1.0, %v8535_v55  ;;  %8548 = vtanh.f32 %v697_v21  ;;  %v8227_v28 = vpop.f32.mrb[32].mxu0 }
 0x11e   :  { %v8539_v25 = vpop.eup %8538  ;;  %v10329_v29 = vpack.c.bf16 %v945_v22, %v944_v17  ;;  %v820_v31 = vadd.f32 1.0, %v8537_v23  ;;  %v10332_v33 = vadd.f32 %v8227_v28, %v10130_v44  ;;  %v541_v62 = vpop.f32.mrb[33].mxu0 }
 0x11f   :  { %17235 = vst [vmem:[#allocation16_spill] sm:$0xff] %v10327_v24  ;;  %v8541_v34 = vpop.eup %8540  ;;  %v886_v36 = vmul.f32 0.5, %v822_v27  ;;  %v823_v37 = vadd.f32 1.0, %v8539_v25  ;;  %v10335_v5 = vadd.f32 %v10130_v44, %v541_v62  ;;  %v8228_v39 = vpop.f32.mrb[34].mxu0 }
 0x120   :  { %17236 = vst [vmem:[#allocation17_spill] sm:$0xff] %v10329_v29  ;;  %7823 = vmatmul.mubr.msk.bf16.gmra.mrb[20].mxu1 %vm282_vm0, %v10237_v45  ;;  %7855 = vmatmul.mubr.msk.bf16.gmra.mrb[84].mxu0 %vm282_vm0, %v10237_v45  ;;  %v884_v42 = vmul.f32 0.5, %v820_v31  ;;  %v821_v46 = vadd.f32 1.0, %v8541_v34  ;;  %v702_v47 = vmul.f32 0.5, %v10332_v33  ;;  %v10343_v15 = vadd.f32 %v8228_v39, %v10130_v44  ;;  %v544_v48 = vpop.f32.mrb[35].mxu0 }
 0x121   :  { %1382 = vmatprep.mubr.bf16.mxu1 %v17124_v41  ;;  %1735 = vmatprep.mubr.bf16.mxu0 %v17124_v41  ;;  %v950_v11 = vmul.f32 %v886_v36, %v10272_v20  ;;  %v887_v51 = vmul.f32 0.5, %v823_v37  ;;  %v700_v53 = vmul.f32 0.5, %v10335_v5  ;;  %v10350_v16 = vadd.f32 %v10130_v44, %v544_v48 }
 0x122   :  { %v948_v2 = vmul.f32 %v884_v42, %v10275_v61  ;;  %v885_v56 = vmul.f32 0.5, %v821_v46  ;;  %8550 = vtanh.f32 %v702_v47  ;;  %v703_v26 = vmul.f32 0.5, %v10343_v15 }
 0x123   :  { %v951_v59 = vmul.f32 %v887_v51, %v10283_v32  ;;  %8552 = vtanh.f32 %v700_v53  ;;  %v701_v0 = vmul.f32 0.5, %v10350_v16 }
 0x124   :  { %v8543_v1 = vpop.eup %8542  ;;  %v949_v20 = vmul.f32 %v885_v56, %v10290_v38  ;;  %8554 = vtanh.f32 %v703_v26 }
 0x125   :  { %v8545_v3 = vpop.eup %8544  ;;  %v10357_v4 = vpack.c.bf16 %v951_v59, %v950_v11  ;;  %v826_v6 = vadd.f32 1.0, %v8543_v1  ;;  %8556 = vtanh.f32 %v701_v0  ;;  %v8231_v7 = vpop.f32.mrb[36].mxu0 }
 0x126   :  { %v8547_v61 = vpop.eup %8546  ;;  %v10359_v9 = vpack.c.bf16 %v949_v20, %v948_v2  ;;  %v824_v43 = vadd.f32 1.0, %v8545_v3  ;;  %v10362_v12 = vadd.f32 %v8231_v7, %v10130_v44  ;;  %v557_v32 = vpop.f32.mrb[37].mxu0 }
 0x127   :  { %17237 = vst [vmem:[#allocation18_spill] sm:$0xff] %v10357_v4  ;;  %v8549_v13 = vpop.eup %8548  ;;  %v890_v17 = vmul.f32 0.5, %v826_v6  ;;  %v827_v18 = vadd.f32 1.0, %v8547_v61  ;;  %v10365_v38 = vadd.f32 %v10130_v44, %v557_v32  ;;  %v8232_v50 = vpop.f32.mrb[38].mxu0  ;;  %v8473_v61 = vld [vmem:[%s17107_s3 + $0x18] ss:$40 sps:$4 sm:$0xff]  }
 0x128   :  { %17238 = vst [vmem:[#allocation19_spill] sm:$0xff] %v10359_v9  ;;  %7824 = vmatmul.mubr.msk.bf16.gmra.mrb[24].mxu1 %vm282_vm0, %v10269_v60  ;;  %7856 = vmatmul.mubr.msk.bf16.gmra.mrb[88].mxu0 %vm282_vm0, %v10269_v60  ;;  %v888_v19 = vmul.f32 0.5, %v824_v43  ;;  %v825_v21 = vadd.f32 1.0, %v8549_v13  ;;  %v706_v55 = vmul.f32 0.5, %v10362_v12  ;;  %v10373_v22 = vadd.f32 %v8232_v50, %v10130_v44  ;;  %v560_v23 = vpop.f32.mrb[39].mxu0 }
 0x129   :  { %1392 = vmatprep.mubr.bf16.mxu1 %v17124_v41  ;;  %1745 = vmatprep.mubr.bf16.mxu0 %v17124_v41  ;;  %v954_v27 = vmul.f32 %v890_v17, %v10302_v57  ;;  %v891_v28 = vmul.f32 0.5, %v827_v18  ;;  %v704_v25 = vmul.f32 0.5, %v10365_v38  ;;  %v10380_v31 = vadd.f32 %v10130_v44, %v560_v23  ;;  %v8475_v18 = vld [vmem:[%s17107_s3 + $0x1c] ss:$40 sps:$4 sm:$0xff]  }
 0x12a   :  { %v952_v62 = vmul.f32 %v888_v19, %v10305_v30  ;;  %v889_v34 = vmul.f32 0.5, %v825_v21  ;;  %8558 = vtanh.f32 %v706_v55  ;;  %v707_v36 = vmul.f32 0.5, %v10373_v22  ;;  %2349 = vmatprep.subr.bf16.mxu0 %v8475_v18 }
 0x12b   :  { %v955_v37 = vmul.f32 %v891_v28, %v10313_v8  ;;  %8560 = vtanh.f32 %v704_v25  ;;  %v705_v39 = vmul.f32 0.5, %v10380_v31  ;;  %2350 = vmatpush1.bf16.msra.mxu0 %v8473_v61 }
 0x12c   :  { %v8551_v42 = vpop.eup %8550  ;;  %v953_v57 = vmul.f32 %v889_v34, %v10320_v14  ;;  %8562 = vtanh.f32 %v707_v36 }
 0x12d   :  { %v8553_v46 = vpop.eup %8552  ;;  %v10387_v47 = vpack.c.bf16 %v955_v37, %v954_v27  ;;  %v830_v48 = vadd.f32 1.0, %v8551_v42  ;;  %8564 = vtanh.f32 %v705_v39  ;;  %v8235_v11 = vpop.f32.mrb[40].mxu0 }
 0x12e   :  { %v8555_v30 = vpop.eup %8554  ;;  %v10389_v51 = vpack.c.bf16 %v953_v57, %v952_v62  ;;  %v828_v53 = vadd.f32 1.0, %v8553_v46  ;;  %v10392_v2 = vadd.f32 %v8235_v11, %v10130_v44  ;;  %v573_v8 = vpop.f32.mrb[41].mxu0 }
 0x12f   :  { %17239 = vst [vmem:[#allocation20_spill] sm:$0xff] %v10387_v47  ;;  %v8557_v56 = vpop.eup %8556  ;;  %v894_v26 = vmul.f32 0.5, %v830_v48  ;;  %v831_v59 = vadd.f32 1.0, %v8555_v30  ;;  %v10395_v14 = vadd.f32 %v10130_v44, %v573_v8  ;;  %v8236_v0 = vpop.f32.mrb[42].mxu0 }
 0x130   :  { %17240 = vst [vmem:[#allocation21_spill] sm:$0xff] %v10389_v51  ;;  %7825 = vmatmul.mubr.msk.bf16.gmra.mrb[28].mxu1 %vm282_vm0, %v10267_v63  ;;  %7857 = vmatmul.mubr.msk.bf16.gmra.mrb[92].mxu0 %vm282_vm0, %v10267_v63  ;;  %v892_v1 = vmul.f32 0.5, %v828_v53  ;;  %v829_v20 = vadd.f32 1.0, %v8557_v56  ;;  %v710_v3 = vmul.f32 0.5, %v10392_v2  ;;  %v10403_v6 = vadd.f32 %v8236_v0, %v10130_v44  ;;  %v576_v7 = vpop.f32.mrb[43].mxu0 }
 0x131   :  { %1402 = vmatprep.mubr.bf16.mxu1 %v17124_v41  ;;  %1755 = vmatprep.mubr.bf16.mxu0 %v17124_v41  ;;  %v958_v43 = vmul.f32 %v894_v26, %v10332_v33  ;;  %v895_v32 = vmul.f32 0.5, %v831_v59  ;;  %v708_v13 = vmul.f32 0.5, %v10395_v14  ;;  %v10413_v17 = vadd.f32 %v10130_v44, %v576_v7 }
 0x132   :  { %v956_v50 = vmul.f32 %v892_v1, %v10335_v5  ;;  %v893_v19 = vmul.f32 0.5, %v829_v20  ;;  %8566 = vtanh.f32 %v710_v3  ;;  %v711_v21 = vmul.f32 0.5, %v10403_v6 }
 0x133   :  { %v959_v55 = vmul.f32 %v895_v32, %v10343_v15  ;;  %8568 = vtanh.f32 %v708_v13  ;;  %v709_v33 = vmul.f32 0.5, %v10413_v17 }
 0x134   :  { %v8559_v23 = vpop.eup %8558  ;;  %v957_v27 = vmul.f32 %v893_v19, %v10350_v16  ;;  %8570 = vtanh.f32 %v711_v21 }
 0x135   :  { %v8561_v28 = vpop.eup %8560  ;;  %v10423_v25 = vpack.c.bf16 %v959_v55, %v958_v43  ;;  %v834_v62 = vadd.f32 1.0, %v8559_v23  ;;  %8572 = vtanh.f32 %v709_v33  ;;  %v8239_v5 = vpop.f32.mrb[44].mxu0 }
 0x136   :  { %v8563_v34 = vpop.eup %8562  ;;  %v10425_v36 = vpack.c.bf16 %v957_v27, %v956_v50  ;;  %v832_v37 = vadd.f32 1.0, %v8561_v28  ;;  %v10428_v15 = vadd.f32 %v8239_v5, %v10130_v44  ;;  %v589_v39 = vpop.f32.mrb[45].mxu0 }
 0x137   :  { %17241 = vst [vmem:[#allocation22_spill] sm:$0xff] %v10423_v25  ;;  %v8565_v42 = vpop.eup %8564  ;;  %v898_v57 = vmul.f32 0.5, %v834_v62  ;;  %v835_v46 = vadd.f32 1.0, %v8563_v34  ;;  %v10431_v16 = vadd.f32 %v10130_v44, %v589_v39  ;;  %v8240_v48 = vpop.f32.mrb[46].mxu0 }
 0x138   :  { %17242 = vst [vmem:[#allocation23_spill] sm:$0xff] %v10425_v36  ;;  %7826 = vmatmul.mubr.msk.bf16.gmra.mrb[32].mxu1 %vm282_vm0, %v10299_v54  ;;  %7858 = vmatmul.mubr.msk.bf16.gmra.mrb[96].mxu0 %vm282_vm0, %v10299_v54  ;;  %v896_v11 = vmul.f32 0.5, %v832_v37  ;;  %v833_v30 = vadd.f32 1.0, %v8565_v42  ;;  %v714_v53 = vmul.f32 0.5, %v10428_v15  ;;  %v10439_v8 = vadd.f32 %v8240_v48, %v10130_v44  ;;  %v592_v56 = vpop.f32.mrb[47].mxu0 }
 0x139   :  { %1412 = vmatprep.mubr.bf16.mxu1 %v17124_v41  ;;  %1765 = vmatprep.mubr.bf16.mxu0 %v17124_v41  ;;  %v962_v26 = vmul.f32 %v898_v57, %v10362_v12  ;;  %v899_v59 = vmul.f32 0.5, %v835_v46  ;;  %v712_v0 = vmul.f32 0.5, %v10431_v16  ;;  %v10446_v1 = vadd.f32 %v10130_v44, %v592_v56 }
 0x13a   :  { %v960_v20 = vmul.f32 %v896_v11, %v10365_v38  ;;  %v897_v3 = vmul.f32 0.5, %v833_v30  ;;  %8574 = vtanh.f32 %v714_v53  ;;  %v715_v7 = vmul.f32 0.5, %v10439_v8 }
 0x13b   :  { %v963_v61 = vmul.f32 %v899_v59, %v10373_v22  ;;  %8576 = vtanh.f32 %v712_v0  ;;  %v713_v43 = vmul.f32 0.5, %v10446_v1 }
 0x13c   :  { %v8567_v32 = vpop.eup %8566  ;;  %v961_v12 = vmul.f32 %v897_v3, %v10380_v31  ;;  %8578 = vtanh.f32 %v715_v7 }
 0x13d   :  { %v8569_v13 = vpop.eup %8568  ;;  %v10453_v18 = vpack.c.bf16 %v963_v61, %v962_v26  ;;  %v838_v50 = vadd.f32 1.0, %v8567_v32  ;;  %8580 = vtanh.f32 %v713_v43  ;;  %v8243_v19 = vpop.f32.mrb[48].mxu0 }
 0x13e   :  { %v8571_v38 = vpop.eup %8570  ;;  %v10455_v21 = vpack.c.bf16 %v961_v12, %v960_v20  ;;  %v836_v55 = vadd.f32 1.0, %v8569_v13  ;;  %v10458_v33 = vadd.f32 %v8243_v19, %v10130_v44  ;;  %v605_v22 = vpop.f32.mrb[49].mxu0 }
 0x13f   :  { %17243 = vst [vmem:[#allocation24_spill] sm:$0xff] %v10453_v18  ;;  %v8573_v23 = vpop.eup %8572  ;;  %v902_v27 = vmul.f32 0.5, %v838_v50  ;;  %v839_v28 = vadd.f32 1.0, %v8571_v38  ;;  %v10461_v31 = vadd.f32 %v10130_v44, %v605_v22  ;;  %v8244_v62 = vpop.f32.mrb[50].mxu0 }
 0x140   :  { %17244 = vst [vmem:[#allocation25_spill] sm:$0xff] %v10455_v21  ;;  %7827 = vmatmul.mubr.msk.bf16.gmra.mrb[36].mxu1 %vm282_vm0, %v10297_v52  ;;  %7859 = vmatmul.mubr.msk.bf16.gmra.mrb[100].mxu0 %vm282_vm0, %v10297_v52  ;;  %v900_v5 = vmul.f32 0.5, %v836_v55  ;;  %v837_v34 = vadd.f32 1.0, %v8573_v23  ;;  %v718_v37 = vmul.f32 0.5, %v10458_v33  ;;  %v10469_v39 = vadd.f32 %v8244_v62, %v10130_v44  ;;  %v608_v42 = vpop.f32.mrb[51].mxu0 }
 0x141   :  { %1422 = vmatprep.mubr.bf16.mxu1 %v17124_v41  ;;  %1775 = vmatprep.mubr.bf16.mxu0 %v17124_v41  ;;  %v966_v57 = vmul.f32 %v902_v27, %v10392_v2  ;;  %v903_v46 = vmul.f32 0.5, %v839_v28  ;;  %v716_v48 = vmul.f32 0.5, %v10461_v31  ;;  %v10476_v11 = vadd.f32 %v10130_v44, %v608_v42 }
 0x142   :  { %v964_v30 = vmul.f32 %v900_v5, %v10395_v14  ;;  %v901_v53 = vmul.f32 0.5, %v837_v34  ;;  %8582 = vtanh.f32 %v718_v37  ;;  %v719_v56 = vmul.f32 0.5, %v10469_v39 }
 0x143   :  { %v967_v26 = vmul.f32 %v903_v46, %v10403_v6  ;;  %8584 = vtanh.f32 %v716_v48  ;;  %v717_v59 = vmul.f32 0.5, %v10476_v11 }
 0x144   :  { %v8575_v0 = vpop.eup %8574  ;;  %v965_v2 = vmul.f32 %v901_v53, %v10413_v17  ;;  %8586 = vtanh.f32 %v719_v56 }
 0x145   :  { %v8577_v20 = vpop.eup %8576  ;;  %v10483_v3 = vpack.c.bf16 %v967_v26, %v966_v57  ;;  %v842_v7 = vadd.f32 1.0, %v8575_v0  ;;  %8588 = vtanh.f32 %v717_v59  ;;  %v8247_v61 = vpop.f32.mrb[52].mxu0 }
 0x146   :  { %v8579_v14 = vpop.eup %8578  ;;  %v10485_v43 = vpack.c.bf16 %v965_v2, %v964_v30  ;;  %v840_v32 = vadd.f32 1.0, %v8577_v20  ;;  %v10488_v12 = vadd.f32 %v8247_v61, %v10130_v44  ;;  %v621_v6 = vpop.f32.mrb[53].mxu0 }
 0x147   :  { %17245 = vst [vmem:[#allocation26_spill] sm:$0xff] %v10483_v3  ;;  %v8581_v13 = vpop.eup %8580  ;;  %v906_v50 = vmul.f32 0.5, %v842_v7  ;;  %v843_v19 = vadd.f32 1.0, %v8579_v14  ;;  %v10491_v17 = vadd.f32 %v10130_v44, %v621_v6  ;;  %v8248_v38 = vpop.f32.mrb[54].mxu0 }
 0x148   :  { %17246 = vst [vmem:[#allocation27_spill] sm:$0xff] %v10485_v43  ;;  %7828 = vmatmul.mubr.msk.bf16.gmra.mrb[40].mxu1 %vm282_vm0, %v10329_v29  ;;  %7860 = vmatmul.mubr.msk.bf16.gmra.mrb[104].mxu0 %vm282_vm0, %v10329_v29  ;;  %v904_v55 = vmul.f32 0.5, %v840_v32  ;;  %v841_v22 = vadd.f32 1.0, %v8581_v13  ;;  %v722_v23 = vmul.f32 0.5, %v10488_v12  ;;  %v10499_v27 = vadd.f32 %v8248_v38, %v10130_v44  ;;  %v624_v28 = vpop.f32.mrb[55].mxu0 }
 0x149   :  { %1432 = vmatprep.mubr.bf16.mxu1 %v17124_v41  ;;  %1785 = vmatprep.mubr.bf16.mxu0 %v17124_v41  ;;  %v970_v62 = vmul.f32 %v906_v50, %v10428_v15  ;;  %v907_v5 = vmul.f32 0.5, %v843_v19  ;;  %v720_v34 = vmul.f32 0.5, %v10491_v17  ;;  %v10506_v37 = vadd.f32 %v10130_v44, %v624_v28  ;;  %v9894_v38 = vld [vmem:[%s17106_s2] ss:$0 sm:$0xff] }
 0x14a   :  { %v968_v42 = vmul.f32 %v904_v55, %v10431_v16  ;;  %v905_v57 = vmul.f32 0.5, %v841_v22  ;;  %8590 = vtanh.f32 %v722_v23  ;;  %v723_v46 = vmul.f32 0.5, %v10499_v27 }
 0x14b   :  { %v971_v48 = vmul.f32 %v907_v5, %v10439_v8  ;;  %8592 = vtanh.f32 %v720_v34  ;;  %v721_v30 = vmul.f32 0.5, %v10506_v37 }
 0x14c   :  { %v8583_v53 = vpop.eup %8582  ;;  %v969_v15 = vmul.f32 %v905_v57, %v10446_v1  ;;  %8594 = vtanh.f32 %v723_v46 }
 0x14d   :  { %v8585_v56 = vpop.eup %8584  ;;  %v10513_v26 = vpack.c.bf16 %v971_v48, %v970_v62  ;;  %v846_v59 = vadd.f32 1.0, %v8583_v53  ;;  %8596 = vtanh.f32 %v721_v30  ;;  %v8251_v0 = vpop.f32.mrb[56].mxu0 }
 0x14e   :  { %v8587_v16 = vpop.eup %8586  ;;  %v10515_v2 = vpack.c.bf16 %v969_v15, %v968_v42  ;;  %v844_v20 = vadd.f32 1.0, %v8585_v56  ;;  %v10518_v7 = vadd.f32 %v8251_v0, %v10130_v44  ;;  %v637_v8 = vpop.f32.mrb[57].mxu0 }
 0x14f   :  { %17247 = vst [vmem:[#allocation28_spill] sm:$0xff] %v10513_v26  ;;  %v8589_v61 = vpop.eup %8588  ;;  %v910_v14 = vmul.f32 0.5, %v846_v59  ;;  %v847_v32 = vadd.f32 1.0, %v8587_v16  ;;  %v10521_v1 = vadd.f32 %v10130_v44, %v637_v8  ;;  %v8252_v6 = vpop.f32.mrb[58].mxu0 }
 0x150   :  { %17248 = vst [vmem:[#allocation29_spill] sm:$0xff] %v10515_v2  ;;  %7829 = vmatmul.mubr.msk.bf16.gmra.mrb[44].mxu1 %vm282_vm0, %v10327_v24  ;;  %7861 = vmatmul.mubr.msk.bf16.gmra.mrb[108].mxu0 %vm282_vm0, %v10327_v24  ;;  %v908_v13 = vmul.f32 0.5, %v844_v20  ;;  %v845_v50 = vadd.f32 1.0, %v8589_v61  ;;  %v726_v19 = vmul.f32 0.5, %v10518_v7  ;;  %v10531_v55 = vadd.f32 %v9894_v38, %v8252_v6  ;;  %v640_v22 = vpop.f32.mrb[59].mxu0 }
 0x151   :  { %1442 = vmatprep.mubr.bf16.mxu1 %v17124_v41  ;;  %1795 = vmatprep.mubr.bf16.mxu0 %v17124_v41  ;;  %v974_v44 = vmul.f32 %v910_v14, %v10458_v33  ;;  %v911_v23 = vmul.f32 0.5, %v847_v32  ;;  %v724_v28 = vmul.f32 0.5, %v10521_v1  ;;  %v10537_v62 = vadd.f32 %v9894_v38, %v640_v22 }
 0x152   :  { %v972_v5 = vmul.f32 %v908_v13, %v10461_v31  ;;  %v909_v34 = vmul.f32 0.5, %v845_v50  ;;  %8598 = vtanh.f32 %v726_v19  ;;  %v727_v42 = vmul.f32 0.5, %v10531_v55 }
 0x153   :  { %v975_v57 = vmul.f32 %v911_v23, %v10469_v39  ;;  %8600 = vtanh.f32 %v724_v28  ;;  %v725_v46 = vmul.f32 0.5, %v10537_v62 }
 0x154   :  { %v8591_v48 = vpop.eup %8590  ;;  %v973_v30 = vmul.f32 %v909_v34, %v10476_v11  ;;  %8602 = vtanh.f32 %v727_v42 }
 0x155   :  { %v8593_v33 = vpop.eup %8592  ;;  %v10544_v53 = vpack.c.bf16 %v975_v57, %v974_v44  ;;  %v850_v15 = vadd.f32 1.0, %v8591_v48  ;;  %8604 = vtanh.f32 %v725_v46  ;;  %v8255_v56 = vpop.f32.mrb[60].mxu0 }
 0x156   :  { %v8595_v31 = vpop.eup %8594  ;;  %v10546_v59 = vpack.c.bf16 %v973_v30, %v972_v5  ;;  %v848_v0 = vadd.f32 1.0, %v8593_v33  ;;  %v10548_v16 = vadd.f32 %v9894_v38, %v8255_v56  ;;  %v653_v39 = vpop.f32.mrb[61].mxu0 }
 0x157   :  { %17249 = vst [vmem:[#allocation30_spill] sm:$0xff] %v10544_v53  ;;  %v8597_v20 = vpop.eup %8596  ;;  %v914_v8 = vmul.f32 0.5, %v850_v15  ;;  %v851_v61 = vadd.f32 1.0, %v8595_v31  ;;  %v10550_v14 = vadd.f32 %v9894_v38, %v653_v39  ;;  %v8256_v11 = vpop.f32.mrb[62].mxu0 }
 0x158   :  { %17250 = vst [vmem:[#allocation31_spill] sm:$0xff] %v10546_v59  ;;  %7830 = vmatmul.mubr.msk.bf16.gmra.mrb[48].mxu1 %vm282_vm0, %v10359_v9  ;;  %7862 = vmatmul.mubr.msk.bf16.gmra.mrb[112].mxu0 %vm282_vm0, %v10359_v9  ;;  %v912_v32 = vmul.f32 0.5, %v848_v0  ;;  %v849_v6 = vadd.f32 1.0, %v8597_v20  ;;  %v730_v13 = vmul.f32 0.5, %v10548_v16  ;;  %v665_v50 = vadd.f32 %v9894_v38, %v8256_v11  ;;  %v656_v19 = vpop.f32.mrb[63].mxu0 }
 0x159   :  { %1452 = vmatprep.mubr.bf16.mxu1 %v17124_v41  ;;  %1805 = vmatprep.mubr.bf16.mxu0 %v17124_v41  ;;  %v978_v22 = vmul.f32 %v914_v8, %v10488_v12  ;;  %v915_v44 = vmul.f32 0.5, %v851_v61  ;;  %v728_v23 = vmul.f32 0.5, %v10550_v14  ;;  %v657_v28 = vadd.f32 %v9894_v38, %v656_v19 }
 0x15a   :  { %v976_v5 = vmul.f32 %v912_v32, %v10491_v17  ;;  %v913_v34 = vmul.f32 0.5, %v849_v6  ;;  %8606 = vtanh.f32 %v730_v13  ;;  %v731_v42 = vmul.f32 0.5, %v665_v50 }
 0x15b   :  { %v979_v57 = vmul.f32 %v915_v44, %v10499_v27  ;;  %8608 = vtanh.f32 %v728_v23  ;;  %v729_v46 = vmul.f32 0.5, %v657_v28 }
 0x15c   :  { %v8599_v48 = vpop.eup %8598  ;;  %v977_v30 = vmul.f32 %v913_v34, %v10506_v37  ;;  %8610 = vtanh.f32 %v731_v42 }
 0x15d   :  { %v8601_v33 = vpop.eup %8600  ;;  %v10564_v15 = vpack.c.bf16 %v979_v57, %v978_v22  ;;  %v854_v12 = vadd.f32 1.0, %v8599_v48  ;;  %8612 = vtanh.f32 %v729_v46 }
 0x15e   :  { %v8603_v56 = vpop.eup %8602  ;;  %v10566_v38 = vpack.c.bf16 %v977_v30, %v976_v5  ;;  %v852_v17 = vadd.f32 1.0, %v8601_v33 }
 0x15f   :  { %17251 = vst [vmem:[#allocation32_spill] sm:$0xff] %v10564_v15  ;;  %v8605_v31 = vpop.eup %8604  ;;  %v918_v0 = vmul.f32 0.5, %v854_v12  ;;  %v855_v39 = vadd.f32 1.0, %v8603_v56 }
 0x160   :  { %17252 = vst [vmem:[#allocation33_spill] sm:$0xff] %v10566_v38  ;;  %7831 = vmatmul.mubr.msk.bf16.gmra.mrb[52].mxu1 %vm282_vm0, %v10357_v4  ;;  %7863 = vmatmul.mubr.msk.bf16.gmra.mrb[116].mxu0 %vm282_vm0, %v10357_v4  ;;  %v916_v27 = vmul.f32 0.5, %v852_v17  ;;  %v853_v37 = vadd.f32 1.0, %v8605_v31 }
 0x161   :  { %1462 = vmatprep.mubr.bf16.mxu1 %v17124_v41  ;;  %1815 = vmatprep.mubr.bf16.mxu0 %v17124_v41  ;;  %v982_v20 = vmul.f32 %v918_v0, %v10518_v7  ;;  %v919_v8 = vmul.f32 0.5, %v855_v39 }
 0x162   :  { %v980_v61 = vmul.f32 %v916_v27, %v10521_v1  ;;  %v917_v11 = vmul.f32 0.5, %v853_v37  ;;  %v1040_v27 = vld [vmem:[%s17108_s4] sm:$0xff] }
 0x163   :  { %v983_v32 = vmul.f32 %v919_v8, %v10531_v55 }
 0x164   :  { %v8607_v6 = vpop.eup %8606  ;;  %v981_v13 = vmul.f32 %v917_v11, %v10537_v62 }
 0x165   :  { %v8609_v19 = vpop.eup %8608  ;;  %v10578_v22 = vpack.c.bf16 %v983_v32, %v982_v20  ;;  %v858_v44 = vadd.f32 1.0, %v8607_v6 }
 0x166   :  { %v8611_v23 = vpop.eup %8610  ;;  %v10580_v5 = vpack.c.bf16 %v981_v13, %v980_v61  ;;  %v856_v34 = vadd.f32 1.0, %v8609_v19 }
 0x167   :  { %17253 = vst [vmem:[#allocation34_spill] sm:$0xff] %v10578_v22  ;;  %v8613_v42 = vpop.eup %8612  ;;  %v922_v57 = vmul.f32 0.5, %v858_v44  ;;  %v859_v7 = vadd.f32 1.0, %v8611_v23 }
 0x168   :  { %17254 = vst [vmem:[#allocation35_spill] sm:$0xff] %v10580_v5  ;;  %7832 = vmatmul.mubr.msk.bf16.gmra.mrb[56].mxu1 %vm282_vm0, %v10389_v51  ;;  %7864 = vmatmul.mubr.msk.bf16.gmra.mrb[120].mxu0 %vm282_vm0, %v10389_v51  ;;  %v920_v1 = vmul.f32 0.5, %v856_v34  ;;  %v857_v55 = vadd.f32 1.0, %v8613_v42 }
 0x169   :  { %1472 = vmatprep.mubr.bf16.mxu1 %v17124_v41  ;;  %1825 = vmatprep.mubr.bf16.mxu0 %v17124_v41  ;;  %v986_v62 = vmul.f32 %v922_v57, %v10548_v16  ;;  %v923_v46 = vmul.f32 0.5, %v859_v7  ;;  %v8478_v16 = vld [vmem:[%s17107_s3 + $0x6c] ss:$40 sps:$4 sm:$0xff]  }
 0x16a   :  { %v984_v48 = vmul.f32 %v920_v1, %v10550_v14  ;;  %v921_v30 = vmul.f32 0.5, %v857_v55  ;;  %v8476_v14 = vld [vmem:[%s17107_s3 + $0x68] ss:$40 sps:$4 sm:$0xff]   ;;  %2351 = vmatprep.subr.bf16.mxu0 %v8478_v16 }
 0x16b   :  { %v987_v33 = vmul.f32 %v923_v46, %v665_v50  ;;  %2352 = vmatpush1.bf16.msra.mxu0 %v8476_v14  ;;  %v8481_v50 = vld [vmem:[%s17107_s3 + $0x24] ss:$40 sps:$4 sm:$0xff]  }
 0x16c   :  { %v985_v12 = vmul.f32 %v921_v30, %v657_v28  ;;  %2702 = vmatprep.subr.bf16.mxu1 %v8481_v50  ;;  %v1044_v28 = vlaneseq }
 0x16d   :  { %v10590_v56 = vpack.c.bf16 %v987_v33, %v986_v62 }
 0x16e   :  { %v10592_v17 = vpack.c.bf16 %v985_v12, %v984_v48  ;;  %v10667_v31 = vshrl.u32 %v1044_v28, 7 }
 0x16f   :  { %17255 = vst [vmem:[#allocation36_spill] sm:$0xff] %v10590_v56 }
 0x170   :  { %17256 = vst [vmem:[#allocation37_spill] sm:$0xff] %v10592_v17  ;;  %7833 = vmatmul.mubr.msk.bf16.gmra.mrb[60].mxu1 %vm282_vm0, %v10387_v47  ;;  %7865 = vmatmul.mubr.msk.bf16.gmra.mrb[124].mxu0 %vm282_vm0, %v10387_v47  ;;  %17257 = vst [vmem:[#allocation38_spill] sm:$0xff] %v10667_v31  ;;  %v17113_v0 = vsub.s32 0, %v10667_v31  ;;  %v1054_v39 = vsub.s32 2, %v10667_v31  ;;  %v17112_v37 = vsub.s32 1, %v10667_v31  ;;  %v1058_v20 = vsub.s32 3, %v10667_v31 }
 0x171   :  { %1482 = vmatprep.mubr.bf16.mxu1 %v17124_v41  ;;  %1835 = vmatprep.mubr.bf16.mxu0 %v17124_v41 }
 0x172   :  { %v10684_v8 = vrot.slane %v1040_v27, %v17113_v0  ;;  %v10686_v61 = vrot.slane %v1040_v27, %v1054_v39  ;;  %v10690_v11 = vrot.slane %v1040_v27, %v17112_v37  ;;  %v10692_v32 = vrot.slane %v1040_v27, %v1058_v20 }
 0x178   :  { %7834 = vmatmul.mubr.msk.bf16.gmra.mrb[64].mxu1 %vm282_vm0, %v10425_v36  ;;  %7866 = vmatmul.mubr.msk.bf16.gmra.mrb[128].mxu0 %vm282_vm0, %v10425_v36 }
 0x179   :  { %1492 = vmatprep.mubr.bf16.mxu1 %v17124_v41  ;;  %1845 = vmatprep.mubr.bf16.mxu0 %v17124_v41 }
 0x180   :  { %7835 = vmatmul.mubr.msk.bf16.gmra.mrb[68].mxu1 %vm282_vm0, %v10423_v25  ;;  %7867 = vmatmul.mubr.msk.bf16.gmra.mrb[132].mxu0 %vm282_vm0, %v10423_v25 }
 0x181   :  { %1502 = vmatprep.mubr.bf16.mxu1 %v17124_v41  ;;  %1855 = vmatprep.mubr.bf16.mxu0 %v17124_v41 }
 0x188   :  { %7836 = vmatmul.mubr.msk.bf16.gmra.mrb[72].mxu1 %vm282_vm0, %v10455_v21  ;;  %7868 = vmatmul.mubr.msk.bf16.gmra.mrb[136].mxu0 %vm282_vm0, %v10455_v21 }
 0x189   :  { %1512 = vmatprep.mubr.bf16.mxu1 %v17124_v41  ;;  %1865 = vmatprep.mubr.bf16.mxu0 %v17124_v41 }
 0x190   :  { %7837 = vmatmul.mubr.msk.bf16.gmra.mrb[76].mxu1 %vm282_vm0, %v10453_v18  ;;  %7869 = vmatmul.mubr.msk.bf16.gmra.mrb[140].mxu0 %vm282_vm0, %v10453_v18 }
 0x191   :  { %1522 = vmatprep.mubr.bf16.mxu1 %v17124_v41  ;;  %1875 = vmatprep.mubr.bf16.mxu0 %v17124_v41 }
 0x198   :  { %7838 = vmatmul.mubr.msk.bf16.gmra.mrb[80].mxu1 %vm282_vm0, %v10485_v43  ;;  %7870 = vmatmul.mubr.msk.bf16.gmra.mrb[144].mxu0 %vm282_vm0, %v10485_v43 }
 0x199   :  { %1532 = vmatprep.mubr.bf16.mxu1 %v17124_v41  ;;  %1885 = vmatprep.mubr.bf16.mxu0 %v17124_v41 }
 0x1a0   :  { %7839 = vmatmul.mubr.msk.bf16.gmra.mrb[84].mxu1 %vm282_vm0, %v10483_v3  ;;  %7871 = vmatmul.mubr.msk.bf16.gmra.mrb[148].mxu0 %vm282_vm0, %v10483_v3 }
 0x1a1   :  { %1542 = vmatprep.mubr.bf16.mxu1 %v17124_v41  ;;  %1895 = vmatprep.mubr.bf16.mxu0 %v17124_v41 }
 0x1a8   :  { %7840 = vmatmul.mubr.msk.bf16.gmra.mrb[88].mxu1 %vm282_vm0, %v10515_v2  ;;  %7872 = vmatmul.mubr.msk.bf16.gmra.mrb[152].mxu0 %vm282_vm0, %v10515_v2 }
 0x1a9   :  { %1552 = vmatprep.mubr.bf16.mxu1 %v17124_v41  ;;  %1905 = vmatprep.mubr.bf16.mxu0 %v17124_v41 }
 0x1b0   :  { %7841 = vmatmul.mubr.msk.bf16.gmra.mrb[92].mxu1 %vm282_vm0, %v10513_v26  ;;  %7873 = vmatmul.mubr.msk.bf16.gmra.mrb[156].mxu0 %vm282_vm0, %v10513_v26 }
 0x1b1   :  { %1562 = vmatprep.mubr.bf16.mxu1 %v17124_v41  ;;  %1915 = vmatprep.mubr.bf16.mxu0 %v17124_v41 }
 0x1b8   :  { %7842 = vmatmul.mubr.msk.bf16.gmra.mrb[96].mxu1 %vm282_vm0, %v10546_v59  ;;  %7874 = vmatmul.mubr.msk.bf16.gmra.mrb[160].mxu0 %vm282_vm0, %v10546_v59 }
 0x1b9   :  { %1572 = vmatprep.mubr.bf16.mxu1 %v17124_v41  ;;  %1925 = vmatprep.mubr.bf16.mxu0 %v17124_v41 }
 0x1c0   :  { %7843 = vmatmul.mubr.msk.bf16.gmra.mrb[100].mxu1 %vm282_vm0, %v10544_v53  ;;  %7875 = vmatmul.mubr.msk.bf16.gmra.mrb[164].mxu0 %vm282_vm0, %v10544_v53 }
 0x1c1   :  { %1582 = vmatprep.mubr.bf16.mxu1 %v17124_v41  ;;  %1935 = vmatprep.mubr.bf16.mxu0 %v17124_v41 }
 0x1c8   :  { %7844 = vmatmul.mubr.msk.bf16.gmra.mrb[104].mxu1 %vm282_vm0, %v10566_v38  ;;  %7876 = vmatmul.mubr.msk.bf16.gmra.mrb[168].mxu0 %vm282_vm0, %v10566_v38 }
 0x1c9   :  { %1592 = vmatprep.mubr.bf16.mxu1 %v17124_v41  ;;  %1945 = vmatprep.mubr.bf16.mxu0 %v17124_v41 }
 0x1cb   :  { %v1324_v6 = vpop.f32.mrb[0].mxu1  ;;  %v1677_v13 = vpop.f32.mrb[64].mxu0 }
 0x1cc   :  { %v10697_v19 = vadd.f32 %v1324_v6, %v10684_v8  ;;  %v10700_v44 = vadd.f32 %v1677_v13, %v10686_v61  ;;  %v1326_v23 = vpop.f32.mrb[1].mxu1  ;;  %v1679_v34 = vpop.f32.mrb[65].mxu0 }
 0x1cd   :  { %v10703_v42 = vadd.f32 %v1326_v23, %v10690_v11  ;;  %v10706_v57 = vadd.f32 %v1679_v34, %v10692_v32  ;;  %v1328_v7 = vpop.f32.mrb[2].mxu1  ;;  %v1681_v1 = vpop.f32.mrb[66].mxu0 }
 0x1ce   :  { %v3055_v55 = vmul.f32 0.5, %v10697_v19  ;;  %v3057_v62 = vmul.f32 0.5, %v10700_v44  ;;  %v10711_v46 = vadd.f32 %v1328_v7, %v10684_v8  ;;  %v10714_v48 = vadd.f32 %v1681_v1, %v10686_v61  ;;  %v1330_v30 = vpop.f32.mrb[3].mxu1  ;;  %v1683_v33 = vpop.f32.mrb[67].mxu0 }
 0x1cf   :  { %v3056_v12 = vmul.f32 0.5, %v10703_v42  ;;  %v3058_v16 = vmul.f32 0.5, %v10706_v57  ;;  %v10719_v14 = vadd.f32 %v1330_v30, %v10690_v11  ;;  %v10722_v50 = vadd.f32 %v1683_v33, %v10692_v32 }
 0x1d0   :  { %8614 = vtanh.f32 %v3055_v55  ;;  %v3065_v28 = vmul.f32 0.5, %v10711_v46  ;;  %7845 = vmatmul.mubr.msk.bf16.gmra.mrb[108].mxu1 %vm282_vm0, %v10564_v15  ;;  %7877 = vmatmul.mubr.msk.bf16.gmra.mrb[172].mxu0 %vm282_vm0, %v10564_v15  ;;  %v3067_v39 = vmul.f32 0.5, %v10714_v48 }
 0x1d1   :  { %8616 = vtanh.f32 %v3057_v62  ;;  %1602 = vmatprep.mubr.bf16.mxu1 %v17124_v41  ;;  %1955 = vmatprep.mubr.bf16.mxu0 %v17124_v41  ;;  %v3066_v27 = vmul.f32 0.5, %v10719_v14  ;;  %v3068_v20 = vmul.f32 0.5, %v10722_v50 }
 0x1d2   :  { %8618 = vtanh.f32 %v3056_v12 }
 0x1d3   :  { %8620 = vtanh.f32 %v3058_v16  ;;  %v1334_v6 = vpop.f32.mrb[4].mxu1  ;;  %v1687_v13 = vpop.f32.mrb[68].mxu0 }
 0x1d4   :  { %8622 = vtanh.f32 %v3065_v28  ;;  %v10735_v23 = vadd.f32 %v1334_v6, %v10684_v8  ;;  %v10738_v34 = vadd.f32 %v1687_v13, %v10686_v61  ;;  %v1336_v7 = vpop.f32.mrb[5].mxu1  ;;  %v1689_v1 = vpop.f32.mrb[69].mxu0 }
 0x1d5   :  { %8624 = vtanh.f32 %v3067_v39  ;;  %v10741_v55 = vadd.f32 %v1336_v7, %v10690_v11  ;;  %v10744_v62 = vadd.f32 %v1689_v1, %v10692_v32  ;;  %v1338_v30 = vpop.f32.mrb[6].mxu1  ;;  %v1691_v33 = vpop.f32.mrb[70].mxu0 }
 0x1d6   :  { %8626 = vtanh.f32 %v3066_v27  ;;  %v3075_v12 = vmul.f32 0.5, %v10735_v23  ;;  %v3077_v16 = vmul.f32 0.5, %v10738_v34  ;;  %v10749_v28 = vadd.f32 %v1338_v30, %v10684_v8  ;;  %v1340_v6 = vpop.f32.mrb[7].mxu1  ;;  %v1693_v13 = vpop.f32.mrb[71].mxu0 }
 0x1d7   :  { %8628 = vtanh.f32 %v3068_v20  ;;  %v3076_v39 = vmul.f32 0.5, %v10741_v55  ;;  %v3078_v7 = vmul.f32 0.5, %v10744_v62  ;;  %v10754_v1 = vadd.f32 %v1691_v33, %v10686_v61 }
 0x1d8   :  { %8630 = vtanh.f32 %v3075_v12  ;;  %v3085_v27 = vmul.f32 0.5, %v10749_v28  ;;  %v10758_v37 = vadd.f32 %v1340_v6, %v10690_v11  ;;  %v10761_v0 = vadd.f32 %v1693_v13, %v10692_v32  ;;  %7846 = vmatmul.mubr.msk.bf16.gmra.mrb[112].mxu1 %vm282_vm0, %v10580_v5  ;;  %7878 = vmatmul.mubr.msk.bf16.gmra.mrb[176].mxu0 %vm282_vm0, %v10580_v5 }
 0x1d9   :  { %8632 = vtanh.f32 %v3077_v16  ;;  %v3087_v20 = vmul.f32 0.5, %v10754_v1  ;;  %1612 = vmatprep.mubr.bf16.mxu1 %v17124_v41  ;;  %1965 = vmatprep.mubr.bf16.mxu0 %v17124_v41 }
 0x1da   :  { %v8615_v30 = vpop.eup %8614  ;;  %8634 = vtanh.f32 %v3076_v39  ;;  %v3086_v33 = vmul.f32 0.5, %v10758_v37  ;;  %v3088_v13 = vmul.f32 0.5, %v10761_v0 }
 0x1db   :  { %v8617_v12 = vpop.eup %8616  ;;  %v4335_v6 = vadd.f32 1.0, %v8615_v30  ;;  %8636 = vtanh.f32 %v3078_v7  ;;  %v1344_v15 = vpop.f32.mrb[8].mxu1 }
 0x1dc   :  { %v1697_v38 = vpop.f32.mrb[72].mxu0  ;;  %v8619_v53 = vpop.eup %8618  ;;  %v4337_v5 = vadd.f32 1.0, %v8617_v12  ;;  %8638 = vtanh.f32 %v3085_v27  ;;  %v10773_v16 = vadd.f32 %v1344_v15, %v10684_v8 }
 0x1dd   :  { %v10776_v59 = vadd.f32 %v1697_v38, %v10686_v61  ;;  %v1346_v41 = vpop.f32.mrb[9].mxu1  ;;  %v10778_v39 = vpop.f32.mrb[73].mxu0  ;;  %v4975_v2 = vmul.f32 0.5, %v4335_v6  ;;  %v4336_v30 = vadd.f32 1.0, %v8619_v53  ;;  %8640 = vtanh.f32 %v3087_v20 }
 0x1de   :  { %v8621_v26 = vpop.eup %8620  ;;  %v10781_v7 = vadd.f32 %v1346_v41, %v10690_v11  ;;  %v10783_v3 = vpop.f32.mrb[10].mxu1  ;;  %v4977_v15 = vmul.f32 0.5, %v4337_v5  ;;  %8642 = vtanh.f32 %v3086_v33  ;;  %v3095_v38 = vmul.f32 0.5, %v10773_v16 }
 0x1df   :  { %v10785_v12 = vpop.f32.mrb[74].mxu0  ;;  %v8623_v27 = vpop.eup %8622  ;;  %v4338_v31 = vadd.f32 1.0, %v8621_v26  ;;  %v5615_v53 = vmul.f32 %v4975_v2, %v10697_v19  ;;  %v4976_v20 = vmul.f32 0.5, %v4336_v30  ;;  %8644 = vtanh.f32 %v3088_v13 }
 0x1e0   :  { %v10788_v43 = vpop.f32.mrb[11].mxu1  ;;  %v10790_v18 = vpop.f32.mrb[75].mxu0  ;;  %v4345_v41 = vadd.f32 1.0, %v8623_v27  ;;  %v5617_v25 = vmul.f32 %v4977_v15, %v10700_v44  ;;  %8646 = vtanh.f32 %v3095_v38  ;;  %7847 = vmatmul.mubr.msk.bf16.gmra.mrb[116].mxu1 %vm282_vm0, %v10578_v22  ;;  %7879 = vmatmul.mubr.msk.bf16.gmra.mrb[180].mxu0 %vm282_vm0, %v10578_v22  ;;  %v3097_v19 = vmul.f32 0.5, %v10776_v59 }
 0x1e1   :  { %v8625_v6 = vpop.eup %8624  ;;  %v4978_v36 = vmul.f32 0.5, %v4338_v31  ;;  %v5616_v5 = vmul.f32 %v4976_v20, %v10703_v42  ;;  %v17258_v13 = vmov 0   ;;  %v3096_v15 = vmul.f32 0.5, %v10781_v7 }
 0x1e2   :  { %v8627_v21 = vpop.eup %8626  ;;  %v4347_v47 = vadd.f32 1.0, %v8625_v6  ;;  %v4985_v33 = vmul.f32 0.5, %v4345_v41  ;;  %1622 = vmatprep.mubr.bf16.mxu1 %v17258_v13  ;;  %1975 = vmatprep.mubr.bf16.mxu0 %v17258_v13  ;;  %8648 = vtanh.f32 %v3097_v19 }
 0x1e3   :  { %v8629_v26 = vpop.eup %8628  ;;  %v4346_v2 = vadd.f32 1.0, %v8627_v21  ;;  %v5618_v44 = vmul.f32 %v4978_v36, %v10706_v57  ;;  %v10805_v21 = vpop.f32.mrb[12].mxu1  ;;  %8650 = vtanh.f32 %v3096_v15 }
 0x1e4   :  { %v8631_v31 = vpop.eup %8630  ;;  %v4987_v30 = vmul.f32 0.5, %v4347_v47  ;;  %v4348_v27 = vadd.f32 1.0, %v8629_v26  ;;  %v5625_v6 = vmul.f32 %v4985_v33, %v10711_v46  ;;  %v10807_v20 = vpop.f32.mrb[76].mxu0 }
 0x1e5   :  { %v8633_v38 = vpop.eup %8632  ;;  %v4986_v22 = vmul.f32 0.5, %v4346_v2  ;;  %v4355_v42 = vadd.f32 1.0, %v8631_v31  ;;  %v10810_v47 = vpop.f32.mrb[13].mxu1 }
 0x1e6   :  { %v8635_v41 = vpop.eup %8634  ;;  %v5627_v51 = vmul.f32 %v4987_v30, %v10714_v48  ;;  %v4988_v4 = vmul.f32 0.5, %v4348_v27  ;;  %v4357_v9 = vadd.f32 1.0, %v8633_v38  ;;  %v10812_v36 = vpop.f32.mrb[77].mxu0  ;;  %v6258_v26 = vadd.f32 %v5625_v6, %v5615_v53 }
 0x1e7   :  { %v8637_v57 = vpop.eup %8636  ;;  %v5626_v46 = vmul.f32 %v4986_v22, %v10719_v14  ;;  %v4995_v33 = vmul.f32 0.5, %v4355_v42  ;;  %v4356_v2 = vadd.f32 1.0, %v8635_v41  ;;  %v10815_v19 = vpop.f32.mrb[14].mxu1 }
 0x1e8   :  { %v10817_v31 = vpop.f32.mrb[78].mxu0  ;;  %v8639_v24 = vpop.eup %8638  ;;  %v6332_v29 = vadd.f32 %v5627_v51, %v5617_v25  ;;  %v5628_v48 = vmul.f32 %v4988_v4, %v10722_v50  ;;  %v4997_v30 = vmul.f32 0.5, %v4357_v9  ;;  %v4358_v27 = vadd.f32 1.0, %v8637_v57  ;;  %7848 = vmatmul.mubr.msk.bf16.gmra.mrb[120].mxu1 %vm282_vm0, %v10592_v17  ;;  %7880 = vmatmul.mubr.msk.bf16.gmra.mrb[184].mxu0 %vm282_vm0, %v10592_v17 }
 0x1e9   :  { %v10820_v15 = vpop.f32.mrb[15].mxu1  ;;  %v10822_v38 = vpop.f32.mrb[79].mxu0  ;;  %v6295_v53 = vadd.f32 %v5626_v46, %v5616_v5  ;;  %v5635_v22 = vmul.f32 %v4995_v33, %v10735_v23  ;;  %v4996_v14 = vmul.f32 0.5, %v4356_v2  ;;  %v4365_v6 = vadd.f32 1.0, %v8639_v24  ;;  %1632 = vmatprep.mubr.bf16.mxu1 %v17258_v13  ;;  %1985 = vmatprep.mubr.bf16.mxu0 %v17258_v13 }
 0x1ea   :  { %v8641_v52 = vpop.eup %8640  ;;  %v6369_v41 = vadd.f32 %v5628_v48, %v5618_v44  ;;  %v5637_v54 = vmul.f32 %v4997_v30, %v10738_v34  ;;  %v4998_v63 = vmul.f32 0.5, %v4358_v27 }
 0x1eb   :  { %v8643_v42 = vpop.eup %8642  ;;  %v4367_v51 = vadd.f32 1.0, %v8641_v52  ;;  %v6259_v9 = vadd.f32 %v6258_v26, %v5635_v22  ;;  %v5636_v25 = vmul.f32 %v4996_v14, %v10741_v55  ;;  %v5005_v50 = vmul.f32 0.5, %v4365_v6  ;;  %v10835_v26 = vpop.f32.mrb[16].mxu1 }
 0x1ec   :  { %v8645_v4 = vpop.eup %8644  ;;  %v4366_v23 = vadd.f32 1.0, %v8643_v42  ;;  %v6333_v34 = vadd.f32 %v6332_v29, %v5637_v54  ;;  %v5638_v52 = vmul.f32 %v4998_v63, %v10744_v62  ;;  %v10837_v55 = vpop.f32.mrb[80].mxu0  ;;  %v10842_v54 = vadd.f32 %v10778_v39, %v10692_v32 }
 0x1ed   :  { %v8647_v24 = vpop.eup %8646  ;;  %v5007_v5 = vmul.f32 0.5, %v4367_v51  ;;  %v4368_v44 = vadd.f32 1.0, %v8645_v4  ;;  %v6296_v57 = vadd.f32 %v6295_v53, %v5636_v25  ;;  %v5645_v46 = vmul.f32 %v5005_v50, %v10749_v28  ;;  %v10844_v63 = vpop.f32.mrb[17].mxu1 }
 0x1ee   :  { %v5006_v33 = vmul.f32 0.5, %v4366_v23  ;;  %v4375_v2 = vadd.f32 1.0, %v8647_v24  ;;  %v6370_v48 = vadd.f32 %v6369_v41, %v5638_v52  ;;  %v10846_v29 = vpop.f32.mrb[81].mxu0  ;;  %v8649_v62 = vpop.eup %8648  ;;  %v10851_v14 = vadd.f32 %v10783_v3, %v10684_v8 }
 0x1ef   :  { %v5647_v30 = vmul.f32 %v5007_v5, %v10754_v1  ;;  %v5008_v27 = vmul.f32 0.5, %v4368_v44  ;;  %v6260_v28 = vadd.f32 %v6259_v9, %v5645_v46  ;;  %v10853_v6 = vpop.f32.mrb[18].mxu1  ;;  %v10855_v1 = vpop.f32.mrb[82].mxu0  ;;  %v4377_v51 = vadd.f32 1.0, %v8649_v62 }
 0x1f0   :  { %v5646_v53 = vmul.f32 %v5006_v33, %v10758_v37  ;;  %v5015_v22 = vmul.f32 0.5, %v4375_v2  ;;  %v8651_v42 = vpop.eup %8650  ;;  %v3098_v4 = vmul.f32 0.5, %v10842_v54  ;;  %v10859_v25 = vpop.f32.mrb[19].mxu1  ;;  %v3105_v23 = vmul.f32 0.5, %v10851_v14  ;;  %7849 = vmatmul.mubr.msk.bf16.gmra.mrb[124].mxu1 %vm282_vm0, %v10590_v56  ;;  %7881 = vmatmul.mubr.msk.bf16.gmra.mrb[188].mxu0 %vm282_vm0, %v10590_v56 }
 0x1f1   :  { %v6334_v39 = vadd.f32 %v6333_v34, %v5647_v30  ;;  %v5648_v41 = vmul.f32 %v5008_v27, %v10761_v0  ;;  %v10861_v9 = vpop.f32.mrb[83].mxu0  ;;  %v4376_v3 = vadd.f32 1.0, %v8651_v42  ;;  %v5017_v52 = vmul.f32 0.5, %v4377_v51  ;;  %2028 = vmatprep.mubr.bf16.mxu1 %v17258_v13  ;;  %2381 = vmatprep.mubr.bf16.mxu0 %v17258_v13  ;;  %v8479_v42 = vld [vmem:[%s17107_s3 + $0x20] ss:$40 sps:$4 sm:$0xff]  }
 0x1f2   :  { %v6297_v37 = vadd.f32 %v6296_v57, %v5646_v53  ;;  %v5655_v50 = vmul.f32 %v5015_v22, %v10773_v16  ;;  %8652 = vtanh.f32 %v3098_v4  ;;  %v10869_v0 = vadd.f32 %v10785_v12, %v10686_v61 }
 0x1f3   :  { %v10865_v24 = vadd.f32 %v6370_v48, %v5648_v41  ;;  %v5016_v16 = vmul.f32 0.5, %v4376_v3  ;;  %8654 = vtanh.f32 %v3105_v23  ;;  %v10879_v5 = vadd.f32 %v10788_v43, %v10690_v11  ;;  %v10903_v48 = vpop.f32.mrb[20].mxu1 }
 0x1f4   :  { %v10875_v34 = vadd.f32 %v6260_v28, %v5655_v50  ;;  %v5657_v12 = vmul.f32 %v5017_v52, %v10776_v59  ;;  %v3107_v44 = vmul.f32 0.5, %v10869_v0  ;;  %v10887_v57 = vadd.f32 %v10790_v18, %v10692_v32  ;;  %v10905_v18 = vpop.f32.mrb[84].mxu0  ;;  %v10911_v27 = vpop.f32.mrb[21].mxu1 }
 0x1f5   :  { %v10891_v46 = vadd.f32 %v10805_v21, %v10684_v8  ;;  %v5656_v33 = vmul.f32 %v5016_v16, %v10781_v7  ;;  %v3106_v43 = vmul.f32 0.5, %v10879_v5  ;;  %v10897_v2 = vadd.f32 %v10807_v20, %v10686_v61  ;;  %v10913_v62 = vpop.f32.mrb[85].mxu0  ;;  %v10919_v53 = vpop.f32.mrb[22].mxu1 }
 0x1f6   :  { %v10901_v59 = vadd.f32 %v10810_v47, %v10690_v11  ;;  %8656 = vtanh.f32 %v3107_v44  ;;  %v10907_v30 = vadd.f32 %v6334_v39, %v5657_v12  ;;  %v3108_v21 = vmul.f32 0.5, %v10887_v57  ;;  %v10921_v22 = vpop.f32.mrb[86].mxu0  ;;  %v10938_v4 = vpop.f32.mrb[23].mxu1 }
 0x1f7   :  { %v3115_v7 = vmul.f32 0.5, %v10891_v46  ;;  %v10915_v20 = vadd.f32 %v6297_v37, %v5656_v33  ;;  %8658 = vtanh.f32 %v3106_v43  ;;  %v3117_v47 = vmul.f32 0.5, %v10897_v2  ;;  %v10940_v37 = vpop.f32.mrb[87].mxu0 }
 0x1f8   :  { %v3116_v28 = vmul.f32 0.5, %v10901_v59  ;;  %8660 = vtanh.f32 %v3108_v21  ;;  %v10928_v39 = vadd.f32 %v10812_v36, %v10692_v32  ;;  %v10932_v41 = vadd.f32 %v10815_v19, %v10684_v8  ;;  %7882 = vmatmul.mubr.msk.bf16.vlgmr.msra.gmra.mrb[128].mxu1 %vm282_vm0, %v10173_v40  ;;  %7914 = vmatmul.mubr.msk.bf16.vlgmr.msra.gmra.mrb[192].mxu0 %vm282_vm0, %v10173_v40 }
 0x1f9   :  { %v10936_v51 = vadd.f32 %v10817_v31, %v10686_v61  ;;  %8662 = vtanh.f32 %v3115_v7  ;;  %v10944_v50 = vadd.f32 %v10820_v15, %v10690_v11  ;;  %v10948_v36 = vadd.f32 %v10822_v38, %v10692_v32  ;;  %2703 = vmatpush1.bf16.msra.mxu1 %v8479_v42  ;;  %2038 = vmatprep.mubr.bf16.mxu1 %v17258_v13 }
 0x1fa   :  { %v10952_v19 = vadd.f32 %v10835_v26, %v10684_v8  ;;  %8664 = vtanh.f32 %v3117_v47  ;;  %v3118_v31 = vmul.f32 0.5, %v10928_v39  ;;  %v3125_v3 = vmul.f32 0.5, %v10932_v41  ;;  %2391 = vmatprep.mubr.bf16.mxu0 %v17258_v13 }
 0x1fb   :  { %v3127_v23 = vmul.f32 0.5, %v10936_v51  ;;  %8666 = vtanh.f32 %v3116_v28  ;;  %v3126_v15 = vmul.f32 0.5, %v10944_v50  ;;  %v3128_v38 = vmul.f32 0.5, %v10948_v36  ;;  %v10986_v7 = vpop.f32.mrb[24].mxu1 }
 0x1fc   :  { %v3135_v26 = vmul.f32 0.5, %v10952_v19  ;;  %v8653_v52 = vpop.eup %8652  ;;  %8668 = vtanh.f32 %v3118_v31  ;;  %v10967_v16 = vadd.f32 %v10837_v55, %v10686_v61  ;;  %v10971_v12 = vadd.f32 %v10844_v63, %v10690_v11  ;;  %v10988_v63 = vpop.f32.mrb[88].mxu0 }
 0x1fd   :  { %v10975_v44 = vadd.f32 %v10846_v29, %v10692_v32  ;;  %v8655_v33 = vpop.eup %8654  ;;  %v4378_v43 = vadd.f32 1.0, %v8653_v52  ;;  %8670 = vtanh.f32 %v3125_v3  ;;  %v10980_v21 = vadd.f32 %v10853_v6, %v10684_v8  ;;  %v10992_v42 = vpop.f32.mrb[25].mxu1 }
 0x1fe   :  { %v10984_v55 = vadd.f32 %v10855_v1, %v10686_v61  ;;  %v4385_v47 = vadd.f32 1.0, %v8655_v33  ;;  %8672 = vtanh.f32 %v3127_v23  ;;  %v3137_v29 = vmul.f32 0.5, %v10967_v16  ;;  %v10994_v31 = vpop.f32.mrb[89].mxu0  ;;  %v10998_v52 = vpop.f32.mrb[26].mxu1 }
 0x1ff   :  { %v3136_v28 = vmul.f32 0.5, %v10971_v12  ;;  %17259 = vst [vmem:[#allocation39_spill] sm:$0xff] %v10994_v31  ;;  %v5018_v6 = vmul.f32 0.5, %v4378_v43  ;;  %8674 = vtanh.f32 %v3126_v15  ;;  %v3138_v3 = vmul.f32 0.5, %v10975_v44  ;;  %17260 = vst [vmem:[#allocation40_spill] sm:$0xff] %v10998_v52  ;;  %v11000_v40 = vpop.f32.mrb[90].mxu0 }
 0x200   :  { %v3145_v1 = vmul.f32 0.5, %v10980_v21  ;;  %17261 = vst [vmem:[#allocation41_spill] sm:$0xff] %v11000_v40  ;;  %v8657_v33 = vpop.eup %8656  ;;  %v5025_v23 = vmul.f32 0.5, %v4385_v47  ;;  %8676 = vtanh.f32 %v3128_v38  ;;  %v3147_v56 = vmul.f32 0.5, %v10984_v55  ;;  %v11007_v60 = vpop.f32.mrb[27].mxu1  ;;  %7883 = vmatmul.mubr.msk.bf16.gmra.mrb[132].mxu1 %vm282_vm0, %v10168_v35  ;;  %7915 = vmatmul.mubr.msk.bf16.gmra.mrb[196].mxu0 %vm282_vm0, %v10168_v35 }
 0x201   :  { %v11005_v17 = vadd.f32 %v10859_v25, %v10690_v11  ;;  %17263 = vst [vmem:[#allocation43_spill] sm:$0xff] %v11007_v60  ;;  %v11009_v15 = vpop.f32.mrb[91].mxu0  ;;  %v8659_v43 = vpop.eup %8658  ;;  %v5658_v45 = vmul.f32 %v5018_v6, %v10842_v54  ;;  %v4387_v31 = vadd.f32 1.0, %v8657_v33  ;;  %8678 = vtanh.f32 %v3135_v26  ;;  %2048 = vmatprep.mubr.bf16.mxu1 %v17258_v13  ;;  %2401 = vmatprep.mubr.bf16.mxu0 %v17258_v13 }
 0x202   :  { %17264 = vst [vmem:[#allocation44_spill] sm:$0xff] %v11009_v15  ;;  %v11014_v40 = vadd.f32 %v10861_v9, %v10692_v32  ;;  %v8661_v38 = vpop.eup %8660  ;;  %v5665_v47 = vmul.f32 %v5025_v23, %v10851_v14  ;;  %v4386_v52 = vadd.f32 1.0, %v8659_v43  ;;  %8680 = vtanh.f32 %v3137_v29 }
 0x203   :  { %17262 = vst [vmem:[#allocation42_spill] sm:$0xff] %v11005_v17  ;;  %v11018_v25 = vmul.f32 0.5, %v11005_v17  ;;  %v8663_v54 = vpop.eup %8662  ;;  %v5027_v26 = vmul.f32 0.5, %v4387_v31  ;;  %v4388_v6 = vadd.f32 1.0, %v8661_v38  ;;  %v6372_v9 = vadd.f32 %v10865_v24, %v5658_v45  ;;  %v11029_v31 = vpop.f32.mrb[28].mxu1 }
 0x204   :  { %8682 = vtanh.f32 %v3136_v28  ;;  %v8665_v14 = vpop.eup %8664  ;;  %v6262_v29 = vadd.f32 %v10875_v34, %v5665_v47  ;;  %v5026_v33 = vmul.f32 0.5, %v4386_v52  ;;  %v4395_v23 = vadd.f32 1.0, %v8663_v54  ;;  %v11031_v45 = vpop.f32.mrb[92].mxu0 }
 0x205   :  { %8684 = vtanh.f32 %v3138_v3  ;;  %v8667_v43 = vpop.eup %8666  ;;  %v5667_v17 = vmul.f32 %v5027_v26, %v10869_v0  ;;  %v5028_v35 = vmul.f32 0.5, %v4388_v6  ;;  %v4397_v15 = vadd.f32 1.0, %v8665_v14  ;;  %v11034_v34 = vpop.f32.mrb[29].mxu1 }
 0x206   :  { %8686 = vtanh.f32 %v3145_v1  ;;  %v8669_v24 = vpop.eup %8668  ;;  %v5666_v28 = vmul.f32 %v5026_v33, %v10879_v5  ;;  %v5035_v38 = vmul.f32 0.5, %v4395_v23  ;;  %v4396_v60 = vadd.f32 1.0, %v8667_v43  ;;  %17265 = vst [vmem:[#allocation45_spill] sm:$0xff] %v11034_v34  ;;  %v11036_v52 = vpop.f32.mrb[93].mxu0 }
 0x207   :  { %8688 = vtanh.f32 %v3147_v56  ;;  %17266 = vst [vmem:[#allocation46_spill] sm:$0xff] %v11036_v52  ;;  %v8671_v3 = vpop.eup %8670  ;;  %v6336_v0 = vadd.f32 %v10907_v30, %v5667_v17  ;;  %v5668_v47 = vmul.f32 %v5028_v35, %v10887_v57  ;;  %v5037_v1 = vmul.f32 0.5, %v4397_v15  ;;  %v11040_v26 = vpop.f32.mrb[30].mxu1 }
 0x208   :  { %v4398_v54 = vadd.f32 1.0, %v8669_v24  ;;  %17267 = vst [vmem:[#allocation47_spill] sm:$0xff] %v11040_v26  ;;  %v11042_v6 = vpop.f32.mrb[94].mxu0  ;;  %v8673_v14 = vpop.eup %8672  ;;  %v6299_v5 = vadd.f32 %v10915_v20, %v5666_v28  ;;  %v5675_v56 = vmul.f32 %v5035_v38, %v10891_v46  ;;  %v5036_v33 = vmul.f32 0.5, %v4396_v60  ;;  %7884 = vmatmul.mubr.msk.bf16.gmra.mrb[136].mxu1 %vm282_vm0, %v10209_v58  ;;  %7916 = vmatmul.mubr.msk.bf16.gmra.mrb[200].mxu0 %vm282_vm0, %v10209_v58 }
 0x209   :  { %17268 = vst [vmem:[#allocation48_spill] sm:$0xff] %v11042_v6  ;;  %v4405_v23 = vadd.f32 1.0, %v8671_v3  ;;  %v11046_v43 = vpop.f32.mrb[31].mxu1  ;;  %v11048_v52 = vpop.f32.mrb[95].mxu0  ;;  %v6373_v30 = vadd.f32 %v6372_v9, %v5668_v47  ;;  %v5677_v35 = vmul.f32 %v5037_v1, %v10897_v2  ;;  %v4407_v15 = vadd.f32 1.0, %v8673_v14  ;;  %2058 = vmatprep.mubr.bf16.mxu1 %v17258_v13  ;;  %2411 = vmatprep.mubr.bf16.mxu0 %v17258_v13 }
 0x20a   :  { %v8675_v17 = vpop.eup %8674  ;;  %v5038_v57 = vmul.f32 0.5, %v4398_v54  ;;  %v6263_v26 = vadd.f32 %v6262_v29, %v5675_v56  ;;  %v5676_v6 = vmul.f32 %v5036_v33, %v10901_v59  ;;  %8690 = vtanh.f32 %v11018_v25 }
 0x20b   :  { %v8677_v24 = vpop.eup %8676  ;;  %v5045_v34 = vmul.f32 0.5, %v4405_v23  ;;  %v4406_v20 = vadd.f32 1.0, %v8675_v17  ;;  %v6337_v46 = vadd.f32 %v6336_v0, %v5677_v35  ;;  %v5047_v28 = vmul.f32 0.5, %v4407_v15  ;;  %v11061_v33 = vpop.f32.mrb[32].mxu1 }
 0x20c   :  { %v8679_v60 = vpop.eup %8678  ;;  %v5678_v9 = vmul.f32 %v5038_v57, %v10928_v39  ;;  %v4408_v2 = vadd.f32 1.0, %v8677_v24  ;;  %v6300_v59 = vadd.f32 %v6299_v5, %v5676_v6  ;;  %v11063_v39 = vpop.f32.mrb[96].mxu0 }
 0x20d   :  { %v8681_v29 = vpop.eup %8680  ;;  %v5685_v38 = vmul.f32 %v5045_v34, %v10932_v41  ;;  %v5046_v3 = vmul.f32 0.5, %v4406_v20  ;;  %v4415_v47 = vadd.f32 1.0, %v8679_v60  ;;  %v5687_v14 = vmul.f32 %v5047_v28, %v10936_v51  ;;  %v11066_v5 = vpop.f32.mrb[33].mxu1 }
 0x20e   :  { %v8683_v1 = vpop.eup %8682  ;;  %v6374_v54 = vadd.f32 %v6373_v30, %v5678_v9  ;;  %v5048_v56 = vmul.f32 0.5, %v4408_v2  ;;  %v4417_v0 = vadd.f32 1.0, %v8681_v29  ;;  %v11068_v41 = vpop.f32.mrb[97].mxu0 }
 0x20f   :  { %v8685_v23 = vpop.eup %8684  ;;  %v6264_v17 = vadd.f32 %v6263_v26, %v5685_v38  ;;  %v5686_v35 = vmul.f32 %v5046_v3, %v10944_v50  ;;  %v5055_v57 = vmul.f32 0.5, %v4415_v47  ;;  %v4416_v6 = vadd.f32 1.0, %v8683_v1  ;;  %v11071_v20 = vpop.f32.mrb[34].mxu1 }
 0x210   :  { %v8687_v34 = vpop.eup %8686  ;;  %v6338_v30 = vadd.f32 %v6337_v46, %v5687_v14  ;;  %v5688_v51 = vmul.f32 %v5048_v56, %v10948_v36  ;;  %v5057_v15 = vmul.f32 0.5, %v4417_v0  ;;  %v4418_v24 = vadd.f32 1.0, %v8685_v23  ;;  %v11073_v60 = vpop.f32.mrb[98].mxu0  ;;  %7885 = vmatmul.mubr.msk.bf16.gmra.mrb[140].mxu1 %vm282_vm0, %v10207_v10  ;;  %7917 = vmatmul.mubr.msk.bf16.gmra.mrb[204].mxu0 %vm282_vm0, %v10207_v10 }
 0x211   :  { %v8689_v9 = vpop.eup %8688  ;;  %v6301_v26 = vadd.f32 %v6300_v59, %v5686_v35  ;;  %v5695_v50 = vmul.f32 %v5055_v57, %v10952_v19  ;;  %v5056_v28 = vmul.f32 0.5, %v4416_v6  ;;  %v4425_v2 = vadd.f32 1.0, %v8687_v34  ;;  %v11076_v29 = vpop.f32.mrb[35].mxu1  ;;  %2068 = vmatprep.mubr.bf16.mxu1 %v17258_v13  ;;  %2421 = vmatprep.mubr.bf16.mxu0 %v17258_v13 }
 0x212   :  { %v11078_v38 = vpop.f32.mrb[99].mxu0  ;;  %v6375_v3 = vadd.f32 %v6374_v54, %v5688_v51  ;;  %v5697_v46 = vmul.f32 %v5057_v15, %v10967_v16  ;;  %v5058_v36 = vmul.f32 0.5, %v4418_v24  ;;  %v4427_v47 = vadd.f32 1.0, %v8689_v9 }
 0x213   :  { %v6265_v1 = vadd.f32 %v6264_v17, %v5695_v50  ;;  %v5696_v14 = vmul.f32 %v5056_v28, %v10971_v12  ;;  %v5065_v56 = vmul.f32 0.5, %v4425_v2  ;;  %v3148_v16 = vmul.f32 0.5, %v11014_v40  ;;  %v11109_v57 = vpop.f32.mrb[36].mxu1 }
 0x214   :  { %v6339_v19 = vadd.f32 %v6338_v30, %v5697_v46  ;;  %v5698_v59 = vmul.f32 %v5058_v36, %v10975_v44  ;;  %v5067_v54 = vmul.f32 0.5, %v4427_v47  ;;  %v11096_v0 = vadd.f32 %v10903_v48, %v10684_v8 }
 0x215   :  { %v11091_v12 = vadd.f32 %v6301_v26, %v5696_v14  ;;  %v5705_v25 = vmul.f32 %v5065_v56, %v10980_v21  ;;  %v11100_v23 = vadd.f32 %v10905_v18, %v10686_v61  ;;  %8692 = vtanh.f32 %v3148_v16  ;;  %v11111_v21 = vpop.f32.mrb[100].mxu0 }
 0x216   :  { %v11102_v44 = vadd.f32 %v6375_v3, %v5698_v59  ;;  %v5707_v17 = vmul.f32 %v5067_v54, %v10984_v55  ;;  %v11107_v35 = vadd.f32 %v10911_v27, %v10690_v11  ;;  %v3155_v48 = vmul.f32 0.5, %v11096_v0  ;;  %v11121_v55 = vpop.f32.mrb[37].mxu1  ;;  %v11123_v30 = vpop.f32.mrb[101].mxu0  ;;  %v17275_v54 = vld [vmem:[#allocation41_spill] sm:$0xff] }
 0x217   :  { %v11113_v6 = vadd.f32 %v6265_v1, %v5705_v25  ;;  %v3157_v18 = vmul.f32 0.5, %v11100_v23  ;;  %v11119_v34 = vadd.f32 %v10913_v62, %v10692_v32  ;;  %v11130_v15 = vadd.f32 %v10919_v53, %v10684_v8  ;;  %v11136_v9 = vpop.f32.mrb[38].mxu1  ;;  %v11138_v62 = vpop.f32.mrb[102].mxu0  ;;  %v17273_v1 = vld [vmem:[#allocation39_spill] sm:$0xff] }
 0x218   :  { %v11125_v27 = vadd.f32 %v6339_v19, %v5707_v17  ;;  %v3156_v51 = vmul.f32 0.5, %v11107_v35  ;;  %v11134_v24 = vadd.f32 %v10921_v22, %v10686_v61  ;;  %17269 = vst [vmem:[#allocation49_spill] sm:$0xff] %v11136_v9  ;;  %17270 = vst [vmem:[#allocation50_spill] sm:$0xff] %v11138_v62  ;;  %8694 = vtanh.f32 %v3155_v48  ;;  %v11149_v53 = vpop.f32.mrb[39].mxu1  ;;  %v11151_v2 = vpop.f32.mrb[103].mxu0  ;;  %7886 = vmatmul.mubr.msk.bf16.gmra.mrb[144].mxu1 %vm282_vm0, %v10239_v49  ;;  %v17274_v19 = vld [vmem:[#allocation40_spill] sm:$0xff] }
 0x219   :  { %v3158_v26 = vmul.f32 0.5, %v11119_v34  ;;  %v11143_v50 = vadd.f32 %v10938_v4, %v10690_v11  ;;  %v11147_v28 = vadd.f32 %v10940_v37, %v10692_v32  ;;  %17271 = vst [vmem:[#allocation51_spill] sm:$0xff] %v11149_v53  ;;  %17272 = vst [vmem:[#allocation52_spill] sm:$0xff] %v11151_v2  ;;  %8696 = vtanh.f32 %v3157_v18  ;;  %7918 = vmatmul.mubr.msk.bf16.gmra.mrb[208].mxu0 %vm282_vm0, %v10239_v49  ;;  %v17281_v49 = vld [vmem:[#allocation44_spill] sm:$0xff] }
 0x21a   :  { %v3165_v22 = vmul.f32 0.5, %v11130_v15  ;;  %v3167_v3 = vmul.f32 0.5, %v11134_v24  ;;  %v11157_v46 = vadd.f32 %v10986_v7, %v10684_v8  ;;  %8698 = vtanh.f32 %v3156_v51  ;;  %2078 = vmatprep.mubr.bf16.mxu1 %v17258_v13  ;;  %2431 = vmatprep.mubr.bf16.mxu0 %v17258_v13 }
 0x21b   :  { %v3166_v4 = vmul.f32 0.5, %v11143_v50  ;;  %v3168_v36 = vmul.f32 0.5, %v11147_v28  ;;  %v11163_v37 = vadd.f32 %v10988_v63, %v10686_v61  ;;  %8700 = vtanh.f32 %v3158_v26  ;;  %v8691_v63 = vpop.eup %8690  ;;  %v11191_v48 = vpop.f32.mrb[40].mxu1 }
 0x21c   :  { %v3175_v47 = vmul.f32 0.5, %v11157_v46  ;;  %v11172_v7 = vadd.f32 %v10992_v42, %v10690_v11  ;;  %v11176_v14 = vadd.f32 %v17273_v1, %v10692_v32  ;;  %8702 = vtanh.f32 %v3165_v22  ;;  %17276 = vst [vmem:[#allocation39_spill] sm:$0xff] %v11191_v48  ;;  %v11193_v18 = vpop.f32.mrb[104].mxu0  ;;  %v17278_v22 = vld [vmem:[#allocation43_spill] sm:$0xff] }
 0x21d   :  { %v3177_v56 = vmul.f32 0.5, %v11163_v37  ;;  %v11183_v59 = vadd.f32 %v17274_v19, %v10684_v8  ;;  %v11187_v42 = vadd.f32 %v17275_v54, %v10686_v61  ;;  %v4426_v16 = vadd.f32 1.0, %v8691_v63  ;;  %17277 = vst [vmem:[#allocation40_spill] sm:$0xff] %v11193_v18  ;;  %v11201_v19 = vpop.f32.mrb[41].mxu1 }
 0x21e   :  { %8704 = vtanh.f32 %v3167_v3  ;;  %v3176_v25 = vmul.f32 0.5, %v11172_v7  ;;  %v3178_v17 = vmul.f32 0.5, %v11176_v14  ;;  %v11199_v1 = vadd.f32 %v17278_v22, %v10690_v11  ;;  %17279 = vst [vmem:[#allocation41_spill] sm:$0xff] %v11201_v19  ;;  %v11203_v3 = vpop.f32.mrb[105].mxu0  ;;  %v11213_v58 = vpop.f32.mrb[42].mxu1 }
 0x21f   :  { %8706 = vtanh.f32 %v3166_v4  ;;  %v3185_v51 = vmul.f32 0.5, %v11183_v59  ;;  %v3187_v26 = vmul.f32 0.5, %v11187_v42  ;;  %17280 = vst [vmem:[#allocation43_spill] sm:$0xff] %v11203_v3  ;;  %v8693_v63 = vpop.eup %8692  ;;  %v5066_v54 = vmul.f32 0.5, %v4426_v16  ;;  %17282 = vst [vmem:[#allocation44_spill] sm:$0xff] %v11213_v58  ;;  %v11215_v18 = vpop.f32.mrb[106].mxu0 }
 0x220   :  { %8708 = vtanh.f32 %v3168_v36  ;;  %v11207_v10 = vadd.f32 %v17281_v49, %v10692_v32  ;;  %v11211_v4 = vadd.f32 %v11029_v31, %v10684_v8  ;;  %17283 = vst [vmem:[#allocation53_spill] sm:$0xff] %v11215_v18  ;;  %v4428_v22 = vadd.f32 1.0, %v8693_v63  ;;  %v11222_v36 = vpop.f32.mrb[43].mxu1  ;;  %v11224_v49 = vpop.f32.mrb[107].mxu0  ;;  %v17287_v3 = vld [vmem:[#allocation42_spill] sm:$0xff] }
 0x221   :  { %8710 = vtanh.f32 %v3175_v47  ;;  %v3186_v19 = vmul.f32 0.5, %v11199_v1  ;;  %v11220_v16 = vadd.f32 %v11031_v45, %v10686_v61  ;;  %17285 = vst [vmem:[#allocation55_spill] sm:$0xff] %v11222_v36  ;;  %17286 = vst [vmem:[#allocation56_spill] sm:$0xff] %v11224_v49  ;;  %v5706_v48 = vmul.f32 %v5066_v54, %v17287_v3  ;;  %v17288_v45 = vld [vmem:[#allocation45_spill] sm:$0xff]  ;;  %v17290_v36 = vld [vmem:[#allocation10_spill] sm:$0xff] }
 0x222   :  { %8712 = vtanh.f32 %v3177_v56  ;;  %v3188_v31 = vmul.f32 0.5, %v11207_v10  ;;  %v3195_v58 = vmul.f32 0.5, %v11211_v4  ;;  %v8695_v18 = vpop.eup %8694  ;;  %v5068_v63 = vmul.f32 0.5, %v4428_v22  ;;  %7887 = vmatmul.mubr.msk.bf16.gmra.mrb[148].mxu1 %vm282_vm0, %v17290_v36  ;;  %7919 = vmatmul.mubr.msk.bf16.gmra.mrb[212].mxu0 %vm282_vm0, %v17290_v36 }
 0x223   :  { %17284 = vst [vmem:[#allocation54_spill] sm:$0xff] %v11220_v16  ;;  %8714 = vtanh.f32 %v3176_v25  ;;  %v11230_v47 = vmul.f32 0.5, %v11220_v16  ;;  %v11234_v2 = vadd.f32 %v17288_v45, %v10690_v11  ;;  %v8697_v56 = vpop.eup %8696  ;;  %v6303_v3 = vadd.f32 %v11091_v12, %v5706_v48  ;;  %v17291_v25 = vld [vmem:[#allocation46_spill] sm:$0xff]  ;;  %2088 = vmatprep.mubr.bf16.mxu1 %v17258_v13  ;;  %2441 = vmatprep.mubr.bf16.mxu0 %v17258_v13 }
 0x224   :  { %v4435_v54 = vadd.f32 1.0, %v8695_v18  ;;  %8716 = vtanh.f32 %v3178_v17  ;;  %v11243_v22 = vadd.f32 %v17291_v25, %v10692_v32  ;;  %v8699_v45 = vpop.eup %8698  ;;  %v5708_v49 = vmul.f32 %v5068_v63, %v11014_v40  ;;  %v11254_v18 = vpop.f32.mrb[44].mxu1 }
 0x225   :  { %17289 = vst [vmem:[#allocation42_spill] sm:$0xff] %v11234_v2  ;;  %v4437_v53 = vadd.f32 1.0, %v8697_v56  ;;  %8718 = vtanh.f32 %v3185_v51  ;;  %v11249_v36 = vmul.f32 0.5, %v11234_v2  ;;  %v8701_v62 = vpop.eup %8700  ;;  %v4436_v48 = vadd.f32 1.0, %v8699_v45  ;;  %17293 = vst [vmem:[#allocation46_spill] sm:$0xff] %v11254_v18  ;;  %v11256_v25 = vpop.f32.mrb[108].mxu0 }
 0x226   :  { %17292 = vst [vmem:[#allocation45_spill] sm:$0xff] %v11243_v22  ;;  %v5075_v12 = vmul.f32 0.5, %v4435_v54  ;;  %8720 = vtanh.f32 %v3187_v26  ;;  %v11252_v17 = vmul.f32 0.5, %v11243_v22  ;;  %17294 = vst [vmem:[#allocation57_spill] sm:$0xff] %v11256_v25  ;;  %v8703_v9 = vpop.eup %8702  ;;  %v6377_v16 = vadd.f32 %v11102_v44, %v5708_v49  ;;  %v11259_v51 = vpop.f32.mrb[45].mxu1 }
 0x227   :  { %v5077_v40 = vmul.f32 0.5, %v4437_v53  ;;  %v4438_v63 = vadd.f32 1.0, %v8701_v62  ;;  %8722 = vtanh.f32 %v3186_v19  ;;  %v11261_v56 = vpop.f32.mrb[109].mxu0  ;;  %v5076_v45 = vmul.f32 0.5, %v4436_v48  ;;  %v11264_v2 = vpop.f32.mrb[46].mxu1 }
 0x228   :  { %17295 = vst [vmem:[#allocation58_spill] sm:$0xff] %v11261_v56  ;;  %v8705_v54 = vpop.eup %8704  ;;  %v5715_v26 = vmul.f32 %v5075_v12, %v11096_v0  ;;  %v4445_v22 = vadd.f32 1.0, %v8703_v9  ;;  %8724 = vtanh.f32 %v3188_v31  ;;  %17296 = vst [vmem:[#allocation59_spill] sm:$0xff] %v11264_v2  ;;  %v11266_v18 = vpop.f32.mrb[110].mxu0 }
 0x229   :  { %17297 = vst [vmem:[#allocation60_spill] sm:$0xff] %v11266_v18  ;;  %v8707_v25 = vpop.eup %8706  ;;  %v5717_v44 = vmul.f32 %v5077_v40, %v11100_v23  ;;  %v5078_v53 = vmul.f32 0.5, %v4438_v63  ;;  %v4447_v62 = vadd.f32 1.0, %v8705_v54  ;;  %8726 = vtanh.f32 %v3195_v58  ;;  %v11269_v19 = vpop.f32.mrb[47].mxu1  ;;  %v17298_v63 = vld [vmem:[#allocation13_spill] sm:$0xff] }
 0x22a   :  { %v11271_v49 = vpop.f32.mrb[111].mxu0  ;;  %v8709_v56 = vpop.eup %8708  ;;  %v6267_v0 = vadd.f32 %v11113_v6, %v5715_v26  ;;  %v5716_v9 = vmul.f32 %v5076_v45, %v11107_v35  ;;  %v5085_v31 = vmul.f32 0.5, %v4445_v22  ;;  %v4446_v12 = vadd.f32 1.0, %v8707_v25  ;;  %7888 = vmatmul.mubr.msk.bf16.gmra.mrb[152].mxu1 %vm282_vm0, %v17298_v63  ;;  %7920 = vmatmul.mubr.msk.bf16.gmra.mrb[216].mxu0 %vm282_vm0, %v17298_v63 }
 0x22b   :  { %v8711_v48 = vpop.eup %8710  ;;  %v6341_v18 = vadd.f32 %v11125_v27, %v5717_v44  ;;  %v5718_v2 = vmul.f32 %v5078_v53, %v11119_v34  ;;  %v5087_v23 = vmul.f32 0.5, %v4447_v62  ;;  %v4448_v40 = vadd.f32 1.0, %v8709_v56  ;;  %2098 = vmatprep.mubr.bf16.mxu1 %v17258_v13  ;;  %2451 = vmatprep.mubr.bf16.mxu0 %v17258_v13 }
 0x22c   :  { %v8713_v58 = vpop.eup %8712  ;;  %v6304_v54 = vadd.f32 %v6303_v3, %v5716_v9  ;;  %v5725_v6 = vmul.f32 %v5085_v31, %v11130_v15  ;;  %v5086_v35 = vmul.f32 0.5, %v4446_v12  ;;  %v4455_v22 = vadd.f32 1.0, %v8711_v48  ;;  %v11286_v9 = vpop.f32.mrb[48].mxu1 }
 0x22d   :  { %v8715_v27 = vpop.eup %8714  ;;  %v6378_v34 = vadd.f32 %v6377_v16, %v5718_v2  ;;  %v5727_v25 = vmul.f32 %v5087_v23, %v11134_v24  ;;  %v5088_v56 = vmul.f32 0.5, %v4448_v40  ;;  %v4457_v26 = vadd.f32 1.0, %v8713_v58  ;;  %v11288_v15 = vpop.f32.mrb[112].mxu0 }
 0x22e   :  { %v8717_v45 = vpop.eup %8716  ;;  %v6268_v44 = vadd.f32 %v6267_v0, %v5725_v6  ;;  %v5726_v53 = vmul.f32 %v5086_v35, %v11143_v50  ;;  %v5095_v62 = vmul.f32 0.5, %v4455_v22  ;;  %v4456_v3 = vadd.f32 1.0, %v8715_v27  ;;  %v11291_v16 = vpop.f32.mrb[49].mxu1 }
 0x22f   :  { %v8719_v31 = vpop.eup %8718  ;;  %v6342_v12 = vadd.f32 %v6341_v18, %v5727_v25  ;;  %v5728_v48 = vmul.f32 %v5088_v56, %v11147_v28  ;;  %v5097_v63 = vmul.f32 0.5, %v4457_v26  ;;  %v4458_v2 = vadd.f32 1.0, %v8717_v45  ;;  %v11293_v24 = vpop.f32.mrb[113].mxu0 }
 0x230   :  { %v8721_v23 = vpop.eup %8720  ;;  %v6305_v0 = vadd.f32 %v6304_v54, %v5726_v53  ;;  %v5735_v50 = vmul.f32 %v5095_v62, %v11157_v46  ;;  %v5096_v40 = vmul.f32 0.5, %v4456_v3  ;;  %v4465_v58 = vadd.f32 1.0, %v8719_v31  ;;  %v11296_v6 = vpop.f32.mrb[50].mxu1 }
 0x231   :  { %17299 = vst [vmem:[#allocation61_spill] sm:$0xff] %v11296_v6  ;;  %v11298_v35 = vpop.f32.mrb[114].mxu0  ;;  %v8723_v22 = vpop.eup %8722  ;;  %v6379_v18 = vadd.f32 %v6378_v34, %v5728_v48  ;;  %v5737_v28 = vmul.f32 %v5097_v63, %v11163_v37  ;;  %v5098_v27 = vmul.f32 0.5, %v4458_v2  ;;  %v4467_v25 = vadd.f32 1.0, %v8721_v23  ;;  %v17301_v48 = vld [vmem:[#allocation12_spill] sm:$0xff] }
 0x232   :  { %17300 = vst [vmem:[#allocation62_spill] sm:$0xff] %v11298_v35  ;;  %v11301_v56 = vpop.f32.mrb[51].mxu1  ;;  %v11303_v26 = vpop.f32.mrb[115].mxu0  ;;  %v6269_v54 = vadd.f32 %v6268_v44, %v5735_v50  ;;  %v5736_v46 = vmul.f32 %v5096_v40, %v11172_v7  ;;  %v5105_v53 = vmul.f32 0.5, %v4465_v58  ;;  %v4466_v62 = vadd.f32 1.0, %v8723_v22  ;;  %7889 = vmatmul.mubr.msk.bf16.gmra.mrb[156].mxu1 %vm282_vm0, %v17301_v48  ;;  %7921 = vmatmul.mubr.msk.bf16.gmra.mrb[220].mxu0 %vm282_vm0, %v17301_v48 }
 0x233   :  { %v8725_v45 = vpop.eup %8724  ;;  %v6343_v31 = vadd.f32 %v6342_v12, %v5737_v28  ;;  %v5738_v35 = vmul.f32 %v5098_v27, %v11176_v14  ;;  %v5107_v6 = vmul.f32 0.5, %v4467_v25  ;;  %2108 = vmatprep.mubr.bf16.mxu1 %v17258_v13  ;;  %2461 = vmatprep.mubr.bf16.mxu0 %v17258_v13  ;;  %8728 = vtanh.f32 %v11230_v47 }
 0x234   :  { %v8727_v3 = vpop.eup %8726  ;;  %v4468_v34 = vadd.f32 1.0, %v8725_v45  ;;  %v6306_v37 = vadd.f32 %v6305_v0, %v5736_v46  ;;  %v5745_v63 = vmul.f32 %v5105_v53, %v11183_v59  ;;  %v5106_v44 = vmul.f32 0.5, %v4466_v62  ;;  %v11318_v0 = vpop.f32.mrb[52].mxu1 }
 0x235   :  { %v4475_v2 = vadd.f32 1.0, %v8727_v3  ;;  %v6380_v7 = vadd.f32 %v6379_v18, %v5738_v35  ;;  %v5747_v14 = vmul.f32 %v5107_v6, %v11187_v42  ;;  %8730 = vtanh.f32 %v11249_v36  ;;  %v11320_v59 = vpop.f32.mrb[116].mxu0  ;;  %v17302_v42 = vld [vmem:[#allocation47_spill] sm:$0xff]  ;;  %v11330_v47 = vpop.f32.mrb[53].mxu1  ;;  %v17303_v18 = vld [vmem:[#allocation48_spill] sm:$0xff] }
 0x236   :  { %v5108_v12 = vmul.f32 0.5, %v4468_v34  ;;  %v6270_v23 = vadd.f32 %v6269_v54, %v5745_v63  ;;  %v5746_v50 = vmul.f32 %v5106_v44, %v11199_v1  ;;  %8732 = vtanh.f32 %v11252_v17  ;;  %v11332_v1 = vpop.f32.mrb[117].mxu0  ;;  %v11345_v17 = vpop.f32.mrb[54].mxu1 }
 0x237   :  { %v5115_v40 = vmul.f32 0.5, %v4475_v2  ;;  %v11322_v58 = vadd.f32 %v6343_v31, %v5747_v14  ;;  %v11328_v6 = vadd.f32 %v17302_v42, %v10684_v8  ;;  %v11339_v28 = vadd.f32 %v17303_v18, %v10686_v61  ;;  %v11347_v27 = vpop.f32.mrb[118].mxu0  ;;  %v11360_v46 = vpop.f32.mrb[55].mxu1 }
 0x238   :  { %v5748_v22 = vmul.f32 %v5108_v12, %v11207_v10  ;;  %v11334_v35 = vadd.f32 %v6306_v37, %v5746_v50  ;;  %v11343_v10 = vadd.f32 %v11046_v43, %v10690_v11  ;;  %v11354_v54 = vadd.f32 %v11048_v52, %v10692_v32  ;;  %17304 = vst [vmem:[#allocation47_spill] sm:$0xff] %v11360_v46  ;;  %v11362_v43 = vpop.f32.mrb[119].mxu0  ;;  %v17306_v37 = vld [vmem:[#allocation15_spill] sm:$0xff] }
 0x239   :  { %v5755_v36 = vmul.f32 %v5115_v40, %v11211_v4  ;;  %v3205_v45 = vmul.f32 0.5, %v11328_v6  ;;  %v11358_v4 = vadd.f32 %v11061_v33, %v10684_v8  ;;  %17305 = vst [vmem:[#allocation48_spill] sm:$0xff] %v11362_v43  ;;  %v3207_v62 = vmul.f32 0.5, %v11339_v28 }
 0x23a   :  { %v11349_v25 = vadd.f32 %v6380_v7, %v5748_v22  ;;  %v3206_v3 = vmul.f32 0.5, %v11343_v10  ;;  %v11370_v31 = vadd.f32 %v11063_v39, %v10686_v61  ;;  %v3208_v52 = vmul.f32 0.5, %v11354_v54  ;;  %7890 = vmatmul.mubr.msk.bf16.gmra.mrb[160].mxu1 %vm282_vm0, %v17306_v37  ;;  %7922 = vmatmul.mubr.msk.bf16.gmra.mrb[224].mxu0 %vm282_vm0, %v17306_v37 }
 0x23b   :  { %v11364_v53 = vadd.f32 %v6270_v23, %v5755_v36  ;;  %8734 = vtanh.f32 %v3205_v45  ;;  %v3215_v33 = vmul.f32 0.5, %v11358_v4  ;;  %v11376_v34 = vadd.f32 %v11066_v5, %v10690_v11  ;;  %2118 = vmatprep.mubr.bf16.mxu1 %v17258_v13  ;;  %2471 = vmatprep.mubr.bf16.mxu0 %v17258_v13  ;;  %v11408_v12 = vpop.f32.mrb[56].mxu1  ;;  %v11410_v23 = vpop.f32.mrb[120].mxu0 }
 0x23c   :  { %8736 = vtanh.f32 %v3207_v62  ;;  %v3217_v63 = vmul.f32 0.5, %v11370_v31  ;;  %v11385_v39 = vadd.f32 %v11068_v41, %v10692_v32  ;;  %v11389_v44 = vadd.f32 %v11071_v20, %v10684_v8  ;;  %17307 = vst [vmem:[#allocation63_spill] sm:$0xff] %v11408_v12  ;;  %17308 = vst [vmem:[#allocation64_spill] sm:$0xff] %v11410_v23  ;;  %v11418_v22 = vpop.f32.mrb[57].mxu1  ;;  %v11420_v42 = vpop.f32.mrb[121].mxu0 }
 0x23d   :  { %8738 = vtanh.f32 %v3206_v3  ;;  %v3216_v5 = vmul.f32 0.5, %v11376_v34  ;;  %v11396_v2 = vadd.f32 %v11073_v60, %v10686_v61  ;;  %v11400_v7 = vadd.f32 %v11076_v29, %v10690_v11  ;;  %v8729_v50 = vpop.eup %8728  ;;  %17309 = vst [vmem:[#allocation65_spill] sm:$0xff] %v11418_v22  ;;  %17310 = vst [vmem:[#allocation66_spill] sm:$0xff] %v11420_v42  ;;  %v11427_v62 = vpop.f32.mrb[58].mxu1 }
 0x23e   :  { %8740 = vtanh.f32 %v3208_v52  ;;  %v3218_v41 = vmul.f32 0.5, %v11385_v39  ;;  %v3225_v20 = vmul.f32 0.5, %v11389_v44  ;;  %v11406_v14 = vadd.f32 %v11078_v38, %v10692_v32  ;;  %17311 = vst [vmem:[#allocation67_spill] sm:$0xff] %v11427_v62  ;;  %v11429_v3 = vpop.f32.mrb[122].mxu0 }
 0x23f   :  { %8742 = vtanh.f32 %v3215_v33  ;;  %v3227_v60 = vmul.f32 0.5, %v11396_v2  ;;  %v3226_v29 = vmul.f32 0.5, %v11400_v7  ;;  %v11416_v40 = vadd.f32 %v11109_v57, %v10684_v8  ;;  %v8731_v38 = vpop.eup %8730  ;;  %17312 = vst [vmem:[#allocation68_spill] sm:$0xff] %v11429_v3  ;;  %v17315_v3 = vld [vmem:[#allocation14_spill] sm:$0xff] }
 0x240   :  { %v4477_v36 = vadd.f32 1.0, %v8729_v50  ;;  %8744 = vtanh.f32 %v3217_v63  ;;  %v3228_v18 = vmul.f32 0.5, %v11406_v14  ;;  %v11425_v45 = vadd.f32 %v11111_v21, %v10686_v61  ;;  %v8733_v52 = vpop.eup %8732  ;;  %v11436_v63 = vpop.f32.mrb[59].mxu1 }
 0x241   :  { %v4476_v57 = vadd.f32 1.0, %v8731_v38  ;;  %8746 = vtanh.f32 %v3216_v5  ;;  %v3235_v33 = vmul.f32 0.5, %v11416_v40  ;;  %v11434_v37 = vadd.f32 %v11121_v55, %v10690_v11  ;;  %17313 = vst [vmem:[#allocation69_spill] sm:$0xff] %v11436_v63  ;;  %v11438_v50 = vpop.f32.mrb[123].mxu0  ;;  %v17316_v55 = vld [vmem:[#allocation54_spill] sm:$0xff] }
 0x242   :  { %17314 = vst [vmem:[#allocation70_spill] sm:$0xff] %v11438_v50  ;;  %v5117_v48 = vmul.f32 0.5, %v4477_v36  ;;  %v4478_v21 = vadd.f32 1.0, %v8733_v52  ;;  %8748 = vtanh.f32 %v3218_v41  ;;  %v3237_v62 = vmul.f32 0.5, %v11425_v45  ;;  %7891 = vmatmul.mubr.msk.bf16.gmra.mrb[164].mxu1 %vm282_vm0, %v17315_v3  ;;  %7923 = vmatmul.mubr.msk.bf16.gmra.mrb[228].mxu0 %vm282_vm0, %v17315_v3  ;;  %v17317_v41 = vld [vmem:[#allocation49_spill] sm:$0xff]  ;;  %v17319_v3 = vld [vmem:[#allocation50_spill] sm:$0xff] }
 0x243   :  { %v5116_v42 = vmul.f32 0.5, %v4476_v57  ;;  %8750 = vtanh.f32 %v3225_v20  ;;  %v3236_v38 = vmul.f32 0.5, %v11434_v37  ;;  %v11444_v5 = vadd.f32 %v11123_v30, %v10692_v32  ;;  %2128 = vmatprep.mubr.bf16.mxu1 %v17258_v13  ;;  %2481 = vmatprep.mubr.bf16.mxu0 %v17258_v13  ;;  %v17318_v20 = vld [vmem:[#allocation42_spill] sm:$0xff]  ;;  %v11465_v23 = vpop.f32.mrb[60].mxu1  ;;  %v11467_v12 = vpop.f32.mrb[124].mxu0 }
 0x244   :  { %v5757_v36 = vmul.f32 %v5117_v48, %v17316_v55  ;;  %v5118_v52 = vmul.f32 0.5, %v4478_v21  ;;  %8752 = vtanh.f32 %v3227_v60  ;;  %v11453_v57 = vadd.f32 %v17317_v41, %v10684_v8  ;;  %v17320_v21 = vld [vmem:[#allocation45_spill] sm:$0xff]  ;;  %17321 = vst [vmem:[#allocation54_spill] sm:$0xff] %v11467_v12  ;;  %v11473_v46 = vpop.f32.mrb[125].mxu0 }
 0x245   :  { %v8735_v30 = vpop.eup %8734  ;;  %v5756_v50 = vmul.f32 %v5116_v42, %v17318_v20  ;;  %8754 = vtanh.f32 %v3226_v29  ;;  %v3238_v63 = vmul.f32 0.5, %v11444_v5  ;;  %v11461_v22 = vadd.f32 %v17319_v3, %v10686_v61  ;;  %v11471_v3 = vpop.f32.mrb[61].mxu1  ;;  %17323 = vst [vmem:[#allocation42_spill] sm:$0xff] %v11473_v46 }
 0x246   :  { %v8737_v48 = vpop.eup %8736  ;;  %v6345_v60 = vadd.f32 %v11322_v58, %v5757_v36  ;;  %v5758_v55 = vmul.f32 %v5118_v52, %v17320_v21  ;;  %v4485_v41 = vadd.f32 1.0, %v8735_v30  ;;  %8756 = vtanh.f32 %v3228_v18  ;;  %17322 = vst [vmem:[#allocation49_spill] sm:$0xff] %v11471_v3  ;;  %v11476_v30 = vpop.f32.mrb[62].mxu1 }
 0x247   :  { %v8739_v43 = vpop.eup %8738  ;;  %v6308_v29 = vadd.f32 %v11334_v35, %v5756_v50  ;;  %v4487_v42 = vadd.f32 1.0, %v8737_v48  ;;  %8758 = vtanh.f32 %v3235_v33  ;;  %v3245_v20 = vmul.f32 0.5, %v11453_v57  ;;  %17324 = vst [vmem:[#allocation50_spill] sm:$0xff] %v11476_v30  ;;  %v11478_v21 = vpop.f32.mrb[126].mxu0 }
 0x248   :  { %v8741_v58 = vpop.eup %8740  ;;  %v6382_v36 = vadd.f32 %v11349_v25, %v5758_v55  ;;  %v5125_v52 = vmul.f32 0.5, %v4485_v41  ;;  %v4486_v18 = vadd.f32 1.0, %v8739_v43  ;;  %8760 = vtanh.f32 %v3237_v62  ;;  %17325 = vst [vmem:[#allocation45_spill] sm:$0xff] %v11478_v21  ;;  %v11483_v48 = vpop.f32.mrb[63].mxu1 }
 0x249   :  { %v8743_v12 = vpop.eup %8742  ;;  %v5127_v35 = vmul.f32 0.5, %v4487_v42  ;;  %v4488_v50 = vadd.f32 1.0, %v8741_v58  ;;  %8762 = vtanh.f32 %v3236_v38  ;;  %v11481_v33 = vmul.f32 0.5, %v11461_v22  ;;  %17326 = vst [vmem:[#allocation71_spill] sm:$0xff] %v11483_v48  ;;  %v11485_v46 = vpop.f32.mrb[127].mxu0  ;;  %v17328_v38 = vld [vmem:[#allocation17_spill] sm:$0xff] }
 0x24a   :  { %17327 = vst [vmem:[#allocation72_spill] sm:$0xff] %v11485_v46  ;;  %v8745_v3 = vpop.eup %8744  ;;  %v5765_v25 = vmul.f32 %v5125_v52, %v11328_v6  ;;  %v5126_v43 = vmul.f32 0.5, %v4486_v18  ;;  %v4495_v62 = vadd.f32 1.0, %v8743_v12  ;;  %8764 = vtanh.f32 %v3238_v63  ;;  %7892 = vmatmul.mubr.msk.bf16.gmra.mrb[168].mxu1 %vm282_vm0, %v17328_v38  ;;  %7924 = vmatmul.mubr.msk.bf16.gmra.mrb[232].mxu0 %vm282_vm0, %v17328_v38 }
 0x24b   :  { %v8747_v55 = vpop.eup %8746  ;;  %v5767_v41 = vmul.f32 %v5127_v35, %v11339_v28  ;;  %v5128_v21 = vmul.f32 0.5, %v4488_v50  ;;  %v4497_v42 = vadd.f32 1.0, %v8745_v3  ;;  %8766 = vtanh.f32 %v3245_v20  ;;  %2138 = vmatprep.mubr.bf16.mxu1 %v17258_v13  ;;  %2491 = vmatprep.mubr.bf16.mxu0 %v17258_v13 }
 0x24c   :  { %v8749_v58 = vpop.eup %8748  ;;  %v6272_v46 = vadd.f32 %v11364_v53, %v5765_v25  ;;  %v5766_v6 = vmul.f32 %v5126_v43, %v11343_v10  ;;  %v5135_v52 = vmul.f32 0.5, %v4495_v62  ;;  %v4496_v12 = vadd.f32 1.0, %v8747_v55  ;;  %v11499_v25 = vpop.f32.mrb[64].mxu1 }
 0x24d   :  { %v8751_v28 = vpop.eup %8750  ;;  %v6346_v63 = vadd.f32 %v6345_v60, %v5767_v41  ;;  %v5768_v20 = vmul.f32 %v5128_v21, %v11354_v54  ;;  %v5137_v3 = vmul.f32 0.5, %v4497_v42  ;;  %v4498_v18 = vadd.f32 1.0, %v8749_v58  ;;  %v11501_v10 = vpop.f32.mrb[128].mxu0 }
 0x24e   :  { %v8753_v35 = vpop.eup %8752  ;;  %v6309_v50 = vadd.f32 %v6308_v29, %v5766_v6  ;;  %v5775_v38 = vmul.f32 %v5135_v52, %v11358_v4  ;;  %v5136_v48 = vmul.f32 0.5, %v4496_v12  ;;  %v4505_v53 = vadd.f32 1.0, %v8751_v28  ;;  %v11504_v41 = vpop.f32.mrb[65].mxu1 }
 0x24f   :  { %v8755_v43 = vpop.eup %8754  ;;  %v6383_v62 = vadd.f32 %v6382_v36, %v5768_v20  ;;  %v5777_v55 = vmul.f32 %v5137_v3, %v11370_v31  ;;  %v5138_v30 = vmul.f32 0.5, %v4498_v18  ;;  %v4507_v60 = vadd.f32 1.0, %v8753_v35  ;;  %17329 = vst [vmem:[#allocation73_spill] sm:$0xff] %v11504_v41  ;;  %v11506_v54 = vpop.f32.mrb[129].mxu0 }
 0x250   :  { %17330 = vst [vmem:[#allocation74_spill] sm:$0xff] %v11506_v54  ;;  %v8757_v21 = vpop.eup %8756  ;;  %v6273_v29 = vadd.f32 %v6272_v46, %v5775_v38  ;;  %v5776_v4 = vmul.f32 %v5136_v48, %v11376_v34  ;;  %v5145_v42 = vmul.f32 0.5, %v4505_v53  ;;  %v4506_v58 = vadd.f32 1.0, %v8755_v43  ;;  %v11509_v6 = vpop.f32.mrb[66].mxu1 }
 0x251   :  { %17331 = vst [vmem:[#allocation75_spill] sm:$0xff] %v11509_v6  ;;  %v11511_v52 = vpop.f32.mrb[130].mxu0  ;;  %v8759_v12 = vpop.eup %8758  ;;  %v6347_v36 = vadd.f32 %v6346_v63, %v5777_v55  ;;  %v5778_v31 = vmul.f32 %v5138_v30, %v11385_v39  ;;  %v5147_v28 = vmul.f32 0.5, %v4507_v60  ;;  %v4508_v20 = vadd.f32 1.0, %v8757_v21  ;;  %v17335_v55 = vld [vmem:[#allocation16_spill] sm:$0xff] }
 0x252   :  { %17332 = vst [vmem:[#allocation76_spill] sm:$0xff] %v11511_v52  ;;  %v11514_v3 = vpop.f32.mrb[67].mxu1  ;;  %v11516_v18 = vpop.f32.mrb[131].mxu0  ;;  %v6310_v46 = vadd.f32 %v6309_v50, %v5776_v4  ;;  %v5785_v34 = vmul.f32 %v5145_v42, %v11389_v44  ;;  %v5146_v48 = vmul.f32 0.5, %v4506_v58  ;;  %v4515_v38 = vadd.f32 1.0, %v8759_v12  ;;  %7893 = vmatmul.mubr.msk.bf16.gmra.mrb[172].mxu1 %vm282_vm0, %v17335_v55  ;;  %7925 = vmatmul.mubr.msk.bf16.gmra.mrb[236].mxu0 %vm282_vm0, %v17335_v55  ;;  %v17360_v55 = vld [vmem:[#allocation57_spill] sm:$0xff] }
 0x253   :  { %17333 = vst [vmem:[#allocation77_spill] sm:$0xff] %v11514_v3  ;;  %17334 = vst [vmem:[#allocation78_spill] sm:$0xff] %v11516_v18  ;;  %v8761_v35 = vpop.eup %8760  ;;  %v6384_v43 = vadd.f32 %v6383_v62, %v5778_v31  ;;  %v5787_v52 = vmul.f32 %v5147_v28, %v11396_v2  ;;  %v5148_v6 = vmul.f32 0.5, %v4508_v20  ;;  %2148 = vmatprep.mubr.bf16.mxu1 %v17258_v13  ;;  %2501 = vmatprep.mubr.bf16.mxu0 %v17258_v13 }
 0x254   :  { %v8763_v53 = vpop.eup %8762  ;;  %v4517_v63 = vadd.f32 1.0, %v8761_v35  ;;  %v6274_v30 = vadd.f32 %v6273_v29, %v5785_v34  ;;  %v5786_v50 = vmul.f32 %v5146_v48, %v11400_v7  ;;  %v5155_v60 = vmul.f32 0.5, %v4515_v38  ;;  %v11529_v29 = vpop.f32.mrb[68].mxu1 }
 0x255   :  { %v8765_v39 = vpop.eup %8764  ;;  %v4516_v44 = vadd.f32 1.0, %v8763_v53  ;;  %v6348_v2 = vadd.f32 %v6347_v36, %v5787_v52  ;;  %v5788_v21 = vmul.f32 %v5148_v6, %v11406_v14  ;;  %17336 = vst [vmem:[#allocation79_spill] sm:$0xff] %v11529_v29  ;;  %v11531_v7 = vpop.f32.mrb[132].mxu0  ;;  %8768 = vtanh.f32 %v11481_v33 }
 0x256   :  { %v8767_v62 = vpop.eup %8766  ;;  %v5157_v4 = vmul.f32 0.5, %v4517_v63  ;;  %v4518_v42 = vadd.f32 1.0, %v8765_v39  ;;  %v6311_v58 = vadd.f32 %v6310_v46, %v5786_v50  ;;  %v5795_v12 = vmul.f32 %v5155_v60, %v11416_v40  ;;  %17337 = vst [vmem:[#allocation80_spill] sm:$0xff] %v11531_v7  ;;  %v11535_v52 = vpop.f32.mrb[69].mxu1  ;;  %v17340_v46 = vld [vmem:[#allocation51_spill] sm:$0xff] }
 0x257   :  { %v5156_v31 = vmul.f32 0.5, %v4516_v44  ;;  %v4525_v28 = vadd.f32 1.0, %v8767_v62  ;;  %v6385_v20 = vadd.f32 %v6384_v43, %v5788_v21  ;;  %17338 = vst [vmem:[#allocation81_spill] sm:$0xff] %v11535_v52  ;;  %v11537_v14 = vpop.f32.mrb[133].mxu0  ;;  %v11542_v48 = vadd.f32 %v17340_v46, %v10690_v11  ;;  %v11544_v38 = vpop.f32.mrb[70].mxu1  ;;  %v17343_v43 = vld [vmem:[#allocation52_spill] sm:$0xff] }
 0x258   :  { %v5797_v35 = vmul.f32 %v5157_v4, %v11425_v45  ;;  %v5158_v34 = vmul.f32 0.5, %v4518_v42  ;;  %17339 = vst [vmem:[#allocation82_spill] sm:$0xff] %v11537_v14  ;;  %v6275_v6 = vadd.f32 %v6274_v30, %v5795_v12  ;;  %17341 = vst [vmem:[#allocation51_spill] sm:$0xff] %v11544_v38  ;;  %v11546_v53 = vpop.f32.mrb[134].mxu0  ;;  %v11553_v63 = vadd.f32 %v17343_v43, %v10692_v32  ;;  %v17344_v39 = vld [vmem:[#allocation39_spill] sm:$0xff]  ;;  %v11559_v30 = vpop.f32.mrb[71].mxu1 }
 0x259   :  { %v5796_v36 = vmul.f32 %v5156_v31, %v11434_v37  ;;  %v5165_v40 = vmul.f32 0.5, %v4525_v28  ;;  %17342 = vst [vmem:[#allocation83_spill] sm:$0xff] %v11546_v53  ;;  %v11557_v37 = vadd.f32 %v17344_v39, %v10684_v8  ;;  %17345 = vst [vmem:[#allocation52_spill] sm:$0xff] %v11559_v30  ;;  %v11561_v50 = vpop.f32.mrb[135].mxu0  ;;  %v3246_v62 = vmul.f32 0.5, %v11542_v48  ;;  %v17348_v12 = vld [vmem:[#allocation41_spill] sm:$0xff] }
 0x25a   :  { %v11548_v45 = vadd.f32 %v6348_v2, %v5797_v35  ;;  %v5798_v33 = vmul.f32 %v5158_v34, %v11444_v5  ;;  %17346 = vst [vmem:[#allocation39_spill] sm:$0xff] %v11561_v50  ;;  %v17347_v5 = vld [vmem:[#allocation40_spill] sm:$0xff]  ;;  %v3248_v4 = vmul.f32 0.5, %v11553_v63  ;;  %v11577_v31 = vadd.f32 %v17348_v12, %v10690_v11  ;;  %v17353_v43 = vld [vmem:[#allocation55_spill] sm:$0xff] }
 0x25b   :  { %v11563_v60 = vadd.f32 %v6311_v58, %v5796_v36  ;;  %v5805_v44 = vmul.f32 %v5165_v40, %v11453_v57  ;;  %v11569_v2 = vadd.f32 %v17347_v5, %v10686_v61  ;;  %v3255_v42 = vmul.f32 0.5, %v11557_v37  ;;  %v17349_v58 = vld [vmem:[#allocation19_spill] sm:$0xff]  ;;  %v17351_v36 = vld [vmem:[#allocation44_spill] sm:$0xff]  ;;  %v11610_v5 = vpop.f32.mrb[72].mxu1 }
 0x25c   :  { %v11571_v21 = vadd.f32 %v6385_v20, %v5798_v33  ;;  %7894 = vmatmul.mubr.msk.bf16.gmra.mrb[176].mxu1 %vm282_vm0, %v17349_v58  ;;  %7926 = vmatmul.mubr.msk.bf16.gmra.mrb[240].mxu0 %vm282_vm0, %v17349_v58  ;;  %8770 = vtanh.f32 %v3246_v62  ;;  %v17350_v20 = vld [vmem:[#allocation43_spill] sm:$0xff]  ;;  %v3256_v34 = vmul.f32 0.5, %v11577_v31  ;;  %v11595_v40 = vadd.f32 %v17351_v36, %v10684_v8  ;;  %17355 = vst [vmem:[#allocation40_spill] sm:$0xff] %v11610_v5 }
 0x25d   :  { %v11583_v57 = vadd.f32 %v6275_v6, %v5805_v44  ;;  %v3257_v28 = vmul.f32 0.5, %v11569_v2  ;;  %v11588_v35 = vadd.f32 %v17350_v20, %v10692_v32  ;;  %2158 = vmatprep.mubr.bf16.mxu1 %v17258_v13  ;;  %2511 = vmatprep.mubr.bf16.mxu0 %v17258_v13  ;;  %8772 = vtanh.f32 %v3248_v4  ;;  %v17352_v6 = vld [vmem:[#allocation53_spill] sm:$0xff]  ;;  %v17354_v44 = vld [vmem:[#allocation56_spill] sm:$0xff]  ;;  %v11612_v4 = vpop.f32.mrb[136].mxu0 }
 0x25e   :  { %v11599_v46 = vadd.f32 %v17352_v6, %v10686_v61  ;;  %8774 = vtanh.f32 %v3255_v42  ;;  %v11604_v39 = vadd.f32 %v17353_v43, %v10690_v11  ;;  %v11608_v62 = vadd.f32 %v17354_v44, %v10692_v32  ;;  %17356 = vst [vmem:[#allocation41_spill] sm:$0xff] %v11612_v4  ;;  %v17357_v42 = vld [vmem:[#allocation46_spill] sm:$0xff]  ;;  %v11620_v6 = vpop.f32.mrb[73].mxu1  ;;  %v11622_v43 = vpop.f32.mrb[137].mxu0 }
 0x25f   :  { %v3258_v33 = vmul.f32 0.5, %v11588_v35  ;;  %8776 = vtanh.f32 %v3257_v28  ;;  %v3265_v12 = vmul.f32 0.5, %v11595_v40  ;;  %v11618_v36 = vadd.f32 %v17357_v42, %v10684_v8  ;;  %17358 = vst [vmem:[#allocation43_spill] sm:$0xff] %v11620_v6  ;;  %17359 = vst [vmem:[#allocation44_spill] sm:$0xff] %v11622_v43  ;;  %v11630_v4 = vpop.f32.mrb[74].mxu1  ;;  %v11632_v5 = vpop.f32.mrb[138].mxu0 }
 0x260   :  { %v3267_v20 = vmul.f32 0.5, %v11599_v46  ;;  %8778 = vtanh.f32 %v3256_v34  ;;  %v3266_v44 = vmul.f32 0.5, %v11604_v39  ;;  %v3268_v58 = vmul.f32 0.5, %v11608_v62  ;;  %17361 = vst [vmem:[#allocation53_spill] sm:$0xff] %v11630_v4  ;;  %17362 = vst [vmem:[#allocation55_spill] sm:$0xff] %v11632_v5  ;;  %v8769_v50 = vpop.eup %8768  ;;  %v17363_v34 = vld [vmem:[#allocation58_spill] sm:$0xff] }
 0x261   :  { %v11628_v28 = vadd.f32 %v17360_v55, %v10686_v61  ;;  %8780 = vtanh.f32 %v3258_v33  ;;  %v3275_v42 = vmul.f32 0.5, %v11618_v36  ;;  %v11637_v43 = vadd.f32 %v11259_v51, %v10690_v11  ;;  %v11643_v30 = vpop.f32.mrb[75].mxu1  ;;  %v11645_v55 = vpop.f32.mrb[139].mxu0  ;;  %v17366_v33 = vld [vmem:[#allocation59_spill] sm:$0xff] }
 0x262   :  { %v11641_v6 = vadd.f32 %v17363_v34, %v10692_v32  ;;  %17364 = vst [vmem:[#allocation56_spill] sm:$0xff] %v11643_v30  ;;  %17365 = vst [vmem:[#allocation46_spill] sm:$0xff] %v11645_v55  ;;  %v4527_v53 = vadd.f32 1.0, %v8769_v50  ;;  %8782 = vtanh.f32 %v3265_v12  ;;  %v11650_v4 = vadd.f32 %v17366_v33, %v10684_v8  ;;  %v17367_v34 = vld [vmem:[#allocation60_spill] sm:$0xff]  ;;  %v17368_v30 = vld [vmem:[#allocation18_spill] sm:$0xff] }
 0x263   :  { %v3277_v5 = vmul.f32 0.5, %v11628_v28  ;;  %8784 = vtanh.f32 %v3267_v20  ;;  %v3276_v51 = vmul.f32 0.5, %v11637_v43  ;;  %v11656_v14 = vadd.f32 %v17367_v34, %v10686_v61  ;;  %v11686_v52 = vpop.f32.mrb[140].mxu0 }
 0x264   :  { %v3278_v38 = vmul.f32 0.5, %v11641_v6  ;;  %7895 = vmatmul.mubr.msk.bf16.gmra.mrb[180].mxu1 %vm282_vm0, %v17368_v30  ;;  %7927 = vmatmul.mubr.msk.bf16.gmra.mrb[244].mxu0 %vm282_vm0, %v17368_v30  ;;  %v5167_v50 = vmul.f32 0.5, %v4527_v53  ;;  %8786 = vtanh.f32 %v3266_v44  ;;  %v3285_v12 = vmul.f32 0.5, %v11650_v4  ;;  %17370 = vst [vmem:[#allocation58_spill] sm:$0xff] %v11686_v52 }
 0x265   :  { %v11665_v20 = vadd.f32 %v11269_v19, %v10690_v11  ;;  %2168 = vmatprep.mubr.bf16.mxu1 %v17258_v13  ;;  %2521 = vmatprep.mubr.bf16.mxu0 %v17258_v13  ;;  %8788 = vtanh.f32 %v3268_v58  ;;  %v3287_v33 = vmul.f32 0.5, %v11656_v14  ;;  %v11672_v34 = vadd.f32 %v11271_v49, %v10692_v32  ;;  %v11684_v58 = vpop.f32.mrb[76].mxu1 }
 0x266   :  { %v11676_v53 = vadd.f32 %v11286_v9, %v10684_v8  ;;  %v8771_v44 = vpop.eup %8770  ;;  %v5807_v30 = vmul.f32 %v5167_v50, %v11461_v22  ;;  %8790 = vtanh.f32 %v3275_v42  ;;  %v11682_v55 = vadd.f32 %v11288_v15, %v10686_v61  ;;  %17369 = vst [vmem:[#allocation57_spill] sm:$0xff] %v11684_v58  ;;  %v11694_v22 = vpop.f32.mrb[77].mxu1 }
 0x267   :  { %v3286_v19 = vmul.f32 0.5, %v11665_v20  ;;  %v8773_v49 = vpop.eup %8772  ;;  %v4526_v7 = vadd.f32 1.0, %v8771_v44  ;;  %8792 = vtanh.f32 %v3277_v5  ;;  %v11689_v9 = vmul.f32 0.5, %v11672_v34  ;;  %17371 = vst [vmem:[#allocation59_spill] sm:$0xff] %v11694_v22  ;;  %v11696_v42 = vpop.f32.mrb[141].mxu0 }
 0x268   :  { %v11692_v29 = vmul.f32 0.5, %v11676_v53  ;;  %17372 = vst [vmem:[#allocation60_spill] sm:$0xff] %v11696_v42  ;;  %v8775_v50 = vpop.eup %8774  ;;  %v6350_v15 = vadd.f32 %v11548_v45, %v5807_v30  ;;  %v4528_v18 = vadd.f32 1.0, %v8773_v49  ;;  %8794 = vtanh.f32 %v3276_v51  ;;  %v11702_v44 = vpop.f32.mrb[78].mxu1 }
 0x269   :  { %v11700_v52 = vmul.f32 0.5, %v11682_v55  ;;  %17373 = vst [vmem:[#allocation84_spill] sm:$0xff] %v11702_v44  ;;  %v11704_v5 = vpop.f32.mrb[142].mxu0  ;;  %v8777_v58 = vpop.eup %8776  ;;  %v5166_v3 = vmul.f32 0.5, %v4526_v7  ;;  %v4535_v54 = vadd.f32 1.0, %v8775_v50  ;;  %8796 = vtanh.f32 %v3278_v38 }
 0x26a   :  { %17374 = vst [vmem:[#allocation85_spill] sm:$0xff] %v11704_v5  ;;  %v11708_v22 = vadd.f32 %v11291_v16, %v10690_v11  ;;  %v11710_v42 = vpop.f32.mrb[79].mxu1  ;;  %v11712_v45 = vpop.f32.mrb[143].mxu0  ;;  %v5168_v51 = vmul.f32 0.5, %v4528_v18  ;;  %v4537_v49 = vadd.f32 1.0, %v8777_v58  ;;  %8798 = vtanh.f32 %v3285_v12  ;;  %v17377_v16 = vld [vmem:[#allocation21_spill] sm:$0xff] }
 0x26b   :  { %17375 = vst [vmem:[#allocation86_spill] sm:$0xff] %v11710_v42  ;;  %17376 = vst [vmem:[#allocation87_spill] sm:$0xff] %v11712_v45  ;;  %v8779_v30 = vpop.eup %8778  ;;  %v11716_v44 = vadd.f32 %v11293_v24, %v10692_v32  ;;  %v5806_v7 = vmul.f32 %v5166_v3, %v11542_v48  ;;  %v5175_v38 = vmul.f32 0.5, %v4535_v54  ;;  %8800 = vtanh.f32 %v3287_v33 }
 0x26c   :  { %v8781_v5 = vpop.eup %8780  ;;  %v4536_v50 = vadd.f32 1.0, %v8779_v30  ;;  %7896 = vmatmul.mubr.msk.bf16.gmra.mrb[184].mxu1 %vm282_vm0, %v17377_v16  ;;  %7928 = vmatmul.mubr.msk.bf16.gmra.mrb[248].mxu0 %vm282_vm0, %v17377_v16  ;;  %v5808_v18 = vmul.f32 %v5168_v51, %v11553_v63  ;;  %v5177_v12 = vmul.f32 0.5, %v4537_v49  ;;  %8802 = vtanh.f32 %v3286_v19  ;;  %v11732_v19 = vpop.f32.mrb[144].mxu0 }
 0x26d   :  { %v8783_v45 = vpop.eup %8782  ;;  %v4538_v58 = vadd.f32 1.0, %v8781_v5  ;;  %2178 = vmatprep.mubr.bf16.mxu1 %v17258_v13  ;;  %2531 = vmatprep.mubr.bf16.mxu0 %v17258_v13  ;;  %v6313_v54 = vadd.f32 %v11563_v60, %v5806_v7  ;;  %v5815_v3 = vmul.f32 %v5175_v38, %v11557_v37  ;;  %v11730_v5 = vpop.f32.mrb[80].mxu1  ;;  %17378 = vst [vmem:[#allocation88_spill] sm:$0xff] %v11732_v19  ;;  %8804 = vtanh.f32 %v11689_v9 }
 0x26e   :  { %v8785_v24 = vpop.eup %8784  ;;  %v5176_v48 = vmul.f32 0.5, %v4536_v50  ;;  %v4545_v33 = vadd.f32 1.0, %v8783_v45  ;;  %v6387_v16 = vadd.f32 %v11571_v21, %v5808_v18  ;;  %v5817_v42 = vmul.f32 %v5177_v12, %v11569_v2  ;;  %v11736_v38 = vpop.f32.mrb[81].mxu1 }
 0x26f   :  { %v8787_v30 = vpop.eup %8786  ;;  %v5178_v63 = vmul.f32 0.5, %v4538_v58  ;;  %v4547_v51 = vadd.f32 1.0, %v8785_v24  ;;  %v6277_v41 = vadd.f32 %v11583_v57, %v5815_v3  ;;  %17379 = vst [vmem:[#allocation89_spill] sm:$0xff] %v11736_v38  ;;  %v11738_v45 = vpop.f32.mrb[145].mxu0  ;;  %8806 = vtanh.f32 %v11692_v29 }
 0x270   :  { %v8789_v49 = vpop.eup %8788  ;;  %v5816_v60 = vmul.f32 %v5176_v48, %v11577_v31  ;;  %v5185_v7 = vmul.f32 0.5, %v4545_v33  ;;  %v4546_v37 = vadd.f32 1.0, %v8787_v30  ;;  %17380 = vst [vmem:[#allocation90_spill] sm:$0xff] %v11738_v45  ;;  %v6351_v50 = vadd.f32 %v6350_v15, %v5817_v42  ;;  %v11741_v58 = vpop.f32.mrb[82].mxu1 }
 0x271   :  { %v8791_v21 = vpop.eup %8790  ;;  %v5818_v2 = vmul.f32 %v5178_v63, %v11588_v35  ;;  %v5187_v18 = vmul.f32 0.5, %v4547_v51  ;;  %v4548_v12 = vadd.f32 1.0, %v8789_v49  ;;  %v11743_v24 = vpop.f32.mrb[146].mxu0  ;;  %8808 = vtanh.f32 %v11700_v52 }
 0x272   :  { %17381 = vst [vmem:[#allocation91_spill] sm:$0xff] %v11743_v24  ;;  %v8793_v19 = vpop.eup %8792  ;;  %v6314_v57 = vadd.f32 %v6313_v54, %v5816_v60  ;;  %v5825_v31 = vmul.f32 %v5185_v7, %v11595_v40  ;;  %v5186_v3 = vmul.f32 0.5, %v4546_v37  ;;  %v4555_v48 = vadd.f32 1.0, %v8791_v21  ;;  %v11747_v15 = vpop.f32.mrb[83].mxu1  ;;  %v17382_v60 = vld [vmem:[#allocation20_spill] sm:$0xff] }
 0x273   :  { %v8795_v33 = vpop.eup %8794  ;;  %v6388_v30 = vadd.f32 %v6387_v16, %v5818_v2  ;;  %v5827_v45 = vmul.f32 %v5187_v18, %v11599_v46  ;;  %v5188_v38 = vmul.f32 0.5, %v4548_v12  ;;  %v4557_v42 = vadd.f32 1.0, %v8793_v19  ;;  %v11749_v35 = vpop.f32.mrb[147].mxu0 }
 0x274   :  { %v8797_v63 = vpop.eup %8796  ;;  %v6278_v51 = vadd.f32 %v6277_v41, %v5825_v31  ;;  %v5826_v49 = vmul.f32 %v5186_v3, %v11604_v39  ;;  %v5195_v24 = vmul.f32 0.5, %v4555_v48  ;;  %v4556_v54 = vadd.f32 1.0, %v8795_v33  ;;  %7897 = vmatmul.mubr.msk.bf16.gmra.mrb[188].mxu1 %vm282_vm0, %v17382_v60  ;;  %7929 = vmatmul.mubr.msk.bf16.gmra.mrb[252].mxu0 %vm282_vm0, %v17382_v60 }
 0x275   :  { %v8799_v40 = vpop.eup %8798  ;;  %v6352_v46 = vadd.f32 %v6351_v50, %v5827_v45  ;;  %v5828_v16 = vmul.f32 %v5188_v38, %v11608_v62  ;;  %v5197_v19 = vmul.f32 0.5, %v4557_v42  ;;  %v4558_v7 = vadd.f32 1.0, %v8797_v63  ;;  %2188 = vmatprep.mubr.bf16.mxu1 %v17258_v13  ;;  %2541 = vmatprep.mubr.bf16.mxu0 %v17258_v13 }
 0x276   :  { %v8801_v41 = vpop.eup %8800  ;;  %v6315_v39 = vadd.f32 %v6314_v57, %v5826_v49  ;;  %v5835_v37 = vmul.f32 %v5195_v24, %v11618_v36  ;;  %v5196_v21 = vmul.f32 0.5, %v4556_v54  ;;  %v4565_v2 = vadd.f32 1.0, %v8799_v40  ;;  %v17383_v40 = vld [vmem:[#allocation61_spill] sm:$0xff] }
 0x277   :  { %v8803_v18 = vpop.eup %8802  ;;  %v6389_v12 = vadd.f32 %v6388_v30, %v5828_v16  ;;  %v5837_v31 = vmul.f32 %v5197_v19, %v11628_v28  ;;  %v5198_v3 = vmul.f32 0.5, %v4558_v7  ;;  %v4567_v45 = vadd.f32 1.0, %v8801_v41  ;;  %v11766_v28 = vpop.f32.mrb[84].mxu1  ;;  %v17384_v16 = vld [vmem:[#allocation23_spill] sm:$0xff] }
 0x278   :  { %v6279_v50 = vadd.f32 %v6278_v51, %v5835_v37  ;;  %v5836_v62 = vmul.f32 %v5196_v21, %v11637_v43  ;;  %v5205_v38 = vmul.f32 0.5, %v4565_v2  ;;  %v4566_v48 = vadd.f32 1.0, %v8803_v18  ;;  %v11768_v30 = vpop.f32.mrb[148].mxu0  ;;  %v11775_v49 = vpop.f32.mrb[85].mxu1 }
 0x279   :  { %v6353_v33 = vadd.f32 %v6352_v46, %v5837_v31  ;;  %v5838_v42 = vmul.f32 %v5198_v3, %v11641_v6  ;;  %v5207_v63 = vmul.f32 0.5, %v4567_v45  ;;  %v3296_v6 = vmul.f32 0.5, %v11708_v22  ;;  %v11777_v9 = vpop.f32.mrb[149].mxu0  ;;  %v11801_v7 = vpop.f32.mrb[86].mxu1 }
 0x27a   :  { %v6316_v36 = vadd.f32 %v6315_v39, %v5836_v62  ;;  %v5845_v24 = vmul.f32 %v5205_v38, %v11650_v4  ;;  %v5206_v57 = vmul.f32 0.5, %v4566_v48  ;;  %v3298_v54 = vmul.f32 0.5, %v11716_v44  ;;  %v11803_v41 = vpop.f32.mrb[150].mxu0  ;;  %v8805_v38 = vpop.eup %8804 }
 0x27b   :  { %v11770_v51 = vadd.f32 %v6389_v12, %v5838_v42  ;;  %v5847_v43 = vmul.f32 %v5207_v63, %v11656_v14  ;;  %v11785_v46 = vadd.f32 %v17383_v40, %v10684_v8  ;;  %8810 = vtanh.f32 %v3296_v6  ;;  %v17385_v14 = vld [vmem:[#allocation62_spill] sm:$0xff] }
 0x27c   :  { %v11779_v4 = vadd.f32 %v6279_v50, %v5845_v24  ;;  %v5846_v29 = vmul.f32 %v5206_v57, %v11665_v20  ;;  %7898 = vmatmul.mubr.msk.bf16.gmra.mrb[192].mxu1 %vm282_vm0, %v17384_v16  ;;  %7930 = vmatmul.mubr.msk.bf16.gmra.mrb[0].mxu0 %vm282_vm0, %v17384_v16  ;;  %v11795_v19 = vadd.f32 %v17385_v14, %v10686_v61  ;;  %8812 = vtanh.f32 %v3298_v54  ;;  %v17389_v57 = vld [vmem:[#allocation63_spill] sm:$0xff]  ;;  %v17390_v6 = vld [vmem:[#allocation22_spill] sm:$0xff] }
 0x27d   :  { %v11791_v52 = vadd.f32 %v6353_v33, %v5847_v43  ;;  %v11799_v20 = vadd.f32 %v11301_v56, %v10690_v11  ;;  %2198 = vmatprep.mubr.bf16.mxu1 %v17258_v13  ;;  %2551 = vmatprep.mubr.bf16.mxu0 %v17258_v13  ;;  %v3305_v37 = vmul.f32 0.5, %v11785_v46  ;;  %v11812_v21 = vadd.f32 %v11303_v26, %v10692_v32  ;;  %v17387_v33 = vld [vmem:[#allocation47_spill] sm:$0xff] }
 0x27e   :  { %v11807_v39 = vadd.f32 %v6316_v36, %v5846_v29  ;;  %v3307_v56 = vmul.f32 0.5, %v11795_v19  ;;  %v11818_v18 = vadd.f32 %v11318_v0, %v10684_v8  ;;  %v11822_v12 = vadd.f32 %v11320_v59, %v10686_v61  ;;  %v8807_v36 = vpop.eup %8806 }
 0x27f   :  { %v3306_v2 = vmul.f32 0.5, %v11799_v20  ;;  %8814 = vtanh.f32 %v3305_v37  ;;  %v3308_v31 = vmul.f32 0.5, %v11812_v21  ;;  %v11827_v3 = vadd.f32 %v11330_v47, %v10690_v11  ;;  %v8809_v29 = vpop.eup %8808  ;;  %v11867_v37 = vpop.f32.mrb[151].mxu0 }
 0x280   :  { %v11831_v26 = vadd.f32 %v11332_v1, %v10692_v32  ;;  %8816 = vtanh.f32 %v3307_v56  ;;  %v3315_v45 = vmul.f32 0.5, %v11818_v18  ;;  %v3317_v0 = vmul.f32 0.5, %v11822_v12  ;;  %v11845_v1 = vpop.f32.mrb[87].mxu1  ;;  %17391 = vst [vmem:[#allocation62_spill] sm:$0xff] %v11867_v37 }
 0x281   :  { %v11837_v59 = vadd.f32 %v11345_v17, %v10684_v8  ;;  %8818 = vtanh.f32 %v3306_v2  ;;  %v3316_v50 = vmul.f32 0.5, %v11827_v3  ;;  %v11843_v47 = vadd.f32 %v11347_v27, %v10686_v61  ;;  %17386 = vst [vmem:[#allocation61_spill] sm:$0xff] %v11845_v1  ;;  %v17388_v17 = vld [vmem:[#allocation48_spill] sm:$0xff] }
 0x282   :  { %v3318_v62 = vmul.f32 0.5, %v11831_v26  ;;  %8820 = vtanh.f32 %v3308_v31  ;;  %v11850_v42 = vadd.f32 %v17387_v33, %v10690_v11  ;;  %v11854_v63 = vadd.f32 %v17388_v17, %v10692_v32  ;;  %v17393_v17 = vld [vmem:[#allocation65_spill] sm:$0xff] }
 0x283   :  { %v3325_v48 = vmul.f32 0.5, %v11837_v59  ;;  %v4568_v24 = vadd.f32 1.0, %v8805_v38  ;;  %8822 = vtanh.f32 %v3315_v45  ;;  %v3327_v27 = vmul.f32 0.5, %v11843_v47 }
 0x284   :  { %v11859_v43 = vadd.f32 %v17389_v57, %v10684_v8  ;;  %7899 = vmatmul.mubr.msk.bf16.gmra.mrb[196].mxu1 %vm282_vm0, %v17390_v6  ;;  %7931 = vmatmul.mubr.msk.bf16.gmra.mrb[4].mxu0 %vm282_vm0, %v17390_v6  ;;  %v4575_v54 = vadd.f32 1.0, %v8807_v36  ;;  %8824 = vtanh.f32 %v3317_v0  ;;  %v3326_v40 = vmul.f32 0.5, %v11850_v42  ;;  %v17392_v0 = vld [vmem:[#allocation64_spill] sm:$0xff] }
 0x285   :  { %v3328_v14 = vmul.f32 0.5, %v11854_v63  ;;  %2208 = vmatprep.mubr.bf16.mxu1 %v17258_v13  ;;  %2561 = vmatprep.mubr.bf16.mxu0 %v17258_v13  ;;  %v5208_v56 = vmul.f32 0.5, %v4568_v24  ;;  %v4577_v2 = vadd.f32 1.0, %v8809_v29  ;;  %8826 = vtanh.f32 %v3316_v50  ;;  %v8811_v45 = vpop.eup %8810 }
 0x286   :  { %v3335_v31 = vmul.f32 0.5, %v11859_v43  ;;  %v5215_v38 = vmul.f32 0.5, %v4575_v54  ;;  %8828 = vtanh.f32 %v3318_v62  ;;  %v11874_v33 = vadd.f32 %v17392_v0, %v10686_v61  ;;  %v8813_v57 = vpop.eup %8812 }
 0x287   :  { %v11878_v36 = vadd.f32 %v17393_v17, %v10690_v11  ;;  %v5848_v6 = vmul.f32 %v5208_v56, %v11672_v34  ;;  %v5217_v16 = vmul.f32 0.5, %v4577_v2  ;;  %v4576_v24 = vadd.f32 1.0, %v8811_v45 }
 0x288   :  { %8830 = vtanh.f32 %v3325_v48  ;;  %v5855_v50 = vmul.f32 %v5215_v38, %v11676_v53  ;;  %v4578_v29 = vadd.f32 1.0, %v8813_v57  ;;  %v3337_v62 = vmul.f32 0.5, %v11874_v33  ;;  %v11886_v48 = vpop.f32.mrb[88].mxu1  ;;  %v11888_v53 = vpop.f32.mrb[152].mxu0 }
 0x289   :  { %8832 = vtanh.f32 %v3327_v27  ;;  %v8815_v54 = vpop.eup %8814  ;;  %v6391_v0 = vadd.f32 %v11770_v51, %v5848_v6  ;;  %v5857_v60 = vmul.f32 %v5217_v16, %v11682_v55  ;;  %v5216_v37 = vmul.f32 0.5, %v4576_v24  ;;  %v11892_v55 = vpop.f32.mrb[89].mxu1  ;;  %v17394_v6 = vld [vmem:[#allocation25_spill] sm:$0xff] }
 0x28a   :  { %8834 = vtanh.f32 %v3326_v40  ;;  %v8817_v17 = vpop.eup %8816  ;;  %v6281_v1 = vadd.f32 %v11779_v4, %v5855_v50  ;;  %v5218_v34 = vmul.f32 0.5, %v4578_v29  ;;  %v4585_v56 = vadd.f32 1.0, %v8815_v54  ;;  %v11894_v16 = vpop.f32.mrb[153].mxu0 }
 0x28b   :  { %8836 = vtanh.f32 %v3328_v14  ;;  %v8819_v27 = vpop.eup %8818  ;;  %v6355_v2 = vadd.f32 %v11791_v52, %v5857_v60  ;;  %v5856_v45 = vmul.f32 %v5216_v37, %v11708_v22  ;;  %v4587_v51 = vadd.f32 1.0, %v8817_v17  ;;  %v11905_v57 = vpop.f32.mrb[90].mxu1 }
 0x28c   :  { %8838 = vtanh.f32 %v3335_v31  ;;  %7900 = vmatmul.mubr.msk.bf16.gmra.mrb[200].mxu1 %vm282_vm0, %v17394_v6  ;;  %7932 = vmatmul.mubr.msk.bf16.gmra.mrb[8].mxu0 %vm282_vm0, %v17394_v6  ;;  %v8821_v4 = vpop.eup %8820  ;;  %v5858_v40 = vmul.f32 %v5218_v34, %v11716_v44  ;;  %v5225_v14 = vmul.f32 0.5, %v4585_v56  ;;  %v4586_v38 = vadd.f32 1.0, %v8819_v27  ;;  %v11907_v24 = vpop.f32.mrb[154].mxu0 }
 0x28d   :  { %8840 = vtanh.f32 %v3337_v62  ;;  %2218 = vmatprep.mubr.bf16.mxu1 %v17258_v13  ;;  %2571 = vmatprep.mubr.bf16.mxu0 %v17258_v13  ;;  %v8823_v22 = vpop.eup %8822  ;;  %v6318_v60 = vadd.f32 %v11807_v39, %v5856_v45  ;;  %v5227_v52 = vmul.f32 0.5, %v4587_v51  ;;  %v4588_v37 = vadd.f32 1.0, %v8821_v4  ;;  %17395 = vst [vmem:[#allocation47_spill] sm:$0xff] %v11907_v24  ;;  %v11911_v39 = vpop.f32.mrb[91].mxu1 }
 0x28e   :  { %v3336_v31 = vmul.f32 0.5, %v11878_v36  ;;  %v8825_v50 = vpop.eup %8824  ;;  %v6392_v44 = vadd.f32 %v6391_v0, %v5858_v40  ;;  %v5865_v29 = vmul.f32 %v5225_v14, %v11785_v46  ;;  %v5226_v62 = vmul.f32 0.5, %v4586_v38  ;;  %17396 = vst [vmem:[#allocation48_spill] sm:$0xff] %v11911_v39  ;;  %v11913_v45 = vpop.f32.mrb[155].mxu0 }
 0x28f   :  { %v4595_v54 = vadd.f32 1.0, %v8823_v22  ;;  %v8827_v17 = vpop.eup %8826  ;;  %v5867_v34 = vmul.f32 %v5227_v52, %v11795_v19  ;;  %v5228_v56 = vmul.f32 0.5, %v4588_v37  ;;  %v4597_v27 = vadd.f32 1.0, %v8825_v50  ;;  %17397 = vst [vmem:[#allocation63_spill] sm:$0xff] %v11913_v45 }
 0x290   :  { %8842 = vtanh.f32 %v3336_v31  ;;  %v8829_v51 = vpop.eup %8828  ;;  %v6282_v4 = vadd.f32 %v6281_v1, %v5865_v29  ;;  %v5866_v6 = vmul.f32 %v5226_v62, %v11799_v20  ;;  %v4596_v0 = vadd.f32 1.0, %v8827_v17  ;;  %v17398_v62 = vld [vmem:[#allocation24_spill] sm:$0xff] }
 0x291   :  { %v5235_v24 = vmul.f32 0.5, %v4595_v54  ;;  %v6356_v46 = vadd.f32 %v6355_v2, %v5867_v34  ;;  %v5868_v14 = vmul.f32 %v5228_v56, %v11812_v21  ;;  %v5237_v38 = vmul.f32 0.5, %v4597_v27  ;;  %v11927_v34 = vpop.f32.mrb[92].mxu1  ;;  %v11929_v56 = vpop.f32.mrb[156].mxu0 }
 0x292   :  { %v8831_v40 = vpop.eup %8830  ;;  %v4598_v22 = vadd.f32 1.0, %v8829_v51  ;;  %v6319_v52 = vadd.f32 %v6318_v60, %v5866_v6  ;;  %v5236_v31 = vmul.f32 0.5, %v4596_v0  ;;  %v11932_v0 = vpop.f32.mrb[93].mxu1 }
 0x293   :  { %v8833_v19 = vpop.eup %8832  ;;  %v5875_v37 = vmul.f32 %v5235_v24, %v11818_v18  ;;  %v4605_v50 = vadd.f32 1.0, %v8831_v40  ;;  %v6393_v45 = vadd.f32 %v6392_v44, %v5868_v14  ;;  %v5877_v1 = vmul.f32 %v5237_v38, %v11822_v12  ;;  %v11934_v40 = vpop.f32.mrb[157].mxu0 }
 0x294   :  { %v8835_v39 = vpop.eup %8834  ;;  %v5238_v29 = vmul.f32 0.5, %v4598_v22  ;;  %v4607_v20 = vadd.f32 1.0, %v8833_v19  ;;  %7901 = vmatmul.mubr.msk.bf16.gmra.mrb[204].mxu1 %vm282_vm0, %v17398_v62  ;;  %7933 = vmatmul.mubr.msk.bf16.gmra.mrb[12].mxu0 %vm282_vm0, %v17398_v62  ;;  %v5876_v6 = vmul.f32 %v5236_v31, %v11827_v3  ;;  %17399 = vst [vmem:[#allocation64_spill] sm:$0xff] %v11934_v40  ;;  %v11937_v22 = vpop.f32.mrb[94].mxu1 }
 0x295   :  { %v8837_v21 = vpop.eup %8836  ;;  %v6283_v2 = vadd.f32 %v6282_v4, %v5875_v37  ;;  %v5245_v60 = vmul.f32 0.5, %v4605_v50  ;;  %v4606_v18 = vadd.f32 1.0, %v8835_v39  ;;  %2228 = vmatprep.mubr.bf16.mxu1 %v17258_v13  ;;  %2581 = vmatprep.mubr.bf16.mxu0 %v17258_v13  ;;  %v6357_v12 = vadd.f32 %v6356_v46, %v5877_v1  ;;  %17400 = vst [vmem:[#allocation65_spill] sm:$0xff] %v11937_v22  ;;  %v11939_v19 = vpop.f32.mrb[158].mxu0 }
 0x296   :  { %v8839_v24 = vpop.eup %8838  ;;  %v5878_v44 = vmul.f32 %v5238_v29, %v11831_v26  ;;  %v5247_v54 = vmul.f32 0.5, %v4607_v20  ;;  %v4608_v17 = vadd.f32 1.0, %v8837_v21  ;;  %v6320_v51 = vadd.f32 %v6319_v52, %v5876_v6  ;;  %17401 = vst [vmem:[#allocation92_spill] sm:$0xff] %v11939_v19  ;;  %v11946_v1 = vpop.f32.mrb[95].mxu1  ;;  %v17404_v21 = vld [vmem:[#allocation67_spill] sm:$0xff]  ;;  %v17431_v19 = vld [vmem:[#allocation29_spill] sm:$0xff] }
 0x297   :  { %v8841_v27 = vpop.eup %8840  ;;  %v5885_v3 = vmul.f32 %v5245_v60, %v11837_v59  ;;  %v5246_v4 = vmul.f32 0.5, %v4606_v18  ;;  %v4615_v39 = vadd.f32 1.0, %v8839_v24  ;;  %v17402_v59 = vld [vmem:[#allocation66_spill] sm:$0xff]  ;;  %v11951_v6 = vadd.f32 %v17404_v21, %v10684_v8 }
 0x298   :  { %v6394_v14 = vadd.f32 %v6393_v45, %v5878_v44  ;;  %v5887_v46 = vmul.f32 %v5247_v54, %v11843_v47  ;;  %v5248_v26 = vmul.f32 0.5, %v4608_v17  ;;  %v4617_v38 = vadd.f32 1.0, %v8841_v27  ;;  %17403 = vst [vmem:[#allocation66_spill] sm:$0xff] %v11946_v1  ;;  %v8482_v17 = vld [vmem:[%s17107_s3 + $0x70] ss:$40 sps:$4 sm:$0xff]   ;;  %v11969_v27 = vpop.f32.mrb[159].mxu0 }
 0x299   :  { %v6284_v37 = vadd.f32 %v6283_v2, %v5885_v3  ;;  %v5886_v52 = vmul.f32 %v5246_v4, %v11850_v42  ;;  %v5255_v31 = vmul.f32 0.5, %v4615_v39  ;;  %v11944_v50 = vadd.f32 %v17402_v59, %v10692_v32  ;;  %17406 = vst [vmem:[#allocation67_spill] sm:$0xff] %v11969_v27  ;;  %v17408_v4 = vld [vmem:[#allocation69_spill] sm:$0xff]  ;;  %v17410_v59 = vld [vmem:[#allocation54_spill] sm:$0xff] }
 0x29a   :  { %v8843_v29 = vpop.eup %8842  ;;  %v6358_v45 = vadd.f32 %v6357_v12, %v5887_v46  ;;  %v5888_v47 = vmul.f32 %v5248_v26, %v11854_v63  ;;  %v5257_v20 = vmul.f32 0.5, %v4617_v38  ;;  %v3345_v54 = vmul.f32 0.5, %v11951_v6  ;;  %v17405_v12 = vld [vmem:[#allocation68_spill] sm:$0xff]  ;;  %v17409_v26 = vld [vmem:[#allocation70_spill] sm:$0xff] }
 0x29b   :  { %v6321_v60 = vadd.f32 %v6320_v51, %v5886_v52  ;;  %v5895_v2 = vmul.f32 %v5255_v31, %v11859_v43  ;;  %v4616_v42 = vadd.f32 1.0, %v8843_v29  ;;  %v3338_v18 = vmul.f32 0.5, %v11944_v50  ;;  %v8484_v43 = vld [vmem:[%s17107_s3 + $0x74] ss:$40 sps:$4 sm:$0xff]  }
 0x29c   :  { %v11955_v24 = vadd.f32 %v6394_v14, %v5888_v47  ;;  %v5897_v44 = vmul.f32 %v5257_v20, %v11874_v33  ;;  %v11961_v63 = vadd.f32 %v17405_v12, %v10686_v61  ;;  %v17407_v51 = vld [vmem:[#allocation27_spill] sm:$0xff]  ;;  %v11979_v39 = vadd.f32 %v17408_v4, %v10690_v11  ;;  %2704 = vmatprep.subr.bf16.mxu1 %v8484_v43  ;;  %v17411_v47 = vld [vmem:[#allocation49_spill] sm:$0xff] }
 0x29d   :  { %7902 = vmatmul.mubr.msk.bf16.gmra.mrb[208].mxu1 %vm282_vm0, %v17407_v51  ;;  %7934 = vmatmul.mubr.msk.bf16.gmra.mrb[16].mxu0 %vm282_vm0, %v17407_v51  ;;  %v11975_v33 = vadd.f32 %v6284_v37, %v5895_v2  ;;  %v5256_v3 = vmul.f32 0.5, %v4616_v42  ;;  %8844 = vtanh.f32 %v3338_v18  ;;  %v11988_v38 = vadd.f32 %v17409_v26, %v10692_v32 }
 0x29e   :  { %2238 = vmatprep.mubr.bf16.mxu1 %v17258_v13  ;;  %2591 = vmatprep.mubr.bf16.mxu0 %v17258_v13  ;;  %v11983_v14 = vadd.f32 %v6358_v45, %v5897_v44  ;;  %8846 = vtanh.f32 %v3345_v54  ;;  %v3347_v46 = vmul.f32 0.5, %v11961_v63  ;;  %v3346_v52 = vmul.f32 0.5, %v11979_v39  ;;  %v17413_v54 = vld [vmem:[#allocation50_spill] sm:$0xff] }
 0x29f   :  { %v5896_v37 = vmul.f32 %v5256_v3, %v11878_v36  ;;  %v11994_v31 = vadd.f32 %v11465_v23, %v10684_v8  ;;  %v11998_v29 = vadd.f32 %v17410_v59, %v10686_v61  ;;  %2705 = vmatpush1.bf16.msra.mxu1 %v8482_v17  ;;  %v3348_v45 = vmul.f32 0.5, %v11988_v38  ;;  %v17412_v36 = vld [vmem:[#allocation42_spill] sm:$0xff]  ;;  %v17414_v17 = vld [vmem:[#allocation45_spill] sm:$0xff] }
 0x2a0   :  { %8848 = vtanh.f32 %v3347_v46  ;;  %v12003_v20 = vadd.f32 %v17411_v47, %v10690_v11  ;;  %v12007_v21 = vadd.f32 %v17412_v36, %v10692_v32  ;;  %v12017_v12 = vadd.f32 %v17413_v54, %v10684_v8  ;;  %v17417_v59 = vld [vmem:[#allocation26_spill] sm:$0xff]  ;;  %v12035_v47 = vpop.f32.mrb[160].mxu0  ;;  %v9895_v36 = vld [vmem:[%s17108_s4] sm:$0xff] }
 0x2a1   :  { %v12009_v2 = vadd.f32 %v6321_v60, %v5896_v37  ;;  %8850 = vtanh.f32 %v3346_v52  ;;  %v3355_v23 = vmul.f32 0.5, %v11994_v31  ;;  %v3357_v42 = vmul.f32 0.5, %v11998_v29  ;;  %v17415_v60 = vld [vmem:[#allocation38_spill] sm:$0xff]  ;;  %v12028_v52 = vpop.f32.mrb[96].mxu1  ;;  %17418 = vst [vmem:[#allocation69_spill] sm:$0xff] %v12035_v47 }
 0x2a2   :  { %8852 = vtanh.f32 %v3348_v45  ;;  %v3356_v18 = vmul.f32 0.5, %v12003_v20  ;;  %v3358_v44 = vmul.f32 0.5, %v12007_v21  ;;  %v12021_v43 = vadd.f32 %v17414_v17, %v10686_v61  ;;  %17416 = vst [vmem:[#allocation68_spill] sm:$0xff] %v12028_v52 }
 0x2a3   :  { %8854 = vtanh.f32 %v3355_v23  ;;  %v1062_v3 = vsub.s32 4, %v17415_v60  ;;  %v1066_v4 = vsub.s32 5, %v17415_v60  ;;  %v3365_v46 = vmul.f32 0.5, %v12017_v12 }
 0x2a4   :  { %8856 = vtanh.f32 %v3357_v42  ;;  %v1070_v26 = vsub.s32 6, %v17415_v60  ;;  %v1074_v37 = vsub.s32 7, %v17415_v60  ;;  %v3367_v45 = vmul.f32 0.5, %v12021_v43 }
 0x2a5   :  { %7903 = vmatmul.mubr.msk.bf16.gmra.mrb[212].mxu1 %vm282_vm0, %v17417_v59  ;;  %7935 = vmatmul.mubr.msk.bf16.gmra.mrb[20].mxu0 %vm282_vm0, %v17417_v59  ;;  %8858 = vtanh.f32 %v3356_v18  ;;  %v12042_v23 = vrot.slane %v9895_v36, %v1062_v3  ;;  %v12044_v42 = vrot.slane %v9895_v36, %v1066_v4  ;;  %v17423_v59 = vld [vmem:[#allocation71_spill] sm:$0xff]  ;;  %v9921_v47 = vmov 1983009808   ;;  %v17424_v3 = vld [vmem:[#allocation72_spill] sm:$0xff] }
 0x2a6   :  { %2248 = vmatprep.mubr.bf16.mxu1 %v17258_v13  ;;  %2601 = vmatprep.mubr.bf16.mxu0 %v17258_v13  ;;  %8860 = vtanh.f32 %v3358_v44  ;;  %v12046_v54 = vrot.slane %v9895_v36, %v1070_v26  ;;  %v12048_v17 = vrot.slane %v9895_v36, %v1074_v37  ;;  %v12052_v51 = vadd.f32 %v17423_v59, %v10690_v11  ;;  %v12067_v59 = vpop.f32.mrb[97].mxu1 }
 0x2a7   :  { %17419 = vst [vmem:[#allocation70_spill] sm:$0xff] %v12042_v23  ;;  %17420 = vst [vmem:[#allocation54_spill] sm:$0xff] %v12044_v42  ;;  %v8845_v18 = vpop.eup %8844  ;;  %8862 = vtanh.f32 %v3365_v46  ;;  %v7021_v52 = vunpack.c.l.s4 %v9921_v47  ;;  %v12056_v23 = vadd.f32 %v17424_v3, %v10692_v32  ;;  %v12061_v46 = vadd.f32 %v11499_v25, %v10684_v8  ;;  %v17426_v3 = vld [vmem:[#allocation73_spill] sm:$0xff] }
 0x2a8   :  { %17421 = vst [vmem:[#allocation49_spill] sm:$0xff] %v12046_v54  ;;  %17422 = vst [vmem:[#allocation42_spill] sm:$0xff] %v12048_v17  ;;  %v8847_v62 = vpop.eup %8846  ;;  %v4618_v44 = vadd.f32 1.0, %v8845_v18  ;;  %8864 = vtanh.f32 %v3367_v45  ;;  %v3366_v26 = vmul.f32 0.5, %v12052_v51  ;;  %v12065_v37 = vadd.f32 %v11501_v10, %v10686_v61  ;;  %v12074_v17 = vpop.f32.mrb[161].mxu0 }
 0x2a9   :  { %v4625_v4 = vadd.f32 1.0, %v8847_v62  ;;  %17425 = vst [vmem:[#allocation50_spill] sm:$0xff] %v12067_v59  ;;  %v7022_v47 = vunpack.c.0.s8 %v7021_v52  ;;  %v3368_v18 = vmul.f32 0.5, %v12056_v23  ;;  %v12072_v62 = vadd.f32 %v17426_v3, %v10690_v11  ;;  %17427 = vst [vmem:[#allocation45_spill] sm:$0xff] %v12074_v17  ;;  %v12083_v3 = vpop.f32.mrb[162].mxu0 }
 0x2aa   :  { %v8849_v45 = vpop.eup %8848  ;;  %v5258_v36 = vmul.f32 0.5, %v4618_v44  ;;  %8866 = vtanh.f32 %v3366_v26  ;;  %v3375_v10 = vmul.f32 0.5, %v12061_v46  ;;  %v12081_v44 = vpop.f32.mrb[98].mxu1  ;;  %17430 = vst [vmem:[#allocation73_spill] sm:$0xff] %v12083_v3 }
 0x2ab   :  { %v8851_v42 = vpop.eup %8850  ;;  %v5265_v25 = vmul.f32 0.5, %v4625_v4  ;;  %v4627_v54 = vadd.f32 1.0, %v8849_v45  ;;  %v12079_v52 = vsub.s32 %v7022_v47, %v17415_v60  ;;  %8868 = vtanh.f32 %v3368_v18  ;;  %17429 = vst [vmem:[#allocation72_spill] sm:$0xff] %v12081_v44  ;;  %v12094_v3 = vpop.f32.mrb[99].mxu1 }
 0x2ac   :  { %v8853_v27 = vpop.eup %8852  ;;  %v5898_v59 = vmul.f32 %v5258_v36, %v11944_v50  ;;  %v4626_v1 = vadd.f32 1.0, %v8851_v42  ;;  %8870 = vtanh.f32 %v3375_v10  ;;  %v3377_v60 = vmul.f32 0.5, %v12065_v37  ;;  %17432 = vst [vmem:[#allocation93_spill] sm:$0xff] %v12094_v3 }
 0x2ad   :  { %17428 = vst [vmem:[#allocation71_spill] sm:$0xff] %v12079_v52  ;;  %7904 = vmatmul.mubr.msk.bf16.gmra.mrb[216].mxu1 %vm282_vm0, %v17431_v19  ;;  %7936 = vmatmul.mubr.msk.bf16.gmra.mrb[24].mxu0 %vm282_vm0, %v17431_v19  ;;  %v8855_v4 = vpop.eup %8854  ;;  %v5905_v26 = vmul.f32 %v5265_v25, %v11951_v6  ;;  %v5267_v45 = vmul.f32 0.5, %v4627_v54  ;;  %v4628_v50 = vadd.f32 1.0, %v8853_v27  ;;  %v12096_v19 = vpop.f32.mrb[163].mxu0 }
 0x2ae   :  { %2258 = vmatprep.mubr.bf16.mxu1 %v17258_v13  ;;  %2611 = vmatprep.mubr.bf16.mxu0 %v17258_v13  ;;  %v8857_v42 = vpop.eup %8856  ;;  %v6396_v36 = vadd.f32 %v11955_v24, %v5898_v59  ;;  %v5266_v47 = vmul.f32 0.5, %v4626_v1  ;;  %v4635_v18 = vadd.f32 1.0, %v8855_v4  ;;  %17433 = vst [vmem:[#allocation94_spill] sm:$0xff] %v12096_v19  ;;  %8872 = vtanh.f32 %v3377_v60 }
 0x2af   :  { %v8859_v44 = vpop.eup %8858  ;;  %v6286_v6 = vadd.f32 %v11975_v33, %v5905_v26  ;;  %v5907_v27 = vmul.f32 %v5267_v45, %v11961_v63  ;;  %v5268_v54 = vmul.f32 0.5, %v4628_v50  ;;  %v4637_v25 = vadd.f32 1.0, %v8857_v42 }
 0x2b0   :  { %v8861_v10 = vpop.eup %8860  ;;  %v5906_v17 = vmul.f32 %v5266_v47, %v11979_v39  ;;  %v5275_v22 = vmul.f32 0.5, %v4635_v18  ;;  %v4636_v24 = vadd.f32 1.0, %v8859_v44  ;;  %v12108_v18 = vpop.f32.mrb[100].mxu1 }
 0x2b1   :  { %v8863_v1 = vpop.eup %8862  ;;  %v6360_v59 = vadd.f32 %v11983_v14, %v5907_v27  ;;  %v5908_v4 = vmul.f32 %v5268_v54, %v11988_v38  ;;  %v5277_v3 = vmul.f32 0.5, %v4637_v25  ;;  %v4638_v19 = vadd.f32 1.0, %v8861_v10  ;;  %v12110_v27 = vpop.f32.mrb[164].mxu0 }
 0x2b2   :  { %v8865_v40 = vpop.eup %8864  ;;  %v6323_v33 = vadd.f32 %v12009_v2, %v5906_v17  ;;  %v5915_v63 = vmul.f32 %v5275_v22, %v11994_v31  ;;  %v5276_v26 = vmul.f32 0.5, %v4636_v24  ;;  %v4645_v45 = vadd.f32 1.0, %v8863_v1  ;;  %v17434_v2 = vld [vmem:[#allocation28_spill] sm:$0xff]  ;;  %v12121_v17 = vpop.f32.mrb[101].mxu1 }
 0x2b3   :  { %v6397_v50 = vadd.f32 %v6396_v36, %v5908_v4  ;;  %v5917_v39 = vmul.f32 %v5277_v3, %v11998_v29  ;;  %v5278_v42 = vmul.f32 0.5, %v4638_v19  ;;  %v4647_v44 = vadd.f32 1.0, %v8865_v40  ;;  %v17435_v29 = vld [vmem:[#allocation74_spill] sm:$0xff]  ;;  %v12123_v3 = vpop.f32.mrb[165].mxu0 }
 0x2b4   :  { %v6287_v60 = vadd.f32 %v6286_v6, %v5915_v63  ;;  %v5916_v47 = vmul.f32 %v5276_v26, %v12003_v20  ;;  %v5285_v14 = vmul.f32 0.5, %v4645_v45  ;;  %v3376_v38 = vmul.f32 0.5, %v12072_v62  ;;  %v8867_v22 = vpop.eup %8866  ;;  %v12130_v10 = vpop.f32.mrb[166].mxu0 }
 0x2b5   :  { %7905 = vmatmul.mubr.msk.bf16.gmra.mrb[220].mxu1 %vm282_vm0, %v17434_v2  ;;  %7937 = vmatmul.mubr.msk.bf16.gmra.mrb[28].mxu0 %vm282_vm0, %v17434_v2  ;;  %v6361_v31 = vadd.f32 %v6360_v59, %v5917_v39  ;;  %v5918_v40 = vmul.f32 %v5278_v42, %v12007_v21  ;;  %v5287_v19 = vmul.f32 0.5, %v4647_v44  ;;  %v12119_v20 = vadd.f32 %v17435_v29, %v10692_v32  ;;  %v8869_v36 = vpop.eup %8868  ;;  %v12128_v21 = vpop.f32.mrb[102].mxu1  ;;  %v17440_v42 = vld [vmem:[#allocation75_spill] sm:$0xff] }
 0x2b6   :  { %2268 = vmatprep.mubr.bf16.mxu1 %v17258_v13  ;;  %2621 = vmatprep.mubr.bf16.mxu0 %v17258_v13  ;;  %v6324_v6 = vadd.f32 %v6323_v33, %v5916_v47  ;;  %v5925_v54 = vmul.f32 %v5285_v14, %v12017_v12  ;;  %v4646_v25 = vadd.f32 1.0, %v8867_v22  ;;  %8874 = vtanh.f32 %v3376_v38  ;;  %17436 = vst [vmem:[#allocation74_spill] sm:$0xff] %v12128_v21  ;;  %v8871_v24 = vpop.eup %8870  ;;  %v12134_v26 = vpop.f32.mrb[103].mxu1 }
 0x2b7   :  { %17437 = vst [vmem:[#allocation95_spill] sm:$0xff] %v12130_v10  ;;  %v6398_v1 = vadd.f32 %v6397_v50, %v5918_v40  ;;  %v5927_v59 = vmul.f32 %v5287_v19, %v12021_v43  ;;  %v4648_v4 = vadd.f32 1.0, %v8869_v36  ;;  %v3378_v63 = vmul.f32 0.5, %v12119_v20  ;;  %17438 = vst [vmem:[#allocation96_spill] sm:$0xff] %v12134_v26  ;;  %v12136_v45 = vpop.f32.mrb[167].mxu0  ;;  %v17441_v50 = vld [vmem:[#allocation76_spill] sm:$0xff] }
 0x2b8   :  { %17439 = vst [vmem:[#allocation97_spill] sm:$0xff] %v12136_v45  ;;  %v6288_v33 = vadd.f32 %v6287_v60, %v5925_v54  ;;  %v5286_v39 = vmul.f32 0.5, %v4646_v25  ;;  %v4655_v12 = vadd.f32 1.0, %v8871_v24  ;;  %v12140_v44 = vadd.f32 %v17440_v42, %v10684_v8  ;;  %v8873_v38 = vpop.eup %8872  ;;  %v17446_v42 = vld [vmem:[#allocation77_spill] sm:$0xff] }
 0x2b9   :  { %v6362_v47 = vadd.f32 %v6361_v31, %v5927_v59  ;;  %v5288_v14 = vmul.f32 0.5, %v4648_v4  ;;  %8876 = vtanh.f32 %v3378_v63  ;;  %v12144_v43 = vadd.f32 %v17441_v50, %v10686_v61  ;;  %v12153_v4 = vpop.f32.mrb[104].mxu1  ;;  %v12155_v63 = vpop.f32.mrb[168].mxu0  ;;  %v17447_v50 = vld [vmem:[#allocation78_spill] sm:$0xff] }
 0x2ba   :  { %v6289_v22 = vrot.slane %v6288_v33, 4  ;;  %v5926_v40 = vmul.f32 %v5286_v39, %v12052_v51  ;;  %v5295_v19 = vmul.f32 0.5, %v4655_v12  ;;  %v3385_v60 = vmul.f32 0.5, %v12140_v44  ;;  %17442 = vst [vmem:[#allocation75_spill] sm:$0xff] %v12153_v4  ;;  %17443 = vst [vmem:[#allocation76_spill] sm:$0xff] %v12155_v63  ;;  %v17444_v51 = vld [vmem:[#allocation31_spill] sm:$0xff] }
 0x2bb   :  { %v6363_v29 = vrot.slane %v6362_v47, 4  ;;  %v5928_v36 = vmul.f32 %v5288_v14, %v12056_v23  ;;  %v4657_v54 = vadd.f32 1.0, %v8873_v38  ;;  %v3387_v25 = vmul.f32 0.5, %v12144_v43 }
 0x2bc   :  { %v6290_v31 = vadd.f32 %v6289_v22, %v6288_v33  ;;  %v6325_v24 = vadd.f32 %v6324_v6, %v5926_v40  ;;  %v12151_v59 = vmul.f32 %v5295_v19, %v12061_v46  ;;  %8878 = vtanh.f32 %v3385_v60  ;;  %v12161_v33 = vpop.f32.mrb[105].mxu1  ;;  %v17448_v40 = vld [vmem:[#allocation79_spill] sm:$0xff] }
 0x2bd   :  { %7906 = vmatmul.mubr.msk.bf16.gmra.mrb[224].mxu1 %vm282_vm0, %v17444_v51  ;;  %7938 = vmatmul.mubr.msk.bf16.gmra.mrb[32].mxu0 %vm282_vm0, %v17444_v51  ;;  %v6364_v23 = vadd.f32 %v6363_v29, %v6362_v47  ;;  %v6399_v39 = vadd.f32 %v6398_v1, %v5928_v36  ;;  %v5297_v12 = vmul.f32 0.5, %v4657_v54  ;;  %8880 = vtanh.f32 %v3387_v25  ;;  %17445 = vst [vmem:[#allocation98_spill] sm:$0xff] %v12161_v33 }
 0x2be   :  { %2278 = vmatprep.mubr.bf16.mxu1 %v17258_v13  ;;  %2631 = vmatprep.mubr.bf16.mxu0 %v17258_v13  ;;  %v6291_v46 = vrot.slane %v6290_v31, 2  ;;  %v6326_v6 = vrot.slane %v6325_v24, 4  ;;  %v12167_v14 = vadd.f32 %v17446_v42, %v10690_v11  ;;  %v12171_v38 = vadd.f32 %v17447_v50, %v10692_v32 }
 0x2bf   :  { %v6365_v47 = vrot.slane %v6364_v23, 2  ;;  %v6400_v1 = vrot.slane %v6399_v39, 4  ;;  %v12174_v22 = vmul.f32 %v5297_v12, %v12065_v37  ;;  %v12178_v19 = vadd.f32 %v17448_v40, %v10684_v8  ;;  %v17449_v37 = vld [vmem:[#allocation80_spill] sm:$0xff] }
 0x2c0   :  { %v8875_v60 = vpop.eup %8874  ;;  %v6292_v29 = vadd.f32 %v6291_v46, %v6290_v31  ;;  %v6327_v36 = vadd.f32 %v6326_v6, %v6325_v24  ;;  %v3386_v54 = vmul.f32 0.5, %v12167_v14  ;;  %v3388_v25 = vmul.f32 0.5, %v12171_v38 }
 0x2c1   :  { %v6366_v42 = vadd.f32 %v6365_v47, %v6364_v23  ;;  %v6401_v51 = vadd.f32 %v6400_v1, %v6399_v39  ;;  %v4656_v50 = vadd.f32 1.0, %v8875_v60  ;;  %v3395_v2 = vmul.f32 0.5, %v12178_v19  ;;  %v17450_v23 = vld [vmem:[#allocation30_spill] sm:$0xff] }
 0x2c2   :  { %v6293_v33 = vrot.slane %v6292_v29, 1  ;;  %v6328_v63 = vrot.slane %v6327_v36, 2  ;;  %8882 = vtanh.f32 %v3386_v54  ;;  %v12185_v12 = vadd.f32 %v17449_v37, %v10686_v61  ;;  %v17452_v54 = vld [vmem:[#allocation82_spill] sm:$0xff] }
 0x2c3   :  { %v8877_v40 = vpop.eup %8876  ;;  %v6367_v4 = vrot.slane %v6366_v42, 1  ;;  %v6402_v31 = vrot.slane %v6401_v51, 2  ;;  %v5296_v24 = vmul.f32 0.5, %v4656_v50  ;;  %8884 = vtanh.f32 %v3388_v25 }
 0x2c4   :  { %v6294_v46 = vadd.f32 %v6293_v33, %v6292_v29  ;;  %v6329_v6 = vadd.f32 %v6328_v63, %v6327_v36  ;;  %v4658_v45 = vadd.f32 1.0, %v8877_v40  ;;  %8886 = vtanh.f32 %v3395_v2  ;;  %v17451_v29 = vld [vmem:[#allocation81_spill] sm:$0xff] }
 0x2c5   :  { %7907 = vmatmul.mubr.msk.bf16.gmra.mrb[228].mxu1 %vm282_vm0, %v17450_v23  ;;  %7939 = vmatmul.mubr.msk.bf16.gmra.mrb[36].mxu0 %vm282_vm0, %v17450_v23  ;;  %v6368_v39 = vadd.f32 %v6367_v4, %v6366_v42  ;;  %v6403_v47 = vadd.f32 %v6402_v31, %v6401_v51  ;;  %v12192_v1 = vmul.f32 %v5296_v24, %v12072_v62  ;;  %v3397_v60 = vmul.f32 0.5, %v12185_v12  ;;  %v17453_v42 = vld [vmem:[#allocation51_spill] sm:$0xff]  ;;  %v12213_v24 = vpop.f32.mrb[169].mxu0 }
 0x2c6   :  { %2288 = vmatprep.mubr.bf16.mxu1 %v17258_v13  ;;  %2641 = vmatprep.mubr.bf16.mxu0 %v17258_v13  ;;  %v8879_v63 = vpop.eup %8878  ;;  %v6330_v33 = vrot.slane %v6329_v6, 1  ;;  %v5298_v2 = vmul.f32 0.5, %v4658_v45  ;;  %v12199_v36 = vadd.f32 %v17451_v29, %v10690_v11  ;;  %v12203_v4 = vadd.f32 %v17452_v54, %v10692_v32  ;;  %17454 = vst [vmem:[#allocation77_spill] sm:$0xff] %v12213_v24 }
 0x2c7   :  { %v8881_v51 = vpop.eup %8880  ;;  %v6404_v62 = vrot.slane %v6403_v47, 1  ;;  %v4665_v25 = vadd.f32 1.0, %v8879_v63  ;;  %8888 = vtanh.f32 %v3397_v60  ;;  %v12207_v50 = vadd.f32 %v17453_v42, %v10684_v8  ;;  %v17455_v42 = vld [vmem:[#allocation83_spill] sm:$0xff] }
 0x2c8   :  { %v6331_v37 = vadd.f32 %v6330_v33, %v6329_v6  ;;  %v12210_v40 = vmul.f32 %v5298_v2, %v12119_v20  ;;  %v4667_v45 = vadd.f32 1.0, %v8881_v51  ;;  %v3396_v31 = vmul.f32 0.5, %v12199_v36  ;;  %v17456_v2 = vld [vmem:[#allocation52_spill] sm:$0xff] }
 0x2c9   :  { %v6405_v29 = vadd.f32 %v6404_v62, %v6403_v47  ;;  %v5305_v54 = vmul.f32 0.5, %v4665_v25  ;;  %v3398_v23 = vmul.f32 0.5, %v12203_v4  ;;  %v3405_v63 = vmul.f32 0.5, %v12207_v50  ;;  %v12226_v47 = vpop.f32.mrb[106].mxu1  ;;  %v12228_v62 = vpop.f32.mrb[170].mxu0 }
 0x2ca   :  { %v7018_v60 = vcombine.low %v6294_v46, %v6331_v37  ;;  %v5307_v26 = vmul.f32 0.5, %v4667_v45  ;;  %8890 = vtanh.f32 %v3396_v31  ;;  %v12219_v6 = vadd.f32 %v17455_v42, %v10686_v61  ;;  %17457 = vst [vmem:[#allocation78_spill] sm:$0xff] %v12226_v47  ;;  %17458 = vst [vmem:[#allocation79_spill] sm:$0xff] %v12228_v62  ;;  %v17460_v45 = vld [vmem:[#allocation33_spill] sm:$0xff] }
 0x2cb   :  { %v7019_v20 = vcombine.low %v6368_v39, %v6405_v29  ;;  %v5945_v33 = vmul.f32 %v5305_v54, %v12140_v44  ;;  %8892 = vtanh.f32 %v3398_v23  ;;  %v12224_v51 = vadd.f32 %v17456_v2, %v10690_v11 }
 0x2cc   :  { %v8883_v25 = vpop.eup %8882  ;;  %v12231_v46 = vrot.slane %v7018_v60, %v12079_v52  ;;  %v5947_v37 = vmul.f32 %v5307_v26, %v12144_v43  ;;  %8894 = vtanh.f32 %v3405_v63  ;;  %v3407_v39 = vmul.f32 0.5, %v12219_v6  ;;  %v12244_v60 = vpop.f32.mrb[107].mxu1 }
 0x2cd   :  { %7908 = vmatmul.mubr.msk.bf16.gmra.mrb[232].mxu1 %vm282_vm0, %v17460_v45  ;;  %7940 = vmatmul.mubr.msk.bf16.gmra.mrb[40].mxu0 %vm282_vm0, %v17460_v45  ;;  %v8885_v44 = vpop.eup %8884  ;;  %v12240_v23 = vrot.slane %v7019_v20, %v12079_v52  ;;  %v6628_v31 = vadd.f32 %v5945_v33, %v12151_v59  ;;  %v4666_v29 = vadd.f32 1.0, %v8883_v25  ;;  %v3406_v54 = vmul.f32 0.5, %v12224_v51  ;;  %17462 = vst [vmem:[#allocation82_spill] sm:$0xff] %v12244_v60  ;;  %v12246_v26 = vpop.f32.mrb[171].mxu0  ;;  %v17464_v20 = vld [vmem:[#allocation39_spill] sm:$0xff] }
 0x2ce   :  { %17459 = vst [vmem:[#allocation80_spill] sm:$0xff] %v12231_v46  ;;  %17463 = vst [vmem:[#allocation51_spill] sm:$0xff] %v12246_v26  ;;  %2298 = vmatprep.mubr.bf16.mxu1 %v17258_v13  ;;  %2651 = vmatprep.mubr.bf16.mxu0 %v17258_v13  ;;  %v8887_v43 = vpop.eup %8886  ;;  %v6702_v63 = vadd.f32 %v5947_v37, %v12174_v22  ;;  %v4668_v42 = vadd.f32 1.0, %v8885_v44  ;;  %8896 = vtanh.f32 %v3407_v39  ;;  %v17465_v26 = vld [vmem:[#allocation40_spill] sm:$0xff]  ;;  %v17466_v22 = vld [vmem:[#allocation41_spill] sm:$0xff] }
 0x2cf   :  { %17461 = vst [vmem:[#allocation81_spill] sm:$0xff] %v12240_v23  ;;  %v12253_v2 = vadd.f32 %v17464_v20, %v10692_v32  ;;  %v5306_v33 = vmul.f32 0.5, %v4666_v29  ;;  %v4675_v25 = vadd.f32 1.0, %v8887_v43  ;;  %8898 = vtanh.f32 %v3406_v54  ;;  %v17467_v59 = vld [vmem:[#allocation43_spill] sm:$0xff]  ;;  %v17468_v54 = vld [vmem:[#allocation44_spill] sm:$0xff] }
 0x2d0   :  { %v5308_v45 = vmul.f32 0.5, %v4668_v42  ;;  %v12260_v60 = vadd.f32 %v17465_v26, %v10684_v8  ;;  %v12264_v37 = vadd.f32 %v17466_v22, %v10686_v61  ;;  %v12269_v29 = vadd.f32 %v17467_v59, %v10690_v11  ;;  %v12281_v59 = vpop.f32.mrb[108].mxu1 }
 0x2d1   :  { %v3408_v52 = vmul.f32 0.5, %v12253_v2  ;;  %v8889_v39 = vpop.eup %8888  ;;  %v5946_v44 = vmul.f32 %v5306_v33, %v12167_v14  ;;  %v5315_v20 = vmul.f32 0.5, %v4675_v25  ;;  %v12273_v43 = vadd.f32 %v17468_v54, %v10692_v32  ;;  %17469 = vst [vmem:[#allocation83_spill] sm:$0xff] %v12281_v59  ;;  %v12283_v25 = vpop.f32.mrb[172].mxu0 }
 0x2d2   :  { %v5948_v42 = vmul.f32 %v5308_v45, %v12171_v38  ;;  %v4677_v26 = vadd.f32 1.0, %v8889_v39  ;;  %v3415_v23 = vmul.f32 0.5, %v12260_v60  ;;  %v3417_v14 = vmul.f32 0.5, %v12264_v37  ;;  %17470 = vst [vmem:[#allocation52_spill] sm:$0xff] %v12283_v25  ;;  %v12287_v45 = vpop.f32.mrb[109].mxu1 }
 0x2d3   :  { %8900 = vtanh.f32 %v3408_v52  ;;  %v6665_v22 = vadd.f32 %v5946_v44, %v12192_v1  ;;  %v5955_v46 = vmul.f32 %v5315_v20, %v12178_v19  ;;  %v3416_v33 = vmul.f32 0.5, %v12269_v29  ;;  %17471 = vst [vmem:[#allocation39_spill] sm:$0xff] %v12287_v45  ;;  %v12289_v1 = vpop.f32.mrb[173].mxu0  ;;  %v17473_v19 = vld [vmem:[#allocation32_spill] sm:$0xff] }
 0x2d4   :  { %v8891_v54 = vpop.eup %8890  ;;  %v6739_v62 = vadd.f32 %v5948_v42, %v12210_v40  ;;  %v5317_v38 = vmul.f32 0.5, %v4677_v26  ;;  %8902 = vtanh.f32 %v3415_v23  ;;  %v3418_v52 = vmul.f32 0.5, %v12273_v43  ;;  %17472 = vst [vmem:[#allocation40_spill] sm:$0xff] %v12289_v1  ;;  %v17474_v40 = vld [vmem:[#allocation53_spill] sm:$0xff]  ;;  %v12299_v23 = vpop.f32.mrb[110].mxu1 }
 0x2d5   :  { %7909 = vmatmul.mubr.msk.bf16.gmra.mrb[236].mxu1 %vm282_vm0, %v17473_v19  ;;  %7941 = vmatmul.mubr.msk.bf16.gmra.mrb[44].mxu0 %vm282_vm0, %v17473_v19  ;;  %v8893_v39 = vpop.eup %8892  ;;  %v6629_v44 = vadd.f32 %v6628_v31, %v5955_v46  ;;  %v4676_v20 = vadd.f32 1.0, %v8891_v54  ;;  %8904 = vtanh.f32 %v3417_v14  ;;  %v12297_v42 = vadd.f32 %v17474_v40, %v10684_v8  ;;  %17475 = vst [vmem:[#allocation41_spill] sm:$0xff] %v12299_v23  ;;  %v12301_v26 = vpop.f32.mrb[174].mxu0  ;;  %v17477_v46 = vld [vmem:[#allocation55_spill] sm:$0xff] }
 0x2d6   :  { %17476 = vst [vmem:[#allocation43_spill] sm:$0xff] %v12301_v26  ;;  %2308 = vmatprep.mubr.bf16.mxu1 %v17258_v13  ;;  %2661 = vmatprep.mubr.bf16.mxu0 %v17258_v13  ;;  %v8895_v1 = vpop.eup %8894  ;;  %v5957_v45 = vmul.f32 %v5317_v38, %v12185_v12  ;;  %v4678_v19 = vadd.f32 1.0, %v8893_v39  ;;  %8906 = vtanh.f32 %v3416_v33  ;;  %v12308_v31 = vadd.f32 %v17477_v46, %v10686_v61  ;;  %v12310_v14 = vpop.f32.mrb[111].mxu1  ;;  %v17480_v33 = vld [vmem:[#allocation56_spill] sm:$0xff] }
 0x2d7   :  { %17478 = vst [vmem:[#allocation44_spill] sm:$0xff] %v12310_v14  ;;  %v12312_v54 = vpop.f32.mrb[175].mxu0  ;;  %v5316_v40 = vmul.f32 0.5, %v4676_v20  ;;  %v4685_v23 = vadd.f32 1.0, %v8895_v1  ;;  %8908 = vtanh.f32 %v3418_v52  ;;  %v3425_v26 = vmul.f32 0.5, %v12297_v42  ;;  %v12328_v10 = vpop.f32.mrb[112].mxu1 }
 0x2d8   :  { %17479 = vst [vmem:[#allocation53_spill] sm:$0xff] %v12312_v54  ;;  %v8897_v25 = vpop.eup %8896  ;;  %v6703_v59 = vadd.f32 %v6702_v63, %v5957_v45  ;;  %v5318_v47 = vmul.f32 0.5, %v4678_v19  ;;  %v3427_v12 = vmul.f32 0.5, %v12308_v31  ;;  %v12318_v38 = vadd.f32 %v17480_v33, %v10690_v11  ;;  %v17481_v54 = vld [vmem:[#allocation46_spill] sm:$0xff]  ;;  %17482 = vst [vmem:[#allocation55_spill] sm:$0xff] %v12328_v10 }
 0x2d9   :  { %v8899_v39 = vpop.eup %8898  ;;  %v5956_v46 = vmul.f32 %v5316_v40, %v12199_v36  ;;  %v5325_v14 = vmul.f32 0.5, %v4685_v23  ;;  %v4687_v24 = vadd.f32 1.0, %v8897_v25  ;;  %8910 = vtanh.f32 %v3425_v26  ;;  %v12330_v36 = vpop.f32.mrb[176].mxu0 }
 0x2da   :  { %v5958_v1 = vmul.f32 %v5318_v47, %v12203_v4  ;;  %v4686_v52 = vadd.f32 1.0, %v8899_v39  ;;  %8912 = vtanh.f32 %v3427_v12  ;;  %v3426_v20 = vmul.f32 0.5, %v12318_v38  ;;  %17483 = vst [vmem:[#allocation56_spill] sm:$0xff] %v12330_v36  ;;  %v17484_v4 = vld [vmem:[#allocation57_spill] sm:$0xff] }
 0x2db   :  { %v6666_v63 = vadd.f32 %v6665_v22, %v5956_v46  ;;  %v5965_v45 = vmul.f32 %v5325_v14, %v12207_v50  ;;  %v5327_v19 = vmul.f32 0.5, %v4687_v24  ;;  %v12326_v33 = vadd.f32 %v17481_v54, %v10692_v32  ;;  %v12336_v22 = vpop.f32.mrb[113].mxu1  ;;  %v12338_v50 = vpop.f32.mrb[177].mxu0  ;;  %v17487_v24 = vld [vmem:[#allocation35_spill] sm:$0xff] }
 0x2dc   :  { %v6740_v23 = vadd.f32 %v6739_v62, %v5958_v1  ;;  %v5326_v26 = vmul.f32 0.5, %v4686_v52  ;;  %8914 = vtanh.f32 %v3426_v20  ;;  %v12334_v47 = vadd.f32 %v17484_v4, %v10684_v8  ;;  %17485 = vst [vmem:[#allocation46_spill] sm:$0xff] %v12336_v22  ;;  %17486 = vst [vmem:[#allocation57_spill] sm:$0xff] %v12338_v50  ;;  %v17488_v1 = vld [vmem:[#allocation58_spill] sm:$0xff] }
 0x2dd   :  { %v8901_v25 = vpop.eup %8900  ;;  %7910 = vmatmul.mubr.msk.bf16.gmra.mrb[240].mxu1 %vm282_vm0, %v17487_v24  ;;  %7942 = vmatmul.mubr.msk.bf16.gmra.mrb[48].mxu0 %vm282_vm0, %v17487_v24  ;;  %v6630_v14 = vadd.f32 %v6629_v44, %v5965_v45  ;;  %v5967_v54 = vmul.f32 %v5327_v19, %v12219_v6  ;;  %v3428_v40 = vmul.f32 0.5, %v12326_v33  ;;  %v12352_v52 = vadd.f32 %v17488_v1, %v10686_v61  ;;  %v17489_v44 = vld [vmem:[#allocation59_spill] sm:$0xff] }
 0x2de   :  { %v4688_v62 = vadd.f32 1.0, %v8901_v25  ;;  %2318 = vmatprep.mubr.bf16.mxu1 %v17258_v13  ;;  %2671 = vmatprep.mubr.bf16.mxu0 %v17258_v13  ;;  %v8903_v12 = vpop.eup %8902  ;;  %v5966_v39 = vmul.f32 %v5326_v26, %v12224_v51  ;;  %v3435_v46 = vmul.f32 0.5, %v12334_v47  ;;  %v12356_v20 = vadd.f32 %v17489_v44, %v10690_v11 }
 0x2df   :  { %v8905_v6 = vpop.eup %8904  ;;  %v6704_v45 = vadd.f32 %v6703_v59, %v5967_v54  ;;  %v4695_v25 = vadd.f32 1.0, %v8903_v12  ;;  %8916 = vtanh.f32 %v3428_v40  ;;  %v3437_v51 = vmul.f32 0.5, %v12352_v52  ;;  %v17490_v59 = vld [vmem:[#allocation60_spill] sm:$0xff] }
 0x2e0   :  { %v5328_v19 = vmul.f32 0.5, %v4688_v62  ;;  %v8907_v4 = vpop.eup %8906  ;;  %v6667_v24 = vadd.f32 %v6666_v63, %v5966_v39  ;;  %v4697_v50 = vadd.f32 1.0, %v8905_v6  ;;  %8918 = vtanh.f32 %v3435_v46 }
 0x2e1   :  { %v8909_v26 = vpop.eup %8908  ;;  %v5335_v1 = vmul.f32 0.5, %v4695_v25  ;;  %v4696_v36 = vadd.f32 1.0, %v8907_v4  ;;  %v3436_v10 = vmul.f32 0.5, %v12356_v20  ;;  %8920 = vtanh.f32 %v3437_v51 }
 0x2e2   :  { %v5968_v22 = vmul.f32 %v5328_v19, %v12253_v2  ;;  %v5337_v44 = vmul.f32 0.5, %v4697_v50  ;;  %v4698_v21 = vadd.f32 1.0, %v8909_v26  ;;  %v12363_v54 = vadd.f32 %v17490_v59, %v10692_v32  ;;  %v17491_v50 = vld [vmem:[#allocation34_spill] sm:$0xff] }
 0x2e3   :  { %v8911_v62 = vpop.eup %8910  ;;  %v5975_v40 = vmul.f32 %v5335_v1, %v12260_v60  ;;  %v5336_v12 = vmul.f32 0.5, %v4696_v36  ;;  %8922 = vtanh.f32 %v3436_v10  ;;  %v17492_v60 = vld [vmem:[#allocation84_spill] sm:$0xff]  ;;  %v12377_v36 = vpop.f32.mrb[114].mxu1 }
 0x2e4   :  { %v6741_v63 = vadd.f32 %v6740_v23, %v5968_v22  ;;  %v8913_v39 = vpop.eup %8912  ;;  %v5977_v2 = vmul.f32 %v5337_v44, %v12264_v37  ;;  %v5338_v46 = vmul.f32 0.5, %v4698_v21  ;;  %v4705_v6 = vadd.f32 1.0, %v8911_v62 }
 0x2e5   :  { %v3438_v19 = vmul.f32 0.5, %v12363_v54  ;;  %7911 = vmatmul.mubr.msk.bf16.gmra.mrb[244].mxu1 %vm282_vm0, %v17491_v50  ;;  %7943 = vmatmul.mubr.msk.bf16.gmra.mrb[52].mxu0 %vm282_vm0, %v17491_v50  ;;  %v6631_v25 = vadd.f32 %v6630_v14, %v5975_v40  ;;  %v5976_v23 = vmul.f32 %v5336_v12, %v12269_v29  ;;  %v4707_v22 = vadd.f32 1.0, %v8913_v39  ;;  %v12382_v14 = vpop.f32.mrb[178].mxu0  ;;  %v17493_v40 = vld [vmem:[#allocation85_spill] sm:$0xff] }
 0x2e6   :  { %v12375_v10 = vadd.f32 %v17492_v60, %v10684_v8  ;;  %2328 = vmatprep.mubr.bf16.mxu1 %v17258_v13  ;;  %2681 = vmatprep.mubr.bf16.mxu0 %v17258_v13  ;;  %v8915_v21 = vpop.eup %8914  ;;  %v6705_v37 = vadd.f32 %v6704_v45, %v5977_v2  ;;  %v5978_v4 = vmul.f32 %v5338_v46, %v12273_v43  ;;  %v5345_v51 = vmul.f32 0.5, %v4705_v6  ;;  %v17494_v45 = vld [vmem:[#allocation86_spill] sm:$0xff]  ;;  %v12394_v43 = vpop.f32.mrb[115].mxu1 }
 0x2e7   :  { %8924 = vtanh.f32 %v3438_v19  ;;  %v6668_v29 = vadd.f32 %v6667_v24, %v5976_v23  ;;  %v5347_v26 = vmul.f32 0.5, %v4707_v22  ;;  %v4706_v1 = vadd.f32 1.0, %v8915_v21  ;;  %v12396_v2 = vpop.f32.mrb[179].mxu0 }
 0x2e8   :  { %v3445_v44 = vmul.f32 0.5, %v12375_v10  ;;  %v6742_v59 = vadd.f32 %v6741_v63, %v5978_v4  ;;  %v5985_v62 = vmul.f32 %v5345_v51, %v12297_v42  ;;  %v12388_v12 = vadd.f32 %v17493_v40, %v10686_v61  ;;  %v17495_v63 = vld [vmem:[#allocation87_spill] sm:$0xff] }
 0x2e9   :  { %v12392_v39 = vadd.f32 %v17494_v45, %v10690_v11  ;;  %v8917_v24 = vpop.eup %8916  ;;  %v5987_v46 = vmul.f32 %v5347_v26, %v12308_v31  ;;  %v5346_v6 = vmul.f32 0.5, %v4706_v1  ;;  %v12401_v42 = vadd.f32 %v17495_v63, %v10692_v32 }
 0x2ea   :  { %8926 = vtanh.f32 %v3445_v44  ;;  %v8919_v19 = vpop.eup %8918  ;;  %v6632_v23 = vadd.f32 %v6631_v25, %v5985_v62  ;;  %v4708_v22 = vadd.f32 1.0, %v8917_v24  ;;  %v3447_v60 = vmul.f32 0.5, %v12388_v12  ;;  %v17496_v25 = vld [vmem:[#allocation88_spill] sm:$0xff]  ;;  %v17497_v62 = vld [vmem:[#allocation37_spill] sm:$0xff] }
 0x2eb   :  { %v3446_v21 = vmul.f32 0.5, %v12392_v39  ;;  %v6706_v4 = vadd.f32 %v6705_v37, %v5987_v46  ;;  %v5986_v51 = vmul.f32 %v5346_v6, %v12318_v38  ;;  %v4715_v40 = vadd.f32 1.0, %v8919_v19  ;;  %v8921_v31 = vpop.eup %8920  ;;  %v12423_v19 = vpop.f32.mrb[116].mxu1 }
 0x2ec   :  { %v3448_v45 = vmul.f32 0.5, %v12401_v42  ;;  %v5348_v26 = vmul.f32 0.5, %v4708_v22  ;;  %8928 = vtanh.f32 %v3447_v60  ;;  %v12409_v1 = vadd.f32 %v11730_v5, %v10684_v8  ;;  %v12425_v22 = vpop.f32.mrb[180].mxu0 }
 0x2ed   :  { %v12413_v44 = vadd.f32 %v17496_v25, %v10686_v61  ;;  %7912 = vmatmul.mubr.msk.bf16.gmra.mrb[248].mxu1 %vm282_vm0, %v17497_v62  ;;  %7944 = vmatmul.mubr.msk.bf16.gmra.mrb[56].mxu0 %vm282_vm0, %v17497_v62  ;;  %v8923_v38 = vpop.eup %8922  ;;  %v6669_v37 = vadd.f32 %v6668_v29, %v5986_v51  ;;  %v5355_v24 = vmul.f32 0.5, %v4715_v40  ;;  %v4717_v46 = vadd.f32 1.0, %v8921_v31  ;;  %v12433_v31 = vpop.f32.mrb[117].mxu1 }
 0x2ee   :  { %8930 = vtanh.f32 %v3446_v21  ;;  %2338 = vmatprep.mubr.bf16.mxu1 %v17258_v13  ;;  %2691 = vmatprep.mubr.bf16.mxu0 %v17258_v13  ;;  %v5988_v5 = vmul.f32 %v5348_v26, %v12326_v33  ;;  %v4716_v6 = vadd.f32 1.0, %v8923_v38  ;;  %v3455_v63 = vmul.f32 0.5, %v12409_v1  ;;  %v17498_v21 = vld [vmem:[#allocation89_spill] sm:$0xff]  ;;  %17499 = vst [vmem:[#allocation58_spill] sm:$0xff] %v12433_v31  ;;  %v12435_v33 = vpop.f32.mrb[181].mxu0  ;;  %v17501_v38 = vld [vmem:[#allocation90_spill] sm:$0xff] }
 0x2ef   :  { %8932 = vtanh.f32 %v3448_v45  ;;  %v5995_v60 = vmul.f32 %v5355_v24, %v12334_v47  ;;  %v5357_v29 = vmul.f32 0.5, %v4717_v46  ;;  %v3457_v51 = vmul.f32 0.5, %v12413_v44  ;;  %17500 = vst [vmem:[#allocation59_spill] sm:$0xff] %v12435_v33  ;;  %v12441_v47 = vpop.f32.mrb[118].mxu1  ;;  %v12443_v24 = vpop.f32.mrb[182].mxu0 }
 0x2f0   :  { %v12431_v40 = vadd.f32 %v17498_v21, %v10690_v11  ;;  %v6743_v26 = vadd.f32 %v6742_v59, %v5988_v5  ;;  %v5356_v25 = vmul.f32 0.5, %v4716_v6  ;;  %8934 = vtanh.f32 %v3455_v63  ;;  %17502 = vst [vmem:[#allocation60_spill] sm:$0xff] %v12443_v24  ;;  %v12453_v6 = vpop.f32.mrb[119].mxu1  ;;  %v12455_v63 = vpop.f32.mrb[183].mxu0 }
 0x2f1   :  { %v8925_v45 = vpop.eup %8924  ;;  %v12439_v62 = vadd.f32 %v17501_v38, %v10692_v32  ;;  %v6633_v46 = vadd.f32 %v6632_v23, %v5995_v60  ;;  %v5997_v21 = vmul.f32 %v5357_v29, %v12352_v52  ;;  %8936 = vtanh.f32 %v3457_v51  ;;  %17503 = vst [vmem:[#allocation84_spill] sm:$0xff] %v12453_v6  ;;  %17504 = vst [vmem:[#allocation85_spill] sm:$0xff] %v12455_v63  ;;  %v17505_v52 = vld [vmem:[#allocation91_spill] sm:$0xff]  ;;  %v12490_v63 = vpop.f32.mrb[184].mxu0 }
 0x2f2   :  { %v4718_v50 = vadd.f32 1.0, %v8925_v45  ;;  %v5996_v31 = vmul.f32 %v5356_v25, %v12356_v20  ;;  %v3456_v33 = vmul.f32 0.5, %v12431_v40  ;;  %v12451_v5 = vadd.f32 %v11741_v58, %v10684_v8  ;;  %v17506_v25 = vld [vmem:[#allocation36_spill] sm:$0xff]  ;;  %17508 = vst [vmem:[#allocation87_spill] sm:$0xff] %v12490_v63 }
 0x2f3   :  { %v3458_v59 = vmul.f32 0.5, %v12439_v62  ;;  %v6707_v23 = vadd.f32 %v6706_v4, %v5997_v21  ;;  %v12459_v29 = vadd.f32 %v17505_v52, %v10686_v61  ;;  %v12463_v20 = vadd.f32 %v11747_v15, %v10690_v11 }
 0x2f4   :  { %v8927_v38 = vpop.eup %8926  ;;  %v5358_v60 = vmul.f32 0.5, %v4718_v50  ;;  %v6670_v51 = vadd.f32 %v6669_v37, %v5996_v31  ;;  %8938 = vtanh.f32 %v3456_v33  ;;  %v3465_v58 = vmul.f32 0.5, %v12451_v5 }
 0x2f5   :  { %v4725_v45 = vadd.f32 1.0, %v8927_v38  ;;  %7913 = vmatmul.mubr.msk.bf16.gmra.mrb[252].mxu1 %vm282_vm0, %v17506_v25  ;;  %7945 = vmatmul.mubr.msk.bf16.gmra.mrb[60].mxu0 %vm282_vm0, %v17506_v25  ;;  %8940 = vtanh.f32 %v3458_v59  ;;  %v3467_v4 = vmul.f32 0.5, %v12459_v29  ;;  %v3466_v21 = vmul.f32 0.5, %v12463_v20  ;;  %v12488_v25 = vpop.f32.mrb[120].mxu1 }
 0x2f6   :  { %v5998_v50 = vmul.f32 %v5358_v60, %v12363_v54  ;;  %2734 = vmatprep.mubr.bf16.mxu1 %v17258_v13  ;;  %v8929_v15 = vpop.eup %8928  ;;  %8942 = vtanh.f32 %v3465_v58  ;;  %v12476_v31 = vadd.f32 %v11749_v35, %v10692_v32  ;;  %v12480_v33 = vadd.f32 %v11766_v28, %v10684_v8  ;;  %17507 = vst [vmem:[#allocation86_spill] sm:$0xff] %v12488_v25 }
 0x2f7   :  { %v5365_v37 = vmul.f32 0.5, %v4725_v45  ;;  %v4727_v59 = vadd.f32 1.0, %v8929_v15  ;;  %8944 = vtanh.f32 %v3467_v4  ;;  %v12484_v60 = vadd.f32 %v11768_v30, %v10686_v61  ;;  %v12494_v4 = vpop.f32.mrb[121].mxu1  ;;  %v12496_v30 = vpop.f32.mrb[185].mxu0 }
 0x2f8   :  { %v8931_v38 = vpop.eup %8930  ;;  %v6744_v54 = vadd.f32 %v6743_v26, %v5998_v50  ;;  %8946 = vtanh.f32 %v3466_v21  ;;  %v3468_v35 = vmul.f32 0.5, %v12476_v31  ;;  %v3475_v26 = vmul.f32 0.5, %v12480_v33  ;;  %17509 = vst [vmem:[#allocation88_spill] sm:$0xff] %v12494_v4 }
 0x2f9   :  { %v8933_v52 = vpop.eup %8932  ;;  %v6005_v45 = vmul.f32 %v5365_v37, %v12375_v10  ;;  %v4726_v58 = vadd.f32 1.0, %v8931_v38  ;;  %v5367_v28 = vmul.f32 0.5, %v4727_v59  ;;  %v3477_v50 = vmul.f32 0.5, %v12484_v60  ;;  %v12502_v38 = vpop.f32.mrb[122].mxu1 }
 0x2fa   :  { %v4728_v6 = vadd.f32 1.0, %v8933_v52  ;;  %v8935_v15 = vpop.eup %8934  ;;  %8948 = vtanh.f32 %v3468_v35  ;;  %v12500_v21 = vadd.f32 %v11775_v49, %v10690_v11  ;;  %17510 = vst [vmem:[#allocation89_spill] sm:$0xff] %v12502_v38  ;;  %v12504_v59 = vpop.f32.mrb[186].mxu0  ;;  %v17513_v35 = vld [vmem:[#allocation7_spill] sm:$0xff] }
 0x2fb   :  { %v6634_v10 = vadd.f32 %v6633_v46, %v6005_v45  ;;  %v5366_v37 = vmul.f32 0.5, %v4726_v58  ;;  %17511 = vst [vmem:[#allocation90_spill] sm:$0xff] %v12504_v59  ;;  %v8937_v52 = vpop.eup %8936  ;;  %v6007_v63 = vmul.f32 %v5367_v28, %v12388_v12  ;;  %v4735_v24 = vadd.f32 1.0, %v8935_v15  ;;  %v12507_v4 = vpop.f32.mrb[123].mxu1 }
 0x2fc   :  { %v5368_v25 = vmul.f32 0.5, %v4728_v6  ;;  %8950 = vtanh.f32 %v3475_v26  ;;  %v4737_v45 = vadd.f32 1.0, %v8937_v52  ;;  %v3476_v58 = vmul.f32 0.5, %v12500_v21  ;;  %v12511_v49 = vpop.f32.mrb[187].mxu0 }
 0x2fd   :  { %v6006_v46 = vmul.f32 %v5366_v37, %v12392_v39  ;;  %8952 = vtanh.f32 %v3477_v50  ;;  %17512 = vst [vmem:[#allocation91_spill] sm:$0xff] %v12511_v49  ;;  %7946 = vmatmul.mubr.msk.bf16.vlgmr.msra.gmra.mrb[0].mxu1 %vm282_vm0, %v17513_v35  ;;  %v6708_v59 = vadd.f32 %v6707_v23, %v6007_v63  ;;  %v5375_v12 = vmul.f32 0.5, %v4735_v24 }
 0x2fe   :  { %v6008_v38 = vmul.f32 %v5368_v25, %v12401_v42  ;;  %v12518_v6 = vadd.f32 %v11777_v9, %v10692_v32  ;;  %2744 = vmatprep.mubr.bf16.mxu1 %v17258_v13  ;;  %v8939_v39 = vpop.eup %8938  ;;  %v5377_v26 = vmul.f32 0.5, %v4737_v45  ;;  %8954 = vtanh.f32 %v3476_v58 }
 0x2ff   :  { %v6671_v28 = vadd.f32 %v6670_v51, %v6006_v46  ;;  %v12523_v50 = vadd.f32 %v11801_v7, %v10684_v8  ;;  %v8941_v15 = vpop.eup %8940  ;;  %v6015_v63 = vmul.f32 %v5375_v12, %v12409_v1  ;;  %v4736_v42 = vadd.f32 1.0, %v8939_v39 }
 0x300   :  { %v6745_v37 = vadd.f32 %v6744_v54, %v6008_v38  ;;  %v3478_v24 = vmul.f32 0.5, %v12518_v6  ;;  %v8943_v23 = vpop.eup %8942  ;;  %v6017_v9 = vmul.f32 %v5377_v26, %v12413_v44  ;;  %v4738_v25 = vadd.f32 1.0, %v8941_v15 }
 0x301   :  { %v3485_v52 = vmul.f32 0.5, %v12523_v50  ;;  %v12531_v51 = vadd.f32 %v11803_v41, %v10686_v61  ;;  %v8945_v46 = vpop.eup %8944  ;;  %v6635_v7 = vadd.f32 %v6634_v10, %v6015_v63  ;;  %v5376_v45 = vmul.f32 0.5, %v4736_v42  ;;  %v17514_v10 = vld [vmem:[#allocation61_spill] sm:$0xff]  ;;  %v17515_v42 = vld [vmem:[#allocation62_spill] sm:$0xff] }
 0x302   :  { %v4745_v58 = vadd.f32 1.0, %v8943_v23  ;;  %8956 = vtanh.f32 %v3478_v24  ;;  %v8947_v54 = vpop.eup %8946  ;;  %v6709_v1 = vadd.f32 %v6708_v59, %v6017_v9  ;;  %v5378_v38 = vmul.f32 0.5, %v4738_v25  ;;  %v17516_v24 = vld [vmem:[#allocation6_spill] sm:$0xff] }
 0x303   :  { %v4747_v35 = vadd.f32 1.0, %v8945_v46  ;;  %8958 = vtanh.f32 %v3485_v52  ;;  %v6016_v12 = vmul.f32 %v5376_v45, %v12431_v40  ;;  %v4746_v39 = vadd.f32 1.0, %v8947_v54 }
 0x304   :  { %v5385_v44 = vmul.f32 0.5, %v4745_v58  ;;  %v3487_v26 = vmul.f32 0.5, %v12531_v51  ;;  %v8949_v15 = vpop.eup %8948  ;;  %v6018_v41 = vmul.f32 %v5378_v38, %v12439_v62  ;;  %v12538_v63 = vadd.f32 %v17514_v10, %v10690_v11 }
 0x305   :  { %v5387_v49 = vmul.f32 0.5, %v4747_v35  ;;  %v12542_v59 = vadd.f32 %v17515_v42, %v10692_v32  ;;  %7947 = vmatmul.mubr.msk.bf16.gmra.mrb[4].mxu1 %vm282_vm0, %v17516_v24  ;;  %v6672_v23 = vadd.f32 %v6671_v28, %v6016_v12  ;;  %v5386_v25 = vmul.f32 0.5, %v4746_v39 }
 0x306   :  { %v8951_v40 = vpop.eup %8950  ;;  %v6025_v9 = vmul.f32 %v5385_v44, %v12451_v5  ;;  %v4748_v52 = vadd.f32 1.0, %v8949_v15  ;;  %2754 = vmatprep.mubr.bf16.mxu1 %v17258_v13  ;;  %v6746_v46 = vadd.f32 %v6745_v37, %v6018_v41  ;;  %8960 = vtanh.f32 %v3487_v26 }
 0x307   :  { %v8953_v62 = vpop.eup %8952  ;;  %v6027_v45 = vmul.f32 %v5387_v49, %v12459_v29  ;;  %v4755_v58 = vadd.f32 1.0, %v8951_v40  ;;  %v6026_v38 = vmul.f32 %v5386_v25, %v12463_v20  ;;  %v3486_v5 = vmul.f32 0.5, %v12538_v63  ;;  %v12565_v25 = vpop.f32.mrb[124].mxu1 }
 0x308   :  { %v6636_v54 = vadd.f32 %v6635_v7, %v6025_v9  ;;  %v5388_v35 = vmul.f32 0.5, %v4748_v52  ;;  %v4757_v10 = vadd.f32 1.0, %v8953_v62  ;;  %v8955_v42 = vpop.eup %8954  ;;  %v3488_v12 = vmul.f32 0.5, %v12542_v59  ;;  %v17517_v52 = vld [vmem:[#allocation9_spill] sm:$0xff] }
 0x309   :  { %v6710_v24 = vadd.f32 %v6709_v1, %v6027_v45  ;;  %v5395_v28 = vmul.f32 0.5, %v4755_v58  ;;  %v6673_v44 = vadd.f32 %v6672_v23, %v6026_v38  ;;  %v4756_v15 = vadd.f32 1.0, %v8955_v42  ;;  %v12576_v45 = vpop.f32.mrb[125].mxu1 }
 0x30a   :  { %v6028_v39 = vmul.f32 %v5388_v35, %v12476_v31  ;;  %v5397_v37 = vmul.f32 0.5, %v4757_v10  ;;  %8962 = vtanh.f32 %v3486_v5  ;;  %v12556_v20 = vadd.f32 %v11886_v48, %v10684_v8  ;;  %v12567_v48 = vpop.f32.mrb[188].mxu0  ;;  %v12592_v42 = vpop.f32.mrb[126].mxu1 }
 0x30b   :  { %v6035_v29 = vmul.f32 %v5395_v28, %v12480_v33  ;;  %v12560_v49 = vadd.f32 %v11888_v53, %v10686_v61  ;;  %v5396_v41 = vmul.f32 0.5, %v4756_v15  ;;  %8964 = vtanh.f32 %v3488_v12  ;;  %v12578_v58 = vpop.f32.mrb[189].mxu0  ;;  %17518 = vst [vmem:[#allocation7_spill] sm:$0xff] %v12592_v42  ;;  %v17521_v15 = vld [vmem:[#allocation48_spill] sm:$0xff] }
 0x30c   :  { %v8957_v7 = vpop.eup %8956  ;;  %v6747_v1 = vadd.f32 %v6746_v46, %v6028_v39  ;;  %v6037_v26 = vmul.f32 %v5397_v37, %v12484_v60  ;;  %v3495_v33 = vmul.f32 0.5, %v12556_v20  ;;  %v12574_v46 = vadd.f32 %v11892_v55, %v10690_v11 }
 0x30d   :  { %v8959_v31 = vpop.eup %8958  ;;  %v6637_v40 = vadd.f32 %v6636_v54, %v6035_v29  ;;  %v4758_v23 = vadd.f32 1.0, %v8957_v7  ;;  %v3497_v9 = vmul.f32 0.5, %v12560_v49  ;;  %7948 = vmatmul.mubr.msk.bf16.gmra.mrb[8].mxu1 %vm282_vm0, %v17517_v52  ;;  %v6036_v62 = vmul.f32 %v5396_v41, %v12500_v21  ;;  %v12608_v7 = vpop.f32.mrb[127].mxu1 }
 0x30e   :  { %v6711_v53 = vadd.f32 %v6710_v24, %v6037_v26  ;;  %v4765_v60 = vadd.f32 1.0, %v8959_v31  ;;  %2764 = vmatprep.mubr.bf16.mxu1 %v17258_v13  ;;  %8966 = vtanh.f32 %v3495_v33  ;;  %v12583_v38 = vadd.f32 %v11894_v16, %v10692_v32  ;;  %v12594_v24 = vpop.f32.mrb[190].mxu0  ;;  %17522 = vst [vmem:[#allocation62_spill] sm:$0xff] %v12608_v7  ;;  %v17524_v31 = vld [vmem:[#allocation63_spill] sm:$0xff] }
 0x30f   :  { %v5398_v54 = vmul.f32 0.5, %v4758_v23  ;;  %v12587_v21 = vadd.f32 %v11905_v57, %v10684_v8  ;;  %v12589_v35 = vadd.f32 %v6673_v44, %v6036_v62  ;;  %8968 = vtanh.f32 %v3497_v9  ;;  %17519 = vst [vmem:[#allocation61_spill] sm:$0xff] %v12594_v24  ;;  %v17520_v57 = vld [vmem:[#allocation47_spill] sm:$0xff]  ;;  %v12610_v26 = vpop.f32.mrb[191].mxu0 }
 0x310   :  { %v5405_v55 = vmul.f32 0.5, %v4765_v60  ;;  %v3496_v10 = vmul.f32 0.5, %v12574_v46  ;;  %v8961_v28 = vpop.eup %8960  ;;  %v3498_v16 = vmul.f32 0.5, %v12583_v38  ;;  %v12601_v39 = vadd.f32 %v17520_v57, %v10686_v61  ;;  %17523 = vst [vmem:[#allocation6_spill] sm:$0xff] %v12610_v26 }
 0x311   :  { %v6038_v5 = vmul.f32 %v5398_v54, %v12518_v6  ;;  %v3505_v12 = vmul.f32 0.5, %v12587_v21  ;;  %v4767_v37 = vadd.f32 1.0, %v8961_v28  ;;  %v12606_v29 = vadd.f32 %v17521_v15, %v10690_v11  ;;  %v17525_v54 = vld [vmem:[#allocation8_spill] sm:$0xff] }
 0x312   :  { %v6045_v44 = vmul.f32 %v5405_v55, %v12523_v50  ;;  %8970 = vtanh.f32 %v3496_v10  ;;  %v3507_v41 = vmul.f32 0.5, %v12601_v39  ;;  %v12615_v23 = vadd.f32 %v17524_v31, %v10692_v32  ;;  %v17529_v31 = vld [vmem:[#allocation65_spill] sm:$0xff] }
 0x313   :  { %v6748_v6 = vadd.f32 %v6747_v1, %v6038_v5  ;;  %8972 = vtanh.f32 %v3498_v16  ;;  %v5407_v50 = vmul.f32 0.5, %v4767_v37  ;;  %v3506_v9 = vmul.f32 0.5, %v12606_v29  ;;  %v12644_v37 = vpop.f32.mrb[128].mxu1 }
 0x314   :  { %v12617_v33 = vadd.f32 %v6637_v40, %v6045_v44  ;;  %8974 = vtanh.f32 %v3505_v12  ;;  %v8963_v52 = vpop.eup %8962  ;;  %v3508_v62 = vmul.f32 0.5, %v12615_v23  ;;  %v12623_v1 = vadd.f32 %v11927_v34, %v10684_v8  ;;  %17527 = vst [vmem:[#allocation9_spill] sm:$0xff] %v12644_v37 }
 0x315   :  { %8976 = vtanh.f32 %v3507_v41  ;;  %v12627_v60 = vadd.f32 %v11929_v56, %v10686_v61  ;;  %7949 = vmatmul.mubr.msk.bf16.gmra.mrb[12].mxu1 %vm282_vm0, %v17525_v54  ;;  %v8965_v40 = vpop.eup %8964  ;;  %v6047_v55 = vmul.f32 %v5407_v50, %v12531_v51  ;;  %v4766_v10 = vadd.f32 1.0, %v8963_v52  ;;  %v17526_v51 = vld [vmem:[#allocation64_spill] sm:$0xff]  ;;  %v12656_v52 = vpop.f32.mrb[129].mxu1 }
 0x316   :  { %8978 = vtanh.f32 %v3506_v9  ;;  %v12634_v28 = vadd.f32 %v11932_v0, %v10690_v11  ;;  %2774 = vmatprep.mubr.bf16.mxu1 %v17258_v13  ;;  %v4768_v34 = vadd.f32 1.0, %v8965_v40  ;;  %v3515_v5 = vmul.f32 0.5, %v12623_v1  ;;  %v12646_v0 = vpop.f32.mrb[192].mxu0  ;;  %17531 = vst [vmem:[#allocation48_spill] sm:$0xff] %v12656_v52 }
 0x317   :  { %8980 = vtanh.f32 %v3508_v62  ;;  %v3517_v56 = vmul.f32 0.5, %v12627_v60  ;;  %v6712_v16 = vadd.f32 %v6711_v53, %v6047_v55  ;;  %v5406_v12 = vmul.f32 0.5, %v4766_v10  ;;  %17528 = vst [vmem:[#allocation47_spill] sm:$0xff] %v12646_v0  ;;  %v17530_v53 = vld [vmem:[#allocation92_spill] sm:$0xff]  ;;  %v12658_v62 = vpop.f32.mrb[193].mxu0 }
 0x318   :  { %v3516_v57 = vmul.f32 0.5, %v12634_v28  ;;  %v12642_v44 = vadd.f32 %v17526_v51, %v10692_v32  ;;  %v8967_v15 = vpop.eup %8966  ;;  %v5408_v41 = vmul.f32 0.5, %v4768_v34  ;;  %8982 = vtanh.f32 %v3515_v5  ;;  %17532 = vst [vmem:[#allocation63_spill] sm:$0xff] %v12658_v62  ;;  %v12662_v34 = vpop.f32.mrb[130].mxu1 }
 0x319   :  { %v12650_v50 = vadd.f32 %v17529_v31, %v10684_v8  ;;  %v12654_v9 = vadd.f32 %v17530_v53, %v10686_v61  ;;  %v8969_v54 = vpop.eup %8968  ;;  %v6046_v40 = vmul.f32 %v5406_v12, %v12538_v63  ;;  %v4775_v55 = vadd.f32 1.0, %v8967_v15  ;;  %17533 = vst [vmem:[#allocation8_spill] sm:$0xff] %v12662_v34  ;;  %v12666_v53 = vpop.f32.mrb[194].mxu0 }
 0x31a   :  { %8984 = vtanh.f32 %v3517_v56  ;;  %v3518_v10 = vmul.f32 0.5, %v12642_v44  ;;  %v6048_v5 = vmul.f32 %v5408_v41, %v12542_v59  ;;  %v4777_v51 = vadd.f32 1.0, %v8969_v54  ;;  %17534 = vst [vmem:[#allocation64_spill] sm:$0xff] %v12666_v53  ;;  %v12670_v34 = vpop.f32.mrb[131].mxu1  ;;  %v12672_v59 = vpop.f32.mrb[195].mxu0 }
 0x31b   :  { %8986 = vtanh.f32 %v3516_v57  ;;  %v3525_v31 = vmul.f32 0.5, %v12650_v50  ;;  %v6675_v62 = vadd.f32 %v12589_v35, %v6046_v40  ;;  %v5415_v0 = vmul.f32 0.5, %v4775_v55  ;;  %17535 = vst [vmem:[#allocation65_spill] sm:$0xff] %v12670_v34  ;;  %17536 = vst [vmem:[#allocation92_spill] sm:$0xff] %v12672_v59  ;;  %v17537_v57 = vld [vmem:[#allocation11_spill] sm:$0xff]  ;;  %v17538_v40 = vld [vmem:[#allocation66_spill] sm:$0xff] }
 0x31c   :  { %v8971_v52 = vpop.eup %8970  ;;  %8988 = vtanh.f32 %v3518_v10  ;;  %v3527_v63 = vmul.f32 0.5, %v12654_v9  ;;  %v6749_v12 = vadd.f32 %v6748_v6, %v6048_v5  ;;  %v5417_v15 = vmul.f32 0.5, %v4777_v51  ;;  %v17539_v51 = vld [vmem:[#allocation67_spill] sm:$0xff] }
 0x31d   :  { %v8973_v56 = vpop.eup %8972  ;;  %v4776_v37 = vadd.f32 1.0, %v8971_v52  ;;  %8990 = vtanh.f32 %v3525_v31  ;;  %7950 = vmatmul.mubr.msk.bf16.gmra.mrb[16].mxu1 %vm282_vm0, %v17537_v57  ;;  %v6055_v54 = vmul.f32 %v5415_v0, %v12556_v20  ;;  %v12679_v55 = vadd.f32 %v17538_v40, %v10690_v11 }
 0x31e   :  { %v8975_v41 = vpop.eup %8974  ;;  %v4778_v35 = vadd.f32 1.0, %v8973_v56  ;;  %8992 = vtanh.f32 %v3527_v63  ;;  %2784 = vmatprep.mubr.bf16.mxu1 %v17258_v13  ;;  %v6057_v52 = vmul.f32 %v5417_v15, %v12560_v49  ;;  %v12685_v31 = vadd.f32 %v17539_v51, %v10692_v32 }
 0x31f   :  { %v8977_v6 = vpop.eup %8976  ;;  %v5416_v10 = vmul.f32 0.5, %v4776_v37  ;;  %v4785_v5 = vadd.f32 1.0, %v8975_v41  ;;  %v6639_v20 = vadd.f32 %v12617_v33, %v6055_v54  ;;  %v3526_v56 = vmul.f32 0.5, %v12679_v55 }
 0x320   :  { %v8979_v57 = vpop.eup %8978  ;;  %v5418_v0 = vmul.f32 0.5, %v4778_v35  ;;  %v4787_v63 = vadd.f32 1.0, %v8977_v6  ;;  %v6713_v59 = vadd.f32 %v6712_v16, %v6057_v52  ;;  %v3528_v54 = vmul.f32 0.5, %v12685_v31  ;;  %v12693_v35 = vpop.f32.mrb[132].mxu1 }
 0x321   :  { %v8981_v40 = vpop.eup %8980  ;;  %v6056_v34 = vmul.f32 %v5416_v10, %v12574_v46  ;;  %v5425_v53 = vmul.f32 0.5, %v4785_v5  ;;  %v4786_v26 = vadd.f32 1.0, %v8979_v57  ;;  %8994 = vtanh.f32 %v3526_v56  ;;  %17540 = vst [vmem:[#allocation11_spill] sm:$0xff] %v12693_v35  ;;  %v12695_v6 = vpop.f32.mrb[196].mxu0 }
 0x322   :  { %v6058_v49 = vmul.f32 %v5418_v0, %v12583_v38  ;;  %v5427_v37 = vmul.f32 0.5, %v4787_v63  ;;  %v4788_v15 = vadd.f32 1.0, %v8981_v40  ;;  %v8983_v41 = vpop.eup %8982  ;;  %17541 = vst [vmem:[#allocation66_spill] sm:$0xff] %v12695_v6  ;;  %8996 = vtanh.f32 %v3528_v54 }
 0x323   :  { %v6676_v51 = vadd.f32 %v6675_v62, %v6056_v34  ;;  %v6065_v7 = vmul.f32 %v5425_v53, %v12587_v21  ;;  %v5426_v33 = vmul.f32 0.5, %v4786_v26  ;;  %v4795_v38 = vadd.f32 1.0, %v8983_v41  ;;  %v12699_v21 = vpop.f32.mrb[133].mxu1  ;;  %v17543_v26 = vld [vmem:[#allocation10_spill] sm:$0xff] }
 0x324   :  { %v8985_v16 = vpop.eup %8984  ;;  %v6750_v46 = vadd.f32 %v6749_v12, %v6058_v49  ;;  %v6067_v52 = vmul.f32 %v5427_v37, %v12601_v39  ;;  %v5428_v10 = vmul.f32 0.5, %v4788_v15  ;;  %17542 = vst [vmem:[#allocation67_spill] sm:$0xff] %v12699_v21 }
 0x325   :  { %v8987_v5 = vpop.eup %8986  ;;  %v6640_v57 = vadd.f32 %v6639_v20, %v6065_v7  ;;  %v6066_v0 = vmul.f32 %v5426_v33, %v12606_v29  ;;  %v4797_v62 = vadd.f32 1.0, %v8985_v16  ;;  %7951 = vmatmul.mubr.msk.bf16.gmra.mrb[20].mxu1 %vm282_vm0, %v17543_v26  ;;  %v5435_v12 = vmul.f32 0.5, %v4795_v38  ;;  %v17544_v29 = vld [vmem:[#allocation68_spill] sm:$0xff] }
 0x326   :  { %v8989_v34 = vpop.eup %8988  ;;  %v6714_v53 = vadd.f32 %v6713_v59, %v6067_v52  ;;  %v6068_v63 = vmul.f32 %v5428_v10, %v12615_v23  ;;  %v4796_v56 = vadd.f32 1.0, %v8987_v5  ;;  %2794 = vmatprep.mubr.bf16.mxu1 %v17258_v13  ;;  %v12707_v49 = vadd.f32 %v17544_v29, %v10684_v8  ;;  %v17545_v5 = vld [vmem:[#allocation69_spill] sm:$0xff] }
 0x327   :  { %v8991_v39 = vpop.eup %8990  ;;  %v6677_v40 = vadd.f32 %v6676_v51, %v6066_v0  ;;  %v5437_v7 = vmul.f32 0.5, %v4797_v62  ;;  %v4798_v20 = vadd.f32 1.0, %v8989_v34  ;;  %v6075_v41 = vmul.f32 %v5435_v12, %v12623_v1 }
 0x328   :  { %v8993_v37 = vpop.eup %8992  ;;  %v6751_v15 = vadd.f32 %v6750_v46, %v6068_v63  ;;  %v5436_v33 = vmul.f32 0.5, %v4796_v56  ;;  %v4805_v59 = vadd.f32 1.0, %v8991_v39  ;;  %v3535_v52 = vmul.f32 0.5, %v12707_v49 }
 0x329   :  { %v6077_v23 = vmul.f32 %v5437_v7, %v12627_v60  ;;  %v5438_v54 = vmul.f32 0.5, %v4798_v20  ;;  %v4807_v16 = vadd.f32 1.0, %v8993_v37  ;;  %v6641_v10 = vadd.f32 %v6640_v57, %v6075_v41  ;;  %v17546_v57 = vld [vmem:[#allocation50_spill] sm:$0xff]  ;;  %v17549_v20 = vld [vmem:[#allocation72_spill] sm:$0xff] }
 0x32a   :  { %v6076_v51 = vmul.f32 %v5436_v33, %v12634_v28  ;;  %v5445_v38 = vmul.f32 0.5, %v4805_v59  ;;  %v12715_v0 = vadd.f32 %v17545_v5, %v10686_v61  ;;  %8998 = vtanh.f32 %v3535_v52  ;;  %v17550_v33 = vld [vmem:[#allocation73_spill] sm:$0xff] }
 0x32b   :  { %v6715_v62 = vadd.f32 %v6714_v53, %v6077_v23  ;;  %v6078_v46 = vmul.f32 %v5438_v54, %v12642_v44  ;;  %v5447_v1 = vmul.f32 0.5, %v4807_v16  ;;  %v8995_v26 = vpop.eup %8994  ;;  %v12722_v12 = vadd.f32 %v17546_v57, %v10690_v11  ;;  %v17547_v53 = vld [vmem:[#allocation45_spill] sm:$0xff] }
 0x32c   :  { %v6678_v34 = vadd.f32 %v6677_v40, %v6076_v51  ;;  %v6085_v60 = vmul.f32 %v5445_v38, %v12650_v50  ;;  %v3537_v63 = vmul.f32 0.5, %v12715_v0  ;;  %v4806_v39 = vadd.f32 1.0, %v8995_v26  ;;  %v17548_v44 = vld [vmem:[#allocation13_spill] sm:$0xff]  ;;  %v17552_v38 = vld [vmem:[#allocation94_spill] sm:$0xff] }
 0x32d   :  { %v6752_v28 = vadd.f32 %v6751_v15, %v6078_v46  ;;  %v6087_v56 = vmul.f32 %v5447_v1, %v12654_v9  ;;  %v12727_v7 = vadd.f32 %v17547_v53, %v10692_v32  ;;  %7952 = vmatmul.mubr.msk.bf16.gmra.mrb[24].mxu1 %vm282_vm0, %v17548_v44  ;;  %v3536_v50 = vmul.f32 0.5, %v12722_v12  ;;  %v8997_v9 = vpop.eup %8996  ;;  %v17551_v16 = vld [vmem:[#allocation93_spill] sm:$0xff] }
 0x32e   :  { %v12731_v40 = vadd.f32 %v6641_v10, %v6085_v60  ;;  %9000 = vtanh.f32 %v3537_v63  ;;  %v12736_v29 = vadd.f32 %v17549_v20, %v10684_v8  ;;  %2804 = vmatprep.mubr.bf16.mxu1 %v17258_v13  ;;  %v5446_v15 = vmul.f32 0.5, %v4806_v39  ;;  %v17557_v20 = vld [vmem:[#allocation12_spill] sm:$0xff] }
 0x32f   :  { %v12739_v37 = vadd.f32 %v6715_v62, %v6087_v56  ;;  %v3538_v41 = vmul.f32 0.5, %v12727_v7  ;;  %v12744_v59 = vadd.f32 %v17550_v33, %v10686_v61  ;;  %v4808_v23 = vadd.f32 1.0, %v8997_v9  ;;  %v12757_v62 = vpop.f32.mrb[197].mxu0  ;;  %v17558_v33 = vld [vmem:[#allocation95_spill] sm:$0xff] }
 0x330   :  { %9002 = vtanh.f32 %v3536_v50  ;;  %v3545_v54 = vmul.f32 0.5, %v12736_v29  ;;  %v12749_v52 = vadd.f32 %v17551_v16, %v10690_v11  ;;  %v6086_v10 = vmul.f32 %v5446_v15, %v12679_v55  ;;  %17553 = vst [vmem:[#allocation10_spill] sm:$0xff] %v12757_v62  ;;  %v12788_v50 = vpop.f32.mrb[198].mxu0 }
 0x331   :  { %9004 = vtanh.f32 %v3538_v41  ;;  %v3547_v51 = vmul.f32 0.5, %v12744_v59  ;;  %v12755_v5 = vadd.f32 %v17552_v38, %v10692_v32  ;;  %v5448_v46 = vmul.f32 0.5, %v4808_v23  ;;  %17556 = vst [vmem:[#allocation69_spill] sm:$0xff] %v12788_v50  ;;  %v12804_v16 = vpop.f32.mrb[199].mxu0 }
 0x332   :  { %9006 = vtanh.f32 %v3545_v54  ;;  %v3546_v1 = vmul.f32 0.5, %v12749_v52  ;;  %v12762_v26 = vadd.f32 %v12108_v18, %v10684_v8  ;;  %v12764_v60 = vadd.f32 %v6678_v34, %v6086_v10  ;;  %17560 = vst [vmem:[#allocation45_spill] sm:$0xff] %v12804_v16 }
 0x333   :  { %9008 = vtanh.f32 %v3547_v51  ;;  %v3548_v55 = vmul.f32 0.5, %v12755_v5  ;;  %v12769_v63 = vadd.f32 %v12110_v27, %v10686_v61  ;;  %v6088_v57 = vmul.f32 %v5448_v46, %v12685_v31  ;;  %v17554_v27 = vld [vmem:[#allocation74_spill] sm:$0xff]  ;;  %v12786_v31 = vpop.f32.mrb[134].mxu1  ;;  %v17561_v51 = vld [vmem:[#allocation96_spill] sm:$0xff]  ;;  %v17562_v46 = vld [vmem:[#allocation97_spill] sm:$0xff] }
 0x334   :  { %9010 = vtanh.f32 %v3546_v1  ;;  %v3555_v56 = vmul.f32 0.5, %v12762_v26  ;;  %v12775_v39 = vadd.f32 %v12121_v17, %v10690_v11  ;;  %v8999_v18 = vpop.eup %8998  ;;  %v12780_v53 = vadd.f32 %v12123_v3, %v10692_v32  ;;  %17555 = vst [vmem:[#allocation68_spill] sm:$0xff] %v12786_v31  ;;  %v12802_v54 = vpop.f32.mrb[135].mxu1 }
 0x335   :  { %9012 = vtanh.f32 %v3548_v55  ;;  %v3557_v34 = vmul.f32 0.5, %v12769_v63  ;;  %v12784_v44 = vadd.f32 %v17554_v27, %v10684_v8  ;;  %7953 = vmatmul.mubr.msk.bf16.gmra.mrb[28].mxu1 %vm282_vm0, %v17557_v20  ;;  %v12792_v17 = vadd.f32 %v6752_v28, %v6088_v57  ;;  %17559 = vst [vmem:[#allocation50_spill] sm:$0xff] %v12802_v54 }
 0x336   :  { %v4815_v9 = vadd.f32 1.0, %v8999_v18  ;;  %9014 = vtanh.f32 %v3555_v56  ;;  %v3556_v15 = vmul.f32 0.5, %v12775_v39  ;;  %2814 = vmatprep.mubr.bf16.mxu1 %v17258_v13  ;;  %v3558_v3 = vmul.f32 0.5, %v12780_v53  ;;  %v17563_v56 = vld [vmem:[#allocation75_spill] sm:$0xff] }
 0x337   :  { %9016 = vtanh.f32 %v3557_v34  ;;  %v3565_v41 = vmul.f32 0.5, %v12784_v44  ;;  %v12800_v23 = vadd.f32 %v17558_v33, %v10686_v61  ;;  %v12808_v38 = vadd.f32 %v17561_v51, %v10690_v11 }
 0x338   :  { %v9001_v28 = vpop.eup %9000  ;;  %v5455_v10 = vmul.f32 0.5, %v4815_v9  ;;  %9018 = vtanh.f32 %v3556_v15  ;;  %v12812_v1 = vadd.f32 %v17562_v46, %v10692_v32  ;;  %v12817_v18 = vadd.f32 %v17563_v56, %v10684_v8  ;;  %v17564_v56 = vld [vmem:[#allocation76_spill] sm:$0xff] }
 0x339   :  { %v4817_v55 = vadd.f32 1.0, %v9001_v28  ;;  %9020 = vtanh.f32 %v3558_v3  ;;  %v3567_v57 = vmul.f32 0.5, %v12800_v23  ;;  %v3566_v20 = vmul.f32 0.5, %v12808_v38 }
 0x33a   :  { %v9003_v34 = vpop.eup %9002  ;;  %v6095_v27 = vmul.f32 %v5455_v10, %v12707_v49  ;;  %9022 = vtanh.f32 %v3565_v41  ;;  %v3568_v9 = vmul.f32 0.5, %v12812_v1  ;;  %v3575_v3 = vmul.f32 0.5, %v12817_v18 }
 0x33b   :  { %v9005_v15 = vpop.eup %9004  ;;  %v5457_v33 = vmul.f32 0.5, %v4817_v55  ;;  %v4816_v51 = vadd.f32 1.0, %v9003_v34  ;;  %9024 = vtanh.f32 %v3567_v57  ;;  %v12826_v54 = vadd.f32 %v17564_v56, %v10686_v61  ;;  %v12829_v55 = vpop.f32.mrb[136].mxu1  ;;  %v17567_v34 = vld [vmem:[#allocation15_spill] sm:$0xff] }
 0x33c   :  { %v9007_v28 = vpop.eup %9006  ;;  %v6643_v46 = vadd.f32 %v12731_v40, %v6095_v27  ;;  %v4818_v16 = vadd.f32 1.0, %v9005_v15  ;;  %9026 = vtanh.f32 %v3566_v20  ;;  %17565 = vst [vmem:[#allocation13_spill] sm:$0xff] %v12829_v55  ;;  %v12831_v57 = vpop.f32.mrb[200].mxu0 }
 0x33d   :  { %v9009_v49 = vpop.eup %9008  ;;  %v6097_v41 = vmul.f32 %v5457_v33, %v12715_v0  ;;  %v5456_v10 = vmul.f32 0.5, %v4816_v51  ;;  %v4825_v50 = vadd.f32 1.0, %v9007_v28  ;;  %9028 = vtanh.f32 %v3568_v9  ;;  %17566 = vst [vmem:[#allocation72_spill] sm:$0xff] %v12831_v57  ;;  %7954 = vmatmul.mubr.msk.bf16.gmra.mrb[32].mxu1 %vm282_vm0, %v17567_v34  ;;  %v12836_v56 = vpop.f32.mrb[137].mxu1 }
 0x33e   :  { %v9011_v40 = vpop.eup %9010  ;;  %v5458_v27 = vmul.f32 0.5, %v4818_v16  ;;  %v4827_v20 = vadd.f32 1.0, %v9009_v49  ;;  %9030 = vtanh.f32 %v3575_v3  ;;  %v3577_v15 = vmul.f32 0.5, %v12826_v54  ;;  %17568 = vst [vmem:[#allocation73_spill] sm:$0xff] %v12836_v56  ;;  %v12838_v31 = vpop.f32.mrb[201].mxu0  ;;  %2824 = vmatprep.mubr.bf16.mxu1 %v17258_v13 }
 0x33f   :  { %17569 = vst [vmem:[#allocation93_spill] sm:$0xff] %v12838_v31  ;;  %v9013_v0 = vpop.eup %9012  ;;  %v6717_v9 = vadd.f32 %v12739_v37, %v6097_v41  ;;  %v6096_v33 = vmul.f32 %v5456_v10, %v12722_v12  ;;  %v5465_v51 = vmul.f32 0.5, %v4825_v50  ;;  %v4826_v28 = vadd.f32 1.0, %v9011_v40  ;;  %v12843_v34 = vpop.f32.mrb[138].mxu1 }
 0x340   :  { %17570 = vst [vmem:[#allocation94_spill] sm:$0xff] %v12843_v34  ;;  %v12845_v16 = vpop.f32.mrb[202].mxu0  ;;  %v9015_v3 = vpop.eup %9014  ;;  %v6098_v49 = vmul.f32 %v5458_v27, %v12727_v7  ;;  %v5467_v57 = vmul.f32 0.5, %v4827_v20  ;;  %v4828_v56 = vadd.f32 1.0, %v9013_v0  ;;  %9032 = vtanh.f32 %v3577_v15 }
 0x341   :  { %17571 = vst [vmem:[#allocation74_spill] sm:$0xff] %v12845_v16  ;;  %v12848_v31 = vpop.f32.mrb[139].mxu1  ;;  %v12850_v55 = vpop.f32.mrb[203].mxu0  ;;  %v6680_v37 = vadd.f32 %v12764_v60, %v6096_v33  ;;  %v6105_v12 = vmul.f32 %v5465_v51, %v12736_v29  ;;  %v5466_v50 = vmul.f32 0.5, %v4826_v28  ;;  %v4835_v41 = vadd.f32 1.0, %v9015_v3 }
 0x342   :  { %17572 = vst [vmem:[#allocation12_spill] sm:$0xff] %v12848_v31  ;;  %17573 = vst [vmem:[#allocation95_spill] sm:$0xff] %v12850_v55  ;;  %v9017_v62 = vpop.eup %9016  ;;  %v6754_v40 = vadd.f32 %v12792_v17, %v6098_v49  ;;  %v6107_v16 = vmul.f32 %v5467_v57, %v12744_v59  ;;  %v5468_v7 = vmul.f32 0.5, %v4828_v56  ;;  %v12859_v57 = vpop.f32.mrb[140].mxu1 }
 0x343   :  { %v9019_v10 = vpop.eup %9018  ;;  %v4837_v27 = vadd.f32 1.0, %v9017_v62  ;;  %v6644_v15 = vadd.f32 %v6643_v46, %v6105_v12  ;;  %v6106_v0 = vmul.f32 %v5466_v50, %v12749_v52  ;;  %v5475_v31 = vmul.f32 0.5, %v4835_v41  ;;  %17574 = vst [vmem:[#allocation96_spill] sm:$0xff] %v12859_v57  ;;  %v12861_v62 = vpop.f32.mrb[204].mxu0  ;;  %v17576_v46 = vld [vmem:[#allocation14_spill] sm:$0xff] }
 0x344   :  { %v9021_v20 = vpop.eup %9020  ;;  %v4836_v55 = vadd.f32 1.0, %v9019_v10  ;;  %v6718_v21 = vadd.f32 %v6717_v9, %v6107_v16  ;;  %v6108_v60 = vmul.f32 %v5468_v7, %v12755_v5  ;;  %17575 = vst [vmem:[#allocation97_spill] sm:$0xff] %v12861_v62  ;;  %v12866_v49 = vpop.f32.mrb[141].mxu1 }
 0x345   :  { %v9023_v34 = vpop.eup %9022  ;;  %v5477_v29 = vmul.f32 0.5, %v4837_v27  ;;  %v4838_v33 = vadd.f32 1.0, %v9021_v20  ;;  %v6681_v28 = vadd.f32 %v6680_v37, %v6106_v0  ;;  %v6115_v17 = vmul.f32 %v5475_v31, %v12762_v26  ;;  %7955 = vmatmul.mubr.msk.bf16.gmra.mrb[36].mxu1 %vm282_vm0, %v17576_v46  ;;  %17577 = vst [vmem:[#allocation75_spill] sm:$0xff] %v12866_v49  ;;  %v12868_v37 = vpop.f32.mrb[205].mxu0  ;;  %v17580_v46 = vld [vmem:[#allocation77_spill] sm:$0xff] }
 0x346   :  { %v9025_v51 = vpop.eup %9024  ;;  %v5476_v3 = vmul.f32 0.5, %v4836_v55  ;;  %v4845_v59 = vadd.f32 1.0, %v9023_v34  ;;  %v6755_v56 = vadd.f32 %v6754_v40, %v6108_v60  ;;  %17578 = vst [vmem:[#allocation76_spill] sm:$0xff] %v12868_v37  ;;  %2834 = vmatprep.mubr.bf16.mxu1 %v17258_v13 }
 0x347   :  { %v9027_v52 = vpop.eup %9026  ;;  %v6117_v9 = vmul.f32 %v5477_v29, %v12769_v63  ;;  %v5478_v5 = vmul.f32 0.5, %v4838_v33  ;;  %v4847_v16 = vadd.f32 1.0, %v9025_v51  ;;  %v6645_v31 = vadd.f32 %v6644_v15, %v6115_v17 }
 0x348   :  { %v9029_v26 = vpop.eup %9028  ;;  %v6116_v55 = vmul.f32 %v5476_v3, %v12775_v39  ;;  %v5485_v34 = vmul.f32 0.5, %v4845_v59  ;;  %v4846_v12 = vadd.f32 1.0, %v9027_v52  ;;  %v17579_v39 = vld [vmem:[#allocation98_spill] sm:$0xff]  ;;  %v12884_v52 = vadd.f32 %v17580_v46, %v10692_v32 }
 0x349   :  { %v9031_v50 = vpop.eup %9030  ;;  %v6719_v41 = vadd.f32 %v6718_v21, %v6117_v9  ;;  %v6118_v10 = vmul.f32 %v5478_v5, %v12780_v53  ;;  %v5487_v40 = vmul.f32 0.5, %v4847_v16  ;;  %v4848_v63 = vadd.f32 1.0, %v9029_v26  ;;  %v17581_v5 = vld [vmem:[#allocation78_spill] sm:$0xff] }
 0x34a   :  { %v6682_v7 = vadd.f32 %v6681_v28, %v6116_v55  ;;  %v6125_v27 = vmul.f32 %v5485_v34, %v12784_v44  ;;  %v5486_v20 = vmul.f32 0.5, %v4846_v12  ;;  %v4855_v0 = vadd.f32 1.0, %v9031_v50  ;;  %v9033_v60 = vpop.eup %9032  ;;  %v17584_v50 = vld [vmem:[#allocation82_spill] sm:$0xff] }
 0x34b   :  { %v6756_v29 = vadd.f32 %v6755_v56, %v6118_v10  ;;  %v6127_v33 = vmul.f32 %v5487_v40, %v12800_v23  ;;  %v5488_v15 = vmul.f32 0.5, %v4848_v63  ;;  %v12877_v51 = vadd.f32 %v17579_v39, %v10690_v11  ;;  %v17585_v40 = vld [vmem:[#allocation51_spill] sm:$0xff] }
 0x34c   :  { %v6646_v17 = vadd.f32 %v6645_v31, %v6125_v27  ;;  %v6126_v21 = vmul.f32 %v5486_v20, %v12808_v38  ;;  %v5495_v53 = vmul.f32 0.5, %v4855_v0  ;;  %v4857_v3 = vadd.f32 1.0, %v9033_v60  ;;  %v17582_v38 = vld [vmem:[#allocation17_spill] sm:$0xff]  ;;  %v17583_v31 = vld [vmem:[#allocation79_spill] sm:$0xff]  ;;  %v17587_v0 = vld [vmem:[#allocation52_spill] sm:$0xff] }
 0x34d   :  { %v6720_v59 = vadd.f32 %v6719_v41, %v6127_v33  ;;  %v6128_v28 = vmul.f32 %v5488_v15, %v12812_v1  ;;  %v3576_v44 = vmul.f32 0.5, %v12877_v51  ;;  %v12891_v16 = vadd.f32 %v17581_v5, %v10684_v8  ;;  %7956 = vmatmul.mubr.msk.bf16.gmra.mrb[40].mxu1 %vm282_vm0, %v17582_v38  ;;  %v17588_v15 = vld [vmem:[#allocation39_spill] sm:$0xff] }
 0x34e   :  { %v12886_v23 = vadd.f32 %v6682_v7, %v6126_v21  ;;  %v6135_v56 = vmul.f32 %v5495_v53, %v12817_v18  ;;  %v5497_v9 = vmul.f32 0.5, %v4857_v3  ;;  %v3578_v1 = vmul.f32 0.5, %v12884_v52  ;;  %2844 = vmatprep.mubr.bf16.mxu1 %v17258_v13  ;;  %v17586_v7 = vld [vmem:[#allocation83_spill] sm:$0xff]  ;;  %v17589_v21 = vld [vmem:[#allocation40_spill] sm:$0xff]  ;;  %v17590_v3 = vld [vmem:[#allocation41_spill] sm:$0xff] }
 0x34f   :  { %v12895_v26 = vadd.f32 %v6756_v29, %v6128_v28  ;;  %9034 = vtanh.f32 %v3576_v44  ;;  %v12900_v55 = vadd.f32 %v17583_v31, %v10686_v61  ;;  %v3585_v12 = vmul.f32 0.5, %v12891_v16  ;;  %v17591_v44 = vld [vmem:[#allocation43_spill] sm:$0xff] }
 0x350   :  { %v12903_v18 = vadd.f32 %v6646_v17, %v6135_v56  ;;  %v6137_v34 = vmul.f32 %v5497_v9, %v12826_v54  ;;  %v12909_v41 = vadd.f32 %v17584_v50, %v10690_v11  ;;  %9036 = vtanh.f32 %v3578_v1  ;;  %v17592_v56 = vld [vmem:[#allocation44_spill] sm:$0xff]  ;;  %v17593_v1 = vld [vmem:[#allocation53_spill] sm:$0xff] }
 0x351   :  { %v3587_v10 = vmul.f32 0.5, %v12900_v55  ;;  %v12914_v63 = vadd.f32 %v17585_v40, %v10692_v32  ;;  %v12918_v27 = vadd.f32 %v17586_v7, %v10684_v8  ;;  %9038 = vtanh.f32 %v3585_v12 }
 0x352   :  { %v12920_v20 = vadd.f32 %v6720_v59, %v6137_v34  ;;  %v3586_v54 = vmul.f32 0.5, %v12909_v41  ;;  %v12925_v60 = vadd.f32 %v17587_v0, %v10686_v61  ;;  %v12931_v39 = vadd.f32 %v17588_v15, %v10690_v11  ;;  %v17594_v34 = vld [vmem:[#allocation16_spill] sm:$0xff] }
 0x353   :  { %9040 = vtanh.f32 %v3587_v10  ;;  %v3588_v29 = vmul.f32 0.5, %v12914_v63  ;;  %v3595_v33 = vmul.f32 0.5, %v12918_v27  ;;  %v12936_v53 = vadd.f32 %v17589_v21, %v10692_v32  ;;  %v17595_v10 = vld [vmem:[#allocation55_spill] sm:$0xff]  ;;  %v17598_v21 = vld [vmem:[#allocation57_spill] sm:$0xff] }
 0x354   :  { %9042 = vtanh.f32 %v3586_v54  ;;  %v3597_v17 = vmul.f32 0.5, %v12925_v60  ;;  %v12940_v59 = vadd.f32 %v17590_v3, %v10684_v8  ;;  %v3596_v28 = vmul.f32 0.5, %v12931_v39  ;;  %v17596_v54 = vld [vmem:[#allocation56_spill] sm:$0xff] }
 0x355   :  { %9044 = vtanh.f32 %v3588_v29  ;;  %v12945_v46 = vadd.f32 %v17591_v44, %v10686_v61  ;;  %v12949_v9 = vadd.f32 %v17592_v56, %v10690_v11  ;;  %v3598_v5 = vmul.f32 0.5, %v12936_v53  ;;  %7957 = vmatmul.mubr.msk.bf16.gmra.mrb[44].mxu1 %vm282_vm0, %v17594_v34  ;;  %v17597_v29 = vld [vmem:[#allocation46_spill] sm:$0xff]  ;;  %v12984_v44 = vpop.f32.mrb[142].mxu1  ;;  %v12986_v56 = vpop.f32.mrb[206].mxu0 }
 0x356   :  { %9046 = vtanh.f32 %v3595_v33  ;;  %v3605_v38 = vmul.f32 0.5, %v12940_v59  ;;  %v12955_v31 = vadd.f32 %v17593_v1, %v10692_v32  ;;  %v12963_v40 = vadd.f32 %v17595_v10, %v10684_v8  ;;  %2854 = vmatprep.mubr.bf16.mxu1 %v17258_v13  ;;  %17599 = vst [vmem:[#allocation15_spill] sm:$0xff] %v12984_v44  ;;  %17600 = vst [vmem:[#allocation14_spill] sm:$0xff] %v12986_v56 }
 0x357   :  { %9048 = vtanh.f32 %v3597_v17  ;;  %v3607_v12 = vmul.f32 0.5, %v12945_v46  ;;  %v3606_v50 = vmul.f32 0.5, %v12949_v9  ;;  %v12969_v0 = vadd.f32 %v17596_v54, %v10686_v61 }
 0x358   :  { %9050 = vtanh.f32 %v3596_v28  ;;  %v3608_v7 = vmul.f32 0.5, %v12955_v31  ;;  %v12973_v33 = vadd.f32 %v17597_v29, %v10690_v11  ;;  %v3615_v17 = vmul.f32 0.5, %v12963_v40 }
 0x359   :  { %v9035_v15 = vpop.eup %9034  ;;  %9052 = vtanh.f32 %v3598_v5  ;;  %v12978_v3 = vadd.f32 %v17598_v21, %v10692_v32  ;;  %v12982_v28 = vadd.f32 %v12377_v36, %v10684_v8  ;;  %v3617_v34 = vmul.f32 0.5, %v12969_v0  ;;  %v13000_v21 = vpop.f32.mrb[143].mxu1 }
 0x35a   :  { %v4856_v1 = vadd.f32 1.0, %v9035_v15  ;;  %9054 = vtanh.f32 %v3605_v38  ;;  %v3616_v5 = vmul.f32 0.5, %v12973_v33  ;;  %v9037_v10 = vpop.eup %9036  ;;  %v12998_v36 = vadd.f32 %v12382_v14, %v10686_v61  ;;  %17601 = vst [vmem:[#allocation98_spill] sm:$0xff] %v13000_v21  ;;  %v13002_v15 = vpop.f32.mrb[207].mxu0 }
 0x35b   :  { %9056 = vtanh.f32 %v3607_v12  ;;  %v12991_v54 = vmul.f32 0.5, %v12978_v3  ;;  %v12994_v29 = vmul.f32 0.5, %v12982_v28  ;;  %17602 = vst [vmem:[#allocation77_spill] sm:$0xff] %v13002_v15  ;;  %v9039_v38 = vpop.eup %9038  ;;  %v4858_v44 = vadd.f32 1.0, %v9037_v10 }
 0x35c   :  { %v5496_v56 = vmul.f32 0.5, %v4856_v1  ;;  %9058 = vtanh.f32 %v3606_v50  ;;  %v13006_v12 = vadd.f32 %v12394_v43, %v10690_v11  ;;  %v4865_v49 = vadd.f32 1.0, %v9039_v38  ;;  %v17603_v50 = vld [vmem:[#allocation19_spill] sm:$0xff] }
 0x35d   :  { %v9041_v37 = vpop.eup %9040  ;;  %9060 = vtanh.f32 %v3608_v7  ;;  %v13009_v62 = vmul.f32 0.5, %v12998_v36  ;;  %v13013_v14 = vadd.f32 %v12396_v2, %v10692_v32  ;;  %v5498_v1 = vmul.f32 0.5, %v4858_v44  ;;  %7958 = vmatmul.mubr.msk.bf16.gmra.mrb[48].mxu1 %vm282_vm0, %v17603_v50 }
 0x35e   :  { %v9043_v21 = vpop.eup %9042  ;;  %v6136_v15 = vmul.f32 %v5496_v56, %v12877_v51  ;;  %v4867_v10 = vadd.f32 1.0, %v9041_v37  ;;  %9062 = vtanh.f32 %v3615_v17  ;;  %v5505_v57 = vmul.f32 0.5, %v4865_v49  ;;  %2864 = vmatprep.mubr.bf16.mxu1 %v17258_v13  ;;  %v13024_v17 = vpop.f32.mrb[144].mxu1 }
 0x35f   :  { %v9045_v43 = vpop.eup %9044  ;;  %v4866_v38 = vadd.f32 1.0, %v9043_v21  ;;  %9064 = vtanh.f32 %v3617_v34  ;;  %v13019_v7 = vmul.f32 0.5, %v13006_v12  ;;  %v6138_v51 = vmul.f32 %v5498_v1, %v12884_v52  ;;  %v13026_v56 = vpop.f32.mrb[208].mxu0 }
 0x360   :  { %v9047_v2 = vpop.eup %9046  ;;  %v6684_v6 = vadd.f32 %v12886_v23, %v6136_v15  ;;  %v5507_v44 = vmul.f32 0.5, %v4867_v10  ;;  %v4868_v37 = vadd.f32 1.0, %v9045_v43  ;;  %17604 = vst [vmem:[#allocation78_spill] sm:$0xff] %v13026_v56  ;;  %v6145_v49 = vmul.f32 %v5505_v57, %v12891_v16  ;;  %v13029_v35 = vpop.f32.mrb[145].mxu1 }
 0x361   :  { %v9049_v50 = vpop.eup %9048  ;;  %v5506_v34 = vmul.f32 0.5, %v4866_v38  ;;  %v4875_v21 = vadd.f32 1.0, %v9047_v2  ;;  %9066 = vtanh.f32 %v3616_v5  ;;  %v13031_v24 = vpop.f32.mrb[209].mxu0  ;;  %v6758_v23 = vadd.f32 %v12895_v26, %v6138_v51 }
 0x362   :  { %17605 = vst [vmem:[#allocation17_spill] sm:$0xff] %v13031_v24  ;;  %v9051_v42 = vpop.eup %9050  ;;  %v6147_v52 = vmul.f32 %v5507_v44, %v12900_v55  ;;  %v5508_v15 = vmul.f32 0.5, %v4868_v37  ;;  %v4877_v1 = vadd.f32 1.0, %v9049_v50  ;;  %v13035_v10 = vpop.f32.mrb[146].mxu1  ;;  %v6648_v57 = vadd.f32 %v12903_v18, %v6145_v49 }
 0x363   :  { %17606 = vst [vmem:[#allocation79_spill] sm:$0xff] %v13035_v10  ;;  %v13037_v43 = vpop.f32.mrb[210].mxu0  ;;  %v9053_v56 = vpop.eup %9052  ;;  %v6146_v16 = vmul.f32 %v5506_v34, %v12909_v41  ;;  %v5515_v5 = vmul.f32 0.5, %v4875_v21  ;;  %v4876_v38 = vadd.f32 1.0, %v9051_v42  ;;  %9068 = vtanh.f32 %v12991_v54  ;;  %v17611_v54 = vld [vmem:[#allocation21_spill] sm:$0xff] }
 0x364   :  { %17607 = vst [vmem:[#allocation82_spill] sm:$0xff] %v13037_v43  ;;  %v13041_v2 = vpop.f32.mrb[147].mxu1  ;;  %v13043_v24 = vpop.f32.mrb[211].mxu0  ;;  %v6722_v55 = vadd.f32 %v12920_v20, %v6147_v52  ;;  %v6148_v51 = vmul.f32 %v5508_v15, %v12914_v63  ;;  %v5517_v44 = vmul.f32 0.5, %v4877_v1  ;;  %v4878_v37 = vadd.f32 1.0, %v9053_v56 }
 0x365   :  { %17608 = vst [vmem:[#allocation51_spill] sm:$0xff] %v13041_v2  ;;  %17609 = vst [vmem:[#allocation83_spill] sm:$0xff] %v13043_v24  ;;  %v9055_v26 = vpop.eup %9054  ;;  %v6685_v43 = vadd.f32 %v6684_v6, %v6146_v16  ;;  %v6155_v10 = vmul.f32 %v5515_v5, %v12918_v27  ;;  %v5516_v18 = vmul.f32 0.5, %v4876_v38  ;;  %v17610_v24 = vld [vmem:[#allocation18_spill] sm:$0xff]  ;;  %v13056_v5 = vpop.f32.mrb[212].mxu0  ;;  %9070 = vtanh.f32 %v12994_v29 }
 0x366   :  { %v9057_v50 = vpop.eup %9056  ;;  %v4885_v49 = vadd.f32 1.0, %v9055_v26  ;;  %v6759_v34 = vadd.f32 %v6758_v23, %v6148_v51  ;;  %v6157_v42 = vmul.f32 %v5517_v44, %v12925_v60  ;;  %v5518_v21 = vmul.f32 0.5, %v4878_v37  ;;  %7959 = vmatmul.mubr.msk.bf16.gmra.mrb[52].mxu1 %vm282_vm0, %v17610_v24  ;;  %v13054_v60 = vpop.f32.mrb[148].mxu1 }
 0x367   :  { %v9059_v41 = vpop.eup %9058  ;;  %v4887_v2 = vadd.f32 1.0, %v9057_v50  ;;  %v6649_v52 = vadd.f32 %v6648_v57, %v6155_v10  ;;  %v6156_v63 = vmul.f32 %v5516_v18, %v12931_v39  ;;  %2874 = vmatprep.mubr.bf16.mxu1 %v17258_v13  ;;  %v13059_v26 = vpop.f32.mrb[149].mxu1  ;;  %9072 = vtanh.f32 %v13009_v62 }
 0x368   :  { %v9061_v20 = vpop.eup %9060  ;;  %v5525_v56 = vmul.f32 0.5, %v4885_v49  ;;  %v4886_v15 = vadd.f32 1.0, %v9059_v41  ;;  %v6723_v27 = vadd.f32 %v6722_v55, %v6157_v42  ;;  %v6158_v1 = vmul.f32 %v5518_v21, %v12936_v53  ;;  %v13061_v51 = vpop.f32.mrb[213].mxu0 }
 0x369   :  { %v9063_v6 = vpop.eup %9062  ;;  %v5527_v23 = vmul.f32 0.5, %v4887_v2  ;;  %v4888_v16 = vadd.f32 1.0, %v9061_v20  ;;  %v6686_v24 = vadd.f32 %v6685_v43, %v6156_v63  ;;  %v13064_v37 = vpop.f32.mrb[150].mxu1  ;;  %v3628_v63 = vmul.f32 0.5, %v13013_v14 }
 0x36a   :  { %v9065_v38 = vpop.eup %9064  ;;  %v6165_v10 = vmul.f32 %v5525_v56, %v12940_v59  ;;  %v5526_v57 = vmul.f32 0.5, %v4886_v15  ;;  %v4895_v39 = vadd.f32 1.0, %v9063_v6  ;;  %v6760_v44 = vadd.f32 %v6759_v34, %v6158_v1  ;;  %v13066_v50 = vpop.f32.mrb[214].mxu0  ;;  %v17612_v15 = vld [vmem:[#allocation58_spill] sm:$0xff] }
 0x36b   :  { %v6167_v55 = vmul.f32 %v5527_v23, %v12945_v46  ;;  %v5528_v53 = vmul.f32 0.5, %v4888_v16  ;;  %v4897_v2 = vadd.f32 1.0, %v9065_v38  ;;  %v9067_v18 = vpop.eup %9066  ;;  %9074 = vtanh.f32 %v13019_v7  ;;  %v17614_v16 = vld [vmem:[#allocation60_spill] sm:$0xff] }
 0x36c   :  { %v6650_v49 = vadd.f32 %v6649_v52, %v6165_v10  ;;  %v6166_v43 = vmul.f32 %v5526_v57, %v12949_v9  ;;  %v5535_v59 = vmul.f32 0.5, %v4895_v39  ;;  %v4896_v34 = vadd.f32 1.0, %v9067_v18 }
 0x36d   :  { %v6724_v41 = vadd.f32 %v6723_v27, %v6167_v55  ;;  %v6168_v42 = vmul.f32 %v5528_v53, %v12955_v31  ;;  %v5537_v21 = vmul.f32 0.5, %v4897_v2  ;;  %v13089_v29 = vadd.f32 %v12425_v22, %v10686_v61  ;;  %v17613_v27 = vld [vmem:[#allocation59_spill] sm:$0xff]  ;;  %v17617_v2 = vld [vmem:[#allocation86_spill] sm:$0xff] }
 0x36e   :  { %v6687_v20 = vadd.f32 %v6686_v24, %v6166_v43  ;;  %v6175_v46 = vmul.f32 %v5535_v59, %v12963_v40  ;;  %v5536_v9 = vmul.f32 0.5, %v4896_v34  ;;  %7960 = vmatmul.mubr.msk.bf16.gmra.mrb[56].mxu1 %vm282_vm0, %v17611_v54  ;;  %v13085_v40 = vadd.f32 %v12423_v19, %v10684_v8  ;;  %v17615_v24 = vld [vmem:[#allocation84_spill] sm:$0xff]  ;;  %v17618_v59 = vld [vmem:[#allocation87_spill] sm:$0xff] }
 0x36f   :  { %v13074_v56 = vadd.f32 %v6760_v44, %v6168_v42  ;;  %v6177_v52 = vmul.f32 %v5537_v21, %v12969_v0  ;;  %2884 = vmatprep.mubr.bf16.mxu1 %v17258_v13  ;;  %9076 = vtanh.f32 %v3628_v63  ;;  %v13097_v6 = vadd.f32 %v17612_v15, %v10690_v11  ;;  %v17619_v42 = vld [vmem:[#allocation88_spill] sm:$0xff] }
 0x370   :  { %v13080_v31 = vadd.f32 %v6650_v49, %v6175_v46  ;;  %v6176_v62 = vmul.f32 %v5536_v9, %v12973_v33  ;;  %v3635_v7 = vmul.f32 0.5, %v13085_v40  ;;  %v3637_v19 = vmul.f32 0.5, %v13089_v29  ;;  %v9069_v49 = vpop.eup %9068  ;;  %v17620_v63 = vld [vmem:[#allocation20_spill] sm:$0xff] }
 0x371   :  { %v13092_v0 = vadd.f32 %v6724_v41, %v6177_v52  ;;  %v13103_v1 = vadd.f32 %v17613_v27, %v10692_v32  ;;  %v13107_v22 = vadd.f32 %v12441_v47, %v10684_v8  ;;  %v3636_v33 = vmul.f32 0.5, %v13097_v6  ;;  %v17616_v47 = vld [vmem:[#allocation85_spill] sm:$0xff]  ;;  %v9071_v52 = vpop.eup %9070 }
 0x372   :  { %v13109_v23 = vadd.f32 %v6687_v20, %v6176_v62  ;;  %v13114_v38 = vadd.f32 %v17614_v16, %v10686_v61  ;;  %v13118_v10 = vadd.f32 %v17615_v24, %v10690_v11  ;;  %9078 = vtanh.f32 %v3635_v7  ;;  %v17621_v62 = vld [vmem:[#allocation89_spill] sm:$0xff]  ;;  %v9073_v7 = vpop.eup %9072 }
 0x373   :  { %v3638_v57 = vmul.f32 0.5, %v13103_v1  ;;  %v3645_v39 = vmul.f32 0.5, %v13107_v22  ;;  %v13124_v44 = vadd.f32 %v17616_v47, %v10692_v32  ;;  %9080 = vtanh.f32 %v3637_v19 }
 0x374   :  { %v3647_v55 = vmul.f32 0.5, %v13114_v38  ;;  %v3646_v53 = vmul.f32 0.5, %v13118_v10  ;;  %v13130_v18 = vadd.f32 %v17617_v2, %v10684_v8  ;;  %9082 = vtanh.f32 %v3636_v33 }
 0x375   :  { %v3648_v43 = vmul.f32 0.5, %v13124_v44  ;;  %v13135_v41 = vadd.f32 %v17618_v59, %v10686_v61  ;;  %v13139_v21 = vadd.f32 %v17619_v42, %v10690_v11  ;;  %v4898_v34 = vadd.f32 1.0, %v9069_v49  ;;  %v9075_v33 = vpop.eup %9074 }
 0x376   :  { %9084 = vtanh.f32 %v3638_v57  ;;  %v3655_v20 = vmul.f32 0.5, %v13130_v18  ;;  %v13144_v46 = vadd.f32 %v12496_v30, %v10692_v32  ;;  %7961 = vmatmul.mubr.msk.bf16.gmra.mrb[60].mxu1 %vm282_vm0, %v17620_v63  ;;  %v13152_v15 = vadd.f32 %v17621_v62, %v10684_v8  ;;  %v17622_v57 = vld [vmem:[#allocation90_spill] sm:$0xff]  ;;  %v13163_v63 = vpop.f32.mrb[151].mxu1 }
 0x377   :  { %9086 = vtanh.f32 %v3645_v39  ;;  %v3657_v9 = vmul.f32 0.5, %v13135_v41  ;;  %v3656_v54 = vmul.f32 0.5, %v13139_v21  ;;  %2894 = vmatprep.mubr.bf16.mxu1 %v17258_v13  ;;  %v5538_v19 = vmul.f32 0.5, %v4898_v34 }
 0x378   :  { %v4905_v27 = vadd.f32 1.0, %v9071_v52  ;;  %9088 = vtanh.f32 %v3647_v55  ;;  %v3658_v30 = vmul.f32 0.5, %v13144_v46  ;;  %v4907_v16 = vadd.f32 1.0, %v9073_v7 }
 0x379   :  { %9090 = vtanh.f32 %v3646_v53  ;;  %v3665_v24 = vmul.f32 0.5, %v13152_v15  ;;  %v13159_v39 = vadd.f32 %v17622_v57, %v10686_v61  ;;  %v9077_v47 = vpop.eup %9076  ;;  %v6178_v2 = vmul.f32 %v5538_v19, %v12978_v3  ;;  %v13165_v53 = vpop.f32.mrb[215].mxu0 }
 0x37a   :  { %v5545_v49 = vmul.f32 0.5, %v4905_v27  ;;  %v4906_v59 = vadd.f32 1.0, %v9075_v33  ;;  %9092 = vtanh.f32 %v3648_v43  ;;  %v5547_v42 = vmul.f32 0.5, %v4907_v16 }
 0x37b   :  { %v4908_v34 = vadd.f32 1.0, %v9077_v47  ;;  %9094 = vtanh.f32 %v3655_v20  ;;  %v3667_v55 = vmul.f32 0.5, %v13159_v39  ;;  %v6762_v52 = vadd.f32 %v13074_v56, %v6178_v2  ;;  %v17623_v56 = vld [vmem:[#allocation23_spill] sm:$0xff] }
 0x37c   :  { %v6185_v62 = vmul.f32 %v5545_v49, %v12982_v28  ;;  %v5546_v7 = vmul.f32 0.5, %v4906_v59  ;;  %9096 = vtanh.f32 %v3657_v9  ;;  %v9079_v57 = vpop.eup %9078  ;;  %v6187_v3 = vmul.f32 %v5547_v42, %v12998_v36 }
 0x37d   :  { %v5548_v19 = vmul.f32 0.5, %v4908_v34  ;;  %9098 = vtanh.f32 %v3656_v54  ;;  %v13172_v43 = vadd.f32 %v12507_v4, %v10690_v11  ;;  %v9081_v20 = vpop.eup %9080  ;;  %v4915_v16 = vadd.f32 1.0, %v9079_v57 }
 0x37e   :  { %v6652_v27 = vadd.f32 %v13080_v31, %v6185_v62  ;;  %v6186_v33 = vmul.f32 %v5546_v7, %v13006_v12  ;;  %9100 = vtanh.f32 %v3658_v30  ;;  %7962 = vmatmul.mubr.msk.bf16.gmra.mrb[64].mxu1 %vm282_vm0, %v17623_v56  ;;  %v9083_v28 = vpop.eup %9082  ;;  %v6726_v9 = vadd.f32 %v13092_v0, %v6187_v3  ;;  %v13182_v12 = vpop.f32.mrb[152].mxu1 }
 0x37f   :  { %v6188_v36 = vmul.f32 %v5548_v19, %v13013_v14  ;;  %v4917_v54 = vadd.f32 1.0, %v9081_v20  ;;  %9102 = vtanh.f32 %v3665_v24  ;;  %2904 = vmatprep.mubr.bf16.mxu1 %v17258_v13  ;;  %v5555_v31 = vmul.f32 0.5, %v4915_v16  ;;  %v13184_v30 = vpop.f32.mrb[216].mxu0  ;;  %v13187_v34 = vpop.f32.mrb[153].mxu1 }
 0x380   :  { %v9085_v4 = vpop.eup %9084  ;;  %v6689_v47 = vadd.f32 %v13109_v23, %v6186_v33  ;;  %v4916_v2 = vadd.f32 1.0, %v9083_v28  ;;  %9104 = vtanh.f32 %v3667_v55  ;;  %v3666_v14 = vmul.f32 0.5, %v13172_v43  ;;  %v13189_v24 = vpop.f32.mrb[217].mxu0  ;;  %v17625_v55 = vld [vmem:[#allocation91_spill] sm:$0xff] }
 0x381   :  { %v9087_v49 = vpop.eup %9086  ;;  %v6763_v59 = vadd.f32 %v6762_v52, %v6188_v36  ;;  %v5557_v42 = vmul.f32 0.5, %v4917_v54  ;;  %v4918_v0 = vadd.f32 1.0, %v9085_v4  ;;  %17624 = vst [vmem:[#allocation52_spill] sm:$0xff] %v13189_v24  ;;  %v6195_v23 = vmul.f32 %v5555_v31, %v13085_v40  ;;  %v13196_v19 = vpop.f32.mrb[154].mxu1 }
 0x382   :  { %v9089_v62 = vpop.eup %9088  ;;  %v5556_v7 = vmul.f32 0.5, %v4916_v2  ;;  %v4925_v57 = vadd.f32 1.0, %v9087_v49  ;;  %v13194_v3 = vadd.f32 %v17625_v55, %v10692_v32  ;;  %17626 = vst [vmem:[#allocation39_spill] sm:$0xff] %v13196_v19  ;;  %v13198_v52 = vpop.f32.mrb[218].mxu0  ;;  %9106 = vtanh.f32 %v3666_v14 }
 0x383   :  { %17627 = vst [vmem:[#allocation40_spill] sm:$0xff] %v13198_v52  ;;  %v9091_v20 = vpop.eup %9090  ;;  %v6197_v33 = vmul.f32 %v5557_v42, %v13089_v29  ;;  %v5558_v16 = vmul.f32 0.5, %v4918_v0  ;;  %v4927_v56 = vadd.f32 1.0, %v9089_v62  ;;  %v13201_v28 = vpop.f32.mrb[155].mxu1  ;;  %v6653_v54 = vadd.f32 %v6652_v27, %v6195_v23 }
 0x384   :  { %17628 = vst [vmem:[#allocation41_spill] sm:$0xff] %v13201_v28  ;;  %v13203_v36 = vpop.f32.mrb[219].mxu0  ;;  %v9093_v40 = vpop.eup %9092  ;;  %v6196_v4 = vmul.f32 %v5556_v7, %v13097_v6  ;;  %v5565_v31 = vmul.f32 0.5, %v4925_v57  ;;  %v4926_v2 = vadd.f32 1.0, %v9091_v20  ;;  %v17630_v28 = vld [vmem:[#allocation22_spill] sm:$0xff] }
 0x385   :  { %17629 = vst [vmem:[#allocation43_spill] sm:$0xff] %v13203_v36  ;;  %v9095_v49 = vpop.eup %9094  ;;  %v6727_v55 = vadd.f32 %v6726_v9, %v6197_v33  ;;  %v6198_v52 = vmul.f32 %v5558_v16, %v13103_v1  ;;  %v5567_v19 = vmul.f32 0.5, %v4927_v56  ;;  %v4928_v24 = vadd.f32 1.0, %v9093_v40  ;;  %v13215_v16 = vpop.f32.mrb[220].mxu0 }
 0x386   :  { %v9097_v29 = vpop.eup %9096  ;;  %v6690_v42 = vadd.f32 %v6689_v47, %v6196_v4  ;;  %v6205_v0 = vmul.f32 %v5565_v31, %v13107_v22  ;;  %v5566_v14 = vmul.f32 0.5, %v4926_v2  ;;  %v4935_v62 = vadd.f32 1.0, %v9095_v49  ;;  %7963 = vmatmul.mubr.msk.bf16.gmra.mrb[68].mxu1 %vm282_vm0, %v17630_v28  ;;  %v13213_v22 = vpop.f32.mrb[156].mxu1  ;;  %17632 = vst [vmem:[#allocation53_spill] sm:$0xff] %v13215_v16 }
 0x387   :  { %v9099_v27 = vpop.eup %9098  ;;  %v6764_v23 = vadd.f32 %v6763_v59, %v6198_v52  ;;  %v6207_v6 = vmul.f32 %v5567_v19, %v13114_v38  ;;  %v5568_v7 = vmul.f32 0.5, %v4928_v24  ;;  %v4937_v57 = vadd.f32 1.0, %v9097_v29  ;;  %2914 = vmatprep.mubr.bf16.mxu1 %v17258_v13  ;;  %17631 = vst [vmem:[#allocation44_spill] sm:$0xff] %v13213_v22  ;;  %v13218_v24 = vpop.f32.mrb[157].mxu1 }
 0x388   :  { %v9101_v1 = vpop.eup %9100  ;;  %v6654_v9 = vadd.f32 %v6653_v54, %v6205_v0  ;;  %v6206_v20 = vmul.f32 %v5566_v14, %v13118_v10  ;;  %v5575_v47 = vmul.f32 0.5, %v4935_v62  ;;  %v4936_v33 = vadd.f32 1.0, %v9099_v27  ;;  %17633 = vst [vmem:[#allocation16_spill] sm:$0xff] %v13218_v24  ;;  %v13220_v19 = vpop.f32.mrb[221].mxu0 }
 0x389   :  { %v9103_v56 = vpop.eup %9102  ;;  %v6728_v28 = vadd.f32 %v6727_v55, %v6207_v6  ;;  %v6208_v59 = vmul.f32 %v5568_v7, %v13124_v44  ;;  %v5577_v52 = vmul.f32 0.5, %v4937_v57  ;;  %v4938_v38 = vadd.f32 1.0, %v9101_v1  ;;  %17634 = vst [vmem:[#allocation55_spill] sm:$0xff] %v13220_v19  ;;  %v13223_v2 = vpop.f32.mrb[158].mxu1 }
 0x38a   :  { %v9105_v40 = vpop.eup %9104  ;;  %v6691_v54 = vadd.f32 %v6690_v42, %v6206_v20  ;;  %v6215_v10 = vmul.f32 %v5575_v47, %v13130_v18  ;;  %v5576_v4 = vmul.f32 0.5, %v4936_v33  ;;  %v4945_v31 = vadd.f32 1.0, %v9103_v56  ;;  %17635 = vst [vmem:[#allocation56_spill] sm:$0xff] %v13223_v2  ;;  %v13225_v49 = vpop.f32.mrb[222].mxu0 }
 0x38b   :  { %17636 = vst [vmem:[#allocation46_spill] sm:$0xff] %v13225_v49  ;;  %v6765_v29 = vadd.f32 %v6764_v23, %v6208_v59  ;;  %v6217_v55 = vmul.f32 %v5577_v52, %v13135_v41  ;;  %v5578_v44 = vmul.f32 0.5, %v4938_v38  ;;  %v4947_v0 = vadd.f32 1.0, %v9105_v40  ;;  %v13228_v14 = vpop.f32.mrb[159].mxu1  ;;  %v13230_v62 = vpop.f32.mrb[223].mxu0 }
 0x38c   :  { %17637 = vst [vmem:[#allocation57_spill] sm:$0xff] %v13228_v14  ;;  %17638 = vst [vmem:[#allocation19_spill] sm:$0xff] %v13230_v62  ;;  %v6655_v27 = vadd.f32 %v6654_v9, %v6215_v10  ;;  %v6216_v42 = vmul.f32 %v5576_v4, %v13139_v21  ;;  %v5585_v6 = vmul.f32 0.5, %v4945_v31  ;;  %v3668_v18 = vmul.f32 0.5, %v13194_v3  ;;  %v9107_v7 = vpop.eup %9106  ;;  %v17639_v9 = vld [vmem:[#allocation25_spill] sm:$0xff] }
 0x38d   :  { %v6729_v57 = vadd.f32 %v6728_v28, %v6217_v55  ;;  %v6218_v1 = vmul.f32 %v5578_v44, %v13144_v46  ;;  %v5587_v20 = vmul.f32 0.5, %v4947_v0  ;;  %v13237_v41 = vadd.f32 %v12565_v25, %v10684_v8  ;;  %v17641_v4 = vld [vmem:[#allocation61_spill] sm:$0xff]  ;;  %v17643_v0 = vld [vmem:[#allocation6_spill] sm:$0xff] }
 0x38e   :  { %v6692_v23 = vadd.f32 %v6691_v54, %v6216_v42  ;;  %v6225_v47 = vmul.f32 %v5585_v6, %v13152_v15  ;;  %v4946_v33 = vadd.f32 1.0, %v9107_v7  ;;  %9108 = vtanh.f32 %v3668_v18  ;;  %7964 = vmatmul.mubr.msk.bf16.gmra.mrb[72].mxu1 %vm282_vm0, %v17639_v9  ;;  %v17644_v6 = vld [vmem:[#allocation38_spill] sm:$0xff]  ;;  %v17653_v9 = vld [vmem:[#allocation47_spill] sm:$0xff] }
 0x38f   :  { %v13242_v21 = vadd.f32 %v6765_v29, %v6218_v1  ;;  %v6227_v56 = vmul.f32 %v5587_v20, %v13159_v39  ;;  %v3675_v28 = vmul.f32 0.5, %v13237_v41  ;;  %v13248_v46 = vadd.f32 %v12567_v48, %v10686_v61  ;;  %2924 = vmatprep.mubr.bf16.mxu1 %v17258_v13  ;;  %v17640_v48 = vld [vmem:[#allocation7_spill] sm:$0xff]  ;;  %v17649_v20 = vld [vmem:[#allocation24_spill] sm:$0xff] }
 0x390   :  { %v13251_v25 = vadd.f32 %v6655_v27, %v6225_v47  ;;  %v5586_v15 = vmul.f32 0.5, %v4946_v33  ;;  %v13255_v59 = vadd.f32 %v12576_v45, %v10690_v11  ;;  %v13259_v52 = vadd.f32 %v12578_v58, %v10692_v32  ;;  %v1041_v58 = vld [vmem:[%s17108_s4 + $0x8] sm:$0x3]  ;;  %v17652_v33 = vld [vmem:[#allocation49_spill] sm:$0xff] }
 0x391   :  { %v13261_v39 = vadd.f32 %v6729_v57, %v6227_v56  ;;  %9110 = vtanh.f32 %v3675_v28  ;;  %v3677_v38 = vmul.f32 0.5, %v13248_v46  ;;  %v13266_v40 = vadd.f32 %v17640_v48, %v10684_v8  ;;  %v17642_v8 = vld [vmem:[#allocation62_spill] sm:$0xff] }
 0x392   :  { %v6226_v54 = vmul.f32 %v5586_v15, %v13172_v43  ;;  %v3676_v10 = vmul.f32 0.5, %v13255_v59  ;;  %v3678_v45 = vmul.f32 0.5, %v13259_v52  ;;  %v13273_v31 = vadd.f32 %v17641_v4, %v10686_v61  ;;  %v17654_v28 = vld [vmem:[#allocation54_spill] sm:$0xff]  ;;  %v17655_v15 = vld [vmem:[#allocation48_spill] sm:$0xff] }
 0x393   :  { %9112 = vtanh.f32 %v3677_v38  ;;  %v3685_v29 = vmul.f32 0.5, %v13266_v40  ;;  %v13281_v55 = vadd.f32 %v17642_v8, %v10690_v11  ;;  %v13288_v61 = vadd.f32 %v17643_v0, %v10692_v32  ;;  %v17650_v32 = vld [vmem:[#allocation70_spill] sm:$0xff]  ;;  %v17658_v4 = vld [vmem:[#allocation8_spill] sm:$0xff] }
 0x394   :  { %v13283_v43 = vadd.f32 %v6692_v23, %v6226_v54  ;;  %9114 = vtanh.f32 %v3676_v10  ;;  %v3687_v44 = vmul.f32 0.5, %v13273_v31  ;;  %v9922_v27 = vmov 0.0   ;;  %v17651_v23 = vld [vmem:[#allocation9_spill] sm:$0xff]  ;;  %v17656_v54 = vld [vmem:[#allocation42_spill] sm:$0xff]  ;;  %v17657_v10 = vld [vmem:[#allocation63_spill] sm:$0xff] }
 0x395   :  { %34 = vst [vmem:[#allocation2 + $0x10] sm:$0xf] %v9922_v27  ;;  %9116 = vtanh.f32 %v3678_v45  ;;  %v3686_v42 = vmul.f32 0.5, %v13281_v55  ;;  %v17645_v18 = vsub.s32 0, %v17644_v6  ;;  %v17647_v11 = vsub.s32 1, %v17644_v6 }
 0x396   :  { %9118 = vtanh.f32 %v3685_v29  ;;  %v3688_v1 = vmul.f32 0.5, %v13288_v61  ;;  %7965 = vmatmul.mubr.msk.bf16.gmra.mrb[76].mxu1 %vm282_vm0, %v17649_v20  ;;  %v13304_v47 = vadd.f32 %v17651_v23, %v17650_v32  ;;  %v13308_v56 = vadd.f32 %v17653_v9, %v17652_v33  ;;  %v17659_v29 = vld [vmem:[#allocation64_spill] sm:$0xff]  ;;  %v17660_v9 = vld [vmem:[#allocation65_spill] sm:$0xff] }
 0x397   :  { %v13293_v7 = vrot.slane %v1041_v58, %v17645_v18  ;;  %v13297_v57 = vrot.slane %v1041_v58, %v17647_v11  ;;  %9120 = vtanh.f32 %v3687_v44  ;;  %v13312_v38 = vadd.f32 %v17655_v15, %v17654_v28  ;;  %2934 = vmatprep.mubr.bf16.mxu1 %v17258_v13 }
 0x398   :  { %v9109_v48 = vpop.eup %9108  ;;  %9122 = vtanh.f32 %v3686_v42  ;;  %v13317_v45 = vadd.f32 %v17657_v10, %v17656_v54  ;;  %v13321_v58 = vadd.f32 %v17658_v4, %v17650_v32  ;;  %v13325_v8 = vadd.f32 %v17659_v29, %v17652_v33  ;;  %v17662_v4 = vld [vmem:[#allocation11_spill] sm:$0xff] }
 0x399   :  { %17646 = vst [vmem:[#allocation18_spill] sm:$0xff] %v13293_v7  ;;  %17648 = vst [vmem:[#allocation21_spill] sm:$0xff] %v13297_v57  ;;  %v4948_v44 = vadd.f32 1.0, %v9109_v48  ;;  %9124 = vtanh.f32 %v3688_v1  ;;  %v3059_v0 = vmul.f32 0.5, %v13304_v47  ;;  %v3061_v27 = vmul.f32 0.5, %v13308_v56  ;;  %v17661_v1 = vld [vmem:[#allocation92_spill] sm:$0xff] }
 0x39a   :  { %v3060_v42 = vmul.f32 0.5, %v13312_v38  ;;  %v3062_v6 = vmul.f32 0.5, %v13317_v45  ;;  %v3069_v18 = vmul.f32 0.5, %v13321_v58  ;;  %v3071_v11 = vmul.f32 0.5, %v13325_v8  ;;  %v17663_v57 = vld [vmem:[#allocation66_spill] sm:$0xff] }
 0x39b   :  { %v9111_v20 = vpop.eup %9110  ;;  %v5588_v23 = vmul.f32 0.5, %v4948_v44  ;;  %9126 = vtanh.f32 %v3059_v0  ;;  %v13335_v15 = vadd.f32 %v17660_v9, %v17654_v28  ;;  %v13339_v48 = vadd.f32 %v17661_v1, %v17656_v54 }
 0x39c   :  { %v4955_v10 = vadd.f32 1.0, %v9111_v20  ;;  %9128 = vtanh.f32 %v3061_v27  ;;  %v13343_v29 = vadd.f32 %v17662_v4, %v17650_v32  ;;  %v13347_v7 = vadd.f32 %v17663_v57, %v17652_v33  ;;  %v17664_v4 = vld [vmem:[#allocation27_spill] sm:$0xff] }
 0x39d   :  { %v9113_v44 = vpop.eup %9112  ;;  %v6228_v0 = vmul.f32 %v5588_v23, %v13194_v3  ;;  %9130 = vtanh.f32 %v3060_v42  ;;  %v3070_v9 = vmul.f32 0.5, %v13335_v15  ;;  %v3072_v62 = vmul.f32 0.5, %v13339_v48 }
 0x39e   :  { %v9115_v1 = vpop.eup %9114  ;;  %v5595_v14 = vmul.f32 0.5, %v4955_v10  ;;  %v4957_v20 = vadd.f32 1.0, %v9113_v44  ;;  %9132 = vtanh.f32 %v3062_v6  ;;  %v3079_v27 = vmul.f32 0.5, %v13343_v29  ;;  %7966 = vmatmul.mubr.msk.bf16.gmra.mrb[80].mxu1 %vm282_vm0, %v17664_v4  ;;  %v17665_v4 = vld [vmem:[#allocation67_spill] sm:$0xff] }
 0x39f   :  { %v9117_v49 = vpop.eup %9116  ;;  %v6767_v57 = vadd.f32 %v13242_v21, %v6228_v0  ;;  %v4956_v2 = vadd.f32 1.0, %v9115_v1  ;;  %9134 = vtanh.f32 %v3069_v18  ;;  %v3081_v3 = vmul.f32 0.5, %v13347_v7  ;;  %2944 = vmatprep.mubr.bf16.mxu1 %v17258_v13 }
 0x3a0   :  { %v9119_v42 = vpop.eup %9118  ;;  %v6235_v23 = vmul.f32 %v5595_v14, %v13237_v41  ;;  %v5597_v10 = vmul.f32 0.5, %v4957_v20  ;;  %v4958_v44 = vadd.f32 1.0, %v9117_v49  ;;  %9136 = vtanh.f32 %v3071_v11 }
 0x3a1   :  { %v9121_v6 = vpop.eup %9120  ;;  %v5596_v19 = vmul.f32 0.5, %v4956_v2  ;;  %v4965_v24 = vadd.f32 1.0, %v9119_v42  ;;  %9138 = vtanh.f32 %v3070_v9  ;;  %v13361_v16 = vadd.f32 %v17665_v4, %v17654_v28 }
 0x3a2   :  { %v9123_v21 = vpop.eup %9122  ;;  %v6657_v18 = vadd.f32 %v13251_v25, %v6235_v23  ;;  %v6237_v0 = vmul.f32 %v5597_v10, %v13248_v46  ;;  %v5598_v1 = vmul.f32 0.5, %v4958_v44  ;;  %v4967_v22 = vadd.f32 1.0, %v9121_v6  ;;  %v13370_v23 = vpop.f32.mrb[160].mxu1 }
 0x3a3   :  { %v9125_v36 = vpop.eup %9124  ;;  %v6236_v14 = vmul.f32 %v5596_v19, %v13255_v59  ;;  %v5605_v49 = vmul.f32 0.5, %v4965_v24  ;;  %v4966_v41 = vadd.f32 1.0, %v9123_v21  ;;  %9140 = vtanh.f32 %v3072_v62  ;;  %v13372_v10 = vpop.f32.mrb[224].mxu0 }
 0x3a4   :  { %v6731_v2 = vadd.f32 %v13261_v39, %v6237_v0  ;;  %v6238_v11 = vmul.f32 %v5598_v1, %v13259_v52  ;;  %v5607_v9 = vmul.f32 0.5, %v4967_v22  ;;  %v4968_v20 = vadd.f32 1.0, %v9125_v36  ;;  %v13375_v52 = vpop.f32.mrb[161].mxu1  ;;  %v13377_v36 = vpop.f32.mrb[225].mxu0  ;;  %v17666_v22 = vld [vmem:[#allocation26_spill] sm:$0xff] }
 0x3a5   :  { %v9127_v42 = vpop.eup %9126  ;;  %v6694_v4 = vadd.f32 %v13283_v43, %v6236_v14  ;;  %v6245_v25 = vmul.f32 %v5605_v49, %v13266_v40  ;;  %v5606_v46 = vmul.f32 0.5, %v4966_v41  ;;  %9142 = vtanh.f32 %v3079_v27  ;;  %v13382_v6 = vpop.f32.mrb[162].mxu1 }
 0x3a6   :  { %v9129_v24 = vpop.eup %9128  ;;  %v6768_v19 = vadd.f32 %v6767_v57, %v6238_v11  ;;  %v6247_v62 = vmul.f32 %v5607_v9, %v13273_v31  ;;  %v5608_v59 = vmul.f32 0.5, %v4968_v20  ;;  %v4339_v39 = vadd.f32 1.0, %v9127_v42  ;;  %7967 = vmatmul.mubr.msk.bf16.gmra.mrb[84].mxu1 %vm282_vm0, %v17666_v22  ;;  %17667 = vst [vmem:[#allocation58_spill] sm:$0xff] %v13382_v6  ;;  %v13384_v57 = vpop.f32.mrb[226].mxu0 }
 0x3a7   :  { %v9131_v40 = vpop.eup %9130  ;;  %v6658_v43 = vadd.f32 %v6657_v18, %v6245_v25  ;;  %v6246_v27 = vmul.f32 %v5606_v46, %v13281_v55  ;;  %v4341_v44 = vadd.f32 1.0, %v9129_v24  ;;  %9144 = vtanh.f32 %v3081_v3  ;;  %17668 = vst [vmem:[#allocation59_spill] sm:$0xff] %v13384_v57  ;;  %2954 = vmatprep.mubr.bf16.mxu1 %v17258_v13  ;;  %v13388_v49 = vpop.f32.mrb[163].mxu1 }
 0x3a8   :  { %v9133_v31 = vpop.eup %9132  ;;  %v6732_v21 = vadd.f32 %v6731_v2, %v6247_v62  ;;  %v6248_v0 = vmul.f32 %v5608_v59, %v13288_v61  ;;  %v4979_v1 = vmul.f32 0.5, %v4339_v39  ;;  %v4340_v14 = vadd.f32 1.0, %v9131_v40  ;;  %17669 = vst [vmem:[#allocation60_spill] sm:$0xff] %v13388_v49  ;;  %v13390_v41 = vpop.f32.mrb[227].mxu0 }
 0x3a9   :  { %17670 = vst [vmem:[#allocation84_spill] sm:$0xff] %v13390_v41  ;;  %v9135_v18 = vpop.eup %9134  ;;  %v6659_v55 = vrot.slane %v6658_v43, 4  ;;  %v6695_v11 = vadd.f32 %v6694_v4, %v6246_v27  ;;  %v4981_v3 = vmul.f32 0.5, %v4341_v44  ;;  %v4342_v9 = vadd.f32 1.0, %v9133_v31 }
 0x3aa   :  { %v9137_v20 = vpop.eup %9136  ;;  %v6733_v42 = vrot.slane %v6732_v21, 4  ;;  %v6769_v25 = vadd.f32 %v6768_v19, %v6248_v0  ;;  %v5619_v46 = vmul.f32 %v4979_v1, %v13304_v47  ;;  %v4980_v24 = vmul.f32 0.5, %v4340_v14  ;;  %v13396_v0 = vpop.f32.mrb[164].mxu1 }
 0x3ab   :  { %v9139_v2 = vpop.eup %9138  ;;  %v6660_v62 = vadd.f32 %v6659_v55, %v6658_v43  ;;  %v6696_v61 = vrot.slane %v6695_v11, 4  ;;  %v5621_v59 = vmul.f32 %v4981_v3, %v13308_v56  ;;  %v4982_v39 = vmul.f32 0.5, %v4342_v9  ;;  %17671 = vst [vmem:[#allocation85_spill] sm:$0xff] %v13396_v0  ;;  %v13398_v47 = vpop.f32.mrb[228].mxu0 }
 0x3ac   :  { %v6734_v22 = vadd.f32 %v6733_v42, %v6732_v21  ;;  %v6770_v40 = vrot.slane %v6769_v25, 4  ;;  %v5620_v41 = vmul.f32 %v4980_v24, %v13312_v38  ;;  %v4349_v49 = vadd.f32 1.0, %v9135_v18  ;;  %17672 = vst [vmem:[#allocation86_spill] sm:$0xff] %v13398_v47  ;;  %v13400_v55 = vpop.f32.mrb[165].mxu1  ;;  %v13402_v21 = vpop.f32.mrb[229].mxu0  ;;  %v17675_v38 = vld [vmem:[#allocation29_spill] sm:$0xff] }
 0x3ad   :  { %v9141_v4 = vpop.eup %9140  ;;  %v6661_v27 = vrot.slane %v6660_v62, 2  ;;  %v6697_v44 = vadd.f32 %v6696_v61, %v6695_v11  ;;  %v5622_v31 = vmul.f32 %v4982_v39, %v13317_v45  ;;  %v4351_v19 = vadd.f32 1.0, %v9137_v20  ;;  %17673 = vst [vmem:[#allocation87_spill] sm:$0xff] %v13400_v55  ;;  %17674 = vst [vmem:[#allocation88_spill] sm:$0xff] %v13402_v21  ;;  %v13406_v20 = vpop.f32.mrb[166].mxu1 }
 0x3ae   :  { %v6735_v43 = vrot.slane %v6734_v22, 2  ;;  %v6771_v1 = vadd.f32 %v6770_v40, %v6769_v25  ;;  %v4989_v14 = vmul.f32 0.5, %v4349_v49  ;;  %v4350_v56 = vadd.f32 1.0, %v9139_v2  ;;  %7968 = vmatmul.mubr.msk.bf16.gmra.mrb[88].mxu1 %vm282_vm0, %v17675_v38  ;;  %17676 = vst [vmem:[#allocation20_spill] sm:$0xff] %v13406_v20  ;;  %v13408_v42 = vpop.f32.mrb[230].mxu0  ;;  %v13412_v61 = vpop.f32.mrb[167].mxu1 }
 0x3af   :  { %v9143_v18 = vpop.eup %9142  ;;  %v6662_v11 = vadd.f32 %v6661_v27, %v6660_v62  ;;  %v6698_v3 = vrot.slane %v6697_v44, 2  ;;  %v4991_v45 = vmul.f32 0.5, %v4351_v19  ;;  %v4352_v9 = vadd.f32 1.0, %v9141_v4  ;;  %17677 = vst [vmem:[#allocation89_spill] sm:$0xff] %v13408_v42  ;;  %2964 = vmatprep.mubr.bf16.mxu1 %v17258_v13  ;;  %17678 = vst [vmem:[#allocation90_spill] sm:$0xff] %v13412_v61  ;;  %v13414_v39 = vpop.f32.mrb[231].mxu0 }
 0x3b0   :  { %v6736_v49 = vadd.f32 %v6735_v43, %v6734_v22  ;;  %v6772_v25 = vrot.slane %v6771_v1, 2  ;;  %v5629_v24 = vmul.f32 %v4989_v14, %v13321_v58  ;;  %v4990_v2 = vmul.f32 0.5, %v4350_v56  ;;  %17679 = vst [vmem:[#allocation23_spill] sm:$0xff] %v13414_v39 }
 0x3b1   :  { %v9145_v40 = vpop.eup %9144  ;;  %v6663_v62 = vrot.slane %v6662_v11, 1  ;;  %v6699_v27 = vadd.f32 %v6698_v3, %v6697_v44  ;;  %v5631_v4 = vmul.f32 %v4991_v45, %v13325_v8  ;;  %v4992_v19 = vmul.f32 0.5, %v4352_v9  ;;  %v17685_v9 = vld [vmem:[#allocation69_spill] sm:$0xff] }
 0x3b2   :  { %v6737_v38 = vrot.slane %v6736_v49, 1  ;;  %v6773_v20 = vadd.f32 %v6772_v25, %v6771_v1  ;;  %v6406_v42 = vadd.f32 %v5629_v24, %v5619_v46  ;;  %v5630_v21 = vmul.f32 %v4990_v2, %v13335_v15  ;;  %v13424_v46 = vpop.f32.mrb[168].mxu1  ;;  %v13426_v15 = vpop.f32.mrb[232].mxu0 }
 0x3b3   :  { %v6664_v22 = vadd.f32 %v6663_v62, %v6662_v11  ;;  %v6700_v43 = vrot.slane %v6699_v27, 1  ;;  %v6480_v55 = vadd.f32 %v5631_v4, %v5621_v59  ;;  %v5632_v58 = vmul.f32 %v4992_v19, %v13339_v48  ;;  %17680 = vst [vmem:[#allocation91_spill] sm:$0xff] %v13424_v46  ;;  %17681 = vst [vmem:[#allocation22_spill] sm:$0xff] %v13426_v15  ;;  %v17682_v48 = vld [vmem:[#allocation10_spill] sm:$0xff]  ;;  %v13453_v19 = vpop.f32.mrb[169].mxu1 }
 0x3b4   :  { %v6738_v14 = vadd.f32 %v6737_v38, %v6736_v49  ;;  %v6774_v56 = vrot.slane %v6773_v20, 1  ;;  %v13419_v61 = vadd.f32 %v5630_v21, %v5620_v41  ;;  %v4359_v39 = vadd.f32 1.0, %v9143_v18  ;;  %v17683_v41 = vld [vmem:[#allocation68_spill] sm:$0xff]  ;;  %17688 = vst [vmem:[#allocation25_spill] sm:$0xff] %v13453_v19  ;;  %v13455_v38 = vpop.f32.mrb[233].mxu0 }
 0x3b5   :  { %v6701_v47 = vadd.f32 %v6700_v43, %v6699_v27  ;;  %v13421_v44 = vadd.f32 %v5632_v58, %v5622_v31  ;;  %v4361_v8 = vadd.f32 1.0, %v9145_v40  ;;  %v3080_v1 = vmul.f32 0.5, %v13361_v16  ;;  %v17684_v31 = vld [vmem:[#allocation28_spill] sm:$0xff]  ;;  %v17687_v27 = vld [vmem:[#allocation50_spill] sm:$0xff]  ;;  %17689 = vst [vmem:[#allocation7_spill] sm:$0xff] %v13455_v38  ;;  %v17690_v43 = vld [vmem:[#allocation45_spill] sm:$0xff] }
 0x3b6   :  { %v6775_v11 = vadd.f32 %v6774_v56, %v6773_v20  ;;  %v4999_v59 = vmul.f32 0.5, %v4359_v39  ;;  %v13430_v3 = vadd.f32 %v17682_v48, %v17656_v54  ;;  %v13434_v21 = vadd.f32 %v17683_v41, %v17650_v32  ;;  %7969 = vmatmul.mubr.msk.bf16.gmra.mrb[92].mxu1 %vm282_vm0, %v17684_v31  ;;  %v17686_v39 = vld [vmem:[#allocation71_spill] sm:$0xff]  ;;  %v17691_v56 = vld [vmem:[#allocation13_spill] sm:$0xff] }
 0x3b7   :  { %v7060_v18 = vcombine.low %v6664_v22, %v6701_v47  ;;  %v5001_v45 = vmul.f32 0.5, %v4361_v8  ;;  %9146 = vtanh.f32 %v3080_v1  ;;  %v13440_v20 = vadd.f32 %v17685_v9, %v17652_v33  ;;  %2974 = vmatprep.mubr.bf16.mxu1 %v17258_v13  ;;  %v17694_v31 = vld [vmem:[#allocation93_spill] sm:$0xff] }
 0x3b8   :  { %v7061_v49 = vcombine.low %v6738_v14, %v6775_v11  ;;  %v5639_v25 = vmul.f32 %v4999_v59, %v13343_v29  ;;  %v3082_v24 = vmul.f32 0.5, %v13430_v3  ;;  %v3089_v2 = vmul.f32 0.5, %v13434_v21 }
 0x3b9   :  { %v7068_v40 = vrot.slane %v7060_v18, %v17686_v39  ;;  %v5641_v47 = vmul.f32 %v5001_v45, %v13347_v7  ;;  %v3091_v62 = vmul.f32 0.5, %v13440_v20  ;;  %v13451_v4 = vadd.f32 %v17687_v27, %v17654_v28  ;;  %v17698_v27 = vld [vmem:[#allocation80_spill] sm:$0xff] }
 0x3ba   :  { %v7075_v29 = vrot.slane %v7061_v49, %v17686_v39  ;;  %v13458_v22 = vadd.f32 %v6406_v42, %v5639_v25  ;;  %9148 = vtanh.f32 %v3082_v24  ;;  %v13462_v58 = vadd.f32 %v17690_v43, %v17656_v54  ;;  %v17692_v42 = vld [vmem:[#allocation72_spill] sm:$0xff]  ;;  %v17695_v49 = vld [vmem:[#allocation94_spill] sm:$0xff]  ;;  %v17696_v24 = vld [vmem:[#allocation31_spill] sm:$0xff] }
 0x3bb   :  { %v13464_v7 = vadd.f32 %v6480_v55, %v5641_v47  ;;  %9150 = vtanh.f32 %v3089_v2  ;;  %v3090_v14 = vmul.f32 0.5, %v13451_v4  ;;  %v13469_v8 = vadd.f32 %v17691_v56, %v17650_v32  ;;  %v17693_v55 = vld [vmem:[#allocation73_spill] sm:$0xff]  ;;  %v17697_v47 = vld [vmem:[#allocation74_spill] sm:$0xff] }
 0x3bc   :  { %v7076_v1 = vcombine.low %v7068_v40, %v7075_v29  ;;  %9152 = vtanh.f32 %v3091_v62  ;;  %v3092_v11 = vmul.f32 0.5, %v13462_v58  ;;  %v13474_v59 = vadd.f32 %v17692_v42, %v17652_v33  ;;  %v17699_v29 = vld [vmem:[#allocation81_spill] sm:$0xff] }
 0x3bd   :  { %9154 = vtanh.f32 %v3090_v14  ;;  %v3099_v48 = vmul.f32 0.5, %v13469_v8  ;;  %v13479_v41 = vadd.f32 %v17693_v55, %v17654_v28  ;;  %v13483_v18 = vadd.f32 %v17694_v31, %v17656_v54  ;;  %v17702_v31 = vld [vmem:[#allocation95_spill] sm:$0xff] }
 0x3be   :  { %v7106_v45 = vrot.slane %v7076_v1, 7  ;;  %9156 = vtanh.f32 %v3092_v11  ;;  %v3101_v9 = vmul.f32 0.5, %v13474_v59  ;;  %v13488_v25 = vadd.f32 %v17695_v49, %v17650_v32  ;;  %7970 = vmatmul.mubr.msk.bf16.gmra.mrb[96].mxu1 %vm282_vm0, %v17696_v24  ;;  %v17701_v1 = vld [vmem:[#allocation12_spill] sm:$0xff] }
 0x3bf   :  { %9158 = vtanh.f32 %v3099_v48  ;;  %v3100_v2 = vmul.f32 0.5, %v13479_v41  ;;  %v3102_v40 = vmul.f32 0.5, %v13483_v18  ;;  %v13496_v62 = vadd.f32 %v17697_v47, %v17652_v33  ;;  %2984 = vmatprep.mubr.bf16.mxu1 %v17258_v13 }
 0x3c0   :  { %v17700_v43 = vcombine.low %v17698_v27, %v17699_v29  ;;  %9160 = vtanh.f32 %v3101_v9  ;;  %v3109_v56 = vmul.f32 0.5, %v13488_v25  ;;  %v13506_v11 = vadd.f32 %v17701_v1, %v17654_v28  ;;  %v13516_v27 = vpop.f32.mrb[170].mxu1  ;;  %v13518_v29 = vpop.f32.mrb[234].mxu0 }
 0x3c1   :  { %v9147_v42 = vpop.eup %9146  ;;  %9162 = vtanh.f32 %v3100_v2  ;;  %v3111_v55 = vmul.f32 0.5, %v13496_v62  ;;  %v13512_v49 = vadd.f32 %v17702_v31, %v17656_v54  ;;  %17703 = vst [vmem:[#allocation61_spill] sm:$0xff] %v13516_v27  ;;  %17704 = vst [vmem:[#allocation62_spill] sm:$0xff] %v13518_v29  ;;  %v13532_v27 = vpop.f32.mrb[235].mxu0 }
 0x3c2   :  { %v7108_v14 = vsel %vm7107_vm1, %v7106_v45, %v17700_v43  ;;  %v4360_v47 = vadd.f32 1.0, %v9147_v42  ;;  %9164 = vtanh.f32 %v3102_v40  ;;  %v3110_v9 = vmul.f32 0.5, %v13506_v11  ;;  %v17706_v40 = vld [vmem:[#allocation97_spill] sm:$0xff]  ;;  %17708 = vst [vmem:[#allocation38_spill] sm:$0xff] %v13532_v27 }
 0x3c3   :  { %v7110_v48 = vsel %vm7109_vm2, %v7106_v45, %v7108_v14  ;;  %9166 = vtanh.f32 %v3109_v56  ;;  %v3112_v2 = vmul.f32 0.5, %v13512_v49  ;;  %v17705_v14 = vld [vmem:[#allocation96_spill] sm:$0xff]  ;;  %v13528_v42 = vadd.f32 %v17706_v40, %v17652_v33 }
 0x3c4   :  { %v7112_v24 = vsel %vm7111_vm3, %v7106_v45, %v7110_v48  ;;  %v13524_v1 = vadd.f32 %v17705_v14, %v17650_v32  ;;  %v9149_v31 = vpop.eup %9148  ;;  %v5000_v38 = vmul.f32 0.5, %v4360_v47  ;;  %9168 = vtanh.f32 %v3111_v55  ;;  %v13530_v48 = vpop.f32.mrb[171].mxu1 }
 0x3c5   :  { %v7114_v43 = vsel %vm7113_vm4, %v7106_v45, %v7112_v24  ;;  %17707 = vst [vmem:[#allocation6_spill] sm:$0xff] %v13530_v48  ;;  %v9151_v29 = vpop.eup %9150  ;;  %v4362_v45 = vadd.f32 1.0, %v9149_v31  ;;  %9170 = vtanh.f32 %v3110_v9  ;;  %v17709_v24 = vld [vmem:[#allocation75_spill] sm:$0xff]  ;;  %v3121_v40 = vmul.f32 0.5, %v13528_v42  ;;  %v17710_v48 = vld [vmem:[#allocation30_spill] sm:$0xff] }
 0x3c6   :  { %v3119_v56 = vmul.f32 0.5, %v13524_v1  ;;  %v13537_v14 = vadd.f32 %v17709_v24, %v17654_v28  ;;  %v9153_v19 = vpop.eup %9152  ;;  %7135 = vst [vmem:[#allocation2] sm:$0xff] %v7114_v43  ;;  %v5640_v55 = vmul.f32 %v5000_v38, %v13361_v16  ;;  %v4369_v47 = vadd.f32 1.0, %v9151_v29  ;;  %7971 = vmatmul.mubr.msk.bf16.gmra.mrb[100].mxu1 %vm282_vm0, %v17710_v48  ;;  %v13547_v48 = vpop.f32.mrb[172].mxu1 }
 0x3c7   :  { %9172 = vtanh.f32 %v3112_v2  ;;  %v9155_v27 = vpop.eup %9154  ;;  %v5002_v31 = vmul.f32 0.5, %v4362_v45  ;;  %v4371_v9 = vadd.f32 1.0, %v9153_v19  ;;  %2994 = vmatprep.mubr.bf16.mxu1 %v17258_v13  ;;  %v13549_v19 = vpop.f32.mrb[236].mxu0 }
 0x3c8   :  { %9174 = vtanh.f32 %v3119_v56  ;;  %v3120_v15 = vmul.f32 0.5, %v13537_v14  ;;  %v9157_v24 = vpop.eup %9156  ;;  %v6444_v43 = vadd.f32 %v13419_v61, %v5640_v55  ;;  %v5009_v46 = vmul.f32 0.5, %v4369_v47  ;;  %17711 = vst [vmem:[#allocation24_spill] sm:$0xff] %v13549_v19  ;;  %v17712_v61 = vld [vmem:[#allocation76_spill] sm:$0xff]  ;;  %v13558_v47 = vpop.f32.mrb[237].mxu0 }
 0x3c9   :  { %v4370_v16 = vadd.f32 1.0, %v9155_v27  ;;  %9176 = vtanh.f32 %v3121_v40  ;;  %v9159_v38 = vpop.eup %9158  ;;  %v5642_v29 = vmul.f32 %v5002_v31, %v13430_v3  ;;  %v5011_v2 = vmul.f32 0.5, %v4371_v9  ;;  %v13556_v27 = vpop.f32.mrb[173].mxu1  ;;  %17714 = vst [vmem:[#allocation9_spill] sm:$0xff] %v13558_v47 }
 0x3ca   :  { %v4372_v0 = vadd.f32 1.0, %v9157_v24  ;;  %9178 = vtanh.f32 %v3120_v15  ;;  %v9161_v45 = vpop.eup %9160  ;;  %v5649_v56 = vmul.f32 %v5009_v46, %v13434_v21  ;;  %v4379_v6 = vadd.f32 1.0, %v9159_v38  ;;  %17713 = vst [vmem:[#allocation70_spill] sm:$0xff] %v13556_v27  ;;  %v13562_v24 = vpop.f32.mrb[174].mxu1 }
 0x3cb   :  { %v5010_v57 = vmul.f32 0.5, %v4370_v16  ;;  %v13554_v55 = vadd.f32 %v17712_v61, %v17656_v54  ;;  %v9163_v3 = vpop.eup %9162  ;;  %v6518_v15 = vadd.f32 %v13421_v44, %v5642_v29  ;;  %v5651_v40 = vmul.f32 %v5011_v2, %v13440_v20  ;;  %17715 = vst [vmem:[#allocation49_spill] sm:$0xff] %v13562_v24  ;;  %v13564_v46 = vpop.f32.mrb[238].mxu0 }
 0x3cc   :  { %v5012_v31 = vmul.f32 0.5, %v4372_v0  ;;  %v4381_v9 = vadd.f32 1.0, %v9161_v45  ;;  %17716 = vst [vmem:[#allocation47_spill] sm:$0xff] %v13564_v46  ;;  %v9165_v21 = vpop.eup %9164  ;;  %v6408_v16 = vadd.f32 %v13458_v22, %v5649_v56  ;;  %v5019_v61 = vmul.f32 0.5, %v4379_v6  ;;  %v13568_v19 = vpop.f32.mrb[175].mxu1 }
 0x3cd   :  { %v5650_v38 = vmul.f32 %v5010_v57, %v13451_v4  ;;  %v4380_v27 = vadd.f32 1.0, %v9163_v3  ;;  %17717 = vst [vmem:[#allocation54_spill] sm:$0xff] %v13568_v19  ;;  %v13570_v47 = vpop.f32.mrb[239].mxu0  ;;  %v9167_v44 = vpop.eup %9166  ;;  %v6482_v20 = vadd.f32 %v13464_v7, %v5651_v40  ;;  %v4382_v2 = vadd.f32 1.0, %v9165_v21  ;;  %v17719_v57 = vld [vmem:[#allocation33_spill] sm:$0xff] }
 0x3ce   :  { %17718 = vst [vmem:[#allocation48_spill] sm:$0xff] %v13570_v47  ;;  %v5652_v0 = vmul.f32 %v5012_v31, %v13462_v58  ;;  %v5021_v29 = vmul.f32 0.5, %v4381_v9  ;;  %v9169_v45 = vpop.eup %9168  ;;  %v5659_v24 = vmul.f32 %v5019_v61, %v13469_v8  ;;  %v4389_v56 = vadd.f32 1.0, %v9167_v44  ;;  %7972 = vmatmul.mubr.msk.bf16.gmra.mrb[104].mxu1 %vm282_vm0, %v17719_v57  ;;  %v13581_v61 = vpop.f32.mrb[176].mxu1 }
 0x3cf   :  { %v6445_v46 = vadd.f32 %v6444_v43, %v5650_v38  ;;  %v5020_v22 = vmul.f32 0.5, %v4380_v27  ;;  %v9171_v6 = vpop.eup %9170  ;;  %v5022_v47 = vmul.f32 0.5, %v4382_v2  ;;  %v4391_v19 = vadd.f32 1.0, %v9169_v45  ;;  %3004 = vmatprep.mubr.bf16.mxu1 %v17258_v13  ;;  %v7160_v45 = vld [vmem:[%s17109_s5 + $0x80] sm:$0xff] }
 0x3d0   :  { %v6519_v4 = vadd.f32 %v6518_v15, %v5652_v0  ;;  %v5661_v3 = vmul.f32 %v5021_v29, %v13474_v59  ;;  %v6409_v7 = vadd.f32 %v6408_v16, %v5659_v24  ;;  %v5029_v43 = vmul.f32 0.5, %v4389_v56  ;;  %v13583_v15 = vpop.f32.mrb[240].mxu0  ;;  %v13586_v16 = vpop.f32.mrb[177].mxu1 }
 0x3d1   :  { %v9173_v58 = vpop.eup %9172  ;;  %v5660_v40 = vmul.f32 %v5020_v22, %v13479_v41  ;;  %v4390_v31 = vadd.f32 1.0, %v9171_v6  ;;  %v5662_v9 = vmul.f32 %v5022_v47, %v13483_v18  ;;  %v5031_v21 = vmul.f32 0.5, %v4391_v19  ;;  %v13588_v41 = vpop.f32.mrb[241].mxu0 }
 0x3d2   :  { %v9175_v8 = vpop.eup %9174  ;;  %v6483_v27 = vadd.f32 %v6482_v20, %v5661_v3  ;;  %v4392_v38 = vadd.f32 1.0, %v9173_v58  ;;  %v5669_v0 = vmul.f32 %v5029_v43, %v13488_v25  ;;  %17720 = vst [vmem:[#allocation42_spill] sm:$0xff] %v13588_v41  ;;  %v7161_v25 = vld [vmem:[%s17109_s5 + $0x88] sm:$0xff]  ;;  %v13599_v22 = vpop.f32.mrb[242].mxu0  ;;  %v7144_v43 = vld [vmem:[%s17109_s5] sm:$0xff] }
 0x3d3   :  { %v9177_v59 = vpop.eup %9176  ;;  %v6446_v44 = vadd.f32 %v6445_v46, %v5660_v40  ;;  %v5030_v29 = vmul.f32 0.5, %v4390_v31  ;;  %v4399_v24 = vadd.f32 1.0, %v9175_v8  ;;  %v6520_v20 = vadd.f32 %v6519_v4, %v5662_v9  ;;  %v13597_v46 = vpop.f32.mrb[178].mxu1  ;;  %17722 = vst [vmem:[#allocation8_spill] sm:$0xff] %v13599_v22  ;;  %v7145_v31 = vld [vmem:[%s17109_s5 + $0x8] sm:$0xff] }
 0x3d4   :  { %v9179_v2 = vpop.eup %9178  ;;  %v5671_v18 = vmul.f32 %v5031_v21, %v13496_v62  ;;  %v5032_v19 = vmul.f32 0.5, %v4392_v38  ;;  %v4401_v47 = vadd.f32 1.0, %v9177_v59  ;;  %17721 = vst [vmem:[#allocation63_spill] sm:$0xff] %v13597_v46  ;;  %v6410_v56 = vadd.f32 %v6409_v7, %v5669_v0  ;;  %v17724_v59 = vld [vmem:[#allocation15_spill] sm:$0xff] }
 0x3d5   :  { %v5670_v57 = vmul.f32 %v5030_v29, %v13506_v11  ;;  %v5039_v6 = vmul.f32 0.5, %v4399_v24  ;;  %v4400_v4 = vadd.f32 1.0, %v9179_v2  ;;  %v3122_v40 = vmul.f32 0.5, %v13554_v55  ;;  %v7147_v29 = vld [vmem:[%s17109_s5 + $0x18] sm:$0xff] }
 0x3d6   :  { %v6484_v62 = vadd.f32 %v6483_v27, %v5671_v18  ;;  %v5672_v3 = vmul.f32 %v5032_v19, %v13512_v49  ;;  %v5041_v58 = vmul.f32 0.5, %v4401_v47  ;;  %v8257_v9 = vpack.c.bf16 %v7161_v25, %v7160_v45  ;;  %v7162_v49 = vld [vmem:[%s17109_s5 + $0x90] sm:$0xff]  ;;  %v17723_v27 = vld [vmem:[#allocation32_spill] sm:$0xff] }
 0x3d7   :  { %v6447_v8 = vadd.f32 %v6446_v44, %v5670_v57  ;;  %v5679_v7 = vmul.f32 %v5039_v6, %v13524_v1  ;;  %v5040_v11 = vmul.f32 0.5, %v4400_v4  ;;  %7973 = vmatmul.mubr.msk.bf16.gmra.mrb[108].mxu1 %vm282_vm0, %v17723_v27  ;;  %9180 = vtanh.f32 %v3122_v40  ;;  %v7163_v1 = vld [vmem:[%s17109_s5 + $0x98] sm:$0xff]  ;;  %v7146_v44 = vld [vmem:[%s17109_s5 + $0x10] sm:$0xff]  ;;  %v7148_v27 = vld [vmem:[%s17109_s5 + $0x20] sm:$0xff] }
 0x3d8   :  { %v13616_v21 = vadd.f32 %v6520_v20, %v5672_v3  ;;  %v5681_v38 = vmul.f32 %v5041_v58, %v13528_v42  ;;  %v13621_v0 = vadd.f32 %v17724_v59, %v17650_v32  ;;  %3014 = vmatprep.mubr.bf16.mxu1 %v17258_v13  ;;  %8258 = vmatprep.subr.bf16.mxu0 %v8257_v9  ;;  %v17725_v2 = vld [vmem:[#allocation14_spill] sm:$0xff]  ;;  %v17727_v57 = vld [vmem:[#allocation77_spill] sm:$0xff] }
 0x3d9   :  { %v13633_v42 = vadd.f32 %v6410_v56, %v5679_v7  ;;  %v5680_v24 = vmul.f32 %v5040_v11, %v13537_v14  ;;  %v13638_v20 = vadd.f32 %v17725_v2, %v17652_v33  ;;  %v8259_v18 = vpack.c.bf16 %v7145_v31, %v7144_v43  ;;  %v17726_v45 = vld [vmem:[#allocation98_spill] sm:$0xff]  ;;  %v7165_v58 = vld [vmem:[%s17109_s5 + $0xa8] sm:$0xff] }
 0x3da   :  { %v13640_v19 = vadd.f32 %v6484_v62, %v5681_v38  ;;  %v3129_v47 = vmul.f32 0.5, %v13621_v0  ;;  %v13645_v25 = vadd.f32 %v17726_v45, %v17654_v28  ;;  %v13649_v56 = vadd.f32 %v17727_v57, %v17656_v54  ;;  %v7164_v62 = vld [vmem:[%s17109_s5 + $0xa0] sm:$0xff]  ;;  %v17729_v9 = vld [vmem:[#allocation17_spill] sm:$0xff]  ;;  %v7151_v45 = vld [vmem:[%s17109_s5 + $0x38] sm:$0xff]  ;;  %v13704_v57 = vpop.f32.mrb[179].mxu1 }
 0x3db   :  { %v13651_v6 = vadd.f32 %v6447_v8, %v5680_v24  ;;  %v3131_v14 = vmul.f32 0.5, %v13638_v20  ;;  %8260 = vmatpush3.bf16.msra.mxu0 %v8259_v18  ;;  %v8261_v4 = vpack.c.bf16 %v7163_v1, %v7162_v49  ;;  %v8263_v3 = vpack.c.bf16 %v7147_v29, %v7146_v44  ;;  %v17728_v8 = vld [vmem:[#allocation78_spill] sm:$0xff]  ;;  %v17730_v1 = vld [vmem:[#allocation79_spill] sm:$0xff]  ;;  %17731 = vst [vmem:[#allocation64_spill] sm:$0xff] %v13704_v57 }
 0x3dc   :  { %9182 = vtanh.f32 %v3129_v47  ;;  %v3130_v40 = vmul.f32 0.5, %v13645_v25  ;;  %v3132_v43 = vmul.f32 0.5, %v13649_v56  ;;  %v13664_v31 = vadd.f32 %v13024_v17, %v17650_v32  ;;  %v7149_v17 = vld [vmem:[%s17109_s5 + $0x28] sm:$0xff]  ;;  %v7166_v44 = vld [vmem:[%s17109_s5 + $0xb0] sm:$0xff]  ;;  %v7167_v29 = vld [vmem:[%s17109_s5 + $0xb8] sm:$0xff] }
 0x3dd   :  { %9184 = vtanh.f32 %v3131_v14  ;;  %8262 = vmatprep.subr.bf16.mxu0 %v8261_v4  ;;  %v13668_v7 = vadd.f32 %v17728_v8, %v17652_v33  ;;  %v13672_v11 = vadd.f32 %v13029_v35, %v17654_v28  ;;  %v13676_v49 = vadd.f32 %v17729_v9, %v17656_v54  ;;  %v7150_v24 = vld [vmem:[%s17109_s5 + $0x30] sm:$0xff]  ;;  %v13706_v14 = vpop.f32.mrb[243].mxu0  ;;  %v17733_v4 = vld [vmem:[#allocation35_spill] sm:$0xff] }
 0x3de   :  { %9186 = vtanh.f32 %v3130_v40  ;;  %v3139_v38 = vmul.f32 0.5, %v13664_v31  ;;  %v8265_v59 = vpack.c.bf16 %v7165_v58, %v7164_v62  ;;  %v13687_v35 = vadd.f32 %v17730_v1, %v17650_v32  ;;  %17732 = vst [vmem:[#allocation65_spill] sm:$0xff] %v13706_v14  ;;  %v17734_v62 = vld [vmem:[#allocation82_spill] sm:$0xff]  ;;  %v17736_v9 = vld [vmem:[#allocation83_spill] sm:$0xff] }
 0x3df   :  { %9188 = vtanh.f32 %v3132_v43  ;;  %8264 = vmatpush3.bf16.msra.mxu0 %v8263_v3  ;;  %v3141_v2 = vmul.f32 0.5, %v13668_v7  ;;  %v3140_v18 = vmul.f32 0.5, %v13672_v11  ;;  %v3142_v47 = vmul.f32 0.5, %v13676_v49  ;;  %7974 = vmatmul.mubr.msk.bf16.gmra.mrb[112].mxu1 %vm282_vm0, %v17733_v4  ;;  %v17735_v43 = vld [vmem:[#allocation51_spill] sm:$0xff] }
 0x3e0   :  { %9190 = vtanh.f32 %v3139_v38  ;;  %8266 = vmatprep.subr.bf16.mxu0 %v8265_v59  ;;  %v3149_v3 = vmul.f32 0.5, %v13687_v35  ;;  %v13713_v58 = vadd.f32 %v17734_v62, %v17652_v33  ;;  %v8267_v40 = vpack.c.bf16 %v7149_v17, %v7148_v27  ;;  %3024 = vmatprep.mubr.bf16.mxu1 %v17258_v13  ;;  %v7168_v17 = vld [vmem:[%s17109_s5 + $0xc0] sm:$0xff] }
 0x3e1   :  { %9192 = vtanh.f32 %v3141_v2  ;;  %v13718_v8 = vadd.f32 %v17735_v43, %v17654_v28  ;;  %v13722_v1 = vadd.f32 %v17736_v9, %v17656_v54  ;;  %v8269_v38 = vpack.c.bf16 %v7167_v29, %v7166_v44  ;;  %v9181_v59 = vpop.eup %9180  ;;  %v7169_v2 = vld [vmem:[%s17109_s5 + $0xc8] sm:$0xff] }
 0x3e2   :  { %9194 = vtanh.f32 %v3140_v18  ;;  %v3151_v4 = vmul.f32 0.5, %v13713_v58  ;;  %v8271_v14 = vpack.c.bf16 %v7151_v45, %v7150_v24  ;;  %v13727_v27 = vadd.f32 %v13054_v60, %v17650_v32 }
 0x3e3   :  { %v4402_v62 = vadd.f32 1.0, %v9181_v59  ;;  %9196 = vtanh.f32 %v3142_v47  ;;  %8268 = vmatpush3.bf16.msra.mxu0 %v8267_v40  ;;  %v3150_v44 = vmul.f32 0.5, %v13718_v8  ;;  %v3152_v29 = vmul.f32 0.5, %v13722_v1 }
 0x3e4   :  { %9198 = vtanh.f32 %v3149_v3  ;;  %8270 = vmatprep.subr.bf16.mxu0 %v8269_v38  ;;  %v3159_v60 = vmul.f32 0.5, %v13727_v27  ;;  %v13740_v24 = vadd.f32 %v13056_v5, %v17652_v33  ;;  %v13744_v18 = vadd.f32 %v13059_v26, %v17654_v28 }
 0x3e5   :  { %v5042_v45 = vmul.f32 0.5, %v4402_v62  ;;  %9200 = vtanh.f32 %v3151_v4  ;;  %v13748_v47 = vadd.f32 %v13061_v51, %v17656_v54  ;;  %v8273_v40 = vpack.c.bf16 %v7169_v2, %v7168_v17  ;;  %v13758_v4 = vpop.f32.mrb[180].mxu1  ;;  %v13760_v17 = vpop.f32.mrb[244].mxu0  ;;  %v17739_v2 = vld [vmem:[#allocation34_spill] sm:$0xff] }
 0x3e6   :  { %v9183_v43 = vpop.eup %9182  ;;  %9202 = vtanh.f32 %v3150_v44  ;;  %v3161_v3 = vmul.f32 0.5, %v13740_v24  ;;  %v3160_v9 = vmul.f32 0.5, %v13744_v18  ;;  %v13754_v5 = vadd.f32 %v13064_v37, %v17650_v32  ;;  %17737 = vst [vmem:[#allocation92_spill] sm:$0xff] %v13758_v4  ;;  %17738 = vst [vmem:[#allocation11_spill] sm:$0xff] %v13760_v17 }
 0x3e7   :  { %v9185_v38 = vpop.eup %9184  ;;  %v5682_v26 = vmul.f32 %v5042_v45, %v13554_v55  ;;  %v4409_v59 = vadd.f32 1.0, %v9183_v43  ;;  %9204 = vtanh.f32 %v3152_v29  ;;  %8272 = vmatpush3.bf16.msra.mxu0 %v8271_v14  ;;  %v3162_v51 = vmul.f32 0.5, %v13748_v47  ;;  %7975 = vmatmul.mubr.msk.bf16.gmra.mrb[116].mxu1 %vm282_vm0, %v17739_v2  ;;  %v13769_v14 = vpop.f32.mrb[181].mxu1 }
 0x3e8   :  { %v9187_v62 = vpop.eup %9186  ;;  %v4411_v44 = vadd.f32 1.0, %v9185_v38  ;;  %9206 = vtanh.f32 %v3159_v60  ;;  %8274 = vmatprep.subr.bf16.mxu0 %v8273_v40  ;;  %v3169_v37 = vmul.f32 0.5, %v13754_v5  ;;  %v13767_v55 = vadd.f32 %v13066_v50, %v17652_v33  ;;  %17740 = vst [vmem:[#allocation66_spill] sm:$0xff] %v13769_v14  ;;  %v13771_v29 = vpop.f32.mrb[245].mxu0  ;;  %3034 = vmatprep.mubr.bf16.mxu1 %v17258_v13 }
 0x3e9   :  { %17741 = vst [vmem:[#allocation27_spill] sm:$0xff] %v13771_v29  ;;  %v9189_v45 = vpop.eup %9188  ;;  %v6522_v43 = vadd.f32 %v13616_v21, %v5682_v26  ;;  %v5049_v2 = vmul.f32 0.5, %v4409_v59  ;;  %v4410_v17 = vadd.f32 1.0, %v9187_v62  ;;  %9208 = vtanh.f32 %v3161_v3  ;;  %v13775_v60 = vpop.f32.mrb[182].mxu1 }
 0x3ea   :  { %17742 = vst [vmem:[#allocation67_spill] sm:$0xff] %v13775_v60  ;;  %v13777_v40 = vpop.f32.mrb[246].mxu0  ;;  %v9191_v38 = vpop.eup %9190  ;;  %v5051_v4 = vmul.f32 0.5, %v4411_v44  ;;  %v4412_v50 = vadd.f32 1.0, %v9189_v45  ;;  %9210 = vtanh.f32 %v3160_v9  ;;  %v13780_v14 = vmul.f32 0.5, %v13767_v55 }
 0x3eb   :  { %17743 = vst [vmem:[#allocation26_spill] sm:$0xff] %v13777_v40  ;;  %v13782_v29 = vpop.f32.mrb[183].mxu1  ;;  %v13784_v57 = vpop.f32.mrb[247].mxu0  ;;  %v5689_v21 = vmul.f32 %v5049_v2, %v13621_v0  ;;  %v5050_v26 = vmul.f32 0.5, %v4410_v17  ;;  %v4419_v3 = vadd.f32 1.0, %v9191_v38  ;;  %9212 = vtanh.f32 %v3162_v51 }
 0x3ec   :  { %17744 = vst [vmem:[#allocation29_spill] sm:$0xff] %v13782_v29  ;;  %17745 = vst [vmem:[#allocation10_spill] sm:$0xff] %v13784_v57  ;;  %v9193_v22 = vpop.eup %9192  ;;  %v5691_v62 = vmul.f32 %v5051_v4, %v13638_v20  ;;  %v5052_v40 = vmul.f32 0.5, %v4412_v50  ;;  %9214 = vtanh.f32 %v3169_v37  ;;  %v13794_v38 = vpop.f32.mrb[184].mxu1 }
 0x3ed   :  { %v9195_v59 = vpop.eup %9194  ;;  %v4421_v44 = vadd.f32 1.0, %v9193_v22  ;;  %v6412_v45 = vadd.f32 %v13633_v42, %v5689_v21  ;;  %v5690_v60 = vmul.f32 %v5050_v26, %v13645_v25  ;;  %v5059_v29 = vmul.f32 0.5, %v4419_v3  ;;  %v13796_v42 = vpop.f32.mrb[248].mxu0  ;;  %v17746_v25 = vld [vmem:[#allocation37_spill] sm:$0xff] }
 0x3ee   :  { %v9197_v9 = vpop.eup %9196  ;;  %v4420_v46 = vadd.f32 1.0, %v9195_v59  ;;  %v6486_v41 = vadd.f32 %v13640_v19, %v5691_v62  ;;  %v5692_v0 = vmul.f32 %v5052_v40, %v13649_v56  ;;  %v13801_v26 = vpop.f32.mrb[185].mxu1  ;;  %9216 = vtanh.f32 %v13780_v14 }
 0x3ef   :  { %v9199_v57 = vpop.eup %9198  ;;  %v5061_v17 = vmul.f32 0.5, %v4421_v44  ;;  %v4422_v51 = vadd.f32 1.0, %v9197_v9  ;;  %v6449_v20 = vadd.f32 %v13651_v6, %v5690_v60  ;;  %v5699_v22 = vmul.f32 %v5059_v29, %v13664_v31  ;;  %7976 = vmatmul.mubr.msk.bf16.gmra.mrb[120].mxu1 %vm282_vm0, %v17746_v25  ;;  %v13803_v6 = vpop.f32.mrb[249].mxu0 }
 0x3f0   :  { %v9201_v2 = vpop.eup %9200  ;;  %v5060_v4 = vmul.f32 0.5, %v4420_v46  ;;  %v4429_v37 = vadd.f32 1.0, %v9199_v57  ;;  %v6523_v19 = vadd.f32 %v6522_v43, %v5692_v0  ;;  %3044 = vmatprep.mubr.bf16.mxu1 %v17258_v13  ;;  %v13807_v3 = vpop.f32.mrb[186].mxu1 }
 0x3f1   :  { %v9203_v50 = vpop.eup %9202  ;;  %v5701_v56 = vmul.f32 %v5061_v17, %v13668_v7  ;;  %v5062_v40 = vmul.f32 0.5, %v4422_v51  ;;  %v4431_v21 = vadd.f32 1.0, %v9201_v2  ;;  %v6413_v31 = vadd.f32 %v6412_v45, %v5699_v22  ;;  %v13809_v59 = vpop.f32.mrb[250].mxu0 }
 0x3f2   :  { %v9205_v46 = vpop.eup %9204  ;;  %v5700_v57 = vmul.f32 %v5060_v4, %v13672_v11  ;;  %v5069_v29 = vmul.f32 0.5, %v4429_v37  ;;  %v4430_v60 = vadd.f32 1.0, %v9203_v50  ;;  %v13812_v0 = vpop.f32.mrb[187].mxu1 }
 0x3f3   :  { %v9207_v43 = vpop.eup %9206  ;;  %v6487_v7 = vadd.f32 %v6486_v41, %v5701_v56  ;;  %v5702_v62 = vmul.f32 %v5062_v40, %v13676_v49  ;;  %v5071_v44 = vmul.f32 0.5, %v4431_v21  ;;  %v4432_v9 = vadd.f32 1.0, %v9205_v46  ;;  %v13814_v17 = vpop.f32.mrb[251].mxu0 }
 0x3f4   :  { %17747 = vst [vmem:[#allocation68_spill] sm:$0xff] %v13814_v17  ;;  %v9209_v13 = vpop.eup %9208  ;;  %v6450_v45 = vadd.f32 %v6449_v20, %v5700_v57  ;;  %v5709_v11 = vmul.f32 %v5069_v29, %v13687_v35  ;;  %v5070_v51 = vmul.f32 0.5, %v4430_v60  ;;  %v4439_v2 = vadd.f32 1.0, %v9207_v43  ;;  %v7170_v43 = vld [vmem:[%s17109_s5 + $0xd0] sm:$0xff] }
 0x3f5   :  { %v9211_v22 = vpop.eup %9210  ;;  %v6524_v4 = vadd.f32 %v6523_v19, %v5702_v62  ;;  %v5711_v37 = vmul.f32 %v5071_v44, %v13713_v58  ;;  %v5072_v25 = vmul.f32 0.5, %v4432_v9  ;;  %v4441_v41 = vadd.f32 1.0, %v9209_v13  ;;  %v7152_v19 = vld [vmem:[%s17109_s5 + $0x40] sm:$0xff]  ;;  %v7153_v58 = vld [vmem:[%s17109_s5 + $0x48] sm:$0xff]  ;;  %v7154_v13 = vld [vmem:[%s17109_s5 + $0x50] sm:$0xff] }
 0x3f6   :  { %v9213_v50 = vpop.eup %9212  ;;  %v6414_v49 = vadd.f32 %v6413_v31, %v5709_v11  ;;  %v5710_v56 = vmul.f32 %v5070_v51, %v13718_v8  ;;  %v5079_v40 = vmul.f32 0.5, %v4439_v2  ;;  %v4440_v21 = vadd.f32 1.0, %v9211_v22 }
 0x3f7   :  { %v9215_v46 = vpop.eup %9214  ;;  %v6488_v17 = vadd.f32 %v6487_v7, %v5711_v37  ;;  %v5712_v20 = vmul.f32 %v5072_v25, %v13722_v1  ;;  %v5081_v57 = vmul.f32 0.5, %v4441_v41  ;;  %v4442_v35 = vadd.f32 1.0, %v9213_v50  ;;  %v13830_v1 = vpop.f32.mrb[188].mxu1  ;;  %v17748_v7 = vld [vmem:[#allocation36_spill] sm:$0xff] }
 0x3f8   :  { %v6451_v29 = vadd.f32 %v6450_v45, %v5710_v56  ;;  %v5719_v31 = vmul.f32 %v5079_v40, %v13727_v27  ;;  %v5080_v8 = vmul.f32 0.5, %v4440_v21  ;;  %v4449_v60 = vadd.f32 1.0, %v9215_v46  ;;  %7977 = vmatmul.mubr.msk.bf16.gmra.mrb[124].mxu1 %vm282_vm0, %v17748_v7  ;;  %v7171_v27 = vld [vmem:[%s17109_s5 + $0xd8] sm:$0xff]  ;;  %v17749_v46 = vld [vmem:[#allocation52_spill] sm:$0xff]  ;;  %v7158_v7 = vld [vmem:[%s17109_s5 + $0x70] sm:$0xff] }
 0x3f9   :  { %v6525_v62 = vadd.f32 %v6524_v4, %v5712_v20  ;;  %v5721_v44 = vmul.f32 %v5081_v57, %v13740_v24  ;;  %v5082_v9 = vmul.f32 0.5, %v4442_v35  ;;  %v7155_v45 = vld [vmem:[%s17109_s5 + $0x58] sm:$0xff]  ;;  %v8275_v24 = vpack.c.bf16 %v7153_v58, %v7152_v19  ;;  %v7157_v57 = vld [vmem:[%s17109_s5 + $0x68] sm:$0xff]  ;;  %v7174_v58 = vld [vmem:[%s17109_s5 + $0xf0] sm:$0xff] }
 0x3fa   :  { %v6415_v11 = vadd.f32 %v6414_v49, %v5719_v31  ;;  %v5720_v51 = vmul.f32 %v5080_v8, %v13744_v18  ;;  %v5089_v2 = vmul.f32 0.5, %v4449_v60  ;;  %v13851_v4 = vadd.f32 %v13163_v63, %v17654_v28  ;;  %v7173_v63 = vld [vmem:[%s17109_s5 + $0xe8] sm:$0xff]  ;;  %v17750_v19 = vld [vmem:[#allocation39_spill] sm:$0xff]  ;;  %v13905_v31 = vpop.f32.mrb[252].mxu0 }
 0x3fb   :  { %v13846_v22 = vadd.f32 %v6488_v17, %v5721_v44  ;;  %v5722_v14 = vmul.f32 %v5082_v9, %v13748_v47  ;;  %v13855_v37 = vadd.f32 %v13165_v53, %v17656_v54  ;;  %8276 = vmatpush3.bf16.msra.mxu0 %v8275_v24  ;;  %v8277_v18 = vpack.c.bf16 %v7171_v27, %v7170_v43  ;;  %v7172_v17 = vld [vmem:[%s17109_s5 + $0xe0] sm:$0xff] }
 0x3fc   :  { %v13857_v25 = vadd.f32 %v6451_v29, %v5720_v51  ;;  %v5729_v41 = vmul.f32 %v5089_v2, %v13754_v5  ;;  %v8279_v50 = vpack.c.bf16 %v7155_v45, %v7154_v13  ;;  %v3170_v53 = vmul.f32 0.5, %v13851_v4  ;;  %v7175_v29 = vld [vmem:[%s17109_s5 + $0xf8] sm:$0xff]  ;;  %17751 = vst [vmem:[#allocation28_spill] sm:$0xff] %v13905_v31  ;;  %v17752_v9 = vld [vmem:[#allocation40_spill] sm:$0xff]  ;;  %v13921_v45 = vpop.f32.mrb[189].mxu1 }
 0x3fd   :  { %v13866_v47 = vadd.f32 %v6525_v62, %v5722_v14  ;;  %v3172_v49 = vmul.f32 0.5, %v13855_v37  ;;  %v13872_v5 = vadd.f32 %v13182_v12, %v17650_v32  ;;  %8278 = vmatprep.subr.bf16.mxu0 %v8277_v18  ;;  %v13878_v40 = vadd.f32 %v13184_v30, %v17652_v33  ;;  %v7156_v12 = vld [vmem:[%s17109_s5 + $0x60] sm:$0xff]  ;;  %v7159_v62 = vld [vmem:[%s17109_s5 + $0x78] sm:$0xff]  ;;  %17753 = vst [vmem:[#allocation69_spill] sm:$0xff] %v13921_v45 }
 0x3fe   :  { %v13874_v56 = vadd.f32 %v6415_v11, %v5729_v41  ;;  %v13882_v21 = vadd.f32 %v13187_v34, %v17654_v28  ;;  %v13886_v20 = vadd.f32 %v17749_v46, %v17656_v54  ;;  %9218 = vtanh.f32 %v3170_v53  ;;  %v17754_v11 = vld [vmem:[#allocation41_spill] sm:$0xff]  ;;  %v17755_v2 = vld [vmem:[#allocation43_spill] sm:$0xff]  ;;  %v9217_v41 = vpop.eup %9216 }
 0x3ff   :  { %v3179_v30 = vmul.f32 0.5, %v13872_v5  ;;  %v8281_v35 = vpack.c.bf16 %v7173_v63, %v7172_v17  ;;  %v13897_v34 = vadd.f32 %v17750_v19, %v17650_v32  ;;  %9220 = vtanh.f32 %v3172_v49  ;;  %8280 = vmatpush3.bf16.msra.mxu0 %v8279_v50  ;;  %v17756_v17 = vld [vmem:[#allocation44_spill] sm:$0xff]  ;;  %v13938_v49 = vpop.f32.mrb[253].mxu0 }
 0x400   :  { %v3181_v8 = vmul.f32 0.5, %v13878_v40  ;;  %v3180_v60 = vmul.f32 0.5, %v13882_v21  ;;  %v3182_v43 = vmul.f32 0.5, %v13886_v20  ;;  %v13919_v27 = vadd.f32 %v17752_v9, %v17652_v33  ;;  %v13936_v53 = vld [vmem:[#allocation2] sm:$0xff]  ;;  %17757 = vst [vmem:[#allocation50_spill] sm:$0xff] %v13938_v49 }
 0x401   :  { %9222 = vtanh.f32 %v3179_v30  ;;  %8282 = vmatprep.subr.bf16.mxu0 %v8281_v35  ;;  %v3189_v44 = vmul.f32 0.5, %v13897_v34  ;;  %v8283_v13 = vpack.c.bf16 %v7157_v57, %v7156_v12  ;;  %v13925_v51 = vadd.f32 %v17754_v11, %v17654_v28  ;;  %v7192_v30 = vld [vmem:[%s17109_s5 + $0x180] sm:$0xff]  ;;  %v7193_v35 = vld [vmem:[%s17109_s5 + $0x188] sm:$0xff]  ;;  %v13969_v11 = vpop.f32.mrb[190].mxu1 }
 0x402   :  { %9224 = vtanh.f32 %v3181_v8  ;;  %v13929_v24 = vadd.f32 %v17755_v2, %v17656_v54  ;;  %v8285_v14 = vpack.c.bf16 %v7175_v29, %v7174_v58  ;;  %v3191_v18 = vmul.f32 0.5, %v13919_v27  ;;  %v17758_v58 = vld [vmem:[#allocation53_spill] sm:$0xff]  ;;  %v17759_v8 = vld [vmem:[#allocation16_spill] sm:$0xff]  ;;  %17761 = vst [vmem:[#allocation45_spill] sm:$0xff] %v13969_v11  ;;  %v13971_v2 = vpop.f32.mrb[254].mxu0 }
 0x403   :  { %9226 = vtanh.f32 %v3180_v60  ;;  %v8287_v50 = vpack.c.bf16 %v7159_v62, %v7158_v7  ;;  %v13934_v63 = vadd.f32 %v17756_v17, %v17650_v32  ;;  %v4451_v46 = vadd.f32 1.0, %v9217_v41  ;;  %8284 = vmatpush3.bf16.msra.mxu0 %v8283_v13  ;;  %v17760_v7 = vld [vmem:[#allocation55_spill] sm:$0xff]  ;;  %v7177_v13 = vld [vmem:[%s17109_s5 + $0x108] sm:$0xff]  ;;  %17762 = vst [vmem:[#allocation13_spill] sm:$0xff] %v13971_v2 }
 0x404   :  { %9228 = vtanh.f32 %v3182_v43  ;;  %v3190_v12 = vmul.f32 0.5, %v13925_v51  ;;  %v3192_v57 = vmul.f32 0.5, %v13929_v24  ;;  %8286 = vmatprep.subr.bf16.mxu0 %v8285_v14  ;;  %v13951_v29 = vadd.f32 %v17758_v58, %v17652_v33  ;;  %v7176_v9 = vld [vmem:[%s17109_s5 + $0x100] sm:$0xff] }
 0x405   :  { %9230 = vtanh.f32 %v3189_v44  ;;  %v3199_v19 = vmul.f32 0.5, %v13934_v63  ;;  %v13955_v60 = vadd.f32 %v17759_v8, %v17654_v28  ;;  %v5091_v43 = vmul.f32 0.5, %v4451_v46  ;;  %v13977_v8 = vpop.f32.mrb[191].mxu1 }
 0x406   :  { %9232 = vtanh.f32 %v3191_v18  ;;  %v13959_v62 = vadd.f32 %v17760_v7, %v17656_v54  ;;  %v7321_v44 = vrot.slane %v13936_v53, %v17686_v39  ;;  %v3201_v14 = vmul.f32 0.5, %v13951_v29  ;;  %17763 = vst [vmem:[#allocation72_spill] sm:$0xff] %v13977_v8  ;;  %v13979_v7 = vpop.f32.mrb[255].mxu0 }
 0x407   :  { %9234 = vtanh.f32 %v3190_v12  ;;  %v3200_v41 = vmul.f32 0.5, %v13955_v60  ;;  %v8289_v18 = vpack.c.bf16 %v7193_v35, %v7192_v30  ;;  %v5731_v17 = vmul.f32 %v5091_v43, %v13767_v55  ;;  %8288 = vmatpush3.bf16.msra.mxu0 %v8287_v50  ;;  %17764 = vst [vmem:[#allocation73_spill] sm:$0xff] %v13979_v7  ;;  %v17765_v12 = vld [vmem:[#allocation56_spill] sm:$0xff]  ;;  %v17766_v30 = vld [vmem:[#allocation46_spill] sm:$0xff]  ;;  %v17767_v7 = vld [vmem:[#allocation57_spill] sm:$0xff] }
 0x408   :  { %9236 = vtanh.f32 %v3192_v57  ;;  %v3202_v46 = vmul.f32 0.5, %v13959_v62  ;;  %v7329_v58 = vcombine.high %v7321_v44, %v7321_v44  ;;  %v9219_v11 = vpop.eup %9218  ;;  %v13983_v2 = vadd.f32 %v17765_v12, %v17650_v32 }
 0x409   :  { %9238 = vtanh.f32 %v3199_v19  ;;  %8290 = vmatprep.subr.bf16.mxu0 %v8289_v18  ;;  %v13987_v35 = vadd.f32 %v17766_v30, %v17652_v33  ;;  %v8291_v55 = vpack.c.bf16 %v7177_v13, %v7176_v9  ;;  %v9221_v50 = vpop.eup %9220  ;;  %v6490_v57 = vadd.f32 %v13846_v22, %v5731_v17 }
 0x40a   :  { %v4450_v43 = vadd.f32 1.0, %v9219_v11  ;;  %9240 = vtanh.f32 %v3201_v14  ;;  %7430 = vmatprep.mubr.f32.mxu0 %v7329_v58  ;;  %v13992_v8 = vadd.f32 %v17767_v7, %v17654_v28  ;;  %v4452_v18 = vadd.f32 1.0, %v9221_v50  ;;  %v17768_v58 = vld [vmem:[#allocation19_spill] sm:$0xff] }
 0x40b   :  { %v9223_v19 = vpop.eup %9222  ;;  %9242 = vtanh.f32 %v3200_v41  ;;  %v3209_v12 = vmul.f32 0.5, %v13983_v2  ;;  %v3211_v49 = vmul.f32 0.5, %v13987_v35  ;;  %7431 = vmatmul.mubr.f32.vlgmr.msra.gmra.mrb[64].mxu0 %v7321_v44  ;;  %v13999_v7 = vadd.f32 %v17768_v58, %v17656_v54 }
 0x40c   :  { %v9225_v30 = vpop.eup %9224  ;;  %v5090_v9 = vmul.f32 0.5, %v4450_v43  ;;  %v4459_v13 = vadd.f32 1.0, %v9223_v19  ;;  %9244 = vtanh.f32 %v3202_v46  ;;  %8292 = vmatpush3.bf16.msra.mxu0 %v8291_v55  ;;  %v3210_v22 = vmul.f32 0.5, %v13992_v8  ;;  %v14002_v43 = vpop.f32.mrb[192].mxu1 }
 0x40d   :  { %v9227_v11 = vpop.eup %9226  ;;  %v5092_v14 = vmul.f32 0.5, %v4452_v18  ;;  %v4461_v17 = vadd.f32 1.0, %v9225_v30  ;;  %9246 = vtanh.f32 %v3209_v12  ;;  %17769 = vst [vmem:[#allocation93_spill] sm:$0xff] %v14002_v43  ;;  %v14004_v46 = vpop.f32.mrb[0].mxu0 }
 0x40e   :  { %v9229_v41 = vpop.eup %9228  ;;  %v5730_v50 = vmul.f32 %v5090_v9, %v13851_v4  ;;  %v5099_v45 = vmul.f32 0.5, %v4459_v13  ;;  %v4460_v44 = vadd.f32 1.0, %v9227_v11  ;;  %9248 = vtanh.f32 %v3211_v49  ;;  %17770 = vst [vmem:[#allocation94_spill] sm:$0xff] %v14004_v46  ;;  %v14007_v12 = vpop.f32.mrb[193].mxu1 }
 0x40f   :  { %v9231_v55 = vpop.eup %9230  ;;  %v5732_v19 = vmul.f32 %v5092_v14, %v13855_v37  ;;  %v5101_v18 = vmul.f32 0.5, %v4461_v17  ;;  %v4462_v30 = vadd.f32 1.0, %v9229_v41  ;;  %9250 = vtanh.f32 %v3210_v22  ;;  %17771 = vst [vmem:[#allocation31_spill] sm:$0xff] %v14007_v12  ;;  %v14009_v58 = vpop.f32.mrb[1].mxu0 }
 0x410   :  { %17772 = vst [vmem:[#allocation74_spill] sm:$0xff] %v14009_v58  ;;  %v9233_v31 = vpop.eup %9232  ;;  %v6453_v4 = vadd.f32 %v13857_v25, %v5730_v50  ;;  %v5739_v9 = vmul.f32 %v5099_v45, %v13872_v5  ;;  %v5100_v49 = vmul.f32 0.5, %v4460_v44  ;;  %v4469_v13 = vadd.f32 1.0, %v9231_v55  ;;  %v14013_v11 = vpop.f32.mrb[194].mxu1 }
 0x411   :  { %17773 = vst [vmem:[#allocation80_spill] sm:$0xff] %v14013_v11  ;;  %v14015_v46 = vpop.f32.mrb[2].mxu0  ;;  %v9235_v43 = vpop.eup %9234  ;;  %v6527_v37 = vadd.f32 %v13866_v47, %v5732_v19  ;;  %v5741_v22 = vmul.f32 %v5101_v18, %v13878_v40  ;;  %v5102_v14 = vmul.f32 0.5, %v4462_v30  ;;  %v4471_v17 = vadd.f32 1.0, %v9233_v31 }
 0x412   :  { %17774 = vst [vmem:[#allocation81_spill] sm:$0xff] %v14015_v46  ;;  %v9237_v41 = vpop.eup %9236  ;;  %v6417_v58 = vadd.f32 %v13874_v56, %v5739_v9  ;;  %v5740_v25 = vmul.f32 %v5100_v49, %v13882_v21  ;;  %v5109_v50 = vmul.f32 0.5, %v4469_v13  ;;  %v4470_v5 = vadd.f32 1.0, %v9235_v43  ;;  %v14021_v45 = vpop.f32.mrb[195].mxu1 }
 0x413   :  { %17775 = vst [vmem:[#allocation12_spill] sm:$0xff] %v14021_v45  ;;  %v14023_v44 = vpop.f32.mrb[3].mxu0  ;;  %v9239_v55 = vpop.eup %9238  ;;  %v6491_v46 = vadd.f32 %v6490_v57, %v5741_v22  ;;  %v5742_v11 = vmul.f32 %v5102_v14, %v13886_v20  ;;  %v5111_v47 = vmul.f32 0.5, %v4471_v17  ;;  %v4472_v19 = vadd.f32 1.0, %v9237_v41 }
 0x414   :  { %17776 = vst [vmem:[#allocation95_spill] sm:$0xff] %v14023_v44  ;;  %v9241_v40 = vpop.eup %9240  ;;  %v6454_v18 = vadd.f32 %v6453_v4, %v5740_v25  ;;  %v5749_v31 = vmul.f32 %v5109_v50, %v13897_v34  ;;  %v5110_v30 = vmul.f32 0.5, %v4470_v5  ;;  %v4479_v56 = vadd.f32 1.0, %v9239_v55  ;;  %v14031_v5 = vpop.f32.mrb[196].mxu1 }
 0x415   :  { %v9243_v9 = vpop.eup %9242  ;;  %v6528_v21 = vadd.f32 %v6527_v37, %v5742_v11  ;;  %v5751_v43 = vmul.f32 %v5111_v47, %v13919_v27  ;;  %v5112_v49 = vmul.f32 0.5, %v4472_v19  ;;  %v4481_v13 = vadd.f32 1.0, %v9241_v40  ;;  %17777 = vst [vmem:[#allocation96_spill] sm:$0xff] %v14031_v5  ;;  %v14033_v55 = vpop.f32.mrb[4].mxu0 }
 0x416   :  { %v9245_v45 = vpop.eup %9244  ;;  %v6418_v44 = vadd.f32 %v6417_v58, %v5749_v31  ;;  %v5750_v57 = vmul.f32 %v5110_v30, %v13925_v51  ;;  %v5119_v22 = vmul.f32 0.5, %v4479_v56  ;;  %v4480_v20 = vadd.f32 1.0, %v9243_v9  ;;  %17778 = vst [vmem:[#allocation97_spill] sm:$0xff] %v14033_v55  ;;  %v14043_v30 = vpop.f32.mrb[197].mxu1 }
 0x417   :  { %v9247_v14 = vpop.eup %9246  ;;  %v6492_v17 = vadd.f32 %v6491_v46, %v5751_v43  ;;  %v5752_v4 = vmul.f32 %v5112_v49, %v13929_v24  ;;  %v5121_v41 = vmul.f32 0.5, %v4481_v13  ;;  %v4482_v34 = vadd.f32 1.0, %v9245_v45  ;;  %17779 = vst [vmem:[#allocation75_spill] sm:$0xff] %v14043_v30  ;;  %v14045_v56 = vpop.f32.mrb[5].mxu0  ;;  %v7179_v43 = vld [vmem:[%s17109_s5 + $0x118] sm:$0xff] }
 0x418   :  { %v9249_v25 = vpop.eup %9248  ;;  %v6455_v50 = vadd.f32 %v6454_v18, %v5750_v57  ;;  %v5759_v11 = vmul.f32 %v5119_v22, %v13934_v63  ;;  %v5120_v37 = vmul.f32 0.5, %v4480_v20  ;;  %v4489_v27 = vadd.f32 1.0, %v9247_v14  ;;  %v7194_v63 = vld [vmem:[%s17109_s5 + $0x190] sm:$0xff]  ;;  %v7195_v18 = vld [vmem:[%s17109_s5 + $0x198] sm:$0xff]  ;;  %17780 = vst [vmem:[#allocation30_spill] sm:$0xff] %v14045_v56 }
 0x419   :  { %v9251_v58 = vpop.eup %9250  ;;  %v6529_v51 = vadd.f32 %v6528_v21, %v5752_v4  ;;  %v5761_v47 = vmul.f32 %v5121_v41, %v13951_v29  ;;  %v5122_v19 = vmul.f32 0.5, %v4482_v34  ;;  %v4491_v46 = vadd.f32 1.0, %v9249_v25  ;;  %v7178_v21 = vld [vmem:[%s17109_s5 + $0x110] sm:$0xff]  ;;  %v7197_v4 = vld [vmem:[%s17109_s5 + $0x1a8] sm:$0xff] }
 0x41a   :  { %v6419_v40 = vadd.f32 %v6418_v44, %v5759_v11  ;;  %v5760_v24 = vmul.f32 %v5120_v37, %v13955_v60  ;;  %v5129_v45 = vmul.f32 0.5, %v4489_v27  ;;  %v4490_v31 = vadd.f32 1.0, %v9251_v58  ;;  %v7181_v37 = vld [vmem:[%s17109_s5 + $0x128] sm:$0xff]  ;;  %v7198_v58 = vld [vmem:[%s17109_s5 + $0x1b0] sm:$0xff] }
 0x41b   :  { %v6493_v29 = vadd.f32 %v6492_v17, %v5761_v47  ;;  %v5762_v9 = vmul.f32 %v5122_v19, %v13959_v62  ;;  %v5131_v44 = vmul.f32 0.5, %v4491_v46  ;;  %v3212_v60 = vmul.f32 0.5, %v13999_v7  ;;  %v7196_v17 = vld [vmem:[%s17109_s5 + $0x1a0] sm:$0xff] }
 0x41c   :  { %v6456_v49 = vadd.f32 %v6455_v50, %v5760_v24  ;;  %v5769_v13 = vmul.f32 %v5129_v45, %v13983_v2  ;;  %v5130_v57 = vmul.f32 0.5, %v4490_v31  ;;  %v7314_v22 = vcombine.high %v13936_v53, %v13936_v53  ;;  %v7183_v45 = vld [vmem:[%s17109_s5 + $0x138] sm:$0xff] }
 0x41d   :  { %v14058_v20 = vadd.f32 %v6529_v51, %v5762_v9  ;;  %v5771_v62 = vmul.f32 %v5131_v44, %v13987_v35  ;;  %9252 = vtanh.f32 %v3212_v60  ;;  %v8293_v14 = vpack.c.bf16 %v7195_v18, %v7194_v63  ;;  %v7199_v51 = vld [vmem:[%s17109_s5 + $0x1b8] sm:$0xff]  ;;  %v17783_v9 = vld [vmem:[#allocation60_spill] sm:$0xff] }
 0x41e   :  { %v14067_v41 = vadd.f32 %v6419_v40, %v5769_v13  ;;  %v5770_v2 = vmul.f32 %v5130_v57, %v13992_v8  ;;  %v14071_v53 = vrot.slane %v7314_v22, %v17686_v39  ;;  %v8295_v34 = vpack.c.bf16 %v7179_v43, %v7178_v21  ;;  %v7180_v8 = vld [vmem:[%s17109_s5 + $0x120] sm:$0xff]  ;;  %v17781_v40 = vld [vmem:[#allocation58_spill] sm:$0xff]  ;;  %v7201_v57 = vld [vmem:[%s17109_s5 + $0x1c8] sm:$0xff] }
 0x41f   :  { %v14073_v25 = vadd.f32 %v6493_v29, %v5771_v62  ;;  %8294 = vmatprep.subr.bf16.mxu0 %v8293_v14  ;;  %v14077_v35 = vadd.f32 %v13370_v23, %v17650_v32  ;;  %v14081_v50 = vadd.f32 %v13372_v10, %v17652_v33  ;;  %v14085_v11 = vadd.f32 %v13375_v52, %v17654_v28  ;;  %v17782_v63 = vld [vmem:[#allocation59_spill] sm:$0xff]  ;;  %v17784_v21 = vld [vmem:[#allocation84_spill] sm:$0xff] }
 0x420   :  { %v14093_v27 = vadd.f32 %v6456_v49, %v5770_v2  ;;  %v7330_v23 = vcombine.high %v14071_v53, %v14071_v53  ;;  %8296 = vmatpush3.bf16.msra.mxu0 %v8295_v34  ;;  %v14099_v10 = vadd.f32 %v13377_v36, %v17656_v54  ;;  %v8297_v52 = vpack.c.bf16 %v7197_v4, %v7196_v17  ;;  %v7182_v36 = vld [vmem:[%s17109_s5 + $0x130] sm:$0xff]  ;;  %v7200_v13 = vld [vmem:[%s17109_s5 + $0x1c0] sm:$0xff] }
 0x421   :  { %v3219_v47 = vmul.f32 0.5, %v14077_v35  ;;  %v3221_v19 = vmul.f32 0.5, %v14081_v50  ;;  %v3220_v46 = vmul.f32 0.5, %v14085_v11  ;;  %v14112_v24 = vadd.f32 %v17781_v40, %v17650_v32  ;;  %v17785_v4 = vld [vmem:[#allocation85_spill] sm:$0xff]  ;;  %v17786_v34 = vld [vmem:[#allocation86_spill] sm:$0xff]  ;;  %v14167_v40 = vpop.f32.mrb[6].mxu0 }
 0x422   :  { %7500 = vmatprep.mubr.f32.mxu0 %v7330_v23  ;;  %v3222_v31 = vmul.f32 0.5, %v14099_v10  ;;  %8298 = vmatprep.subr.bf16.mxu0 %v8297_v52  ;;  %v14123_v18 = vadd.f32 %v17782_v63, %v17652_v33  ;;  %v8299_v29 = vpack.c.bf16 %v7181_v37, %v7180_v8  ;;  %v14127_v44 = vadd.f32 %v17783_v9, %v17654_v28  ;;  %v17787_v37 = vld [vmem:[#allocation87_spill] sm:$0xff]  ;;  %v17788_v52 = vld [vmem:[#allocation88_spill] sm:$0xff]  ;;  %v7202_v9 = vld [vmem:[%s17109_s5 + $0x1d0] sm:$0xff] }
 0x423   :  { %9254 = vtanh.f32 %v3219_v47  ;;  %v3229_v60 = vmul.f32 0.5, %v14112_v24  ;;  %v14132_v43 = vadd.f32 %v17784_v21, %v17656_v54  ;;  %v8301_v49 = vpack.c.bf16 %v7199_v51, %v7198_v58  ;;  %v7184_v47 = vld [vmem:[%s17109_s5 + $0x140] sm:$0xff]  ;;  %17790 = vst [vmem:[#allocation33_spill] sm:$0xff] %v14167_v40 }
 0x424   :  { %9256 = vtanh.f32 %v3221_v19  ;;  %v3231_v22 = vmul.f32 0.5, %v14123_v18  ;;  %8300 = vmatpush3.bf16.msra.mxu0 %v8299_v29  ;;  %v3230_v62 = vmul.f32 0.5, %v14127_v44  ;;  %v8303_v14 = vpack.c.bf16 %v7183_v45, %v7182_v36  ;;  %v7185_v19 = vld [vmem:[%s17109_s5 + $0x148] sm:$0xff]  ;;  %v17794_v39 = vld [vmem:[#allocation23_spill] sm:$0xff] }
 0x425   :  { %9258 = vtanh.f32 %v3220_v46  ;;  %v3232_v17 = vmul.f32 0.5, %v14132_v43  ;;  %8302 = vmatprep.subr.bf16.mxu0 %v8301_v49  ;;  %v14145_v2 = vadd.f32 %v17785_v4, %v17650_v32  ;;  %v14149_v8 = vadd.f32 %v17786_v34, %v17652_v33  ;;  %v14165_v46 = vpop.f32.mrb[198].mxu1  ;;  %v17791_v63 = vld [vmem:[#allocation20_spill] sm:$0xff]  ;;  %v7187_v4 = vld [vmem:[%s17109_s5 + $0x158] sm:$0xff] }
 0x426   :  { %9260 = vtanh.f32 %v3222_v31  ;;  %v14153_v23 = vadd.f32 %v17787_v37, %v17654_v28  ;;  %v14157_v58 = vadd.f32 %v17788_v52, %v17656_v54  ;;  %v8305_v51 = vpack.c.bf16 %v7201_v57, %v7200_v13  ;;  %17789 = vst [vmem:[#allocation76_spill] sm:$0xff] %v14165_v46  ;;  %v7186_v57 = vld [vmem:[%s17109_s5 + $0x150] sm:$0xff]  ;;  %v14203_v56 = vpop.f32.mrb[199].mxu1 }
 0x427   :  { %v9253_v36 = vpop.eup %9252  ;;  %9262 = vtanh.f32 %v3229_v60  ;;  %v3239_v45 = vmul.f32 0.5, %v14145_v2  ;;  %v3241_v31 = vmul.f32 0.5, %v14149_v8  ;;  %v14173_v29 = vadd.f32 %v17791_v63, %v17650_v32  ;;  %v7203_v60 = vld [vmem:[%s17109_s5 + $0x1d8] sm:$0xff]  ;;  %17795 = vst [vmem:[#allocation32_spill] sm:$0xff] %v14203_v56 }
 0x428   :  { %v4492_v21 = vadd.f32 1.0, %v9253_v36  ;;  %9264 = vtanh.f32 %v3231_v22  ;;  %8304 = vmatpush3.bf16.msra.mxu0 %v8303_v14  ;;  %v3240_v49 = vmul.f32 0.5, %v14153_v23  ;;  %v3242_v13 = vmul.f32 0.5, %v14157_v58  ;;  %v17792_v14 = vld [vmem:[#allocation89_spill] sm:$0xff]  ;;  %v17793_v36 = vld [vmem:[#allocation90_spill] sm:$0xff] }
 0x429   :  { %9266 = vtanh.f32 %v3230_v62  ;;  %8306 = vmatprep.subr.bf16.mxu0 %v8305_v51  ;;  %v3249_v22 = vmul.f32 0.5, %v14173_v29  ;;  %v14192_v34 = vadd.f32 %v17792_v14, %v17652_v33  ;;  %v8307_v37 = vpack.c.bf16 %v7185_v19, %v7184_v47  ;;  %v14205_v14 = vpop.f32.mrb[7].mxu0 }
 0x42a   :  { %v5132_v52 = vmul.f32 0.5, %v4492_v21  ;;  %9268 = vtanh.f32 %v3232_v17  ;;  %v14196_v63 = vadd.f32 %v17793_v36, %v17654_v28  ;;  %v14200_v40 = vadd.f32 %v17794_v39, %v17656_v54  ;;  %17796 = vst [vmem:[#allocation15_spill] sm:$0xff] %v14205_v14  ;;  %v17797_v39 = vld [vmem:[#allocation91_spill] sm:$0xff] }
 0x42b   :  { %9270 = vtanh.f32 %v3239_v45  ;;  %v3251_v62 = vmul.f32 0.5, %v14192_v34  ;;  %v8309_v51 = vpack.c.bf16 %v7203_v60, %v7202_v9  ;;  %v8311_v46 = vpack.c.bf16 %v7187_v4, %v7186_v57  ;;  %v17798_v9 = vld [vmem:[#allocation22_spill] sm:$0xff]  ;;  %v17799_v57 = vld [vmem:[#allocation25_spill] sm:$0xff] }
 0x42c   :  { %v5772_v47 = vmul.f32 %v5132_v52, %v13999_v7  ;;  %9272 = vtanh.f32 %v3241_v31  ;;  %8308 = vmatpush3.bf16.msra.mxu0 %v8307_v37  ;;  %v3250_v17 = vmul.f32 0.5, %v14196_v63  ;;  %v3252_v19 = vmul.f32 0.5, %v14200_v40 }
 0x42d   :  { %v9255_v21 = vpop.eup %9254  ;;  %9274 = vtanh.f32 %v3240_v49  ;;  %8310 = vmatprep.subr.bf16.mxu0 %v8309_v51  ;;  %v14212_v45 = vadd.f32 %v17797_v39, %v17650_v32  ;;  %v14216_v60 = vadd.f32 %v17798_v9, %v17652_v33  ;;  %v14220_v7 = vadd.f32 %v17799_v57, %v17654_v28  ;;  %v17800_v49 = vld [vmem:[#allocation7_spill] sm:$0xff] }
 0x42e   :  { %v9257_v31 = vpop.eup %9256  ;;  %v6531_v4 = vadd.f32 %v14058_v20, %v5772_v47  ;;  %v4499_v37 = vadd.f32 1.0, %v9255_v21  ;;  %9276 = vtanh.f32 %v3242_v13  ;;  %v14225_v52 = vadd.f32 %v17800_v49, %v17656_v54  ;;  %v14239_v49 = vpop.f32.mrb[8].mxu0 }
 0x42f   :  { %v9259_v36 = vpop.eup %9258  ;;  %v4501_v51 = vadd.f32 1.0, %v9257_v31  ;;  %9278 = vtanh.f32 %v3249_v22  ;;  %v3259_v39 = vmul.f32 0.5, %v14212_v45  ;;  %v14229_v9 = vmul.f32 0.5, %v14216_v60  ;;  %v14237_v22 = vpop.f32.mrb[200].mxu1  ;;  %17802 = vst [vmem:[#allocation98_spill] sm:$0xff] %v14239_v49 }
 0x430   :  { %v9261_v14 = vpop.eup %9260  ;;  %v5139_v57 = vmul.f32 0.5, %v4499_v37  ;;  %v4500_v56 = vadd.f32 1.0, %v9259_v36  ;;  %9280 = vtanh.f32 %v3251_v62  ;;  %8312 = vmatpush3.bf16.msra.mxu0 %v8311_v46  ;;  %v14232_v20 = vmul.f32 0.5, %v14220_v7  ;;  %17801 = vst [vmem:[#allocation14_spill] sm:$0xff] %v14237_v22  ;;  %v14242_v46 = vpop.f32.mrb[201].mxu1 }
 0x431   :  { %v9263_v13 = vpop.eup %9262  ;;  %v5141_v47 = vmul.f32 0.5, %v4501_v51  ;;  %v4502_v21 = vadd.f32 1.0, %v9261_v14  ;;  %9282 = vtanh.f32 %v3250_v17  ;;  %v14235_v31 = vmul.f32 0.5, %v14225_v52  ;;  %17803 = vst [vmem:[#allocation77_spill] sm:$0xff] %v14242_v46  ;;  %v14244_v55 = vpop.f32.mrb[9].mxu0 }
 0x432   :  { %v9265_v30 = vpop.eup %9264  ;;  %v5779_v37 = vmul.f32 %v5139_v57, %v14077_v35  ;;  %v5140_v36 = vmul.f32 0.5, %v4500_v56  ;;  %v4509_v62 = vadd.f32 1.0, %v9263_v13  ;;  %9284 = vtanh.f32 %v3252_v19  ;;  %17804 = vst [vmem:[#allocation78_spill] sm:$0xff] %v14244_v55  ;;  %v14247_v12 = vpop.f32.mrb[202].mxu1 }
 0x433   :  { %v9267_v51 = vpop.eup %9266  ;;  %v5781_v14 = vmul.f32 %v5141_v47, %v14081_v50  ;;  %v5142_v17 = vmul.f32 0.5, %v4502_v21  ;;  %v4511_v5 = vadd.f32 1.0, %v9265_v30  ;;  %9286 = vtanh.f32 %v3259_v39  ;;  %17805 = vst [vmem:[#allocation17_spill] sm:$0xff] %v14247_v12  ;;  %v14249_v22 = vpop.f32.mrb[10].mxu0 }
 0x434   :  { %17806 = vst [vmem:[#allocation79_spill] sm:$0xff] %v14249_v22  ;;  %v9269_v49 = vpop.eup %9268  ;;  %v6421_v35 = vadd.f32 %v14067_v41, %v5779_v37  ;;  %v5780_v56 = vmul.f32 %v5140_v36, %v14085_v11  ;;  %v5149_v19 = vmul.f32 0.5, %v4509_v62  ;;  %v4510_v57 = vadd.f32 1.0, %v9267_v51  ;;  %v14255_v30 = vpop.f32.mrb[203].mxu1 }
 0x435   :  { %v9271_v13 = vpop.eup %9270  ;;  %v6495_v55 = vadd.f32 %v14073_v25, %v5781_v14  ;;  %v5782_v46 = vmul.f32 %v5142_v17, %v14099_v10  ;;  %v5151_v50 = vmul.f32 0.5, %v4511_v5  ;;  %v4512_v47 = vadd.f32 1.0, %v9269_v49  ;;  %17807 = vst [vmem:[#allocation35_spill] sm:$0xff] %v14255_v30  ;;  %v14257_v39 = vpop.f32.mrb[11].mxu0 }
 0x436   :  { %17808 = vst [vmem:[#allocation82_spill] sm:$0xff] %v14257_v39  ;;  %v9273_v21 = vpop.eup %9272  ;;  %v6458_v22 = vadd.f32 %v14093_v27, %v5780_v56  ;;  %v5789_v41 = vmul.f32 %v5149_v19, %v14112_v24  ;;  %v5150_v37 = vmul.f32 0.5, %v4510_v57  ;;  %v4519_v11 = vadd.f32 1.0, %v9271_v13 }
 0x437   :  { %v9275_v36 = vpop.eup %9274  ;;  %v6532_v62 = vadd.f32 %v6531_v4, %v5782_v46  ;;  %v5791_v51 = vmul.f32 %v5151_v50, %v14123_v18  ;;  %v5152_v25 = vmul.f32 0.5, %v4512_v47  ;;  %v4521_v14 = vadd.f32 1.0, %v9273_v21  ;;  %v14266_v21 = vpop.f32.mrb[204].mxu1 }
 0x438   :  { %v9277_v10 = vpop.eup %9276  ;;  %v6422_v5 = vadd.f32 %v6421_v35, %v5789_v41  ;;  %v5790_v49 = vmul.f32 %v5150_v37, %v14127_v44  ;;  %v5159_v17 = vmul.f32 0.5, %v4519_v11  ;;  %v4520_v30 = vadd.f32 1.0, %v9275_v36  ;;  %v14268_v41 = vpop.f32.mrb[12].mxu0 }
 0x439   :  { %v9279_v39 = vpop.eup %9278  ;;  %v6496_v12 = vadd.f32 %v6495_v55, %v5791_v51  ;;  %v5792_v27 = vmul.f32 %v5152_v25, %v14132_v43  ;;  %v5161_v56 = vmul.f32 0.5, %v4521_v14  ;;  %v4522_v24 = vadd.f32 1.0, %v9277_v10  ;;  %v14271_v36 = vpop.f32.mrb[205].mxu1 }
 0x43a   :  { %v9281_v19 = vpop.eup %9280  ;;  %v6459_v57 = vadd.f32 %v6458_v22, %v5790_v49  ;;  %v5799_v4 = vmul.f32 %v5159_v17, %v14145_v2  ;;  %v5160_v46 = vmul.f32 0.5, %v4520_v30  ;;  %v4529_v18 = vadd.f32 1.0, %v9279_v39  ;;  %v14273_v2 = vpop.f32.mrb[13].mxu0  ;;  %v7204_v17 = vld [vmem:[%s17109_s5 + $0x1e0] sm:$0xff] }
 0x43b   :  { %v9283_v13 = vpop.eup %9282  ;;  %v6533_v50 = vadd.f32 %v6532_v62, %v5792_v27  ;;  %v5801_v35 = vmul.f32 %v5161_v56, %v14149_v8  ;;  %v5162_v47 = vmul.f32 0.5, %v4522_v24  ;;  %v4531_v44 = vadd.f32 1.0, %v9281_v19  ;;  %v14276_v25 = vpop.f32.mrb[206].mxu1 }
 0x43c   :  { %v9285_v55 = vpop.eup %9284  ;;  %v6423_v43 = vadd.f32 %v6422_v5, %v5799_v4  ;;  %v5800_v37 = vmul.f32 %v5160_v46, %v14153_v23  ;;  %v5169_v11 = vmul.f32 0.5, %v4529_v18  ;;  %v4530_v22 = vadd.f32 1.0, %v9283_v13  ;;  %v14278_v14 = vpop.f32.mrb[14].mxu0  ;;  %v7188_v46 = vld [vmem:[%s17109_s5 + $0x160] sm:$0xff]  ;;  %v7189_v18 = vld [vmem:[%s17109_s5 + $0x168] sm:$0xff] }
 0x43d   :  { %v9287_v30 = vpop.eup %9286  ;;  %v6497_v39 = vadd.f32 %v6496_v12, %v5801_v35  ;;  %v5802_v8 = vmul.f32 %v5162_v47, %v14157_v58  ;;  %v5171_v62 = vmul.f32 0.5, %v4531_v44  ;;  %v4532_v51 = vadd.f32 1.0, %v9285_v55  ;;  %v7205_v12 = vld [vmem:[%s17109_s5 + $0x1e8] sm:$0xff]  ;;  %v14287_v58 = vpop.f32.mrb[207].mxu1  ;;  %v7190_v55 = vld [vmem:[%s17109_s5 + $0x170] sm:$0xff] }
 0x43e   :  { %v6460_v10 = vadd.f32 %v6459_v57, %v5800_v37  ;;  %v5809_v5 = vmul.f32 %v5169_v11, %v14173_v29  ;;  %v5170_v23 = vmul.f32 0.5, %v4530_v22  ;;  %v4539_v49 = vadd.f32 1.0, %v9287_v30  ;;  %v14289_v27 = vpop.f32.mrb[15].mxu0  ;;  %v17810_v47 = vld [vmem:[#allocation61_spill] sm:$0xff]  ;;  %v17812_v11 = vld [vmem:[#allocation6_spill] sm:$0xff] }
 0x43f   :  { %17809 = vst [vmem:[#allocation51_spill] sm:$0xff] %v14289_v27  ;;  %v6534_v56 = vadd.f32 %v6533_v50, %v5802_v8  ;;  %v5811_v24 = vmul.f32 %v5171_v62, %v14192_v34  ;;  %v5172_v19 = vmul.f32 0.5, %v4532_v51  ;;  %9288 = vtanh.f32 %v14229_v9  ;;  %v17813_v30 = vld [vmem:[#allocation38_spill] sm:$0xff] }
 0x440   :  { %v6424_v29 = vadd.f32 %v6423_v43, %v5809_v5  ;;  %v5810_v57 = vmul.f32 %v5170_v23, %v14196_v63  ;;  %v5179_v4 = vmul.f32 0.5, %v4539_v49  ;;  %9290 = vtanh.f32 %v14232_v20  ;;  %v7206_v63 = vld [vmem:[%s17109_s5 + $0x1f0] sm:$0xff]  ;;  %v7207_v20 = vld [vmem:[%s17109_s5 + $0x1f8] sm:$0xff] }
 0x441   :  { %v14301_v13 = vadd.f32 %v6497_v39, %v5811_v24  ;;  %v5812_v34 = vmul.f32 %v5172_v19, %v14200_v40  ;;  %9292 = vtanh.f32 %v14235_v31  ;;  %v8313_v9 = vpack.c.bf16 %v7205_v12, %v7204_v17  ;;  %v17811_v40 = vld [vmem:[#allocation62_spill] sm:$0xff]  ;;  %v17814_v12 = vld [vmem:[#allocation24_spill] sm:$0xff] }
 0x442   :  { %v14311_v50 = vadd.f32 %v6460_v10, %v5810_v57  ;;  %v5819_v35 = vmul.f32 %v5179_v4, %v14212_v45  ;;  %v14316_v44 = vadd.f32 %v17810_v47, %v17650_v32  ;;  %v14320_v31 = vadd.f32 %v17811_v40, %v17652_v33  ;;  %v7191_v43 = vld [vmem:[%s17109_s5 + $0x178] sm:$0xff] }
 0x443   :  { %v14328_v37 = vadd.f32 %v6534_v56, %v5812_v34  ;;  %8314 = vmatprep.subr.bf16.mxu0 %v8313_v9  ;;  %v8315_v45 = vpack.c.bf16 %v7189_v18, %v7188_v46  ;;  %v14332_v22 = vadd.f32 %v17812_v11, %v17654_v28  ;;  %v14336_v39 = vadd.f32 %v17813_v30, %v17656_v54  ;;  %v17815_v24 = vld [vmem:[#allocation70_spill] sm:$0xff]  ;;  %v17818_v18 = vld [vmem:[#allocation47_spill] sm:$0xff]  ;;  %v17820_v30 = vld [vmem:[#allocation48_spill] sm:$0xff] }
 0x444   :  { %v14338_v8 = vadd.f32 %v6424_v29, %v5819_v35  ;;  %v3269_v62 = vmul.f32 0.5, %v14316_v44  ;;  %v3271_v51 = vmul.f32 0.5, %v14320_v31  ;;  %v8317_v10 = vpack.c.bf16 %v7207_v20, %v7206_v63  ;;  %v17816_v29 = vld [vmem:[#allocation9_spill] sm:$0xff] }
 0x445   :  { %8316 = vmatpush3.bf16.msra.mxu0 %v8315_v45  ;;  %v3270_v5 = vmul.f32 0.5, %v14332_v22  ;;  %v3272_v23 = vmul.f32 0.5, %v14336_v39  ;;  %v8319_v49 = vpack.c.bf16 %v7191_v43, %v7190_v55  ;;  %v14346_v17 = vadd.f32 %v13547_v48, %v17650_v32  ;;  %v17817_v48 = vld [vmem:[#allocation49_spill] sm:$0xff]  ;;  %v17819_v55 = vld [vmem:[#allocation54_spill] sm:$0xff] }
 0x446   :  { %9294 = vtanh.f32 %v3269_v62  ;;  %8318 = vmatprep.subr.bf16.mxu0 %v8317_v10  ;;  %v14350_v56 = vadd.f32 %v17814_v12, %v17652_v33  ;;  %v14354_v19 = vadd.f32 %v17815_v24, %v17654_v28  ;;  %v14358_v57 = vadd.f32 %v17816_v29, %v17656_v54 }
 0x447   :  { %9296 = vtanh.f32 %v3271_v51  ;;  %v3279_v4 = vmul.f32 0.5, %v14346_v17  ;;  %v14363_v46 = vadd.f32 %v17817_v48, %v17650_v32  ;;  %v14367_v34 = vadd.f32 %v17818_v18, %v17652_v33 }
 0x448   :  { %9298 = vtanh.f32 %v3270_v5  ;;  %v3281_v9 = vmul.f32 0.5, %v14350_v56  ;;  %v3280_v63 = vmul.f32 0.5, %v14354_v19  ;;  %v3282_v20 = vmul.f32 0.5, %v14358_v57 }
 0x449   :  { %v9289_v35 = vpop.eup %9288  ;;  %9300 = vtanh.f32 %v3272_v23  ;;  %8320 = vmatpush3.bf16.msra.mxu0 %v8319_v49  ;;  %v3289_v47 = vmul.f32 0.5, %v14363_v46  ;;  %v3291_v40 = vmul.f32 0.5, %v14367_v34  ;;  %v14376_v43 = vadd.f32 %v17819_v55, %v17654_v28 }
 0x44a   :  { %v9291_v45 = vpop.eup %9290  ;;  %v4541_v11 = vadd.f32 1.0, %v9289_v35  ;;  %9302 = vtanh.f32 %v3279_v4  ;;  %v14380_v62 = vadd.f32 %v17820_v30, %v17656_v54  ;;  %v14384_v51 = vadd.f32 %v13581_v61, %v17650_v32  ;;  %v14400_v35 = vpop.f32.mrb[208].mxu1 }
 0x44b   :  { %v9293_v10 = vpop.eup %9292  ;;  %v4540_v5 = vadd.f32 1.0, %v9291_v45  ;;  %9304 = vtanh.f32 %v3281_v9  ;;  %v3290_v23 = vmul.f32 0.5, %v14376_v43  ;;  %v14389_v49 = vadd.f32 %v13583_v15, %v17652_v33  ;;  %17821 = vst [vmem:[#allocation83_spill] sm:$0xff] %v14400_v35  ;;  %v17824_v45 = vld [vmem:[#allocation63_spill] sm:$0xff] }
 0x44c   :  { %v5181_v12 = vmul.f32 0.5, %v4541_v11  ;;  %v4542_v24 = vadd.f32 1.0, %v9293_v10  ;;  %9306 = vtanh.f32 %v3280_v63  ;;  %7501 = vmatmul.mubr.f32.vlgmr.msra.gmra.mrb[66].mxu0 %v14071_v53  ;;  %v3292_v29 = vmul.f32 0.5, %v14380_v62  ;;  %v14402_v63 = vpop.f32.mrb[16].mxu0  ;;  %v14416_v10 = vpop.f32.mrb[209].mxu1 }
 0x44d   :  { %v5180_v4 = vmul.f32 0.5, %v4540_v5  ;;  %9308 = vtanh.f32 %v3282_v20  ;;  %v3299_v61 = vmul.f32 0.5, %v14384_v51  ;;  %v3301_v48 = vmul.f32 0.5, %v14389_v49  ;;  %17822 = vst [vmem:[#allocation34_spill] sm:$0xff] %v14402_v63  ;;  %v17823_v20 = vld [vmem:[#allocation42_spill] sm:$0xff]  ;;  %17825 = vst [vmem:[#allocation37_spill] sm:$0xff] %v14416_v10 }
 0x44e   :  { %v5821_v18 = vmul.f32 %v5181_v12, %v14216_v60  ;;  %v5182_v9 = vmul.f32 0.5, %v4542_v24  ;;  %9310 = vtanh.f32 %v3289_v47  ;;  %v14398_v15 = vadd.f32 %v13586_v16, %v17654_v28 }
 0x44f   :  { %v5820_v53 = vmul.f32 %v5180_v4, %v14220_v7  ;;  %9312 = vtanh.f32 %v3291_v40  ;;  %v14407_v55 = vadd.f32 %v17823_v20, %v17656_v54  ;;  %v14411_v60 = vadd.f32 %v17824_v45, %v17650_v32  ;;  %v14418_v7 = vpop.f32.mrb[17].mxu0 }
 0x450   :  { %v9295_v47 = vpop.eup %9294  ;;  %v6499_v11 = vadd.f32 %v14301_v13, %v5821_v18  ;;  %v5822_v16 = vmul.f32 %v5182_v9, %v14225_v52  ;;  %9314 = vtanh.f32 %v3290_v23  ;;  %v3300_v30 = vmul.f32 0.5, %v14398_v15  ;;  %17826 = vst [vmem:[#allocation36_spill] sm:$0xff] %v14418_v7  ;;  %v14424_v23 = vpop.f32.mrb[210].mxu1 }
 0x451   :  { %v9297_v40 = vpop.eup %9296  ;;  %v6462_v5 = vadd.f32 %v14311_v50, %v5820_v53  ;;  %v4549_v12 = vadd.f32 1.0, %v9295_v47  ;;  %9316 = vtanh.f32 %v3292_v29  ;;  %v3302_v24 = vmul.f32 0.5, %v14407_v55  ;;  %17827 = vst [vmem:[#allocation52_spill] sm:$0xff] %v14424_v23  ;;  %v14426_v18 = vpop.f32.mrb[18].mxu0  ;;  %v17829_v50 = vld [vmem:[#allocation8_spill] sm:$0xff] }
 0x452   :  { %v9299_v4 = vpop.eup %9298  ;;  %v6536_v20 = vadd.f32 %v14328_v37, %v5822_v16  ;;  %v4551_v13 = vadd.f32 1.0, %v9297_v40  ;;  %9318 = vtanh.f32 %v3299_v61  ;;  %v3309_v52 = vmul.f32 0.5, %v14411_v60  ;;  %17828 = vst [vmem:[#allocation39_spill] sm:$0xff] %v14426_v18  ;;  %v17830_v37 = vld [vmem:[#allocation64_spill] sm:$0xff]  ;;  %v14436_v16 = vpop.f32.mrb[211].mxu1 }
 0x453   :  { %v9301_v9 = vpop.eup %9300  ;;  %v5189_v45 = vmul.f32 0.5, %v4549_v12  ;;  %v4550_v7 = vadd.f32 1.0, %v9299_v4  ;;  %9320 = vtanh.f32 %v3301_v48  ;;  %v14430_v29 = vadd.f32 %v17829_v50, %v17652_v33  ;;  %17831 = vst [vmem:[#allocation40_spill] sm:$0xff] %v14436_v16  ;;  %v14438_v40 = vpop.f32.mrb[19].mxu0 }
 0x454   :  { %v9303_v53 = vpop.eup %9302  ;;  %v5191_v47 = vmul.f32 0.5, %v4551_v13  ;;  %v4552_v10 = vadd.f32 1.0, %v9301_v9  ;;  %9322 = vtanh.f32 %v3300_v30  ;;  %v14434_v61 = vadd.f32 %v17830_v37, %v17654_v28  ;;  %17832 = vst [vmem:[#allocation41_spill] sm:$0xff] %v14438_v40 }
 0x455   :  { %v9305_v18 = vpop.eup %9304  ;;  %v5829_v12 = vmul.f32 %v5189_v45, %v14316_v44  ;;  %v5190_v48 = vmul.f32 0.5, %v4550_v7  ;;  %v4559_v4 = vadd.f32 1.0, %v9303_v53  ;;  %9324 = vtanh.f32 %v3302_v24 }
 0x456   :  { %v9307_v50 = vpop.eup %9306  ;;  %v5831_v23 = vmul.f32 %v5191_v47, %v14320_v31  ;;  %v5192_v13 = vmul.f32 0.5, %v4552_v10  ;;  %v4561_v9 = vadd.f32 1.0, %v9305_v18  ;;  %9326 = vtanh.f32 %v3309_v52 }
 0x457   :  { %v9309_v30 = vpop.eup %9308  ;;  %v6426_v37 = vadd.f32 %v14338_v8, %v5829_v12  ;;  %v5830_v63 = vmul.f32 %v5190_v48, %v14332_v22  ;;  %v5199_v16 = vmul.f32 0.5, %v4559_v4  ;;  %v4560_v35 = vadd.f32 1.0, %v9307_v50  ;;  %v14447_v48 = vpop.f32.mrb[212].mxu1 }
 0x458   :  { %v9311_v40 = vpop.eup %9310  ;;  %v6500_v27 = vadd.f32 %v6499_v11, %v5831_v23  ;;  %v5832_v44 = vmul.f32 %v5192_v13, %v14336_v39  ;;  %v5201_v7 = vmul.f32 0.5, %v4561_v9  ;;  %v4562_v45 = vadd.f32 1.0, %v9309_v30  ;;  %v14449_v4 = vpop.f32.mrb[20].mxu0 }
 0x459   :  { %v9313_v24 = vpop.eup %9312  ;;  %v6463_v53 = vadd.f32 %v6462_v5, %v5830_v63  ;;  %v5839_v31 = vmul.f32 %v5199_v16, %v14346_v17  ;;  %v5200_v10 = vmul.f32 0.5, %v4560_v35  ;;  %v4569_v18 = vadd.f32 1.0, %v9311_v40  ;;  %v14452_v5 = vpop.f32.mrb[213].mxu1 }
 0x45a   :  { %v9315_v52 = vpop.eup %9314  ;;  %v6537_v47 = vadd.f32 %v6536_v20, %v5832_v44  ;;  %v5841_v8 = vmul.f32 %v5201_v7, %v14350_v56  ;;  %v5202_v12 = vmul.f32 0.5, %v4562_v45  ;;  %v4571_v22 = vadd.f32 1.0, %v9313_v24  ;;  %v14454_v17 = vpop.f32.mrb[21].mxu0 }
 0x45b   :  { %v9317_v11 = vpop.eup %9316  ;;  %v6427_v39 = vadd.f32 %v6426_v37, %v5839_v31  ;;  %v5840_v23 = vmul.f32 %v5200_v10, %v14354_v19  ;;  %v5209_v50 = vmul.f32 0.5, %v4569_v18  ;;  %v4570_v63 = vadd.f32 1.0, %v9315_v52  ;;  %17833 = vst [vmem:[#allocation43_spill] sm:$0xff] %v14454_v17  ;;  %v14457_v13 = vpop.f32.mrb[214].mxu1 }
 0x45c   :  { %v9319_v35 = vpop.eup %9318  ;;  %v6501_v20 = vadd.f32 %v6500_v27, %v5841_v8  ;;  %v5842_v56 = vmul.f32 %v5202_v12, %v14358_v57  ;;  %v5211_v16 = vmul.f32 0.5, %v4571_v22  ;;  %v4572_v40 = vadd.f32 1.0, %v9317_v11  ;;  %17834 = vst [vmem:[#allocation44_spill] sm:$0xff] %v14457_v13  ;;  %v14459_v9 = vpop.f32.mrb[22].mxu0 }
 0x45d   :  { %17835 = vst [vmem:[#allocation53_spill] sm:$0xff] %v14459_v9  ;;  %v9321_v30 = vpop.eup %9320  ;;  %v6464_v37 = vadd.f32 %v6463_v53, %v5840_v23  ;;  %v5849_v19 = vmul.f32 %v5209_v50, %v14363_v46  ;;  %v5210_v44 = vmul.f32 0.5, %v4570_v63  ;;  %v4579_v7 = vadd.f32 1.0, %v9319_v35  ;;  %v14462_v45 = vpop.f32.mrb[215].mxu1 }
 0x45e   :  { %17836 = vst [vmem:[#allocation16_spill] sm:$0xff] %v14462_v45  ;;  %v14464_v24 = vpop.f32.mrb[23].mxu0  ;;  %v9323_v31 = vpop.eup %9322  ;;  %v6538_v27 = vadd.f32 %v6537_v47, %v5842_v56  ;;  %v5851_v57 = vmul.f32 %v5211_v16, %v14367_v34  ;;  %v5212_v10 = vmul.f32 0.5, %v4572_v40  ;;  %v4581_v18 = vadd.f32 1.0, %v9321_v30 }
 0x45f   :  { %17837 = vst [vmem:[#allocation55_spill] sm:$0xff] %v14464_v24  ;;  %v9325_v52 = vpop.eup %9324  ;;  %v6428_v8 = vadd.f32 %v6427_v39, %v5849_v19  ;;  %v5850_v12 = vmul.f32 %v5210_v44, %v14376_v43  ;;  %v5219_v22 = vmul.f32 0.5, %v4579_v7  ;;  %v4580_v53 = vadd.f32 1.0, %v9323_v31  ;;  %v14472_v43 = vpop.f32.mrb[216].mxu1 }
 0x460   :  { %v9327_v11 = vpop.eup %9326  ;;  %v6502_v46 = vadd.f32 %v6501_v20, %v5851_v57  ;;  %v5852_v23 = vmul.f32 %v5212_v10, %v14380_v62  ;;  %v5221_v50 = vmul.f32 0.5, %v4581_v18  ;;  %v4582_v63 = vadd.f32 1.0, %v9325_v52  ;;  %17838 = vst [vmem:[#allocation56_spill] sm:$0xff] %v14472_v43  ;;  %v14474_v30 = vpop.f32.mrb[24].mxu0 }
 0x461   :  { %v6465_v35 = vadd.f32 %v6464_v37, %v5850_v12  ;;  %v5859_v24 = vmul.f32 %v5219_v22, %v14384_v51  ;;  %v5220_v47 = vmul.f32 0.5, %v4580_v53  ;;  %v4589_v56 = vadd.f32 1.0, %v9327_v11  ;;  %17839 = vst [vmem:[#allocation46_spill] sm:$0xff] %v14474_v30  ;;  %v14478_v44 = vpop.f32.mrb[217].mxu1  ;;  %v17845_v53 = vld [vmem:[#allocation27_spill] sm:$0xff] }
 0x462   :  { %v6539_v34 = vadd.f32 %v6538_v27, %v5852_v23  ;;  %v5861_v16 = vmul.f32 %v5221_v50, %v14389_v49  ;;  %v5222_v40 = vmul.f32 0.5, %v4582_v63  ;;  %v3311_v39 = vmul.f32 0.5, %v14430_v29  ;;  %17840 = vst [vmem:[#allocation57_spill] sm:$0xff] %v14478_v44  ;;  %v17841_v49 = vld [vmem:[#allocation65_spill] sm:$0xff] }
 0x463   :  { %v6429_v20 = vadd.f32 %v6428_v8, %v5859_v24  ;;  %v5860_v62 = vmul.f32 %v5220_v47, %v14398_v15  ;;  %v5229_v19 = vmul.f32 0.5, %v4589_v56  ;;  %v3310_v37 = vmul.f32 0.5, %v14434_v61  ;;  %v17842_v15 = vld [vmem:[#allocation92_spill] sm:$0xff]  ;;  %v17844_v8 = vld [vmem:[#allocation66_spill] sm:$0xff] }
 0x464   :  { %v14480_v51 = vadd.f32 %v6502_v46, %v5861_v16  ;;  %v5862_v7 = vmul.f32 %v5222_v40, %v14407_v55  ;;  %9328 = vtanh.f32 %v3311_v39  ;;  %v14485_v31 = vadd.f32 %v17841_v49, %v17656_v54  ;;  %v17843_v55 = vld [vmem:[#allocation11_spill] sm:$0xff]  ;;  %v17848_v16 = vld [vmem:[#allocation29_spill] sm:$0xff] }
 0x465   :  { %v14487_v27 = vadd.f32 %v6465_v35, %v5860_v62  ;;  %v5869_v24 = vmul.f32 %v5229_v19, %v14411_v60  ;;  %9330 = vtanh.f32 %v3310_v37  ;;  %v14492_v57 = vadd.f32 %v17842_v15, %v17650_v32  ;;  %v17846_v46 = vld [vmem:[#allocation67_spill] sm:$0xff]  ;;  %v17847_v35 = vld [vmem:[#allocation26_spill] sm:$0xff] }
 0x466   :  { %v14494_v10 = vadd.f32 %v6539_v34, %v5862_v7  ;;  %v3312_v18 = vmul.f32 0.5, %v14485_v31  ;;  %v14499_v52 = vadd.f32 %v17843_v55, %v17652_v33  ;;  %v14503_v12 = vadd.f32 %v17844_v8, %v17654_v28  ;;  %v14560_v8 = vpop.f32.mrb[218].mxu1 }
 0x467   :  { %v14505_v22 = vadd.f32 %v6429_v20, %v5869_v24  ;;  %v3319_v60 = vmul.f32 0.5, %v14492_v57  ;;  %v14510_v11 = vadd.f32 %v17845_v53, %v17656_v54  ;;  %v14514_v23 = vadd.f32 %v17846_v46, %v17650_v32  ;;  %v17849_v20 = vld [vmem:[#allocation10_spill] sm:$0xff]  ;;  %v14546_v24 = vpop.f32.mrb[25].mxu0  ;;  %17851 = vst [vmem:[#allocation58_spill] sm:$0xff] %v14560_v8 }
 0x468   :  { %9332 = vtanh.f32 %v3312_v18  ;;  %v3321_v50 = vmul.f32 0.5, %v14499_v52  ;;  %v3320_v63 = vmul.f32 0.5, %v14503_v12  ;;  %v14520_v47 = vadd.f32 %v17847_v35, %v17652_v33  ;;  %17850 = vst [vmem:[#allocation19_spill] sm:$0xff] %v14546_v24  ;;  %v14593_v24 = vpop.f32.mrb[219].mxu1 }
 0x469   :  { %9334 = vtanh.f32 %v3319_v60  ;;  %v3322_v56 = vmul.f32 0.5, %v14510_v11  ;;  %v3329_v34 = vmul.f32 0.5, %v14514_v23  ;;  %v14526_v40 = vadd.f32 %v17848_v16, %v17654_v28  ;;  %v14562_v60 = vpop.f32.mrb[26].mxu0  ;;  %17856 = vst [vmem:[#allocation60_spill] sm:$0xff] %v14593_v24 }
 0x46a   :  { %9336 = vtanh.f32 %v3321_v50  ;;  %v3331_v39 = vmul.f32 0.5, %v14520_v47  ;;  %v14531_v62 = vadd.f32 %v17849_v20, %v17656_v54  ;;  %v14535_v19 = vadd.f32 %v13794_v38, %v17650_v32  ;;  %17852 = vst [vmem:[#allocation59_spill] sm:$0xff] %v14562_v60 }
 0x46b   :  { %9338 = vtanh.f32 %v3320_v63  ;;  %v3330_v37 = vmul.f32 0.5, %v14526_v40  ;;  %v14540_v7 = vadd.f32 %v13796_v42, %v17652_v33  ;;  %v14544_v49 = vadd.f32 %v13801_v26, %v17654_v28 }
 0x46c   :  { %9340 = vtanh.f32 %v3322_v56  ;;  %v3332_v15 = vmul.f32 0.5, %v14531_v62  ;;  %v3339_v18 = vmul.f32 0.5, %v14535_v19  ;;  %v14552_v38 = vadd.f32 %v13803_v6, %v17656_v54  ;;  %v17853_v56 = vld [vmem:[#allocation68_spill] sm:$0xff] }
 0x46d   :  { %9342 = vtanh.f32 %v3329_v34  ;;  %v3341_v55 = vmul.f32 0.5, %v14540_v7  ;;  %v3340_v42 = vmul.f32 0.5, %v14544_v49  ;;  %v14558_v26 = vadd.f32 %v13807_v3, %v17650_v32 }
 0x46e   :  { %v9329_v53 = vpop.eup %9328  ;;  %9344 = vtanh.f32 %v3331_v39  ;;  %v3342_v46 = vmul.f32 0.5, %v14552_v38  ;;  %v14567_v6 = vadd.f32 %v13809_v59, %v17652_v33  ;;  %v14571_v50 = vadd.f32 %v13812_v0, %v17654_v28 }
 0x46f   :  { %v9331_v63 = vpop.eup %9330  ;;  %v4591_v35 = vadd.f32 1.0, %v9329_v53  ;;  %9346 = vtanh.f32 %v3330_v37  ;;  %v3349_v3 = vmul.f32 0.5, %v14558_v26  ;;  %v14576_v34 = vadd.f32 %v17853_v56, %v17656_v54  ;;  %v17854_v56 = vld [vmem:[#allocation28_spill] sm:$0xff] }
 0x470   :  { %v4590_v16 = vadd.f32 1.0, %v9331_v63  ;;  %9348 = vtanh.f32 %v3332_v15  ;;  %v3351_v39 = vmul.f32 0.5, %v14567_v6  ;;  %v3350_v59 = vmul.f32 0.5, %v14571_v50  ;;  %v17855_v15 = vld [vmem:[#allocation69_spill] sm:$0xff] }
 0x471   :  { %v5231_v20 = vmul.f32 0.5, %v4591_v35  ;;  %9350 = vtanh.f32 %v3339_v18  ;;  %v3352_v0 = vmul.f32 0.5, %v14576_v34  ;;  %v14583_v53 = vadd.f32 %v13830_v1, %v17650_v32  ;;  %v14595_v18 = vpop.f32.mrb[27].mxu0 }
 0x472   :  { %v9333_v37 = vpop.eup %9332  ;;  %v5230_v60 = vmul.f32 0.5, %v4590_v16  ;;  %9352 = vtanh.f32 %v3341_v55  ;;  %v14587_v8 = vadd.f32 %v17854_v56, %v17652_v33  ;;  %v14591_v63 = vadd.f32 %v17855_v15, %v17654_v28  ;;  %17857 = vst [vmem:[#allocation84_spill] sm:$0xff] %v14595_v18 }
 0x473   :  { %v9335_v35 = vpop.eup %9334  ;;  %v5871_v44 = vmul.f32 %v5231_v20, %v14430_v29  ;;  %v4592_v1 = vadd.f32 1.0, %v9333_v37  ;;  %9354 = vtanh.f32 %v3340_v42  ;;  %v14599_v16 = vmul.f32 0.5, %v14583_v53 }
 0x474   :  { %v9337_v55 = vpop.eup %9336  ;;  %v5870_v56 = vmul.f32 %v5230_v60, %v14434_v61  ;;  %v4599_v30 = vadd.f32 1.0, %v9335_v35  ;;  %9356 = vtanh.f32 %v3342_v46  ;;  %v14603_v15 = vmul.f32 0.5, %v14587_v8 }
 0x475   :  { %v9339_v43 = vpop.eup %9338  ;;  %v6504_v24 = vadd.f32 %v14480_v51, %v5871_v44  ;;  %v5232_v18 = vmul.f32 0.5, %v4592_v1  ;;  %v4601_v45 = vadd.f32 1.0, %v9337_v55  ;;  %9358 = vtanh.f32 %v3349_v3  ;;  %v14609_v51 = vpop.f32.mrb[220].mxu1 }
 0x476   :  { %v9341_v29 = vpop.eup %9340  ;;  %v6467_v42 = vadd.f32 %v14487_v27, %v5870_v56  ;;  %v5239_v20 = vmul.f32 0.5, %v4599_v30  ;;  %v4600_v37 = vadd.f32 1.0, %v9339_v43  ;;  %9360 = vtanh.f32 %v3351_v39  ;;  %v14611_v3 = vpop.f32.mrb[28].mxu0 }
 0x477   :  { %v9343_v9 = vpop.eup %9342  ;;  %v5872_v61 = vmul.f32 %v5232_v18, %v14485_v31  ;;  %v5241_v60 = vmul.f32 0.5, %v4601_v45  ;;  %v4602_v46 = vadd.f32 1.0, %v9341_v29  ;;  %9362 = vtanh.f32 %v3350_v59  ;;  %v14615_v45 = vpop.f32.mrb[221].mxu1 }
 0x478   :  { %v9345_v35 = vpop.eup %9344  ;;  %v5879_v13 = vmul.f32 %v5239_v20, %v14492_v57  ;;  %v5240_v17 = vmul.f32 0.5, %v4600_v37  ;;  %v4609_v44 = vadd.f32 1.0, %v9343_v9  ;;  %9364 = vtanh.f32 %v3352_v0  ;;  %v14617_v59 = vpop.f32.mrb[29].mxu0 }
 0x479   :  { %v9347_v27 = vpop.eup %9346  ;;  %v6541_v43 = vadd.f32 %v14494_v10, %v5872_v61  ;;  %v5881_v30 = vmul.f32 %v5241_v60, %v14499_v52  ;;  %v5242_v39 = vmul.f32 0.5, %v4602_v46  ;;  %v4611_v31 = vadd.f32 1.0, %v9345_v35  ;;  %17858 = vst [vmem:[#allocation85_spill] sm:$0xff] %v14617_v59  ;;  %v14621_v55 = vpop.f32.mrb[222].mxu1 }
 0x47a   :  { %v9349_v18 = vpop.eup %9348  ;;  %v6431_v57 = vadd.f32 %v14505_v22, %v5879_v13  ;;  %v5880_v9 = vmul.f32 %v5240_v17, %v14503_v12  ;;  %v5249_v0 = vmul.f32 0.5, %v4609_v44  ;;  %v4610_v1 = vadd.f32 1.0, %v9347_v27  ;;  %17859 = vst [vmem:[#allocation86_spill] sm:$0xff] %v14621_v55  ;;  %v14623_v56 = vpop.f32.mrb[30].mxu0 }
 0x47b   :  { %17860 = vst [vmem:[#allocation87_spill] sm:$0xff] %v14623_v56  ;;  %v9351_v10 = vpop.eup %9350  ;;  %v6505_v29 = vadd.f32 %v6504_v24, %v5881_v30  ;;  %v5882_v52 = vmul.f32 %v5242_v39, %v14510_v11  ;;  %v5251_v20 = vmul.f32 0.5, %v4611_v31  ;;  %v4612_v37 = vadd.f32 1.0, %v9349_v18  ;;  %v14626_v61 = vpop.f32.mrb[223].mxu1 }
 0x47c   :  { %17861 = vst [vmem:[#allocation88_spill] sm:$0xff] %v14626_v61  ;;  %v14628_v60 = vpop.f32.mrb[31].mxu0  ;;  %v9353_v46 = vpop.eup %9352  ;;  %v6468_v13 = vadd.f32 %v6467_v42, %v5880_v9  ;;  %v5889_v17 = vmul.f32 %v5249_v0, %v14514_v23  ;;  %v5250_v12 = vmul.f32 0.5, %v4610_v1  ;;  %v4619_v22 = vadd.f32 1.0, %v9351_v10 }
 0x47d   :  { %17862 = vst [vmem:[#allocation20_spill] sm:$0xff] %v14628_v60  ;;  %v9355_v35 = vpop.eup %9354  ;;  %v6542_v44 = vadd.f32 %v6541_v43, %v5882_v52  ;;  %v5891_v27 = vmul.f32 %v5251_v20, %v14520_v47  ;;  %v5252_v56 = vmul.f32 0.5, %v4612_v37  ;;  %v4621_v24 = vadd.f32 1.0, %v9353_v46  ;;  %v14635_v52 = vpop.f32.mrb[224].mxu1 }
 0x47e   :  { %v9357_v30 = vpop.eup %9356  ;;  %v6432_v11 = vadd.f32 %v6431_v57, %v5889_v17  ;;  %v5890_v39 = vmul.f32 %v5250_v12, %v14526_v40  ;;  %v5259_v31 = vmul.f32 0.5, %v4619_v22  ;;  %v4620_v18 = vadd.f32 1.0, %v9355_v35  ;;  %17863 = vst [vmem:[#allocation89_spill] sm:$0xff] %v14635_v52  ;;  %v14637_v20 = vpop.f32.mrb[32].mxu0 }
 0x47f   :  { %v9359_v61 = vpop.eup %9358  ;;  %v6506_v60 = vadd.f32 %v6505_v29, %v5891_v27  ;;  %v5892_v42 = vmul.f32 %v5252_v56, %v14531_v62  ;;  %v5261_v9 = vmul.f32 0.5, %v4621_v24  ;;  %v4622_v23 = vadd.f32 1.0, %v9357_v30  ;;  %17864 = vst [vmem:[#allocation90_spill] sm:$0xff] %v14637_v20  ;;  %v14640_v17 = vpop.f32.mrb[225].mxu1 }
 0x480   :  { %v9361_v0 = vpop.eup %9360  ;;  %v6469_v1 = vadd.f32 %v6468_v13, %v5890_v39  ;;  %v5899_v43 = vmul.f32 %v5259_v31, %v14535_v19  ;;  %v5260_v10 = vmul.f32 0.5, %v4620_v18  ;;  %v4629_v47 = vadd.f32 1.0, %v9359_v61  ;;  %17865 = vst [vmem:[#allocation23_spill] sm:$0xff] %v14640_v17  ;;  %v14642_v62 = vpop.f32.mrb[33].mxu0 }
 0x481   :  { %v9363_v57 = vpop.eup %9362  ;;  %v6543_v40 = vadd.f32 %v6542_v44, %v5892_v42  ;;  %v5901_v37 = vmul.f32 %v5261_v9, %v14540_v7  ;;  %v5262_v46 = vmul.f32 0.5, %v4622_v23  ;;  %v4631_v29 = vadd.f32 1.0, %v9361_v0  ;;  %17866 = vst [vmem:[#allocation91_spill] sm:$0xff] %v14642_v62  ;;  %v14645_v22 = vpop.f32.mrb[226].mxu1  ;;  %v17870_v23 = vld [vmem:[#allocation50_spill] sm:$0xff] }
 0x482   :  { %v9365_v56 = vpop.eup %9364  ;;  %v6433_v13 = vadd.f32 %v6432_v11, %v5899_v43  ;;  %v5900_v19 = vmul.f32 %v5260_v10, %v14544_v49  ;;  %v5269_v12 = vmul.f32 0.5, %v4629_v47  ;;  %v4630_v61 = vadd.f32 1.0, %v9363_v57  ;;  %17867 = vst [vmem:[#allocation22_spill] sm:$0xff] %v14645_v22  ;;  %v14647_v35 = vpop.f32.mrb[34].mxu0  ;;  %v17873_v47 = vld [vmem:[#allocation72_spill] sm:$0xff] }
 0x483   :  { %17868 = vst [vmem:[#allocation25_spill] sm:$0xff] %v14647_v35  ;;  %v6507_v27 = vadd.f32 %v6506_v60, %v5901_v37  ;;  %v5902_v44 = vmul.f32 %v5262_v46, %v14552_v38  ;;  %v5271_v7 = vmul.f32 0.5, %v4631_v29  ;;  %v4632_v24 = vadd.f32 1.0, %v9365_v56  ;;  %v14650_v30 = vpop.f32.mrb[227].mxu1  ;;  %v17874_v46 = vld [vmem:[#allocation73_spill] sm:$0xff] }
 0x484   :  { %17869 = vst [vmem:[#allocation7_spill] sm:$0xff] %v14650_v30  ;;  %v6470_v39 = vadd.f32 %v6469_v1, %v5900_v19  ;;  %v5909_v31 = vmul.f32 %v5269_v12, %v14558_v26  ;;  %v5270_v18 = vmul.f32 0.5, %v4630_v61  ;;  %9366 = vtanh.f32 %v14599_v16  ;;  %v17871_v1 = vld [vmem:[#allocation45_spill] sm:$0xff]  ;;  %v17876_v12 = vld [vmem:[#allocation94_spill] sm:$0xff]  ;;  %v14765_v55 = vpop.f32.mrb[228].mxu1 }
 0x485   :  { %v6544_v49 = vadd.f32 %v6543_v40, %v5902_v44  ;;  %v5911_v11 = vmul.f32 %v5271_v7, %v14567_v6  ;;  %v5272_v42 = vmul.f32 0.5, %v4632_v24  ;;  %9368 = vtanh.f32 %v14603_v15  ;;  %v17872_v15 = vld [vmem:[#allocation13_spill] sm:$0xff]  ;;  %v17877_v44 = vld [vmem:[#allocation31_spill] sm:$0xff]  ;;  %v17878_v24 = vld [vmem:[#allocation74_spill] sm:$0xff]  ;;  %17889 = vst [vmem:[#allocation62_spill] sm:$0xff] %v14765_v55 }
 0x486   :  { %v14656_v9 = vadd.f32 %v6433_v13, %v5909_v31  ;;  %v5910_v38 = vmul.f32 %v5270_v18, %v14571_v50  ;;  %v3360_v60 = vmul.f32 0.5, %v14591_v63  ;;  %v14662_v0 = vadd.f32 %v17870_v23, %v17656_v54  ;;  %v17875_v13 = vld [vmem:[#allocation93_spill] sm:$0xff] }
 0x487   :  { %v14664_v26 = vadd.f32 %v6507_v27, %v5911_v11  ;;  %v5912_v16 = vmul.f32 %v5272_v42, %v14576_v34  ;;  %v14669_v6 = vadd.f32 %v17871_v1, %v17650_v32  ;;  %v14673_v43 = vadd.f32 %v17872_v15, %v17652_v33 }
 0x488   :  { %v14675_v10 = vadd.f32 %v6470_v39, %v5910_v38  ;;  %9370 = vtanh.f32 %v3360_v60  ;;  %v3362_v50 = vmul.f32 0.5, %v14662_v0  ;;  %v14680_v57 = vadd.f32 %v17873_v47, %v17654_v28  ;;  %v17880_v60 = vld [vmem:[#allocation81_spill] sm:$0xff] }
 0x489   :  { %v14682_v40 = vadd.f32 %v6544_v49, %v5912_v16  ;;  %v3369_v34 = vmul.f32 0.5, %v14669_v6  ;;  %v3371_v37 = vmul.f32 0.5, %v14673_v43  ;;  %v14688_v29 = vadd.f32 %v17874_v46, %v17656_v54  ;;  %v17879_v49 = vld [vmem:[#allocation80_spill] sm:$0xff]  ;;  %v14720_v16 = vpop.f32.mrb[35].mxu0 }
 0x48a   :  { %9372 = vtanh.f32 %v3362_v50  ;;  %v3370_v56 = vmul.f32 0.5, %v14680_v57  ;;  %v14693_v19 = vadd.f32 %v17875_v13, %v17650_v32  ;;  %v14697_v61 = vadd.f32 %v17876_v12, %v17652_v33  ;;  %17881 = vst [vmem:[#allocation61_spill] sm:$0xff] %v14720_v16  ;;  %v17882_v50 = vld [vmem:[#allocation12_spill] sm:$0xff] }
 0x48b   :  { %9374 = vtanh.f32 %v3369_v34  ;;  %v3372_v27 = vmul.f32 0.5, %v14688_v29  ;;  %v14702_v7 = vadd.f32 %v17877_v44, %v17654_v28  ;;  %v14706_v39 = vadd.f32 %v17878_v24, %v17656_v54  ;;  %v17883_v34 = vld [vmem:[#allocation95_spill] sm:$0xff]  ;;  %v17884_v12 = vld [vmem:[#allocation96_spill] sm:$0xff] }
 0x48c   :  { %9376 = vtanh.f32 %v3371_v37  ;;  %v3379_v31 = vmul.f32 0.5, %v14693_v19  ;;  %v3381_v18 = vmul.f32 0.5, %v14697_v61  ;;  %v14712_v11 = vadd.f32 %v17879_v49, %v17650_v32 }
 0x48d   :  { %9378 = vtanh.f32 %v3370_v56  ;;  %v3380_v42 = vmul.f32 0.5, %v14702_v7  ;;  %v3382_v38 = vmul.f32 0.5, %v14706_v39  ;;  %v14718_v23 = vadd.f32 %v17880_v60, %v17652_v33 }
 0x48e   :  { %v9367_v1 = vpop.eup %9366  ;;  %9380 = vtanh.f32 %v3372_v27  ;;  %v3389_v15 = vmul.f32 0.5, %v14712_v11  ;;  %v14725_v47 = vadd.f32 %v17882_v50, %v17654_v28  ;;  %v14729_v37 = vadd.f32 %v17883_v34, %v17656_v54  ;;  %v17885_v34 = vld [vmem:[#allocation97_spill] sm:$0xff] }
 0x48f   :  { %v9369_v46 = vpop.eup %9368  ;;  %v4639_v56 = vadd.f32 1.0, %v9367_v1  ;;  %9382 = vtanh.f32 %v3379_v31  ;;  %v3391_v13 = vmul.f32 0.5, %v14718_v23  ;;  %v14734_v44 = vadd.f32 %v17884_v12, %v17650_v32  ;;  %v17886_v12 = vld [vmem:[#allocation75_spill] sm:$0xff] }
 0x490   :  { %v4641_v27 = vadd.f32 1.0, %v9369_v46  ;;  %9384 = vtanh.f32 %v3381_v18  ;;  %v3390_v24 = vmul.f32 0.5, %v14725_v47  ;;  %v3392_v49 = vmul.f32 0.5, %v14729_v37  ;;  %v17887_v18 = vld [vmem:[#allocation30_spill] sm:$0xff] }
 0x491   :  { %v5279_v60 = vmul.f32 0.5, %v4639_v56  ;;  %9386 = vtanh.f32 %v3380_v42  ;;  %v3399_v50 = vmul.f32 0.5, %v14734_v44  ;;  %v14741_v1 = vadd.f32 %v17885_v34, %v17652_v33 }
 0x492   :  { %v9371_v31 = vpop.eup %9370  ;;  %v5281_v16 = vmul.f32 0.5, %v4641_v27  ;;  %9388 = vtanh.f32 %v3382_v38  ;;  %v14745_v30 = vadd.f32 %v17886_v12, %v17654_v28  ;;  %v14749_v46 = vadd.f32 %v17887_v18, %v17656_v54 }
 0x493   :  { %v5919_v56 = vmul.f32 %v5279_v60, %v14583_v53  ;;  %v4640_v42 = vadd.f32 1.0, %v9371_v31  ;;  %9390 = vtanh.f32 %v3389_v15  ;;  %v3401_v35 = vmul.f32 0.5, %v14741_v1  ;;  %v17888_v31 = vld [vmem:[#allocation76_spill] sm:$0xff] }
 0x494   :  { %v9373_v22 = vpop.eup %9372  ;;  %v5921_v34 = vmul.f32 %v5281_v16, %v14587_v8  ;;  %9392 = vtanh.f32 %v3391_v13  ;;  %v3400_v38 = vmul.f32 0.5, %v14745_v30  ;;  %v14756_v27 = vmul.f32 0.5, %v14749_v46 }
 0x495   :  { %v9375_v12 = vpop.eup %9374  ;;  %v6435_v62 = vadd.f32 %v14656_v9, %v5919_v56  ;;  %v5280_v18 = vmul.f32 0.5, %v4640_v42  ;;  %v4642_v17 = vadd.f32 1.0, %v9373_v22  ;;  %9394 = vtanh.f32 %v3390_v24  ;;  %v14767_v9 = vpop.f32.mrb[36].mxu0 }
 0x496   :  { %v9377_v53 = vpop.eup %9376  ;;  %v6509_v15 = vadd.f32 %v14664_v26, %v5921_v34  ;;  %v4649_v60 = vadd.f32 1.0, %v9375_v12  ;;  %9396 = vtanh.f32 %v3392_v49  ;;  %v14762_v8 = vadd.f32 %v17888_v31, %v17650_v32  ;;  %17890 = vst [vmem:[#allocation6_spill] sm:$0xff] %v14767_v9  ;;  %v14772_v49 = vpop.f32.mrb[229].mxu1 }
 0x497   :  { %v9379_v16 = vpop.eup %9378  ;;  %v5920_v13 = vmul.f32 %v5280_v18, %v14591_v63  ;;  %v5282_v20 = vmul.f32 0.5, %v4642_v17  ;;  %v4651_v52 = vadd.f32 1.0, %v9377_v53  ;;  %9398 = vtanh.f32 %v3399_v50  ;;  %17891 = vst [vmem:[#allocation38_spill] sm:$0xff] %v14772_v49  ;;  %v14774_v42 = vpop.f32.mrb[37].mxu0 }
 0x498   :  { %v9381_v22 = vpop.eup %9380  ;;  %v5289_v24 = vmul.f32 0.5, %v4649_v60  ;;  %v4650_v56 = vadd.f32 1.0, %v9379_v16  ;;  %9400 = vtanh.f32 %v3401_v35  ;;  %v14770_v26 = vmul.f32 0.5, %v14762_v8  ;;  %17892 = vst [vmem:[#allocation24_spill] sm:$0xff] %v14774_v42  ;;  %v14778_v18 = vpop.f32.mrb[230].mxu1 }
 0x499   :  { %v9383_v34 = vpop.eup %9382  ;;  %v6472_v63 = vadd.f32 %v14675_v10, %v5920_v13  ;;  %v5922_v17 = vmul.f32 %v5282_v20, %v14662_v0  ;;  %v5291_v50 = vmul.f32 0.5, %v4651_v52  ;;  %v4652_v12 = vadd.f32 1.0, %v9381_v22  ;;  %17893 = vst [vmem:[#allocation70_spill] sm:$0xff] %v14778_v18  ;;  %v14780_v53 = vpop.f32.mrb[38].mxu0 }
 0x49a   :  { %17894 = vst [vmem:[#allocation9_spill] sm:$0xff] %v14780_v53  ;;  %v9385_v60 = vpop.eup %9384  ;;  %v5929_v35 = vmul.f32 %v5289_v24, %v14669_v6  ;;  %v5290_v31 = vmul.f32 0.5, %v4650_v56  ;;  %v4659_v16 = vadd.f32 1.0, %v9383_v34  ;;  %9402 = vtanh.f32 %v3400_v38  ;;  %v14783_v49 = vpop.f32.mrb[231].mxu1 }
 0x49b   :  { %17895 = vst [vmem:[#allocation49_spill] sm:$0xff] %v14783_v49  ;;  %v14785_v42 = vpop.f32.mrb[39].mxu0  ;;  %v9387_v9 = vpop.eup %9386  ;;  %v6546_v10 = vadd.f32 %v14682_v40, %v5922_v17  ;;  %v5931_v52 = vmul.f32 %v5291_v50, %v14673_v43  ;;  %v5292_v20 = vmul.f32 0.5, %v4652_v12  ;;  %v4661_v0 = vadd.f32 1.0, %v9385_v60 }
 0x49c   :  { %17896 = vst [vmem:[#allocation47_spill] sm:$0xff] %v14785_v42  ;;  %v9389_v13 = vpop.eup %9388  ;;  %v6436_v22 = vadd.f32 %v6435_v62, %v5929_v35  ;;  %v5930_v53 = vmul.f32 %v5290_v31, %v14680_v57  ;;  %v5299_v18 = vmul.f32 0.5, %v4659_v16  ;;  %v4660_v6 = vadd.f32 1.0, %v9387_v9  ;;  %v14793_v60 = vpop.f32.mrb[232].mxu1 }
 0x49d   :  { %v9391_v24 = vpop.eup %9390  ;;  %v6510_v56 = vadd.f32 %v6509_v15, %v5931_v52  ;;  %v5932_v38 = vmul.f32 %v5292_v20, %v14688_v29  ;;  %v5301_v34 = vmul.f32 0.5, %v4661_v0  ;;  %v4662_v49 = vadd.f32 1.0, %v9389_v13  ;;  %v14795_v9 = vpop.f32.mrb[40].mxu0 }
 0x49e   :  { %v9393_v42 = vpop.eup %9392  ;;  %v6437_v55 = vrot.slane %v6436_v22, 4  ;;  %v6473_v59 = vadd.f32 %v6472_v63, %v5930_v53  ;;  %v5939_v40 = vmul.f32 %v5299_v18, %v14693_v19  ;;  %v5300_v43 = vmul.f32 0.5, %v4660_v6  ;;  %v14798_v63 = vpop.f32.mrb[233].mxu1 }
 0x49f   :  { %v9395_v17 = vpop.eup %9394  ;;  %v6511_v50 = vrot.slane %v6510_v56, 4  ;;  %v6547_v12 = vadd.f32 %v6546_v10, %v5932_v38  ;;  %v5941_v62 = vmul.f32 %v5301_v34, %v14697_v61  ;;  %v5302_v57 = vmul.f32 0.5, %v4662_v49  ;;  %17897 = vst [vmem:[#allocation54_spill] sm:$0xff] %v14798_v63  ;;  %v14800_v19 = vpop.f32.mrb[41].mxu0 }
 0x4a0   :  { %v9397_v15 = vpop.eup %9396  ;;  %v6438_v29 = vadd.f32 %v6437_v55, %v6436_v22  ;;  %v6474_v35 = vrot.slane %v6473_v59, 4  ;;  %v5940_v31 = vmul.f32 %v5300_v43, %v14702_v7  ;;  %v4669_v16 = vadd.f32 1.0, %v9391_v24  ;;  %17898 = vst [vmem:[#allocation48_spill] sm:$0xff] %v14800_v19  ;;  %v14803_v52 = vpop.f32.mrb[234].mxu1 }
 0x4a1   :  { %v9399_v18 = vpop.eup %9398  ;;  %v6512_v53 = vadd.f32 %v6511_v50, %v6510_v56  ;;  %v6548_v10 = vrot.slane %v6547_v12, 4  ;;  %v5942_v61 = vmul.f32 %v5302_v57, %v14706_v39  ;;  %v4671_v49 = vadd.f32 1.0, %v9393_v42  ;;  %17899 = vst [vmem:[#allocation42_spill] sm:$0xff] %v14803_v52  ;;  %v14805_v20 = vpop.f32.mrb[42].mxu0 }
 0x4a2   :  { %17900 = vst [vmem:[#allocation63_spill] sm:$0xff] %v14805_v20  ;;  %v9401_v0 = vpop.eup %9400  ;;  %v6439_v55 = vrot.slane %v6438_v29, 2  ;;  %v6475_v13 = vadd.f32 %v6474_v35, %v6473_v59  ;;  %v5309_v22 = vmul.f32 0.5, %v4669_v16  ;;  %v4670_v7 = vadd.f32 1.0, %v9395_v17  ;;  %v14807_v6 = vpop.f32.mrb[235].mxu1 }
 0x4a3   :  { %17901 = vst [vmem:[#allocation8_spill] sm:$0xff] %v14807_v6  ;;  %v14809_v24 = vpop.f32.mrb[43].mxu0  ;;  %v6513_v38 = vrot.slane %v6512_v53, 2  ;;  %v6549_v34 = vadd.f32 %v6548_v10, %v6547_v12  ;;  %v5311_v56 = vmul.f32 0.5, %v4671_v49  ;;  %v4672_v43 = vadd.f32 1.0, %v9397_v15 }
 0x4a4   :  { %17902 = vst [vmem:[#allocation64_spill] sm:$0xff] %v14809_v24  ;;  %v9403_v50 = vpop.eup %9402  ;;  %v6440_v39 = vadd.f32 %v6439_v55, %v6438_v29  ;;  %v6476_v42 = vrot.slane %v6475_v13, 2  ;;  %v5949_v57 = vmul.f32 %v5309_v22, %v14712_v11  ;;  %v5310_v52 = vmul.f32 0.5, %v4670_v7  ;;  %v14815_v29 = vpop.f32.mrb[236].mxu1 }
 0x4a5   :  { %v6514_v20 = vadd.f32 %v6513_v38, %v6512_v53  ;;  %v6550_v19 = vrot.slane %v6549_v34, 2  ;;  %v5951_v59 = vmul.f32 %v5311_v56, %v14718_v23  ;;  %v5312_v35 = vmul.f32 0.5, %v4672_v43 }
 0x4a6   :  { %v6441_v17 = vrot.slane %v6440_v39, 1  ;;  %v6477_v16 = vadd.f32 %v6476_v42, %v6475_v13  ;;  %v6776_v6 = vadd.f32 %v5949_v57, %v5939_v40  ;;  %v5950_v24 = vmul.f32 %v5310_v52, %v14725_v47  ;;  %v14843_v42 = vpop.f32.mrb[44].mxu0 }
 0x4a7   :  { %v6515_v63 = vrot.slane %v6514_v20, 1  ;;  %v6551_v12 = vadd.f32 %v6550_v19, %v6549_v34  ;;  %v6850_v10 = vadd.f32 %v5951_v59, %v5941_v62  ;;  %v5952_v15 = vmul.f32 %v5312_v35, %v14729_v37  ;;  %v17903_v37 = vld [vmem:[#allocation33_spill] sm:$0xff]  ;;  %v17906_v34 = vld [vmem:[#allocation71_spill] sm:$0xff] }
 0x4a8   :  { %v6442_v49 = vadd.f32 %v6441_v17, %v6440_v39  ;;  %v6478_v11 = vrot.slane %v6477_v16, 1  ;;  %v6813_v55 = vadd.f32 %v5950_v24, %v5940_v31  ;;  %v4679_v53 = vadd.f32 1.0, %v9399_v18  ;;  %v17905_v24 = vld [vmem:[#allocation15_spill] sm:$0xff] }
 0x4a9   :  { %v6516_v22 = vadd.f32 %v6515_v63, %v6514_v20  ;;  %v6552_v7 = vrot.slane %v6551_v12, 1  ;;  %v14817_v23 = vadd.f32 %v5952_v15, %v5942_v61  ;;  %v4681_v38 = vadd.f32 1.0, %v9401_v0  ;;  %v17904_v61 = vld [vmem:[#allocation32_spill] sm:$0xff]  ;;  %v14863_v15 = vpop.f32.mrb[45].mxu0 }
 0x4aa   :  { %v6479_v13 = vadd.f32 %v6478_v11, %v6477_v16  ;;  %v5319_v40 = vmul.f32 0.5, %v4679_v53  ;;  %v4680_v56 = vadd.f32 1.0, %v9403_v50  ;;  %9404 = vtanh.f32 %v14756_v27 }
 0x4ab   :  { %v6553_v47 = vadd.f32 %v6552_v7, %v6551_v12  ;;  %v5321_v62 = vmul.f32 0.5, %v4681_v38  ;;  %9406 = vtanh.f32 %v14770_v26  ;;  %v14823_v19 = vadd.f32 %v17903_v37, %v17652_v33  ;;  %v14861_v12 = vpop.f32.mrb[237].mxu1  ;;  %v17913_v38 = vld [vmem:[#allocation17_spill] sm:$0xff]  ;;  %v17915_v37 = vld [vmem:[#allocation35_spill] sm:$0xff] }
 0x4ac   :  { %v7035_v31 = vcombine.low %v6442_v49, %v6479_v13  ;;  %v5959_v63 = vmul.f32 %v5319_v40, %v14734_v44  ;;  %v5320_v18 = vmul.f32 0.5, %v4680_v56  ;;  %v14828_v52 = vadd.f32 %v17904_v61, %v17654_v28  ;;  %v17911_v49 = vld [vmem:[#allocation77_spill] sm:$0xff]  ;;  %v17914_v40 = vld [vmem:[#allocation79_spill] sm:$0xff]  ;;  %v14895_v61 = vpop.f32.mrb[238].mxu1 }
 0x4ad   :  { %v7036_v20 = vcombine.low %v6516_v22, %v6553_v47  ;;  %v5961_v0 = vmul.f32 %v5321_v62, %v14741_v1  ;;  %v3411_v27 = vmul.f32 0.5, %v14823_v19  ;;  %v14834_v26 = vadd.f32 %v17905_v24, %v17656_v54 }
 0x4ae   :  { %v14837_v43 = vrot.slane %v7035_v31, %v17906_v34  ;;  %v14839_v50 = vadd.f32 %v6776_v6, %v5959_v63  ;;  %v5960_v44 = vmul.f32 %v5320_v18, %v14745_v30  ;;  %v3410_v39 = vmul.f32 0.5, %v14828_v52  ;;  %v17909_v6 = vld [vmem:[#allocation14_spill] sm:$0xff] }
 0x4af   :  { %v14846_v57 = vrot.slane %v7036_v20, %v17906_v34  ;;  %v14848_v1 = vadd.f32 %v6850_v10, %v5961_v0  ;;  %9408 = vtanh.f32 %v3411_v27  ;;  %v3412_v59 = vmul.f32 0.5, %v14834_v26  ;;  %v17910_v30 = vld [vmem:[#allocation98_spill] sm:$0xff]  ;;  %v14897_v20 = vpop.f32.mrb[46].mxu0 }
 0x4b0   :  { %17907 = vst [vmem:[#allocation65_spill] sm:$0xff] %v14837_v43  ;;  %v14851_v35 = vadd.f32 %v6813_v55, %v5960_v44  ;;  %9410 = vtanh.f32 %v3410_v39  ;;  %v14855_v17 = vadd.f32 %v17909_v6, %v17650_v32  ;;  %v14859_v16 = vadd.f32 %v17910_v30, %v17652_v33  ;;  %v17912_v55 = vld [vmem:[#allocation78_spill] sm:$0xff] }
 0x4b1   :  { %17908 = vst [vmem:[#allocation92_spill] sm:$0xff] %v14846_v57  ;;  %9412 = vtanh.f32 %v3412_v59  ;;  %v14869_v11 = vadd.f32 %v17911_v49, %v17654_v28  ;;  %v14873_v53 = vadd.f32 %v17912_v55, %v17656_v54  ;;  %v14879_v13 = vadd.f32 %v17913_v38, %v17650_v32  ;;  %v17916_v63 = vld [vmem:[#allocation82_spill] sm:$0xff]  ;;  %v14912_v38 = vpop.f32.mrb[239].mxu1 }
 0x4b2   :  { %v3419_v22 = vmul.f32 0.5, %v14855_v17  ;;  %v3421_v7 = vmul.f32 0.5, %v14859_v16  ;;  %v14883_v56 = vadd.f32 %v17914_v40, %v17652_v33  ;;  %v14889_v31 = vadd.f32 %v17915_v37, %v17654_v28  ;;  %17917 = vst [vmem:[#allocation11_spill] sm:$0xff] %v14912_v38  ;;  %v14914_v40 = vpop.f32.mrb[47].mxu0  ;;  %v14940_v34 = vpop.f32.mrb[240].mxu1 }
 0x4b3   :  { %v3420_v47 = vmul.f32 0.5, %v14869_v11  ;;  %v3422_v62 = vmul.f32 0.5, %v14873_v53  ;;  %v14893_v18 = vadd.f32 %v17916_v63, %v17656_v54  ;;  %v3429_v27 = vmul.f32 0.5, %v14879_v13  ;;  %17918 = vst [vmem:[#allocation66_spill] sm:$0xff] %v14914_v40  ;;  %17919 = vst [vmem:[#allocation27_spill] sm:$0xff] %v14940_v34 }
 0x4b4   :  { %v9405_v0 = vpop.eup %9404  ;;  %9414 = vtanh.f32 %v3419_v22  ;;  %v3431_v24 = vmul.f32 0.5, %v14883_v56  ;;  %v14903_v44 = vadd.f32 %v14266_v21, %v17650_v32  ;;  %v3430_v6 = vmul.f32 0.5, %v14889_v31 }
 0x4b5   :  { %v9407_v39 = vpop.eup %9406  ;;  %v4682_v59 = vadd.f32 1.0, %v9405_v0  ;;  %9416 = vtanh.f32 %v3421_v7  ;;  %v3432_v30 = vmul.f32 0.5, %v14893_v18  ;;  %v14910_v22 = vadd.f32 %v14268_v41, %v17652_v33 }
 0x4b6   :  { %v4689_v49 = vadd.f32 1.0, %v9407_v39  ;;  %9418 = vtanh.f32 %v3420_v47  ;;  %v3439_v55 = vmul.f32 0.5, %v14903_v44  ;;  %v14918_v7 = vadd.f32 %v14271_v36, %v17654_v28 }
 0x4b7   :  { %v5322_v21 = vmul.f32 0.5, %v4682_v59  ;;  %9420 = vtanh.f32 %v3422_v62  ;;  %v14922_v37 = vadd.f32 %v14273_v2, %v17656_v54  ;;  %v3441_v63 = vmul.f32 0.5, %v14910_v22 }
 0x4b8   :  { %v5329_v47 = vmul.f32 0.5, %v4689_v49  ;;  %9422 = vtanh.f32 %v3429_v27  ;;  %v14927_v41 = vadd.f32 %v14276_v25, %v17650_v32  ;;  %v3440_v62 = vmul.f32 0.5, %v14918_v7 }
 0x4b9   :  { %v9409_v0 = vpop.eup %9408  ;;  %v5962_v39 = vmul.f32 %v5322_v21, %v14749_v46  ;;  %9424 = vtanh.f32 %v3431_v24  ;;  %v3442_v36 = vmul.f32 0.5, %v14922_v37  ;;  %v14937_v46 = vadd.f32 %v14278_v14, %v17652_v33 }
 0x4ba   :  { %v9411_v59 = vpop.eup %9410  ;;  %v5969_v2 = vmul.f32 %v5329_v47, %v14762_v8  ;;  %v4691_v10 = vadd.f32 1.0, %v9409_v0  ;;  %9426 = vtanh.f32 %v3430_v6  ;;  %v3449_v27 = vmul.f32 0.5, %v14927_v41  ;;  %v14942_v8 = vpop.f32.mrb[48].mxu0  ;;  %v17923_v0 = vld [vmem:[#allocation51_spill] sm:$0xff] }
 0x4bb   :  { %v9413_v49 = vpop.eup %9412  ;;  %v6888_v57 = vadd.f32 %v14817_v23, %v5962_v39  ;;  %v4690_v25 = vadd.f32 1.0, %v9411_v59  ;;  %9428 = vtanh.f32 %v3432_v30  ;;  %17920 = vst [vmem:[#allocation67_spill] sm:$0xff] %v14942_v8  ;;  %v3451_v47 = vmul.f32 0.5, %v14937_v46  ;;  %v14949_v30 = vpop.f32.mrb[241].mxu1 }
 0x4bc   :  { %v6778_v24 = vadd.f32 %v14839_v50, %v5969_v2  ;;  %v5331_v21 = vmul.f32 0.5, %v4691_v10  ;;  %v4692_v43 = vadd.f32 1.0, %v9413_v49  ;;  %9430 = vtanh.f32 %v3439_v55  ;;  %17921 = vst [vmem:[#allocation26_spill] sm:$0xff] %v14949_v30  ;;  %v14951_v14 = vpop.f32.mrb[49].mxu0 }
 0x4bd   :  { %v5330_v6 = vmul.f32 0.5, %v4690_v25  ;;  %9432 = vtanh.f32 %v3441_v63  ;;  %v14947_v23 = vadd.f32 %v14287_v58, %v17654_v28  ;;  %17922 = vst [vmem:[#allocation29_spill] sm:$0xff] %v14951_v14  ;;  %v14956_v39 = vadd.f32 %v17923_v0, %v17656_v54  ;;  %v14958_v63 = vpop.f32.mrb[242].mxu1  ;;  %v14960_v59 = vpop.f32.mrb[50].mxu0 }
 0x4be   :  { %v9415_v50 = vpop.eup %9414  ;;  %v5971_v10 = vmul.f32 %v5331_v21, %v14823_v19  ;;  %v5332_v55 = vmul.f32 0.5, %v4692_v43  ;;  %9434 = vtanh.f32 %v3440_v62  ;;  %17924 = vst [vmem:[#allocation10_spill] sm:$0xff] %v14958_v63  ;;  %17925 = vst [vmem:[#allocation68_spill] sm:$0xff] %v14960_v59  ;;  %v14964_v14 = vpop.f32.mrb[243].mxu1 }
 0x4bf   :  { %v9417_v2 = vpop.eup %9416  ;;  %v5970_v58 = vmul.f32 %v5330_v6, %v14828_v52  ;;  %v4699_v49 = vadd.f32 1.0, %v9415_v50  ;;  %9436 = vtanh.f32 %v3442_v36  ;;  %v3450_v25 = vmul.f32 0.5, %v14947_v23  ;;  %17926 = vst [vmem:[#allocation28_spill] sm:$0xff] %v14964_v14  ;;  %v14966_v19 = vpop.f32.mrb[51].mxu0 }
 0x4c0   :  { %17927 = vst [vmem:[#allocation69_spill] sm:$0xff] %v14966_v19  ;;  %v9419_v43 = vpop.eup %9418  ;;  %v6852_v62 = vadd.f32 %v14848_v1, %v5971_v10  ;;  %v5972_v21 = vmul.f32 %v5332_v55, %v14834_v26  ;;  %v4701_v0 = vadd.f32 1.0, %v9417_v2  ;;  %9438 = vtanh.f32 %v3449_v27  ;;  %v17928_v2 = vld [vmem:[#allocation83_spill] sm:$0xff] }
 0x4c1   :  { %v9421_v63 = vpop.eup %9420  ;;  %v6815_v59 = vadd.f32 %v14851_v35, %v5970_v58  ;;  %v5339_v30 = vmul.f32 0.5, %v4699_v49  ;;  %v4700_v52 = vadd.f32 1.0, %v9419_v43  ;;  %9440 = vtanh.f32 %v3451_v47 }
 0x4c2   :  { %v9423_v36 = vpop.eup %9422  ;;  %v6889_v6 = vadd.f32 %v6888_v57, %v5972_v21  ;;  %v5341_v50 = vmul.f32 0.5, %v4701_v0  ;;  %v4702_v8 = vadd.f32 1.0, %v9421_v63  ;;  %9442 = vtanh.f32 %v3450_v25  ;;  %v14978_v57 = vpop.f32.mrb[244].mxu1 }
 0x4c3   :  { %v9425_v14 = vpop.eup %9424  ;;  %v5979_v19 = vmul.f32 %v5339_v30, %v14855_v17  ;;  %v5340_v34 = vmul.f32 0.5, %v4700_v52  ;;  %v4709_v1 = vadd.f32 1.0, %v9423_v36  ;;  %v3452_v26 = vmul.f32 0.5, %v14956_v39  ;;  %17929 = vst [vmem:[#allocation50_spill] sm:$0xff] %v14978_v57  ;;  %v14980_v63 = vpop.f32.mrb[52].mxu0 }
 0x4c4   :  { %v9427_v10 = vpop.eup %9426  ;;  %v5981_v27 = vmul.f32 %v5341_v50, %v14859_v16  ;;  %v5342_v55 = vmul.f32 0.5, %v4702_v8  ;;  %v4711_v35 = vadd.f32 1.0, %v9425_v14  ;;  %v14976_v47 = vadd.f32 %v17928_v2, %v17650_v32  ;;  %17930 = vst [vmem:[#allocation45_spill] sm:$0xff] %v14980_v63  ;;  %v14983_v43 = vpop.f32.mrb[245].mxu1 }
 0x4c5   :  { %v9429_v58 = vpop.eup %9428  ;;  %v6779_v49 = vadd.f32 %v6778_v24, %v5979_v19  ;;  %v5980_v17 = vmul.f32 %v5340_v34, %v14869_v11  ;;  %v5349_v30 = vmul.f32 0.5, %v4709_v1  ;;  %v4710_v25 = vadd.f32 1.0, %v9427_v10  ;;  %17931 = vst [vmem:[#allocation13_spill] sm:$0xff] %v14983_v43  ;;  %v14985_v21 = vpop.f32.mrb[53].mxu0 }
 0x4c6   :  { %17932 = vst [vmem:[#allocation72_spill] sm:$0xff] %v14985_v21  ;;  %v9431_v16 = vpop.eup %9430  ;;  %v6853_v8 = vadd.f32 %v6852_v62, %v5981_v27  ;;  %v5982_v14 = vmul.f32 %v5342_v55, %v14873_v53  ;;  %v5351_v0 = vmul.f32 0.5, %v4711_v35  ;;  %v4712_v52 = vadd.f32 1.0, %v9429_v58  ;;  %v14988_v36 = vpop.f32.mrb[246].mxu1 }
 0x4c7   :  { %17933 = vst [vmem:[#allocation73_spill] sm:$0xff] %v14988_v36  ;;  %v9433_v50 = vpop.eup %9432  ;;  %v6816_v2 = vadd.f32 %v6815_v59, %v5980_v17  ;;  %v5989_v24 = vmul.f32 %v5349_v30, %v14879_v13  ;;  %v5350_v19 = vmul.f32 0.5, %v4710_v25  ;;  %v4719_v34 = vadd.f32 1.0, %v9431_v16 }
 0x4c8   :  { %v9435_v11 = vpop.eup %9434  ;;  %v6890_v1 = vadd.f32 %v6889_v6, %v5982_v14  ;;  %v5991_v10 = vmul.f32 %v5351_v0, %v14883_v56  ;;  %v5352_v43 = vmul.f32 0.5, %v4712_v52  ;;  %v4721_v21 = vadd.f32 1.0, %v9433_v50 }
 0x4c9   :  { %v9437_v63 = vpop.eup %9436  ;;  %v6780_v62 = vadd.f32 %v6779_v49, %v5989_v24  ;;  %v5990_v53 = vmul.f32 %v5350_v19, %v14889_v31  ;;  %v5359_v27 = vmul.f32 0.5, %v4719_v34  ;;  %v4720_v55 = vadd.f32 1.0, %v9435_v11 }
 0x4ca   :  { %v9439_v35 = vpop.eup %9438  ;;  %v6854_v58 = vadd.f32 %v6853_v8, %v5991_v10  ;;  %v5992_v59 = vmul.f32 %v5352_v43, %v14893_v18  ;;  %v5361_v17 = vmul.f32 0.5, %v4721_v21  ;;  %v4722_v13 = vadd.f32 1.0, %v9437_v63  ;;  %v17935_v10 = vld [vmem:[#allocation37_spill] sm:$0xff] }
 0x4cb   :  { %v9441_v30 = vpop.eup %9440  ;;  %v6817_v25 = vadd.f32 %v6816_v2, %v5990_v53  ;;  %v5999_v6 = vmul.f32 %v5359_v27, %v14903_v44  ;;  %v5360_v16 = vmul.f32 0.5, %v4720_v55  ;;  %v4729_v56 = vadd.f32 1.0, %v9439_v35  ;;  %v17937_v35 = vld [vmem:[#allocation52_spill] sm:$0xff] }
 0x4cc   :  { %v9443_v14 = vpop.eup %9442  ;;  %v6891_v0 = vadd.f32 %v6890_v1, %v5992_v59  ;;  %v6001_v49 = vmul.f32 %v5361_v17, %v14910_v22  ;;  %v5362_v52 = vmul.f32 0.5, %v4722_v13  ;;  %v4731_v31 = vadd.f32 1.0, %v9441_v30  ;;  %v17934_v1 = vld [vmem:[#allocation34_spill] sm:$0xff]  ;;  %v15026_v59 = vpop.f32.mrb[54].mxu0  ;;  %v17939_v13 = vld [vmem:[#allocation39_spill] sm:$0xff] }
 0x4cd   :  { %v6781_v50 = vadd.f32 %v6780_v62, %v5999_v6  ;;  %v6000_v24 = vmul.f32 %v5360_v16, %v14918_v7  ;;  %v5369_v8 = vmul.f32 0.5, %v4729_v56  ;;  %v4730_v19 = vadd.f32 1.0, %v9443_v14  ;;  %17938 = vst [vmem:[#allocation93_spill] sm:$0xff] %v15026_v59  ;;  %v17941_v56 = vld [vmem:[#allocation41_spill] sm:$0xff] }
 0x4ce   :  { %v6855_v18 = vadd.f32 %v6854_v58, %v6001_v49  ;;  %v6002_v63 = vmul.f32 %v5362_v52, %v14922_v37  ;;  %v5371_v43 = vmul.f32 0.5, %v4731_v31  ;;  %9444 = vtanh.f32 %v3452_v26  ;;  %v15048_v49 = vpop.f32.mrb[247].mxu1 }
 0x4cf   :  { %v6818_v21 = vadd.f32 %v6817_v25, %v6000_v24  ;;  %v6009_v44 = vmul.f32 %v5369_v8, %v14927_v41  ;;  %v5370_v2 = vmul.f32 0.5, %v4730_v19  ;;  %v3459_v34 = vmul.f32 0.5, %v14976_v47  ;;  %v17936_v41 = vld [vmem:[#allocation36_spill] sm:$0xff]  ;;  %17942 = vst [vmem:[#allocation94_spill] sm:$0xff] %v15048_v49  ;;  %v15056_v24 = vpop.f32.mrb[55].mxu0 }
 0x4d0   :  { %v15000_v11 = vadd.f32 %v6891_v0, %v6002_v63  ;;  %v6011_v22 = vmul.f32 %v5371_v43, %v14937_v46  ;;  %v15005_v7 = vadd.f32 %v17934_v1, %v17652_v33  ;;  %v15009_v62 = vadd.f32 %v17935_v10, %v17654_v28  ;;  %v17940_v25 = vld [vmem:[#allocation40_spill] sm:$0xff]  ;;  %17943 = vst [vmem:[#allocation31_spill] sm:$0xff] %v15056_v24  ;;  %v17944_v63 = vld [vmem:[#allocation43_spill] sm:$0xff] }
 0x4d1   :  { %v15011_v37 = vadd.f32 %v6781_v50, %v6009_v44  ;;  %v6010_v26 = vmul.f32 %v5370_v2, %v14947_v23  ;;  %9446 = vtanh.f32 %v3459_v34  ;;  %v15016_v53 = vadd.f32 %v17936_v41, %v17656_v54  ;;  %v17946_v34 = vld [vmem:[#allocation53_spill] sm:$0xff] }
 0x4d2   :  { %v15018_v27 = vadd.f32 %v6855_v18, %v6011_v22  ;;  %v3461_v46 = vmul.f32 0.5, %v15005_v7  ;;  %v3460_v55 = vmul.f32 0.5, %v15009_v62  ;;  %v15024_v58 = vadd.f32 %v17937_v35, %v17650_v32  ;;  %v17948_v35 = vld [vmem:[#allocation55_spill] sm:$0xff] }
 0x4d3   :  { %v15028_v17 = vadd.f32 %v6818_v21, %v6010_v26  ;;  %v3462_v23 = vmul.f32 0.5, %v15016_v53  ;;  %v15033_v30 = vadd.f32 %v17939_v13, %v17652_v33  ;;  %v15037_v6 = vadd.f32 %v17940_v25, %v17654_v28 }
 0x4d4   :  { %9448 = vtanh.f32 %v3461_v46  ;;  %v3469_v16 = vmul.f32 0.5, %v15024_v58  ;;  %v15042_v14 = vadd.f32 %v17941_v56, %v17656_v54  ;;  %v15046_v0 = vadd.f32 %v14447_v48, %v17650_v32 }
 0x4d5   :  { %9450 = vtanh.f32 %v3460_v55  ;;  %v3471_v52 = vmul.f32 0.5, %v15033_v30  ;;  %v3470_v31 = vmul.f32 0.5, %v15037_v6  ;;  %v15054_v50 = vadd.f32 %v14449_v4, %v17652_v33  ;;  %v17945_v4 = vld [vmem:[#allocation44_spill] sm:$0xff] }
 0x4d6   :  { %9452 = vtanh.f32 %v3462_v23  ;;  %v3472_v8 = vmul.f32 0.5, %v15042_v14  ;;  %v3479_v19 = vmul.f32 0.5, %v15046_v0  ;;  %v15062_v48 = vadd.f32 %v14452_v5, %v17654_v28  ;;  %v17947_v5 = vld [vmem:[#allocation16_spill] sm:$0xff] }
 0x4d7   :  { %9454 = vtanh.f32 %v3469_v16  ;;  %v3481_v18 = vmul.f32 0.5, %v15054_v50  ;;  %v15067_v43 = vadd.f32 %v17944_v63, %v17656_v54  ;;  %v15071_v21 = vadd.f32 %v17945_v4, %v17650_v32  ;;  %v17949_v16 = vld [vmem:[#allocation56_spill] sm:$0xff]  ;;  %v15100_v63 = vpop.f32.mrb[56].mxu0 }
 0x4d8   :  { %v9445_v44 = vpop.eup %9444  ;;  %9456 = vtanh.f32 %v3471_v52  ;;  %v3480_v2 = vmul.f32 0.5, %v15062_v48  ;;  %v15076_v22 = vadd.f32 %v17946_v34, %v17652_v33  ;;  %v15080_v1 = vadd.f32 %v17947_v5, %v17654_v28  ;;  %v17950_v52 = vld [vmem:[#allocation46_spill] sm:$0xff]  ;;  %17952 = vst [vmem:[#allocation80_spill] sm:$0xff] %v15100_v63  ;;  %v17953_v34 = vld [vmem:[#allocation57_spill] sm:$0xff] }
 0x4d9   :  { %v4732_v10 = vadd.f32 1.0, %v9445_v44  ;;  %9458 = vtanh.f32 %v3470_v31  ;;  %v3482_v26 = vmul.f32 0.5, %v15067_v43  ;;  %v3489_v41 = vmul.f32 0.5, %v15071_v21 }
 0x4da   :  { %9460 = vtanh.f32 %v3472_v8  ;;  %v3491_v46 = vmul.f32 0.5, %v15076_v22  ;;  %v3490_v55 = vmul.f32 0.5, %v15080_v1  ;;  %v15088_v23 = vadd.f32 %v17948_v35, %v17656_v54  ;;  %v15098_v8 = vpop.f32.mrb[248].mxu1 }
 0x4db   :  { %v9447_v13 = vpop.eup %9446  ;;  %v5372_v25 = vmul.f32 0.5, %v4732_v10  ;;  %9462 = vtanh.f32 %v3479_v19  ;;  %v15092_v56 = vadd.f32 %v17949_v16, %v17650_v32  ;;  %v15096_v31 = vadd.f32 %v17950_v52, %v17652_v33  ;;  %17951 = vst [vmem:[#allocation74_spill] sm:$0xff] %v15098_v8  ;;  %v15107_v19 = vpop.f32.mrb[249].mxu1 }
 0x4dc   :  { %v4739_v4 = vadd.f32 1.0, %v9447_v13  ;;  %9464 = vtanh.f32 %v3481_v18  ;;  %v3492_v44 = vmul.f32 0.5, %v15088_v23  ;;  %v15105_v5 = vadd.f32 %v17953_v34, %v17654_v28  ;;  %17954 = vst [vmem:[#allocation81_spill] sm:$0xff] %v15107_v19  ;;  %v15109_v10 = vpop.f32.mrb[57].mxu0  ;;  %v15114_v63 = vpop.f32.mrb[250].mxu1  ;;  %v17958_v19 = vld [vmem:[#allocation19_spill] sm:$0xff] }
 0x4dd   :  { %17955 = vst [vmem:[#allocation12_spill] sm:$0xff] %v15109_v10  ;;  %v6012_v35 = vmul.f32 %v5372_v25, %v14956_v39  ;;  %9466 = vtanh.f32 %v3480_v2  ;;  %v3499_v16 = vmul.f32 0.5, %v15092_v56  ;;  %v3501_v52 = vmul.f32 0.5, %v15096_v31  ;;  %17956 = vst [vmem:[#allocation95_spill] sm:$0xff] %v15114_v63  ;;  %v15116_v18 = vpop.f32.mrb[58].mxu0  ;;  %v15125_v39 = vpop.f32.mrb[251].mxu1 }
 0x4de   :  { %17957 = vst [vmem:[#allocation96_spill] sm:$0xff] %v15116_v18  ;;  %v9449_v13 = vpop.eup %9448  ;;  %v5379_v8 = vmul.f32 0.5, %v4739_v4  ;;  %9468 = vtanh.f32 %v3482_v26  ;;  %v15119_v34 = vmul.f32 0.5, %v15105_v5  ;;  %v15123_v10 = vadd.f32 %v17958_v19, %v17656_v54  ;;  %17959 = vst [vmem:[#allocation97_spill] sm:$0xff] %v15125_v39  ;;  %v15127_v2 = vpop.f32.mrb[59].mxu0  ;;  %v17961_v18 = vld [vmem:[#allocation58_spill] sm:$0xff] }
 0x4df   :  { %17960 = vst [vmem:[#allocation75_spill] sm:$0xff] %v15127_v2  ;;  %v9451_v25 = vpop.eup %9450  ;;  %v6893_v24 = vadd.f32 %v15000_v11, %v6012_v35  ;;  %v4741_v63 = vadd.f32 1.0, %v9449_v13  ;;  %9470 = vtanh.f32 %v3489_v41  ;;  %v15132_v4 = vadd.f32 %v17961_v18, %v17650_v32 }
 0x4e0   :  { %v9453_v26 = vpop.eup %9452  ;;  %v6019_v49 = vmul.f32 %v5379_v8, %v14976_v47  ;;  %v4740_v59 = vadd.f32 1.0, %v9451_v25  ;;  %9472 = vtanh.f32 %v3491_v46  ;;  %v15136_v19 = vmul.f32 0.5, %v15123_v10  ;;  %v15143_v25 = vpop.f32.mrb[252].mxu1 }
 0x4e1   :  { %v9455_v39 = vpop.eup %9454  ;;  %v5381_v36 = vmul.f32 0.5, %v4741_v63  ;;  %v4742_v2 = vadd.f32 1.0, %v9453_v26  ;;  %9474 = vtanh.f32 %v3490_v55  ;;  %v15139_v11 = vmul.f32 0.5, %v15132_v4  ;;  %v15145_v63 = vpop.f32.mrb[60].mxu0 }
 0x4e2   :  { %v9457_v41 = vpop.eup %9456  ;;  %v6783_v35 = vadd.f32 %v15011_v37, %v6019_v49  ;;  %v5380_v18 = vmul.f32 0.5, %v4740_v59  ;;  %v4749_v13 = vadd.f32 1.0, %v9455_v39  ;;  %9476 = vtanh.f32 %v3492_v44  ;;  %17962 = vst [vmem:[#allocation30_spill] sm:$0xff] %v15145_v63  ;;  %v15148_v37 = vpop.f32.mrb[253].mxu1 }
 0x4e3   :  { %v9459_v57 = vpop.eup %9458  ;;  %v6021_v47 = vmul.f32 %v5381_v36, %v15005_v7  ;;  %v5382_v46 = vmul.f32 0.5, %v4742_v2  ;;  %v4751_v8 = vadd.f32 1.0, %v9457_v41  ;;  %9478 = vtanh.f32 %v3499_v16  ;;  %17963 = vst [vmem:[#allocation76_spill] sm:$0xff] %v15148_v37  ;;  %v15150_v59 = vpop.f32.mrb[61].mxu0 }
 0x4e4   :  { %v9461_v55 = vpop.eup %9460  ;;  %v6020_v26 = vmul.f32 %v5380_v18, %v15009_v62  ;;  %v5389_v40 = vmul.f32 0.5, %v4749_v13  ;;  %v4750_v38 = vadd.f32 1.0, %v9459_v57  ;;  %9480 = vtanh.f32 %v3501_v52  ;;  %17964 = vst [vmem:[#allocation33_spill] sm:$0xff] %v15150_v59  ;;  %v15154_v39 = vpop.f32.mrb[254].mxu1 }
 0x4e5   :  { %v9463_v49 = vpop.eup %9462  ;;  %v6857_v36 = vadd.f32 %v15018_v27, %v6021_v47  ;;  %v6022_v7 = vmul.f32 %v5382_v46, %v15016_v53  ;;  %v5391_v44 = vmul.f32 0.5, %v4751_v8  ;;  %v4752_v16 = vadd.f32 1.0, %v9461_v55  ;;  %17965 = vst [vmem:[#allocation32_spill] sm:$0xff] %v15154_v39  ;;  %v15156_v2 = vpop.f32.mrb[62].mxu0 }
 0x4e6   :  { %17966 = vst [vmem:[#allocation15_spill] sm:$0xff] %v15156_v2  ;;  %v9465_v41 = vpop.eup %9464  ;;  %v6820_v62 = vadd.f32 %v15028_v17, %v6020_v26  ;;  %v6029_v57 = vmul.f32 %v5389_v40, %v15024_v58  ;;  %v5390_v52 = vmul.f32 0.5, %v4750_v38  ;;  %v4759_v18 = vadd.f32 1.0, %v9463_v49  ;;  %v15160_v13 = vpop.f32.mrb[255].mxu1 }
 0x4e7   :  { %v9467_v59 = vpop.eup %9466  ;;  %v6894_v37 = vadd.f32 %v6893_v24, %v6022_v7  ;;  %v6031_v27 = vmul.f32 %v5391_v44, %v15033_v30  ;;  %v5392_v53 = vmul.f32 0.5, %v4752_v16  ;;  %v4761_v47 = vadd.f32 1.0, %v9465_v41 }
 0x4e8   :  { %v9469_v46 = vpop.eup %9468  ;;  %v6784_v8 = vadd.f32 %v6783_v35, %v6029_v57  ;;  %v6030_v55 = vmul.f32 %v5390_v52, %v15037_v6  ;;  %v5399_v2 = vmul.f32 0.5, %v4759_v18  ;;  %v4760_v39 = vadd.f32 1.0, %v9467_v59 }
 0x4e9   :  { %v9471_v63 = vpop.eup %9470  ;;  %v6858_v17 = vadd.f32 %v6857_v36, %v6031_v27  ;;  %v6032_v40 = vmul.f32 %v5392_v53, %v15042_v14  ;;  %v5401_v38 = vmul.f32 0.5, %v4761_v47  ;;  %v4762_v58 = vadd.f32 1.0, %v9469_v46 }
 0x4ea   :  { %v9473_v26 = vpop.eup %9472  ;;  %v6821_v49 = vadd.f32 %v6820_v62, %v6030_v55  ;;  %v6039_v24 = vmul.f32 %v5399_v2, %v15046_v0  ;;  %v5400_v7 = vmul.f32 0.5, %v4760_v39  ;;  %v4769_v30 = vadd.f32 1.0, %v9471_v63 }
 0x4eb   :  { %v9475_v44 = vpop.eup %9474  ;;  %v6895_v16 = vadd.f32 %v6894_v37, %v6032_v40  ;;  %v6041_v35 = vmul.f32 %v5401_v38, %v15054_v50  ;;  %v5402_v41 = vmul.f32 0.5, %v4762_v58  ;;  %v4771_v6 = vadd.f32 1.0, %v9473_v26 }
 0x4ec   :  { %v9477_v57 = vpop.eup %9476  ;;  %v6785_v59 = vadd.f32 %v6784_v8, %v6039_v24  ;;  %v6040_v36 = vmul.f32 %v5400_v7, %v15062_v48  ;;  %v5409_v52 = vmul.f32 0.5, %v4769_v30  ;;  %v4770_v14 = vadd.f32 1.0, %v9475_v44  ;;  %v15171_v48 = vpop.f32.mrb[63].mxu0  ;;  %v17968_v7 = vld [vmem:[#allocation60_spill] sm:$0xff] }
 0x4ed   :  { %v9479_v18 = vpop.eup %9478  ;;  %v6859_v27 = vadd.f32 %v6858_v17, %v6041_v35  ;;  %v6042_v62 = vmul.f32 %v5402_v41, %v15067_v43  ;;  %v5411_v53 = vmul.f32 0.5, %v4771_v6  ;;  %v4772_v0 = vadd.f32 1.0, %v9477_v57 }
 0x4ee   :  { %v9481_v39 = vpop.eup %9480  ;;  %v6822_v63 = vadd.f32 %v6821_v49, %v6040_v36  ;;  %v6049_v37 = vmul.f32 %v5409_v52, %v15071_v21  ;;  %v5410_v2 = vmul.f32 0.5, %v4770_v14  ;;  %v4779_v50 = vadd.f32 1.0, %v9479_v18  ;;  %v17967_v49 = vld [vmem:[#allocation59_spill] sm:$0xff]  ;;  %v17971_v14 = vld [vmem:[#allocation86_spill] sm:$0xff] }
 0x4ef   :  { %v6896_v47 = vadd.f32 %v6895_v16, %v6042_v62  ;;  %v6051_v46 = vmul.f32 %v5411_v53, %v15076_v22  ;;  %v5412_v8 = vmul.f32 0.5, %v4772_v0  ;;  %v4781_v55 = vadd.f32 1.0, %v9481_v39  ;;  %v17973_v0 = vld [vmem:[#allocation88_spill] sm:$0xff] }
 0x4f0   :  { %v6786_v40 = vadd.f32 %v6785_v59, %v6049_v37  ;;  %v6050_v17 = vmul.f32 %v5410_v2, %v15080_v1  ;;  %v5419_v38 = vmul.f32 0.5, %v4779_v50  ;;  %9482 = vtanh.f32 %v15119_v34  ;;  %v17970_v59 = vld [vmem:[#allocation85_spill] sm:$0xff] }
 0x4f1   :  { %v6860_v43 = vadd.f32 %v6859_v27, %v6051_v46  ;;  %v6052_v58 = vmul.f32 %v5412_v8, %v15088_v23  ;;  %v5421_v26 = vmul.f32 0.5, %v4781_v55  ;;  %9484 = vtanh.f32 %v15136_v19  ;;  %v17969_v19 = vld [vmem:[#allocation84_spill] sm:$0xff]  ;;  %v17975_v46 = vld [vmem:[#allocation89_spill] sm:$0xff] }
 0x4f2   :  { %v15177_v21 = vadd.f32 %v6822_v63, %v6050_v17  ;;  %v6059_v22 = vmul.f32 %v5419_v38, %v15092_v56  ;;  %9486 = vtanh.f32 %v15139_v11  ;;  %v15183_v24 = vadd.f32 %v17967_v49, %v17652_v33  ;;  %v17974_v63 = vld [vmem:[#allocation20_spill] sm:$0xff] }
 0x4f3   :  { %v15185_v1 = vadd.f32 %v6896_v47, %v6052_v58  ;;  %v6061_v34 = vmul.f32 %v5421_v26, %v15096_v31  ;;  %v15190_v23 = vadd.f32 %v17968_v7, %v17654_v28  ;;  %v15194_v30 = vadd.f32 %v17969_v19, %v17656_v54 }
 0x4f4   :  { %v15196_v44 = vadd.f32 %v6786_v40, %v6059_v22  ;;  %v3511_v56 = vmul.f32 0.5, %v15183_v24  ;;  %v15201_v11 = vadd.f32 %v14609_v51, %v17650_v32  ;;  %v15205_v16 = vadd.f32 %v14611_v3, %v17652_v33  ;;  %v15221_v3 = vpop.f32.mrb[0].mxu1 }
 0x4f5   :  { %v15207_v31 = vadd.f32 %v6860_v43, %v6061_v34  ;;  %v3510_v35 = vmul.f32 0.5, %v15190_v23  ;;  %v3512_v41 = vmul.f32 0.5, %v15194_v30  ;;  %v15213_v6 = vadd.f32 %v14615_v45, %v17654_v28  ;;  %v17972_v45 = vld [vmem:[#allocation87_spill] sm:$0xff]  ;;  %v15232_v62 = vpop.f32.mrb[1].mxu1  ;;  %v17976_v43 = vld [vmem:[#allocation90_spill] sm:$0xff] }
 0x4f6   :  { %9488 = vtanh.f32 %v3511_v56  ;;  %v3519_v57 = vmul.f32 0.5, %v15201_v11  ;;  %v3521_v51 = vmul.f32 0.5, %v15205_v16  ;;  %v15219_v36 = vadd.f32 %v17970_v59, %v17656_v54  ;;  %v15243_v2 = vpop.f32.mrb[2].mxu1  ;;  %v17977_v34 = vld [vmem:[#allocation23_spill] sm:$0xff] }
 0x4f7   :  { %9490 = vtanh.f32 %v3510_v35  ;;  %v3520_v52 = vmul.f32 0.5, %v15213_v6  ;;  %v15226_v18 = vadd.f32 %v17971_v14, %v17650_v32  ;;  %v15230_v27 = vadd.f32 %v17972_v45, %v17652_v33  ;;  %v15251_v55 = vpop.f32.mrb[3].mxu1 }
 0x4f8   :  { %9492 = vtanh.f32 %v3512_v41  ;;  %v3522_v53 = vmul.f32 0.5, %v15219_v36  ;;  %v15237_v39 = vadd.f32 %v17973_v0, %v17654_v28  ;;  %v15241_v37 = vadd.f32 %v17974_v63, %v17656_v54  ;;  %v17978_v41 = vld [vmem:[#allocation91_spill] sm:$0xff]  ;;  %v17979_v0 = vld [vmem:[#allocation22_spill] sm:$0xff] }
 0x4f9   :  { %9494 = vtanh.f32 %v3519_v57  ;;  %v3529_v50 = vmul.f32 0.5, %v15226_v18  ;;  %v3531_v47 = vmul.f32 0.5, %v15230_v27  ;;  %v15249_v8 = vadd.f32 %v17975_v46, %v17650_v32 }
 0x4fa   :  { %v9483_v40 = vpop.eup %9482  ;;  %9496 = vtanh.f32 %v3521_v51  ;;  %v3530_v17 = vmul.f32 0.5, %v15237_v39  ;;  %v3532_v38 = vmul.f32 0.5, %v15241_v37  ;;  %v15257_v58 = vadd.f32 %v17976_v43, %v17652_v33  ;;  %v17981_v43 = vld [vmem:[#allocation25_spill] sm:$0xff] }
 0x4fb   :  { %v9485_v26 = vpop.eup %9484  ;;  %v4780_v22 = vadd.f32 1.0, %v9483_v40  ;;  %9498 = vtanh.f32 %v3520_v52  ;;  %v3539_v49 = vmul.f32 0.5, %v15249_v8  ;;  %v15262_v7 = vadd.f32 %v17977_v34, %v17654_v28 }
 0x4fc   :  { %v9487_v19 = vpop.eup %9486  ;;  %v4782_v56 = vadd.f32 1.0, %v9485_v26  ;;  %9500 = vtanh.f32 %v3522_v53  ;;  %v3541_v35 = vmul.f32 0.5, %v15257_v58  ;;  %v15267_v57 = vadd.f32 %v17978_v41, %v17656_v54  ;;  %v15275_v53 = vpop.f32.mrb[4].mxu1 }
 0x4fd   :  { %v5420_v51 = vmul.f32 0.5, %v4780_v22  ;;  %v4789_v59 = vadd.f32 1.0, %v9487_v19  ;;  %9502 = vtanh.f32 %v3529_v50  ;;  %v3540_v52 = vmul.f32 0.5, %v15262_v7  ;;  %17980 = vst [vmem:[#allocation14_spill] sm:$0xff] %v15275_v53  ;;  %v15282_v50 = vpop.f32.mrb[5].mxu1  ;;  %v17983_v19 = vld [vmem:[#allocation7_spill] sm:$0xff] }
 0x4fe   :  { %v5422_v14 = vmul.f32 0.5, %v4782_v56  ;;  %9504 = vtanh.f32 %v3531_v47  ;;  %v3542_v45 = vmul.f32 0.5, %v15267_v57  ;;  %v15273_v63 = vadd.f32 %v17979_v0, %v17650_v32  ;;  %17982 = vst [vmem:[#allocation98_spill] sm:$0xff] %v15282_v50  ;;  %v15290_v41 = vpop.f32.mrb[6].mxu1 }
 0x4ff   :  { %v6060_v46 = vmul.f32 %v5420_v51, %v15105_v5  ;;  %v5429_v40 = vmul.f32 0.5, %v4789_v59  ;;  %9506 = vtanh.f32 %v3530_v17  ;;  %v15280_v26 = vadd.f32 %v17981_v43, %v17652_v33  ;;  %17984 = vst [vmem:[#allocation77_spill] sm:$0xff] %v15290_v41  ;;  %v15294_v0 = vpop.f32.mrb[7].mxu1 }
 0x500   :  { %v9489_v22 = vpop.eup %9488  ;;  %v6062_v47 = vmul.f32 %v5422_v14, %v15123_v10  ;;  %9508 = vtanh.f32 %v3532_v38  ;;  %v3549_v34 = vmul.f32 0.5, %v15273_v63  ;;  %v15288_v56 = vadd.f32 %v17983_v19, %v17654_v28  ;;  %17985 = vst [vmem:[#allocation78_spill] sm:$0xff] %v15294_v0 }
 0x501   :  { %v9491_v5 = vpop.eup %9490  ;;  %v6824_v17 = vadd.f32 %v15177_v21, %v6060_v46  ;;  %v6069_v51 = vmul.f32 %v5429_v40, %v15132_v4  ;;  %v4791_v59 = vadd.f32 1.0, %v9489_v22  ;;  %9510 = vtanh.f32 %v3539_v49  ;;  %v15299_v21 = vpop.f32.mrb[64].mxu0 }
 0x502   :  { %v9493_v43 = vpop.eup %9492  ;;  %v6898_v10 = vadd.f32 %v15185_v1, %v6062_v47  ;;  %v4790_v38 = vadd.f32 1.0, %v9491_v5  ;;  %9512 = vtanh.f32 %v3541_v35  ;;  %v3551_v14 = vmul.f32 0.5, %v15280_v26  ;;  %17986 = vst [vmem:[#allocation17_spill] sm:$0xff] %v15299_v21  ;;  %v15304_v1 = vpop.f32.mrb[65].mxu0 }
 0x503   :  { %v9495_v19 = vpop.eup %9494  ;;  %v6788_v50 = vadd.f32 %v15196_v44, %v6069_v51  ;;  %v5431_v41 = vmul.f32 0.5, %v4791_v59  ;;  %v4792_v53 = vadd.f32 1.0, %v9493_v43  ;;  %9514 = vtanh.f32 %v3540_v52  ;;  %17987 = vst [vmem:[#allocation79_spill] sm:$0xff] %v15304_v1  ;;  %v15308_v43 = vpop.f32.mrb[8].mxu1 }
 0x504   :  { %v9497_v4 = vpop.eup %9496  ;;  %v5430_v46 = vmul.f32 0.5, %v4790_v38  ;;  %v4799_v49 = vadd.f32 1.0, %v9495_v19  ;;  %9516 = vtanh.f32 %v3542_v45  ;;  %v15302_v40 = vmul.f32 0.5, %v15288_v56  ;;  %v15312_v0 = vpop.f32.mrb[9].mxu1 }
 0x505   :  { %v9499_v35 = vpop.eup %9498  ;;  %v6071_v22 = vmul.f32 %v5431_v41, %v15183_v24  ;;  %v5432_v47 = vmul.f32 0.5, %v4792_v53  ;;  %v4801_v5 = vadd.f32 1.0, %v9497_v4  ;;  %9518 = vtanh.f32 %v3549_v34  ;;  %v15315_v4 = vpop.f32.mrb[10].mxu1 }
 0x506   :  { %v9501_v44 = vpop.eup %9500  ;;  %v6070_v52 = vmul.f32 %v5430_v46, %v15190_v23  ;;  %v5439_v51 = vmul.f32 0.5, %v4799_v49  ;;  %v4800_v59 = vadd.f32 1.0, %v9499_v35  ;;  %9520 = vtanh.f32 %v3551_v14  ;;  %17988 = vst [vmem:[#allocation35_spill] sm:$0xff] %v15315_v4 }
 0x507   :  { %v9503_v45 = vpop.eup %9502  ;;  %v6862_v38 = vadd.f32 %v15207_v31, %v6071_v22  ;;  %v6072_v19 = vmul.f32 %v5432_v47, %v15194_v30  ;;  %v5441_v1 = vmul.f32 0.5, %v4801_v5  ;;  %v4802_v21 = vadd.f32 1.0, %v9501_v44  ;;  %v15318_v22 = vpop.f32.mrb[11].mxu1 }
 0x508   :  { %v9505_v24 = vpop.eup %9504  ;;  %v6825_v53 = vadd.f32 %v6824_v17, %v6070_v52  ;;  %v6079_v34 = vmul.f32 %v5439_v51, %v15201_v11  ;;  %v5440_v41 = vmul.f32 0.5, %v4800_v59  ;;  %v4809_v23 = vadd.f32 1.0, %v9503_v45  ;;  %17989 = vst [vmem:[#allocation82_spill] sm:$0xff] %v15318_v22 }
 0x509   :  { %v9507_v14 = vpop.eup %9506  ;;  %v6899_v46 = vadd.f32 %v6898_v10, %v6072_v19  ;;  %v6081_v49 = vmul.f32 %v5441_v1, %v15205_v16  ;;  %v5442_v35 = vmul.f32 0.5, %v4802_v21  ;;  %v4811_v31 = vadd.f32 1.0, %v9505_v24 }
 0x50a   :  { %v9509_v30 = vpop.eup %9508  ;;  %v6789_v47 = vadd.f32 %v6788_v50, %v6079_v34  ;;  %v6080_v5 = vmul.f32 %v5440_v41, %v15213_v6  ;;  %v5449_v44 = vmul.f32 0.5, %v4809_v23  ;;  %v4810_v17 = vadd.f32 1.0, %v9507_v14 }
 0x50b   :  { %v9511_v52 = vpop.eup %9510  ;;  %v6863_v11 = vadd.f32 %v6862_v38, %v6081_v49  ;;  %v6082_v51 = vmul.f32 %v5442_v35, %v15219_v36  ;;  %v5451_v59 = vmul.f32 0.5, %v4811_v31  ;;  %v4812_v45 = vadd.f32 1.0, %v9509_v30  ;;  %v15325_v49 = vpop.f32.mrb[12].mxu1 }
 0x50c   :  { %v9513_v4 = vpop.eup %9512  ;;  %v6826_v10 = vadd.f32 %v6825_v53, %v6080_v5  ;;  %v6089_v16 = vmul.f32 %v5449_v44, %v15226_v18  ;;  %v5450_v21 = vmul.f32 0.5, %v4810_v17  ;;  %v4819_v1 = vadd.f32 1.0, %v9511_v52  ;;  %17990 = vst [vmem:[#allocation51_spill] sm:$0xff] %v15325_v49  ;;  %v15328_v5 = vpop.f32.mrb[13].mxu1 }
 0x50d   :  { %v9515_v19 = vpop.eup %9514  ;;  %v6900_v24 = vadd.f32 %v6899_v46, %v6082_v51  ;;  %v6091_v50 = vmul.f32 %v5451_v59, %v15230_v27  ;;  %v5452_v34 = vmul.f32 0.5, %v4812_v45  ;;  %v4821_v6 = vadd.f32 1.0, %v9513_v4  ;;  %17991 = vst [vmem:[#allocation83_spill] sm:$0xff] %v15328_v5 }
 0x50e   :  { %v9517_v41 = vpop.eup %9516  ;;  %v6790_v23 = vadd.f32 %v6789_v47, %v6089_v16  ;;  %v6090_v38 = vmul.f32 %v5450_v21, %v15237_v39  ;;  %v5459_v14 = vmul.f32 0.5, %v4819_v1  ;;  %v4820_v36 = vadd.f32 1.0, %v9515_v19  ;;  %v17993_v19 = vld [vmem:[#allocation62_spill] sm:$0xff] }
 0x50f   :  { %v9519_v35 = vpop.eup %9518  ;;  %v6864_v53 = vadd.f32 %v6863_v11, %v6091_v50  ;;  %v6092_v18 = vmul.f32 %v5452_v34, %v15241_v37  ;;  %v5461_v31 = vmul.f32 0.5, %v4821_v6  ;;  %v4822_v30 = vadd.f32 1.0, %v9517_v41  ;;  %v17995_v6 = vld [vmem:[#allocation38_spill] sm:$0xff] }
 0x510   :  { %v9521_v46 = vpop.eup %9520  ;;  %v6827_v27 = vadd.f32 %v6826_v10, %v6090_v38  ;;  %v6099_v4 = vmul.f32 %v5459_v14, %v15249_v8  ;;  %v5460_v44 = vmul.f32 0.5, %v4820_v36  ;;  %v4829_v47 = vadd.f32 1.0, %v9519_v35  ;;  %v17992_v10 = vld [vmem:[#allocation61_spill] sm:$0xff]  ;;  %v17996_v14 = vld [vmem:[#allocation24_spill] sm:$0xff] }
 0x511   :  { %v6901_v17 = vadd.f32 %v6900_v24, %v6092_v18  ;;  %v6101_v39 = vmul.f32 %v5461_v31, %v15257_v58  ;;  %v5462_v52 = vmul.f32 0.5, %v4822_v30  ;;  %v4831_v51 = vadd.f32 1.0, %v9521_v46  ;;  %v17998_v30 = vld [vmem:[#allocation9_spill] sm:$0xff] }
 0x512   :  { %v6791_v59 = vadd.f32 %v6790_v23, %v6099_v4  ;;  %v6100_v11 = vmul.f32 %v5460_v44, %v15262_v7  ;;  %v5469_v45 = vmul.f32 0.5, %v4829_v47  ;;  %9522 = vtanh.f32 %v15302_v40  ;;  %v17994_v7 = vld [vmem:[#allocation6_spill] sm:$0xff]  ;;  %v18000_v47 = vld [vmem:[#allocation47_spill] sm:$0xff] }
 0x513   :  { %v6865_v37 = vadd.f32 %v6864_v53, %v6101_v39  ;;  %v6102_v16 = vmul.f32 %v5462_v52, %v15267_v57  ;;  %v5471_v21 = vmul.f32 0.5, %v4831_v51  ;;  %v15337_v8 = vadd.f32 %v17992_v10, %v17656_v54  ;;  %v17997_v53 = vld [vmem:[#allocation70_spill] sm:$0xff]  ;;  %v18002_v10 = vld [vmem:[#allocation48_spill] sm:$0xff] }
 0x514   :  { %v15339_v1 = vadd.f32 %v6827_v27, %v6100_v11  ;;  %v6109_v58 = vmul.f32 %v5469_v45, %v15273_v63  ;;  %v15344_v24 = vadd.f32 %v17993_v19, %v17650_v32  ;;  %v15348_v50 = vadd.f32 %v17994_v7, %v17652_v33  ;;  %v17999_v27 = vld [vmem:[#allocation49_spill] sm:$0xff] }
 0x515   :  { %v15350_v40 = vadd.f32 %v6901_v17, %v6102_v16  ;;  %v6111_v57 = vmul.f32 %v5471_v21, %v15280_v26  ;;  %v3552_v34 = vmul.f32 0.5, %v15337_v8  ;;  %v15356_v41 = vadd.f32 %v17995_v6, %v17654_v28 }
 0x516   :  { %v15358_v23 = vadd.f32 %v6791_v59, %v6109_v58  ;;  %v3559_v63 = vmul.f32 0.5, %v15344_v24  ;;  %v3561_v38 = vmul.f32 0.5, %v15348_v50  ;;  %v15364_v36 = vadd.f32 %v17996_v14, %v17656_v54 }
 0x517   :  { %v15366_v35 = vadd.f32 %v6865_v37, %v6111_v57  ;;  %9524 = vtanh.f32 %v3552_v34  ;;  %v3560_v26 = vmul.f32 0.5, %v15356_v41  ;;  %v15371_v18 = vadd.f32 %v17997_v53, %v17650_v32  ;;  %v18001_v37 = vld [vmem:[#allocation54_spill] sm:$0xff]  ;;  %v18004_v34 = vld [vmem:[#allocation63_spill] sm:$0xff] }
 0x518   :  { %9526 = vtanh.f32 %v3559_v63  ;;  %v3562_v31 = vmul.f32 0.5, %v15364_v36  ;;  %v15376_v46 = vadd.f32 %v17998_v30, %v17652_v33  ;;  %v15380_v4 = vadd.f32 %v17999_v27, %v17654_v28  ;;  %v15417_v63 = vpop.f32.mrb[14].mxu1  ;;  %v18007_v27 = vld [vmem:[#allocation64_spill] sm:$0xff] }
 0x519   :  { %9528 = vtanh.f32 %v3561_v38  ;;  %v3569_v44 = vmul.f32 0.5, %v15371_v18  ;;  %v15385_v17 = vadd.f32 %v18000_v47, %v17656_v54  ;;  %v15389_v39 = vadd.f32 %v14793_v60, %v17650_v32  ;;  %18005 = vst [vmem:[#allocation34_spill] sm:$0xff] %v15417_v63  ;;  %v15430_v47 = vpop.f32.mrb[15].mxu1 }
 0x51a   :  { %9530 = vtanh.f32 %v3560_v26  ;;  %v3571_v52 = vmul.f32 0.5, %v15376_v46  ;;  %v3570_v51 = vmul.f32 0.5, %v15380_v4  ;;  %v15395_v59 = vadd.f32 %v14795_v9, %v17652_v33  ;;  %v18003_v9 = vld [vmem:[#allocation42_spill] sm:$0xff]  ;;  %v18006_v26 = vld [vmem:[#allocation8_spill] sm:$0xff]  ;;  %18008 = vst [vmem:[#allocation37_spill] sm:$0xff] %v15430_v47 }
 0x51b   :  { %9532 = vtanh.f32 %v3562_v31  ;;  %v3572_v11 = vmul.f32 0.5, %v15385_v17  ;;  %v3579_v45 = vmul.f32 0.5, %v15389_v39  ;;  %v15401_v16 = vadd.f32 %v18001_v37, %v17654_v28 }
 0x51c   :  { %v9523_v60 = vpop.eup %9522  ;;  %9534 = vtanh.f32 %v3569_v44  ;;  %v3581_v21 = vmul.f32 0.5, %v15395_v59  ;;  %v15406_v58 = vadd.f32 %v18002_v10, %v17656_v54  ;;  %v15410_v19 = vadd.f32 %v18003_v9, %v17650_v32 }
 0x51d   :  { %v4830_v7 = vadd.f32 1.0, %v9523_v60  ;;  %9536 = vtanh.f32 %v3571_v52  ;;  %v3580_v57 = vmul.f32 0.5, %v15401_v16  ;;  %v15415_v6 = vadd.f32 %v18004_v34, %v17652_v33 }
 0x51e   :  { %9538 = vtanh.f32 %v3570_v51  ;;  %v3582_v38 = vmul.f32 0.5, %v15406_v58  ;;  %v3589_v14 = vmul.f32 0.5, %v15410_v19  ;;  %v15423_v53 = vadd.f32 %v18006_v26, %v17654_v28 }
 0x51f   :  { %v5470_v31 = vmul.f32 0.5, %v4830_v7  ;;  %9540 = vtanh.f32 %v3572_v11  ;;  %v3591_v30 = vmul.f32 0.5, %v15415_v6  ;;  %v15428_v44 = vadd.f32 %v18007_v27, %v17656_v54 }
 0x520   :  { %9542 = vtanh.f32 %v3579_v45  ;;  %v3590_v52 = vmul.f32 0.5, %v15423_v53  ;;  %v15435_v51 = vadd.f32 %v14815_v29, %v17650_v32  ;;  %v15439_v37 = vadd.f32 %v14843_v42, %v17652_v33 }
 0x521   :  { %v9525_v11 = vpop.eup %9524  ;;  %v6110_v60 = vmul.f32 %v5470_v31, %v15288_v56  ;;  %9544 = vtanh.f32 %v3581_v21  ;;  %v3592_v10 = vmul.f32 0.5, %v15428_v44  ;;  %v15445_v9 = vadd.f32 %v14861_v12, %v17654_v28 }
 0x522   :  { %v9527_v45 = vpop.eup %9526  ;;  %v4832_v7 = vadd.f32 1.0, %v9525_v11  ;;  %9546 = vtanh.f32 %v3580_v57  ;;  %v15448_v29 = vmul.f32 0.5, %v15435_v51  ;;  %v15451_v34 = vmul.f32 0.5, %v15439_v37 }
 0x523   :  { %v9529_v42 = vpop.eup %9528  ;;  %v6829_v26 = vadd.f32 %v15339_v1, %v6110_v60  ;;  %v4839_v56 = vadd.f32 1.0, %v9527_v45  ;;  %9548 = vtanh.f32 %v3582_v38  ;;  %v15455_v21 = vmul.f32 0.5, %v15445_v9  ;;  %v15465_v38 = vpop.f32.mrb[16].mxu1 }
 0x524   :  { %v9531_v31 = vpop.eup %9530  ;;  %v5472_v12 = vmul.f32 0.5, %v4832_v7  ;;  %v4841_v27 = vadd.f32 1.0, %v9529_v42  ;;  %9550 = vtanh.f32 %v3589_v14  ;;  %v15459_v57 = vadd.f32 %v14863_v15, %v17656_v54  ;;  %18009 = vst [vmem:[#allocation36_spill] sm:$0xff] %v15465_v38  ;;  %v15468_v14 = vpop.f32.mrb[17].mxu1 }
 0x525   :  { %v9533_v11 = vpop.eup %9532  ;;  %v5479_v47 = vmul.f32 0.5, %v4839_v56  ;;  %v4840_v63 = vadd.f32 1.0, %v9531_v31  ;;  %9552 = vtanh.f32 %v3591_v30  ;;  %v15463_v1 = vadd.f32 %v14895_v61, %v17650_v32  ;;  %18010 = vst [vmem:[#allocation52_spill] sm:$0xff] %v15468_v14  ;;  %v15471_v30 = vpop.f32.mrb[18].mxu1 }
 0x526   :  { %v9535_v60 = vpop.eup %9534  ;;  %v6112_v45 = vmul.f32 %v5472_v12, %v15337_v8  ;;  %v5481_v7 = vmul.f32 0.5, %v4841_v27  ;;  %v4842_v42 = vadd.f32 1.0, %v9533_v11  ;;  %9554 = vtanh.f32 %v3590_v52  ;;  %18011 = vst [vmem:[#allocation39_spill] sm:$0xff] %v15471_v30  ;;  %v15475_v12 = vpop.f32.mrb[19].mxu1 }
 0x527   :  { %v9537_v15 = vpop.eup %9536  ;;  %v6119_v5 = vmul.f32 %v5479_v47, %v15344_v24  ;;  %v5480_v56 = vmul.f32 0.5, %v4840_v63  ;;  %v4849_v31 = vadd.f32 1.0, %v9535_v60  ;;  %9556 = vtanh.f32 %v3592_v10  ;;  %18012 = vst [vmem:[#allocation40_spill] sm:$0xff] %v15475_v12 }
 0x528   :  { %v9539_v61 = vpop.eup %9538  ;;  %v6903_v49 = vadd.f32 %v15350_v40, %v6112_v45  ;;  %v6121_v38 = vmul.f32 %v5481_v7, %v15348_v50  ;;  %v5482_v22 = vmul.f32 0.5, %v4842_v42  ;;  %v4851_v8 = vadd.f32 1.0, %v9537_v15 }
 0x529   :  { %v9541_v52 = vpop.eup %9540  ;;  %v6793_v27 = vadd.f32 %v15358_v23, %v6119_v5  ;;  %v6120_v11 = vmul.f32 %v5480_v56, %v15356_v41  ;;  %v5489_v24 = vmul.f32 0.5, %v4849_v31  ;;  %v4850_v63 = vadd.f32 1.0, %v9539_v61 }
 0x52a   :  { %v9543_v47 = vpop.eup %9542  ;;  %v6867_v10 = vadd.f32 %v15366_v35, %v6121_v38  ;;  %v6122_v60 = vmul.f32 %v5482_v22, %v15364_v36  ;;  %v5491_v30 = vmul.f32 0.5, %v4851_v8  ;;  %v4852_v40 = vadd.f32 1.0, %v9541_v52  ;;  %v15484_v36 = vpop.f32.mrb[20].mxu1 }
 0x52b   :  { %v9545_v45 = vpop.eup %9544  ;;  %v6830_v50 = vadd.f32 %v6829_v26, %v6120_v11  ;;  %v6129_v7 = vmul.f32 %v5489_v24, %v15371_v18  ;;  %v5490_v42 = vmul.f32 0.5, %v4850_v63  ;;  %v4859_v15 = vadd.f32 1.0, %v9543_v47  ;;  %v15487_v11 = vpop.f32.mrb[21].mxu1 }
 0x52c   :  { %v9547_v12 = vpop.eup %9546  ;;  %v6904_v14 = vadd.f32 %v6903_v49, %v6122_v60  ;;  %v6131_v5 = vmul.f32 %v5491_v30, %v15376_v46  ;;  %v5492_v41 = vmul.f32 0.5, %v4852_v40  ;;  %v4861_v23 = vadd.f32 1.0, %v9545_v45  ;;  %v15490_v63 = vpop.f32.mrb[22].mxu1 }
 0x52d   :  { %v9549_v56 = vpop.eup %9548  ;;  %v6794_v31 = vadd.f32 %v6793_v27, %v6129_v7  ;;  %v6130_v35 = vmul.f32 %v5490_v42, %v15380_v4  ;;  %v5499_v38 = vmul.f32 0.5, %v4859_v15  ;;  %v4860_v22 = vadd.f32 1.0, %v9547_v12  ;;  %v15493_v40 = vpop.f32.mrb[23].mxu1 }
 0x52e   :  { %v9551_v61 = vpop.eup %9550  ;;  %v6868_v26 = vadd.f32 %v6867_v10, %v6131_v5  ;;  %v6132_v18 = vmul.f32 %v5492_v41, %v15385_v17  ;;  %v5501_v8 = vmul.f32 0.5, %v4861_v23  ;;  %v4862_v52 = vadd.f32 1.0, %v9549_v56  ;;  %v15496_v15 = vpop.f32.mrb[66].mxu0 }
 0x52f   :  { %v9553_v49 = vpop.eup %9552  ;;  %v6831_v46 = vadd.f32 %v6830_v50, %v6130_v35  ;;  %v6139_v30 = vmul.f32 %v5499_v38, %v15389_v39  ;;  %v5500_v24 = vmul.f32 0.5, %v4860_v22  ;;  %v4869_v27 = vadd.f32 1.0, %v9551_v61 }
 0x530   :  { %v9555_v4 = vpop.eup %9554  ;;  %v6905_v12 = vadd.f32 %v6904_v14, %v6132_v18  ;;  %v6141_v47 = vmul.f32 %v5501_v8, %v15395_v59  ;;  %v5502_v60 = vmul.f32 0.5, %v4862_v52  ;;  %v4871_v10 = vadd.f32 1.0, %v9553_v49  ;;  %v15499_v14 = vpop.f32.mrb[67].mxu0  ;;  %v18017_v52 = vld [vmem:[#allocation66_spill] sm:$0xff] }
 0x531   :  { %v9557_v17 = vpop.eup %9556  ;;  %v6795_v45 = vadd.f32 %v6794_v31, %v6139_v30  ;;  %v6140_v7 = vmul.f32 %v5500_v24, %v15401_v16  ;;  %v5509_v42 = vmul.f32 0.5, %v4869_v27  ;;  %v4870_v50 = vadd.f32 1.0, %v9555_v4  ;;  %18013 = vst [vmem:[#allocation41_spill] sm:$0xff] %v15499_v14  ;;  %v18019_v30 = vld [vmem:[#allocation27_spill] sm:$0xff] }
 0x532   :  { %v6869_v39 = vadd.f32 %v6868_v26, %v6141_v47  ;;  %v6142_v5 = vmul.f32 %v5502_v60, %v15406_v58  ;;  %v5511_v41 = vmul.f32 0.5, %v4871_v10  ;;  %v4872_v23 = vadd.f32 1.0, %v9557_v17  ;;  %v15510_v26 = vpop.f32.mrb[24].mxu1  ;;  %v18021_v47 = vld [vmem:[#allocation67_spill] sm:$0xff]  ;;  %v18022_v10 = vld [vmem:[#allocation26_spill] sm:$0xff] }
 0x533   :  { %v6832_v59 = vadd.f32 %v6831_v46, %v6140_v7  ;;  %v6149_v56 = vmul.f32 %v5509_v42, %v15410_v19  ;;  %v5510_v35 = vmul.f32 0.5, %v4870_v50  ;;  %9558 = vtanh.f32 %v15448_v29  ;;  %18014 = vst [vmem:[#allocation43_spill] sm:$0xff] %v15510_v26  ;;  %v18023_v7 = vld [vmem:[#allocation29_spill] sm:$0xff]  ;;  %v18024_v50 = vld [vmem:[#allocation10_spill] sm:$0xff] }
 0x534   :  { %v6906_v31 = vadd.f32 %v6905_v12, %v6142_v5  ;;  %v6151_v16 = vmul.f32 %v5511_v41, %v15415_v6  ;;  %v5512_v38 = vmul.f32 0.5, %v4872_v23  ;;  %9560 = vtanh.f32 %v15451_v34  ;;  %v15520_v34 = vpop.f32.mrb[25].mxu1  ;;  %v18025_v23 = vld [vmem:[#allocation68_spill] sm:$0xff] }
 0x535   :  { %v15505_v22 = vadd.f32 %v6795_v45, %v6149_v56  ;;  %v6150_v58 = vmul.f32 %v5510_v35, %v15423_v53  ;;  %9562 = vtanh.f32 %v15455_v21  ;;  %v3602_v61 = vmul.f32 0.5, %v15459_v57  ;;  %18015 = vst [vmem:[#allocation44_spill] sm:$0xff] %v15520_v34  ;;  %v18016_v53 = vld [vmem:[#allocation11_spill] sm:$0xff] }
 0x536   :  { %v15512_v19 = vadd.f32 %v6869_v39, %v6151_v16  ;;  %v6152_v29 = vmul.f32 %v5512_v38, %v15428_v44  ;;  %v3609_v18 = vmul.f32 0.5, %v15463_v1  ;;  %v15518_v6 = vadd.f32 %v14897_v20, %v17652_v33  ;;  %v15532_v44 = vpop.f32.mrb[26].mxu1 }
 0x537   :  { %v15522_v8 = vadd.f32 %v6832_v59, %v6150_v58  ;;  %9564 = vtanh.f32 %v3602_v61  ;;  %v15526_v21 = vadd.f32 %v18016_v53, %v17654_v28  ;;  %v15530_v49 = vadd.f32 %v18017_v52, %v17656_v54  ;;  %18018 = vst [vmem:[#allocation53_spill] sm:$0xff] %v15532_v44  ;;  %v15541_v27 = vpop.f32.mrb[27].mxu1  ;;  %v18027_v61 = vld [vmem:[#allocation69_spill] sm:$0xff] }
 0x538   :  { %v15534_v46 = vadd.f32 %v6906_v31, %v6152_v29  ;;  %9566 = vtanh.f32 %v3609_v18  ;;  %v3611_v20 = vmul.f32 0.5, %v15518_v6  ;;  %v15539_v24 = vadd.f32 %v18019_v30, %v17650_v32  ;;  %18020 = vst [vmem:[#allocation16_spill] sm:$0xff] %v15541_v27  ;;  %v18026_v31 = vld [vmem:[#allocation28_spill] sm:$0xff]  ;;  %v18028_v18 = vld [vmem:[#allocation50_spill] sm:$0xff]  ;;  %v15583_v52 = vpop.f32.mrb[28].mxu1 }
 0x539   :  { %v3610_v4 = vmul.f32 0.5, %v15526_v21  ;;  %v3612_v12 = vmul.f32 0.5, %v15530_v49  ;;  %v15547_v60 = vadd.f32 %v18021_v47, %v17652_v33  ;;  %v15551_v17 = vadd.f32 %v18022_v10, %v17654_v28  ;;  %18029 = vst [vmem:[#allocation55_spill] sm:$0xff] %v15583_v52  ;;  %v15590_v10 = vpop.f32.mrb[29].mxu1 }
 0x53a   :  { %9568 = vtanh.f32 %v3611_v20  ;;  %v3619_v45 = vmul.f32 0.5, %v15539_v24  ;;  %v15556_v42 = vadd.f32 %v18023_v7, %v17656_v54  ;;  %v15560_v39 = vadd.f32 %v18024_v50, %v17650_v32  ;;  %18031 = vst [vmem:[#allocation56_spill] sm:$0xff] %v15590_v10 }
 0x53b   :  { %9570 = vtanh.f32 %v3610_v4  ;;  %v3621_v5 = vmul.f32 0.5, %v15547_v60  ;;  %v3620_v41 = vmul.f32 0.5, %v15551_v17  ;;  %v15566_v59 = vadd.f32 %v18025_v23, %v17652_v33 }
 0x53c   :  { %9572 = vtanh.f32 %v3612_v12  ;;  %v3622_v56 = vmul.f32 0.5, %v15556_v42  ;;  %v3629_v35 = vmul.f32 0.5, %v15560_v39  ;;  %v15572_v16 = vadd.f32 %v18026_v31, %v17654_v28  ;;  %v18030_v12 = vld [vmem:[#allocation45_spill] sm:$0xff]  ;;  %v15594_v31 = vpop.f32.mrb[30].mxu1 }
 0x53d   :  { %v9559_v38 = vpop.eup %9558  ;;  %9574 = vtanh.f32 %v3619_v45  ;;  %v3631_v58 = vmul.f32 0.5, %v15566_v59  ;;  %v15577_v29 = vadd.f32 %v18027_v61, %v17656_v54  ;;  %v15581_v53 = vadd.f32 %v18028_v18, %v17650_v32  ;;  %18032 = vst [vmem:[#allocation46_spill] sm:$0xff] %v15594_v31  ;;  %v15605_v27 = vpop.f32.mrb[31].mxu1 }
 0x53e   :  { %v9561_v20 = vpop.eup %9560  ;;  %v4879_v30 = vadd.f32 1.0, %v9559_v38  ;;  %9576 = vtanh.f32 %v3621_v5  ;;  %v3630_v4 = vmul.f32 0.5, %v15572_v16  ;;  %v15588_v47 = vadd.f32 %v18030_v12, %v17652_v33  ;;  %v18033_v12 = vld [vmem:[#allocation13_spill] sm:$0xff]  ;;  %18035 = vst [vmem:[#allocation57_spill] sm:$0xff] %v15605_v27 }
 0x53f   :  { %v9563_v45 = vpop.eup %9562  ;;  %v4881_v7 = vadd.f32 1.0, %v9561_v20  ;;  %9578 = vtanh.f32 %v3620_v41  ;;  %v3632_v50 = vmul.f32 0.5, %v15577_v29  ;;  %v3639_v23 = vmul.f32 0.5, %v15581_v53  ;;  %v18034_v41 = vld [vmem:[#allocation72_spill] sm:$0xff] }
 0x540   :  { %v5519_v61 = vmul.f32 0.5, %v4879_v30  ;;  %v4880_v38 = vadd.f32 1.0, %v9563_v45  ;;  %9580 = vtanh.f32 %v3622_v56  ;;  %v3641_v5 = vmul.f32 0.5, %v15588_v47 }
 0x541   :  { %v9565_v18 = vpop.eup %9564  ;;  %v5521_v52 = vmul.f32 0.5, %v4881_v7  ;;  %9582 = vtanh.f32 %v3629_v35  ;;  %v15599_v10 = vadd.f32 %v18033_v12, %v17654_v28  ;;  %v15603_v20 = vadd.f32 %v18034_v41, %v17656_v54 }
 0x542   :  { %v9567_v44 = vpop.eup %9566  ;;  %v6159_v30 = vmul.f32 %v5519_v61, %v15435_v51  ;;  %v5520_v45 = vmul.f32 0.5, %v4880_v38  ;;  %v4882_v56 = vadd.f32 1.0, %v9565_v18  ;;  %9584 = vtanh.f32 %v3631_v58 }
 0x543   :  { %v6161_v31 = vmul.f32 %v5521_v52, %v15439_v37  ;;  %v4889_v7 = vadd.f32 1.0, %v9567_v44  ;;  %9586 = vtanh.f32 %v3630_v4  ;;  %v3640_v35 = vmul.f32 0.5, %v15599_v10 }
 0x544   :  { %v9569_v12 = vpop.eup %9568  ;;  %v6797_v34 = vadd.f32 %v15505_v22, %v6159_v30  ;;  %v6160_v41 = vmul.f32 %v5520_v45, %v15445_v9  ;;  %v5522_v26 = vmul.f32 0.5, %v4882_v56  ;;  %9588 = vtanh.f32 %v3632_v50 }
 0x545   :  { %v9571_v27 = vpop.eup %9570  ;;  %v6871_v14 = vadd.f32 %v15512_v19, %v6161_v31  ;;  %v5529_v51 = vmul.f32 0.5, %v4889_v7  ;;  %v4891_v61 = vadd.f32 1.0, %v9569_v12  ;;  %9590 = vtanh.f32 %v3639_v23 }
 0x546   :  { %v9573_v58 = vpop.eup %9572  ;;  %v6834_v37 = vadd.f32 %v15522_v8, %v6160_v41  ;;  %v6162_v44 = vmul.f32 %v5522_v26, %v15459_v57  ;;  %v4890_v52 = vadd.f32 1.0, %v9571_v27  ;;  %9592 = vtanh.f32 %v3641_v5 }
 0x547   :  { %v9575_v4 = vpop.eup %9574  ;;  %v6169_v22 = vmul.f32 %v5529_v51, %v15463_v1  ;;  %v5531_v38 = vmul.f32 0.5, %v4891_v61  ;;  %v4892_v9 = vadd.f32 1.0, %v9573_v58  ;;  %9594 = vtanh.f32 %v3640_v35  ;;  %v15621_v51 = vpop.f32.mrb[32].mxu1 }
 0x548   :  { %v9577_v50 = vpop.eup %9576  ;;  %v6908_v18 = vadd.f32 %v15534_v46, %v6162_v44  ;;  %v5530_v19 = vmul.f32 0.5, %v4890_v52  ;;  %v4899_v31 = vadd.f32 1.0, %v9575_v4  ;;  %v3642_v23 = vmul.f32 0.5, %v15603_v20  ;;  %v15624_v52 = vpop.f32.mrb[33].mxu1 }
 0x549   :  { %v9579_v30 = vpop.eup %9578  ;;  %v6798_v45 = vadd.f32 %v6797_v34, %v6169_v22  ;;  %v6171_v8 = vmul.f32 %v5531_v38, %v15518_v6  ;;  %v5532_v57 = vmul.f32 0.5, %v4892_v9  ;;  %v4901_v26 = vadd.f32 1.0, %v9577_v50  ;;  %v15627_v9 = vpop.f32.mrb[34].mxu1 }
 0x54a   :  { %v9581_v27 = vpop.eup %9580  ;;  %v6170_v5 = vmul.f32 %v5530_v19, %v15526_v21  ;;  %v5539_v1 = vmul.f32 0.5, %v4899_v31  ;;  %v4900_v56 = vadd.f32 1.0, %v9579_v30  ;;  %9596 = vtanh.f32 %v3642_v23  ;;  %v15630_v23 = vpop.f32.mrb[35].mxu1 }
 0x54b   :  { %v9583_v7 = vpop.eup %9582  ;;  %v6872_v35 = vadd.f32 %v6871_v14, %v6171_v8  ;;  %v6172_v46 = vmul.f32 %v5532_v57, %v15530_v49  ;;  %v5541_v12 = vmul.f32 0.5, %v4901_v26  ;;  %v4902_v41 = vadd.f32 1.0, %v9581_v27  ;;  %18036 = vst [vmem:[#allocation19_spill] sm:$0xff] %v15630_v23 }
 0x54c   :  { %v9585_v61 = vpop.eup %9584  ;;  %v6835_v34 = vadd.f32 %v6834_v37, %v6170_v5  ;;  %v6179_v6 = vmul.f32 %v5539_v1, %v15539_v24  ;;  %v5540_v58 = vmul.f32 0.5, %v4900_v56  ;;  %v4909_v44 = vadd.f32 1.0, %v9583_v7 }
 0x54d   :  { %v9587_v21 = vpop.eup %9586  ;;  %v6909_v4 = vadd.f32 %v6908_v18, %v6172_v46  ;;  %v6181_v22 = vmul.f32 %v5541_v12, %v15547_v60  ;;  %v5542_v38 = vmul.f32 0.5, %v4902_v41  ;;  %v4911_v14 = vadd.f32 1.0, %v9585_v61 }
 0x54e   :  { %v9589_v49 = vpop.eup %9588  ;;  %v6799_v50 = vadd.f32 %v6798_v45, %v6179_v6  ;;  %v6180_v19 = vmul.f32 %v5540_v58, %v15551_v17  ;;  %v5549_v31 = vmul.f32 0.5, %v4909_v44  ;;  %v4910_v37 = vadd.f32 1.0, %v9587_v21  ;;  %v15641_v44 = vpop.f32.mrb[36].mxu1 }
 0x54f   :  { %v9591_v24 = vpop.eup %9590  ;;  %v6873_v30 = vadd.f32 %v6872_v35, %v6181_v22  ;;  %v6182_v8 = vmul.f32 %v5542_v38, %v15556_v42  ;;  %v5551_v57 = vmul.f32 0.5, %v4911_v14  ;;  %v4912_v18 = vadd.f32 1.0, %v9589_v49  ;;  %18038 = vst [vmem:[#allocation58_spill] sm:$0xff] %v15641_v44  ;;  %v18039_v38 = vld [vmem:[#allocation93_spill] sm:$0xff]  ;;  %v15648_v14 = vpop.f32.mrb[37].mxu1 }
 0x550   :  { %v9593_v26 = vpop.eup %9592  ;;  %v6836_v60 = vadd.f32 %v6835_v34, %v6180_v19  ;;  %v6189_v27 = vmul.f32 %v5549_v31, %v15560_v39  ;;  %v5550_v5 = vmul.f32 0.5, %v4910_v37  ;;  %v4919_v1 = vadd.f32 1.0, %v9591_v24  ;;  %v18037_v34 = vld [vmem:[#allocation73_spill] sm:$0xff]  ;;  %18040 = vst [vmem:[#allocation59_spill] sm:$0xff] %v15648_v14  ;;  %v15652_v31 = vpop.f32.mrb[38].mxu1 }
 0x551   :  { %v9595_v56 = vpop.eup %9594  ;;  %v6910_v45 = vadd.f32 %v6909_v4, %v6182_v8  ;;  %v6191_v17 = vmul.f32 %v5551_v57, %v15566_v59  ;;  %v5552_v7 = vmul.f32 0.5, %v4912_v18  ;;  %v4921_v46 = vadd.f32 1.0, %v9593_v26  ;;  %18041 = vst [vmem:[#allocation60_spill] sm:$0xff] %v15652_v31  ;;  %v15662_v57 = vpop.f32.mrb[39].mxu1  ;;  %v18044_v26 = vld [vmem:[#allocation31_spill] sm:$0xff] }
 0x552   :  { %v6800_v12 = vadd.f32 %v6799_v50, %v6189_v27  ;;  %v6190_v41 = vmul.f32 %v5550_v5, %v15572_v16  ;;  %v5559_v35 = vmul.f32 0.5, %v4919_v1  ;;  %v4920_v61 = vadd.f32 1.0, %v9595_v56  ;;  %18043 = vst [vmem:[#allocation84_spill] sm:$0xff] %v15662_v57  ;;  %v18045_v5 = vld [vmem:[#allocation74_spill] sm:$0xff] }
 0x553   :  { %v6874_v42 = vadd.f32 %v6873_v30, %v6191_v17  ;;  %v6192_v6 = vmul.f32 %v5552_v7, %v15577_v29  ;;  %v5561_v58 = vmul.f32 0.5, %v4921_v46  ;;  %v15639_v39 = vadd.f32 %v18037_v34, %v17650_v32  ;;  %v18042_v30 = vld [vmem:[#allocation94_spill] sm:$0xff]  ;;  %v18046_v17 = vld [vmem:[#allocation80_spill] sm:$0xff]  ;;  %v18047_v46 = vld [vmem:[#allocation81_spill] sm:$0xff] }
 0x554   :  { %v9597_v21 = vpop.eup %9596  ;;  %v6837_v4 = vadd.f32 %v6836_v60, %v6190_v41  ;;  %v6199_v59 = vmul.f32 %v5559_v35, %v15581_v53  ;;  %v5560_v22 = vmul.f32 0.5, %v4920_v61  ;;  %v15646_v16 = vadd.f32 %v18039_v38, %v17652_v33  ;;  %v18048_v35 = vld [vmem:[#allocation12_spill] sm:$0xff] }
 0x555   :  { %v6911_v49 = vadd.f32 %v6910_v45, %v6192_v6  ;;  %v6201_v29 = vmul.f32 %v5561_v58, %v15588_v47  ;;  %v4922_v50 = vadd.f32 1.0, %v9597_v21  ;;  %v3649_v19 = vmul.f32 0.5, %v15639_v39  ;;  %v15696_v6 = vpop.f32.mrb[40].mxu1 }
 0x556   :  { %v15654_v37 = vadd.f32 %v6800_v12, %v6199_v59  ;;  %v6200_v24 = vmul.f32 %v5560_v22, %v15599_v10  ;;  %v3651_v53 = vmul.f32 0.5, %v15646_v16  ;;  %v15660_v8 = vadd.f32 %v18042_v30, %v17654_v28  ;;  %18050 = vst [vmem:[#allocation85_spill] sm:$0xff] %v15696_v6  ;;  %v18051_v22 = vld [vmem:[#allocation96_spill] sm:$0xff] }
 0x557   :  { %v15664_v18 = vadd.f32 %v6874_v42, %v6201_v29  ;;  %v5562_v47 = vmul.f32 0.5, %v4922_v50  ;;  %9598 = vtanh.f32 %v3649_v19  ;;  %v15668_v60 = vadd.f32 %v18044_v26, %v17656_v54  ;;  %v18049_v42 = vld [vmem:[#allocation95_spill] sm:$0xff]  ;;  %v15708_v29 = vpop.f32.mrb[41].mxu1  ;;  %v18056_v26 = vld [vmem:[#allocation30_spill] sm:$0xff] }
 0x558   :  { %v15670_v27 = vadd.f32 %v6837_v4, %v6200_v24  ;;  %9600 = vtanh.f32 %v3651_v53  ;;  %v3650_v10 = vmul.f32 0.5, %v15660_v8  ;;  %v15675_v1 = vadd.f32 %v18045_v5, %v17650_v32  ;;  %18052 = vst [vmem:[#allocation86_spill] sm:$0xff] %v15708_v29  ;;  %v18054_v19 = vld [vmem:[#allocation75_spill] sm:$0xff]  ;;  %v15722_v30 = vpop.f32.mrb[42].mxu1  ;;  %v18057_v5 = vld [vmem:[#allocation76_spill] sm:$0xff]  ;;  %v18066_v29 = vld [vmem:[#allocation21_spill] sm:$0xff] }
 0x559   :  { %v6202_v56 = vmul.f32 %v5562_v47, %v15603_v20  ;;  %v3652_v45 = vmul.f32 0.5, %v15668_v60  ;;  %v15681_v7 = vadd.f32 %v18046_v17, %v17652_v33  ;;  %v15685_v12 = vadd.f32 %v18047_v46, %v17654_v28  ;;  %18055 = vst [vmem:[#allocation87_spill] sm:$0xff] %v15722_v30 }
 0x55a   :  { %9602 = vtanh.f32 %v3650_v10  ;;  %v3659_v41 = vmul.f32 0.5, %v15675_v1  ;;  %v15690_v61 = vadd.f32 %v18048_v35, %v17656_v54  ;;  %v15694_v20 = vadd.f32 %v18049_v42, %v17650_v32  ;;  %v18059_v42 = vld [vmem:[#allocation33_spill] sm:$0xff] }
 0x55b   :  { %v15698_v58 = vadd.f32 %v6911_v49, %v6202_v56  ;;  %9604 = vtanh.f32 %v3652_v45  ;;  %v3661_v34 = vmul.f32 0.5, %v15681_v7  ;;  %v3660_v21 = vmul.f32 0.5, %v15685_v12  ;;  %v18053_v49 = vld [vmem:[#allocation97_spill] sm:$0xff]  ;;  %v15733_v45 = vpop.f32.mrb[43].mxu1 }
 0x55c   :  { %9606 = vtanh.f32 %v3659_v41  ;;  %v3662_v4 = vmul.f32 0.5, %v15690_v61  ;;  %v3669_v59 = vmul.f32 0.5, %v15694_v20  ;;  %v15706_v38 = vadd.f32 %v18051_v22, %v17652_v33  ;;  %18058 = vst [vmem:[#allocation88_spill] sm:$0xff] %v15733_v45  ;;  %v18060_v22 = vld [vmem:[#allocation32_spill] sm:$0xff] }
 0x55d   :  { %9608 = vtanh.f32 %v3661_v34  ;;  %v15712_v50 = vadd.f32 %v18053_v49, %v17654_v28  ;;  %v15716_v24 = vadd.f32 %v18054_v19, %v17656_v54  ;;  %v15720_v53 = vadd.f32 %v15143_v25, %v17650_v32  ;;  %v18061_v49 = vld [vmem:[#allocation15_spill] sm:$0xff] }
 0x55e   :  { %9610 = vtanh.f32 %v3660_v21  ;;  %v3671_v47 = vmul.f32 0.5, %v15706_v38  ;;  %v15727_v10 = vadd.f32 %v18056_v26, %v17652_v33  ;;  %v15731_v56 = vadd.f32 %v18057_v5, %v17654_v28  ;;  %v15756_v26 = vpop.f32.mrb[44].mxu1 }
 0x55f   :  { %9612 = vtanh.f32 %v3662_v4  ;;  %v3670_v17 = vmul.f32 0.5, %v15712_v50  ;;  %v3672_v25 = vmul.f32 0.5, %v15716_v24  ;;  %v3679_v46 = vmul.f32 0.5, %v15720_v53  ;;  %18062 = vst [vmem:[#allocation20_spill] sm:$0xff] %v15756_v26 }
 0x560   :  { %9614 = vtanh.f32 %v3669_v59  ;;  %v3681_v41 = vmul.f32 0.5, %v15727_v10  ;;  %v3680_v35 = vmul.f32 0.5, %v15731_v56  ;;  %v15742_v34 = vadd.f32 %v18059_v42, %v17656_v54 }
 0x561   :  { %v9599_v21 = vpop.eup %9598  ;;  %9616 = vtanh.f32 %v3671_v47  ;;  %v15746_v4 = vadd.f32 %v18060_v22, %v17650_v32  ;;  %v15750_v19 = vadd.f32 %v18061_v49, %v17652_v33  ;;  %v15754_v59 = vadd.f32 %v15160_v13, %v17654_v28  ;;  %v15765_v49 = vpop.f32.mrb[45].mxu1 }
 0x562   :  { %v9601_v5 = vpop.eup %9600  ;;  %v4929_v45 = vadd.f32 1.0, %v9599_v21  ;;  %9618 = vtanh.f32 %v3670_v17  ;;  %v3682_v42 = vmul.f32 0.5, %v15742_v34  ;;  %v15761_v47 = vadd.f32 %v15171_v48, %v17656_v54  ;;  %18063 = vst [vmem:[#allocation89_spill] sm:$0xff] %v15765_v49  ;;  %v15777_v30 = vpop.f32.mrb[46].mxu1 }
 0x563   :  { %v4931_v32 = vadd.f32 1.0, %v9601_v5  ;;  %9620 = vtanh.f32 %v3672_v25  ;;  %v3689_v33 = vmul.f32 0.5, %v15746_v4  ;;  %v3691_v22 = vmul.f32 0.5, %v15750_v19  ;;  %v18064_v25 = vld [vmem:[#allocation18_spill] sm:$0xff]  ;;  %18065 = vst [vmem:[#allocation90_spill] sm:$0xff] %v15777_v30  ;;  %v15784_v57 = vpop.f32.mrb[47].mxu1 }
 0x564   :  { %v9603_v28 = vpop.eup %9602  ;;  %v5569_v13 = vmul.f32 0.5, %v4929_v45  ;;  %9622 = vtanh.f32 %v3679_v46  ;;  %v15768_v21 = vmul.f32 0.5, %v15754_v59  ;;  %v15771_v17 = vmul.f32 0.5, %v15761_v47  ;;  %18067 = vst [vmem:[#allocation23_spill] sm:$0xff] %v15784_v57 }
 0x565   :  { %v9605_v26 = vpop.eup %9604  ;;  %v5571_v54 = vmul.f32 0.5, %v4931_v32  ;;  %v4930_v48 = vadd.f32 1.0, %v9603_v28  ;;  %9624 = vtanh.f32 %v3681_v41  ;;  %v15775_v5 = vadd.f32 %v15221_v3, %v18064_v25 }
 0x566   :  { %v9607_v49 = vpop.eup %9606  ;;  %v6209_v45 = vmul.f32 %v5569_v13, %v15639_v39  ;;  %v4932_v46 = vadd.f32 1.0, %v9605_v26  ;;  %9626 = vtanh.f32 %v3680_v35  ;;  %v15782_v6 = vadd.f32 %v15232_v62, %v18066_v29 }
 0x567   :  { %v9609_v32 = vpop.eup %9608  ;;  %v6211_v41 = vmul.f32 %v5571_v54, %v15646_v16  ;;  %v5570_v28 = vmul.f32 0.5, %v4930_v48  ;;  %v4939_v31 = vadd.f32 1.0, %v9607_v49  ;;  %9628 = vtanh.f32 %v3682_v42  ;;  %v15791_v42 = vpop.f32.mrb[48].mxu1 }
 0x568   :  { %v9611_v3 = vpop.eup %9610  ;;  %v6802_v30 = vadd.f32 %v15654_v37, %v6209_v45  ;;  %v5572_v14 = vmul.f32 0.5, %v4932_v46  ;;  %v4941_v44 = vadd.f32 1.0, %v9609_v32  ;;  %9630 = vtanh.f32 %v3689_v33 }
 0x569   :  { %v9613_v39 = vpop.eup %9612  ;;  %v6876_v35 = vadd.f32 %v15664_v18, %v6211_v41  ;;  %v6210_v62 = vmul.f32 %v5570_v28, %v15660_v8  ;;  %v5579_v26 = vmul.f32 0.5, %v4939_v31  ;;  %v4940_v13 = vadd.f32 1.0, %v9611_v3 }
 0x56a   :  { %v9615_v57 = vpop.eup %9614  ;;  %v6212_v23 = vmul.f32 %v5572_v14, %v15668_v60  ;;  %v5581_v16 = vmul.f32 0.5, %v4941_v44  ;;  %v4942_v54 = vadd.f32 1.0, %v9613_v39  ;;  %9632 = vtanh.f32 %v3691_v22  ;;  %v15797_v14 = vpop.f32.mrb[49].mxu1 }
 0x56b   :  { %v9617_v49 = vpop.eup %9616  ;;  %v6839_v37 = vadd.f32 %v15670_v27, %v6210_v62  ;;  %v6219_v33 = vmul.f32 %v5579_v26, %v15675_v1  ;;  %v5580_v48 = vmul.f32 0.5, %v4940_v13  ;;  %v4949_v45 = vadd.f32 1.0, %v9615_v57  ;;  %v15800_v27 = vpop.f32.mrb[50].mxu1 }
 0x56c   :  { %v9619_v18 = vpop.eup %9618  ;;  %v6913_v8 = vadd.f32 %v15698_v58, %v6212_v23  ;;  %v6221_v31 = vmul.f32 %v5581_v16, %v15681_v7  ;;  %v5582_v46 = vmul.f32 0.5, %v4942_v54  ;;  %v4951_v32 = vadd.f32 1.0, %v9617_v49  ;;  %v15803_v58 = vpop.f32.mrb[51].mxu1 }
 0x56d   :  { %v9621_v44 = vpop.eup %9620  ;;  %v6803_v60 = vadd.f32 %v6802_v30, %v6219_v33  ;;  %v6220_v22 = vmul.f32 %v5580_v48, %v15685_v12  ;;  %v5589_v41 = vmul.f32 0.5, %v4949_v45  ;;  %v4950_v28 = vadd.f32 1.0, %v9619_v18 }
 0x56e   :  { %v9623_v1 = vpop.eup %9622  ;;  %v6877_v3 = vadd.f32 %v6876_v35, %v6221_v31  ;;  %v6222_v57 = vmul.f32 %v5582_v46, %v15690_v61  ;;  %v5591_v39 = vmul.f32 0.5, %v4951_v32  ;;  %v4952_v23 = vadd.f32 1.0, %v9621_v44  ;;  %v15808_v31 = vpop.f32.mrb[52].mxu1 }
 0x56f   :  { %v9625_v7 = vpop.eup %9624  ;;  %v6840_v62 = vadd.f32 %v6839_v37, %v6220_v22  ;;  %v6229_v26 = vmul.f32 %v5589_v41, %v15694_v20  ;;  %v5590_v13 = vmul.f32 0.5, %v4950_v28  ;;  %v4959_v30 = vadd.f32 1.0, %v9623_v1  ;;  %v15812_v28 = vpop.f32.mrb[53].mxu1 }
 0x570   :  { %v9627_v16 = vpop.eup %9626  ;;  %v6914_v12 = vadd.f32 %v6913_v8, %v6222_v57  ;;  %v6231_v54 = vmul.f32 %v5591_v39, %v15706_v38  ;;  %v5592_v49 = vmul.f32 0.5, %v4952_v23  ;;  %v4961_v33 = vadd.f32 1.0, %v9625_v7  ;;  %v15817_v7 = vpop.f32.mrb[54].mxu1 }
 0x571   :  { %v9629_v48 = vpop.eup %9628  ;;  %v6804_v35 = vadd.f32 %v6803_v60, %v6229_v26  ;;  %v6230_v61 = vmul.f32 %v5590_v13, %v15712_v50  ;;  %v5599_v45 = vmul.f32 0.5, %v4959_v30  ;;  %v4960_v18 = vadd.f32 1.0, %v9627_v16  ;;  %v15822_v13 = vpop.f32.mrb[55].mxu1 }
 0x572   :  { %v9631_v46 = vpop.eup %9630  ;;  %v6878_v37 = vadd.f32 %v6877_v3, %v6231_v54  ;;  %v6232_v20 = vmul.f32 %v5592_v49, %v15716_v24  ;;  %v5601_v32 = vmul.f32 0.5, %v4961_v33  ;;  %v4962_v44 = vadd.f32 1.0, %v9629_v48  ;;  %v15828_v16 = vpop.f32.mrb[56].mxu1  ;;  %v18068_v33 = vld [vmem:[#allocation14_spill] sm:$0xff] }
 0x573   :  { %v6841_v22 = vadd.f32 %v6840_v62, %v6230_v61  ;;  %v6239_v8 = vmul.f32 %v5599_v45, %v15720_v53  ;;  %v5600_v38 = vmul.f32 0.5, %v4960_v18  ;;  %v4969_v41 = vadd.f32 1.0, %v9631_v46  ;;  %v15840_v54 = vpop.f32.mrb[57].mxu1 }
 0x574   :  { %v9633_v60 = vpop.eup %9632  ;;  %v6915_v1 = vadd.f32 %v6914_v12, %v6232_v20  ;;  %v6241_v50 = vmul.f32 %v5601_v32, %v15727_v10  ;;  %v5602_v57 = vmul.f32 0.5, %v4962_v44  ;;  %9634 = vtanh.f32 %v15768_v21  ;;  %v15857_v46 = vpop.f32.mrb[58].mxu1  ;;  %v18071_v32 = vld [vmem:[#allocation78_spill] sm:$0xff] }
 0x575   :  { %v6805_v39 = vadd.f32 %v6804_v35, %v6239_v8  ;;  %v6240_v3 = vmul.f32 %v5600_v38, %v15731_v56  ;;  %v5609_v24 = vmul.f32 0.5, %v4969_v41  ;;  %v4971_v23 = vadd.f32 1.0, %v9633_v60  ;;  %v18072_v41 = vld [vmem:[#allocation17_spill] sm:$0xff]  ;;  %v18073_v60 = vld [vmem:[#allocation79_spill] sm:$0xff] }
 0x576   :  { %v6879_v62 = vadd.f32 %v6878_v37, %v6241_v50  ;;  %v6242_v53 = vmul.f32 %v5602_v57, %v15742_v34  ;;  %9636 = vtanh.f32 %v15771_v17  ;;  %v3063_v26 = vmul.f32 0.5, %v15775_v5  ;;  %v15871_v50 = vpop.f32.mrb[59].mxu1 }
 0x577   :  { %v15824_v10 = vadd.f32 %v6841_v22, %v6240_v3  ;;  %v6249_v21 = vmul.f32 %v5609_v24, %v15746_v4  ;;  %v5611_v30 = vmul.f32 0.5, %v4971_v23  ;;  %v3064_v56 = vmul.f32 0.5, %v15782_v6  ;;  %v7978_v22 = vld [vmem:[%s17110_s6] ss:$0 sm:$0xff]  ;;  %v15874_v24 = vpop.f32.mrb[60].mxu1 }
 0x578   :  { %v15830_v12 = vadd.f32 %v6915_v1, %v6242_v53  ;;  %9638 = vtanh.f32 %v3063_v26  ;;  %v15834_v34 = vadd.f32 %v15243_v2, %v18064_v25  ;;  %v15838_v17 = vadd.f32 %v15251_v55, %v18066_v29  ;;  %v18069_v2 = vld [vmem:[#allocation98_spill] sm:$0xff]  ;;  %v18070_v55 = vld [vmem:[#allocation77_spill] sm:$0xff]  ;;  %18074 = vst [vmem:[#allocation91_spill] sm:$0xff] %v15874_v24 }
 0x579   :  { %v6806_v49 = vadd.f32 %v6805_v39, %v6249_v21  ;;  %v6251_v4 = vmul.f32 %v5611_v30, %v15750_v19  ;;  %9640 = vtanh.f32 %v3064_v56  ;;  %v15845_v48 = vadd.f32 %v18068_v33, %v18064_v25  ;;  %v15886_v21 = vpop.f32.mrb[61].mxu1 }
 0x57a   :  { %v3073_v35 = vmul.f32 0.5, %v15834_v34  ;;  %v3074_v61 = vmul.f32 0.5, %v15838_v17  ;;  %v15851_v45 = vadd.f32 %v18069_v2, %v18066_v29  ;;  %v15855_v18 = vadd.f32 %v18070_v55, %v18064_v25  ;;  %18075 = vst [vmem:[#allocation22_spill] sm:$0xff] %v15886_v21 }
 0x57b   :  { %v6807_v19 = vrot.slane %v6806_v49, 4  ;;  %v6880_v37 = vadd.f32 %v6879_v62, %v6251_v4  ;;  %v3083_v20 = vmul.f32 0.5, %v15845_v48  ;;  %v15862_v44 = vadd.f32 %v18071_v32, %v18066_v29  ;;  %v15888_v4 = vpop.f32.mrb[62].mxu1 }
 0x57c   :  { %9642 = vtanh.f32 %v3073_v35  ;;  %v3084_v8 = vmul.f32 0.5, %v15851_v45  ;;  %v3093_v38 = vmul.f32 0.5, %v15855_v18  ;;  %v8048_v1 = vadd.f32 %v18073_v60, %v18072_v41  ;;  %18076 = vst [vmem:[#allocation25_spill] sm:$0xff] %v15888_v4 }
 0x57d   :  { %v6808_v57 = vadd.f32 %v6807_v19, %v6806_v49  ;;  %v6881_v39 = vrot.slane %v6880_v37, 4  ;;  %9644 = vtanh.f32 %v3074_v61  ;;  %v3094_v3 = vmul.f32 0.5, %v15862_v44 }
 0x57e   :  { %v9635_v23 = vpop.eup %9634  ;;  %9646 = vtanh.f32 %v3083_v20  ;;  %v15876_v62 = vadd.f32 %v8048_v1, %v7978_v22  ;;  %v15880_v53 = vadd.f32 %v15308_v43, %v18064_v25  ;;  %v15884_v26 = vadd.f32 %v15312_v0, %v18066_v29  ;;  %v18077_v43 = vld [vmem:[#allocation35_spill] sm:$0xff]  ;;  %v18078_v22 = vld [vmem:[#allocation82_spill] sm:$0xff] }
 0x57f   :  { %v6809_v30 = vrot.slane %v6808_v57, 2  ;;  %v6882_v56 = vadd.f32 %v6881_v39, %v6880_v37  ;;  %v4970_v49 = vadd.f32 1.0, %v9635_v23  ;;  %9648 = vtanh.f32 %v3084_v8 }
 0x580   :  { %v9637_v33 = vpop.eup %9636  ;;  %9650 = vtanh.f32 %v3093_v38  ;;  %v3103_v35 = vmul.f32 0.5, %v15880_v53  ;;  %v3104_v61 = vmul.f32 0.5, %v15884_v26  ;;  %v15894_v2 = vadd.f32 %v18077_v43, %v18064_v25  ;;  %v18079_v38 = vld [vmem:[#allocation51_spill] sm:$0xff] }
 0x581   :  { %v6810_v0 = vadd.f32 %v6809_v30, %v6808_v57  ;;  %v6883_v55 = vrot.slane %v6882_v56, 2  ;;  %v5610_v19 = vmul.f32 0.5, %v4970_v49  ;;  %v4972_v20 = vadd.f32 1.0, %v9637_v33 }
 0x582   :  { %v9639_v32 = vpop.eup %9638  ;;  %9652 = vtanh.f32 %v3094_v3  ;;  %v3113_v37 = vmul.f32 0.5, %v15894_v2  ;;  %v15899_v8 = vadd.f32 %v18078_v22, %v18066_v29  ;;  %v15903_v41 = vadd.f32 %v18079_v38, %v18064_v25 }
 0x583   :  { %v9641_v60 = vpop.eup %9640  ;;  %v6811_v1 = vrot.slane %v6810_v0, 1  ;;  %v6884_v39 = vadd.f32 %v6883_v55, %v6882_v56  ;;  %v6250_v57 = vmul.f32 %v5610_v19, %v15754_v59  ;;  %v5612_v23 = vmul.f32 0.5, %v4972_v20  ;;  %v15912_v59 = vpop.f32.mrb[63].mxu1 }
 0x584   :  { %v4343_v30 = vadd.f32 1.0, %v9639_v32  ;;  %v4344_v49 = vadd.f32 1.0, %v9641_v60  ;;  %9654 = vtanh.f32 %v3103_v35  ;;  %v3114_v3 = vmul.f32 0.5, %v15899_v8  ;;  %18080 = vst [vmem:[#allocation7_spill] sm:$0xff] %v15912_v59 }
 0x585   :  { %v15907_v33 = vadd.f32 %v6811_v1, %v6810_v0  ;;  %v6885_v43 = vrot.slane %v6884_v39, 1  ;;  %v6843_v22 = vadd.f32 %v15824_v10, %v6250_v57  ;;  %v6252_v4 = vmul.f32 %v5612_v23, %v15761_v47 }
 0x586   :  { %v9643_v38 = vpop.eup %9642  ;;  %v4983_v21 = vmul.f32 0.5, %v4343_v30  ;;  %v4984_v24 = vmul.f32 0.5, %v4344_v49  ;;  %9656 = vtanh.f32 %v3104_v61  ;;  %v3123_v56 = vmul.f32 0.5, %v15903_v41 }
 0x587   :  { %v9645_v55 = vpop.eup %9644  ;;  %v15914_v19 = vadd.f32 %v6885_v43, %v6884_v39  ;;  %v6844_v35 = vrot.slane %v6843_v22, 4  ;;  %v6917_v0 = vadd.f32 %v15830_v12, %v6252_v4  ;;  %v4353_v20 = vadd.f32 1.0, %v9643_v38  ;;  %v18081_v43 = vld [vmem:[#allocation83_spill] sm:$0xff] }
 0x588   :  { %v9647_v32 = vpop.eup %9646  ;;  %v5623_v10 = vmul.f32 %v4983_v21, %v15775_v5  ;;  %v5624_v47 = vmul.f32 %v4984_v24, %v15782_v6  ;;  %v4354_v60 = vadd.f32 1.0, %v9645_v55  ;;  %9658 = vtanh.f32 %v3113_v37  ;;  %v15924_v24 = vpop.f32.mrb[64].mxu1 }
 0x589   :  { %v9649_v1 = vpop.eup %9648  ;;  %v6845_v61 = vadd.f32 %v6844_v35, %v6843_v22  ;;  %v6918_v57 = vrot.slane %v6917_v0, 4  ;;  %v4993_v23 = vmul.f32 0.5, %v4353_v20  ;;  %v4363_v30 = vadd.f32 1.0, %v9647_v32  ;;  %v15927_v35 = vpop.f32.mrb[65].mxu1 }
 0x58a   :  { %v9651_v49 = vpop.eup %9650  ;;  %v4994_v59 = vmul.f32 0.5, %v4354_v60  ;;  %v4364_v39 = vadd.f32 1.0, %v9649_v1  ;;  %9660 = vtanh.f32 %v3114_v3  ;;  %v15921_v12 = vadd.f32 %v18081_v43, %v18066_v29  ;;  %v15930_v1 = vpop.f32.mrb[66].mxu1 }
 0x58b   :  { %v6846_v4 = vrot.slane %v6845_v61, 2  ;;  %v6919_v38 = vadd.f32 %v6918_v57, %v6917_v0  ;;  %v5633_v5 = vmul.f32 %v4993_v23, %v15834_v34  ;;  %v5003_v6 = vmul.f32 0.5, %v4363_v30  ;;  %v15933_v43 = vpop.f32.mrb[67].mxu1 }
 0x58c   :  { %v9653_v21 = vpop.eup %9652  ;;  %v5634_v37 = vmul.f32 %v4994_v59, %v15838_v17  ;;  %v5004_v22 = vmul.f32 0.5, %v4364_v39  ;;  %v4373_v55 = vadd.f32 1.0, %v9651_v49  ;;  %9662 = vtanh.f32 %v3123_v56 }
 0x58d   :  { %v6847_v3 = vadd.f32 %v6846_v4, %v6845_v61  ;;  %v6920_v20 = vrot.slane %v6919_v38, 2  ;;  %v6554_v32 = vadd.f32 %v5633_v5, %v5623_v10  ;;  %v5643_v60 = vmul.f32 %v5003_v6, %v15845_v48  ;;  %v7224_v10 = vld [vmem:[%s17109_s5 + $0x280] sm:$0xff]  ;;  %v7225_v48 = vld [vmem:[%s17109_s5 + $0x288] sm:$0xff] }
 0x58e   :  { %v9655_v0 = vpop.eup %9654  ;;  %v6591_v34 = vadd.f32 %v5634_v37, %v5624_v47  ;;  %v5644_v57 = vmul.f32 %v5004_v22, %v15851_v45  ;;  %v5013_v23 = vmul.f32 0.5, %v4373_v55  ;;  %v4374_v30 = vadd.f32 1.0, %v9653_v21  ;;  %v7208_v37 = vld [vmem:[%s17109_s5 + $0x200] sm:$0xff]  ;;  %v7209_v22 = vld [vmem:[%s17109_s5 + $0x208] sm:$0xff] }
 0x58f   :  { %v6848_v17 = vrot.slane %v6847_v3, 1  ;;  %v6921_v59 = vadd.f32 %v6920_v20, %v6919_v38  ;;  %v6555_v56 = vadd.f32 %v6554_v32, %v5643_v60  ;;  %v4383_v49 = vadd.f32 1.0, %v9655_v0 }
 0x590   :  { %v9657_v61 = vpop.eup %9656  ;;  %v6592_v47 = vadd.f32 %v6591_v34, %v5644_v57  ;;  %v5653_v45 = vmul.f32 %v5013_v23, %v15855_v18  ;;  %v5014_v39 = vmul.f32 0.5, %v4374_v30  ;;  %v3124_v4 = vmul.f32 0.5, %v15921_v12  ;;  %v15952_v57 = vpop.f32.mrb[68].mxu1 }
 0x591   :  { %v6849_v5 = vadd.f32 %v6848_v17, %v6847_v3  ;;  %v6922_v6 = vrot.slane %v6921_v59, 1  ;;  %v5023_v38 = vmul.f32 0.5, %v4383_v49  ;;  %v4384_v21 = vadd.f32 1.0, %v9657_v61  ;;  %v18082_v49 = vld [vmem:[#allocation34_spill] sm:$0xff] }
 0x592   :  { %v9659_v55 = vpop.eup %9658  ;;  %v6556_v20 = vadd.f32 %v6555_v56, %v5653_v45  ;;  %v5654_v32 = vmul.f32 %v5014_v39, %v15862_v44  ;;  %9664 = vtanh.f32 %v3124_v4  ;;  %v8321_v18 = vpack.c.bf16 %v7225_v48, %v7224_v10  ;;  %v7226_v44 = vld [vmem:[%s17109_s5 + $0x290] sm:$0xff] }
 0x593   :  { %v7077_v60 = vcombine.low %v15907_v33, %v6849_v5  ;;  %v6923_v3 = vadd.f32 %v6922_v6, %v6921_v59  ;;  %v5663_v0 = vmul.f32 %v5023_v38, %v15880_v53  ;;  %v5024_v34 = vmul.f32 0.5, %v4384_v21  ;;  %v7227_v53 = vld [vmem:[%s17109_s5 + $0x298] sm:$0xff]  ;;  %v15964_v33 = vpop.f32.mrb[69].mxu1  ;;  %v18084_v21 = vld [vmem:[#allocation37_spill] sm:$0xff] }
 0x594   :  { %v9661_v23 = vpop.eup %9660  ;;  %v6593_v30 = vadd.f32 %v6592_v47, %v5654_v32  ;;  %v4393_v17 = vadd.f32 1.0, %v9659_v55  ;;  %8322 = vmatprep.subr.bf16.mxu0 %v8321_v18  ;;  %v15956_v61 = vadd.f32 %v18082_v49, %v18064_v25  ;;  %v8323_v56 = vpack.c.bf16 %v7209_v22, %v7208_v37  ;;  %v18083_v59 = vld [vmem:[#allocation71_spill] sm:$0xff]  ;;  %v15969_v39 = vpop.f32.mrb[70].mxu1  ;;  %v7210_v22 = vld [vmem:[%s17109_s5 + $0x210] sm:$0xff] }
 0x595   :  { %v7085_v10 = vrot.slane %v7077_v60, %v18083_v59  ;;  %v7078_v48 = vcombine.low %v15914_v19, %v6923_v3  ;;  %v6557_v47 = vadd.f32 %v6556_v20, %v5663_v0  ;;  %v5664_v45 = vmul.f32 %v5024_v34, %v15884_v26  ;;  %v7211_v26 = vld [vmem:[%s17109_s5 + $0x218] sm:$0xff]  ;;  %v15982_v19 = vpop.f32.mrb[71].mxu1 }
 0x596   :  { %v9663_v4 = vpop.eup %9662  ;;  %v5033_v5 = vmul.f32 0.5, %v4393_v17  ;;  %v4394_v6 = vadd.f32 1.0, %v9661_v23  ;;  %v3133_v38 = vmul.f32 0.5, %v15956_v61  ;;  %8324 = vmatpush3.bf16.msra.mxu0 %v8323_v56  ;;  %v15974_v37 = vadd.f32 %v18084_v21, %v18066_v29  ;;  %v15985_v60 = vpop.f32.mrb[72].mxu1  ;;  %v7228_v23 = vld [vmem:[%s17109_s5 + $0x2a0] sm:$0xff]  ;;  %v7229_v17 = vld [vmem:[%s17109_s5 + $0x2a8] sm:$0xff] }
 0x597   :  { %v7092_v55 = vrot.slane %v7078_v48, %v18083_v59  ;;  %v6594_v20 = vadd.f32 %v6593_v30, %v5664_v45  ;;  %v4403_v32 = vadd.f32 1.0, %v9663_v4  ;;  %v8325_v18 = vpack.c.bf16 %v7227_v53, %v7226_v44  ;;  %v15995_v49 = vpop.f32.mrb[73].mxu1  ;;  %v7212_v48 = vld [vmem:[%s17109_s5 + $0x220] sm:$0xff]  ;;  %v7213_v45 = vld [vmem:[%s17109_s5 + $0x228] sm:$0xff] }
 0x598   :  { %v5673_v3 = vmul.f32 %v5033_v5, %v15894_v2  ;;  %v5034_v0 = vmul.f32 0.5, %v4394_v6  ;;  %9666 = vtanh.f32 %v3133_v38  ;;  %v3134_v34 = vmul.f32 0.5, %v15974_v37  ;;  %18085 = vst [vmem:[#allocation61_spill] sm:$0xff] %v15995_v49  ;;  %v18086_v2 = vld [vmem:[#allocation36_spill] sm:$0xff]  ;;  %v16007_v4 = vpop.f32.mrb[74].mxu1 }
 0x599   :  { %v7093_v30 = vcombine.low %v7085_v10, %v7092_v55  ;;  %v5043_v56 = vmul.f32 0.5, %v4403_v32  ;;  %8326 = vmatprep.subr.bf16.mxu0 %v8325_v18  ;;  %v8327_v44 = vpack.c.bf16 %v7211_v26, %v7210_v22  ;;  %v15999_v53 = vadd.f32 %v18086_v2, %v18064_v25  ;;  %18087 = vst [vmem:[#allocation62_spill] sm:$0xff] %v16007_v4  ;;  %v18088_v6 = vld [vmem:[#allocation52_spill] sm:$0xff]  ;;  %v16014_v21 = vpop.f32.mrb[75].mxu1 }
 0x59a   :  { %v6558_v5 = vadd.f32 %v6557_v47, %v5673_v3  ;;  %v5674_v10 = vmul.f32 %v5034_v0, %v15899_v8  ;;  %9668 = vtanh.f32 %v3134_v34  ;;  %v16012_v38 = vadd.f32 %v18088_v6, %v18066_v29  ;;  %18089 = vst [vmem:[#allocation6_spill] sm:$0xff] %v16014_v21  ;;  %v7230_v47 = vld [vmem:[%s17109_s5 + $0x2b0] sm:$0xff]  ;;  %v16021_v18 = vpop.f32.mrb[76].mxu1  ;;  %v18091_v34 = vld [vmem:[#allocation39_spill] sm:$0xff]  ;;  %v18096_v21 = vld [vmem:[#allocation40_spill] sm:$0xff] }
 0x59b   :  { %v7117_v22 = vrot.slane %v7093_v30, 7  ;;  %v5683_v26 = vmul.f32 %v5043_v56, %v15903_v41  ;;  %8328 = vmatpush3.bf16.msra.mxu0 %v8327_v44  ;;  %v3143_v55 = vmul.f32 0.5, %v15999_v53  ;;  %v8329_v32 = vpack.c.bf16 %v7229_v17, %v7228_v23  ;;  %18090 = vst [vmem:[#allocation38_spill] sm:$0xff] %v16021_v18  ;;  %v7231_v41 = vld [vmem:[%s17109_s5 + $0x2b8] sm:$0xff]  ;;  %v7214_v23 = vld [vmem:[%s17109_s5 + $0x230] sm:$0xff]  ;;  %v18093_v56 = vld [vmem:[#allocation92_spill] sm:$0xff] }
 0x59c   :  { %v9665_v8 = vpop.eup %9664  ;;  %v6595_v3 = vadd.f32 %v6594_v20, %v5674_v10  ;;  %v3144_v0 = vmul.f32 0.5, %v16012_v38  ;;  %v16026_v2 = vadd.f32 %v18091_v34, %v18064_v25  ;;  %v8331_v30 = vpack.c.bf16 %v7213_v45, %v7212_v48  ;;  %v7215_v17 = vld [vmem:[%s17109_s5 + $0x238] sm:$0xff]  ;;  %v18092_v20 = vld [vmem:[#allocation65_spill] sm:$0xff]  ;;  %v16043_v45 = vpop.f32.mrb[77].mxu1 }
 0x59d   :  { %v18094_v44 = vcombine.low %v18092_v20, %v18093_v56  ;;  %v16041_v6 = vadd.f32 %v6558_v5, %v5683_v26  ;;  %v4404_v48 = vadd.f32 1.0, %v9665_v8  ;;  %9670 = vtanh.f32 %v3143_v55  ;;  %8330 = vmatprep.subr.bf16.mxu0 %v8329_v32  ;;  %18095 = vst [vmem:[#allocation24_spill] sm:$0xff] %v16043_v45  ;;  %v7232_v20 = vld [vmem:[%s17109_s5 + $0x2c0] sm:$0xff]  ;;  %v7233_v5 = vld [vmem:[%s17109_s5 + $0x2c8] sm:$0xff]  ;;  %v16057_v26 = vpop.f32.mrb[78].mxu1 }
 0x59e   :  { %9672 = vtanh.f32 %v3144_v0  ;;  %v3153_v18 = vmul.f32 0.5, %v16026_v2  ;;  %v16049_v4 = vadd.f32 %v18096_v21, %v18066_v29  ;;  %18097 = vst [vmem:[#allocation70_spill] sm:$0xff] %v16057_v26  ;;  %v8333_v8 = vpack.c.bf16 %v7231_v41, %v7230_v47  ;;  %v7216_v21 = vld [vmem:[%s17109_s5 + $0x240] sm:$0xff]  ;;  %v7217_v56 = vld [vmem:[%s17109_s5 + $0x248] sm:$0xff] }
 0x59f   :  { %v7118_v10 = vsel %vm7107_vm1, %v7117_v22, %v18094_v44  ;;  %v5044_v32 = vmul.f32 0.5, %v4404_v48  ;;  %8332 = vmatpush3.bf16.msra.mxu0 %v8331_v30  ;;  %v8335_v0 = vpack.c.bf16 %v7215_v17, %v7214_v23  ;;  %v16066_v44 = vpop.f32.mrb[79].mxu1  ;;  %v16074_v47 = vadd.f32 %v15484_v36, %v18064_v25 }
 0x5a0   :  { %v7119_v34 = vsel %vm7109_vm2, %v7117_v22, %v7118_v10  ;;  %18098 = vst [vmem:[#allocation9_spill] sm:$0xff] %v16066_v44  ;;  %9674 = vtanh.f32 %v3153_v18  ;;  %8334 = vmatprep.subr.bf16.mxu0 %v8333_v8  ;;  %v16079_v41 = vadd.f32 %v15487_v11, %v18066_v29  ;;  %v8337_v23 = vpack.c.bf16 %v7233_v5, %v7232_v20  ;;  %v7235_v18 = vld [vmem:[%s17109_s5 + $0x2d8] sm:$0xff] }
 0x5a1   :  { %v7120_v55 = vsel %vm7111_vm3, %v7117_v22, %v7119_v34  ;;  %v3154_v34 = vmul.f32 0.5, %v16049_v4  ;;  %v5684_v30 = vmul.f32 %v5044_v32, %v15921_v12  ;;  %v3163_v36 = vmul.f32 0.5, %v16074_v47  ;;  %v7218_v32 = vld [vmem:[%s17109_s5 + $0x250] sm:$0xff]  ;;  %v7219_v8 = vld [vmem:[%s17109_s5 + $0x258] sm:$0xff] }
 0x5a2   :  { %v16069_v10 = vsel %vm7113_vm4, %v7117_v22, %v7120_v55  ;;  %v7234_v22 = vld [vmem:[%s17109_s5 + $0x2d0] sm:$0xff]  ;;  %v9667_v17 = vpop.eup %9666  ;;  %v16090_v12 = vadd.f32 %v15490_v63, %v18064_v25  ;;  %v8339_v48 = vpack.c.bf16 %v7217_v56, %v7216_v21  ;;  %v3164_v20 = vmul.f32 0.5, %v16079_v41 }
 0x5a3   :  { %9676 = vtanh.f32 %v3154_v34  ;;  %v6596_v11 = vadd.f32 %v6595_v3, %v5684_v30  ;;  %v4413_v55 = vadd.f32 1.0, %v9667_v17  ;;  %8336 = vmatpush3.bf16.msra.mxu0 %v8335_v0  ;;  %v16095_v5 = vadd.f32 %v15493_v40, %v18066_v29  ;;  %v18099_v0 = vld [vmem:[#allocation41_spill] sm:$0xff]  ;;  %v7236_v17 = vld [vmem:[%s17109_s5 + $0x2e0] sm:$0xff] }
 0x5a4   :  { %v9669_v63 = vpop.eup %9668  ;;  %9678 = vtanh.f32 %v3163_v36  ;;  %8338 = vmatprep.subr.bf16.mxu0 %v8337_v23  ;;  %v3173_v3 = vmul.f32 0.5, %v16090_v12  ;;  %v8083_v21 = vadd.f32 %v18099_v0, %v15496_v15  ;;  %v8341_v56 = vpack.c.bf16 %v7235_v18, %v7234_v22  ;;  %v7237_v36 = vld [vmem:[%s17109_s5 + $0x2e8] sm:$0xff]  ;;  %v16113_v23 = vpop.f32.mrb[80].mxu1  ;;  %v18102_v22 = vld [vmem:[#allocation43_spill] sm:$0xff] }
 0x5a5   :  { %v5053_v34 = vmul.f32 0.5, %v4413_v55  ;;  %v4414_v40 = vadd.f32 1.0, %v9669_v63  ;;  %9680 = vtanh.f32 %v3164_v20  ;;  %v3174_v30 = vmul.f32 0.5, %v16095_v5  ;;  %18100 = vst [vmem:[#allocation49_spill] sm:$0xff] %v16113_v23  ;;  %v18103_v0 = vld [vmem:[#allocation44_spill] sm:$0xff] }
 0x5a6   :  { %9682 = vtanh.f32 %v3173_v3  ;;  %v16116_v44 = vadd.f32 %v8083_v21, %v15876_v62  ;;  %v8343_v15 = vpack.c.bf16 %v7219_v8, %v7218_v32  ;;  %v16120_v18 = vadd.f32 %v18102_v22, %v18064_v25  ;;  %v7220_v62 = vld [vmem:[%s17109_s5 + $0x260] sm:$0xff]  ;;  %v7221_v32 = vld [vmem:[%s17109_s5 + $0x268] sm:$0xff] }
 0x5a7   :  { %v9671_v55 = vpop.eup %9670  ;;  %v5693_v20 = vmul.f32 %v5053_v34, %v15956_v61  ;;  %v5054_v63 = vmul.f32 0.5, %v4414_v40  ;;  %8340 = vmatpush3.bf16.msra.mxu0 %v8339_v48  ;;  %9684 = vtanh.f32 %v3174_v30  ;;  %v16125_v26 = vadd.f32 %v18103_v0, %v18066_v29  ;;  %v18104_v48 = vld [vmem:[#allocation53_spill] sm:$0xff] }
 0x5a8   :  { %18101 = vst [vmem:[#allocation47_spill] sm:$0xff] %v16116_v44  ;;  %v9673_v8 = vpop.eup %9672  ;;  %v4423_v3 = vadd.f32 1.0, %v9671_v55  ;;  %8342 = vmatprep.subr.bf16.mxu0 %v8341_v56  ;;  %v3183_v61 = vmul.f32 0.5, %v16120_v18  ;;  %v8345_v21 = vpack.c.bf16 %v7237_v36, %v7236_v17  ;;  %v16136_v34 = vadd.f32 %v18104_v48, %v18064_v25  ;;  %v7238_v44 = vld [vmem:[%s17109_s5 + $0x2f0] sm:$0xff]  ;;  %v7239_v56 = vld [vmem:[%s17109_s5 + $0x2f8] sm:$0xff]  ;;  %v16147_v17 = vpop.f32.mrb[81].mxu1 }
 0x5a9   :  { %v6560_v40 = vadd.f32 %v16041_v6, %v5693_v20  ;;  %v5694_v30 = vmul.f32 %v5054_v63, %v15974_v37  ;;  %v4424_v22 = vadd.f32 1.0, %v9673_v8  ;;  %v3184_v0 = vmul.f32 0.5, %v16125_v26  ;;  %18105 = vst [vmem:[#allocation54_spill] sm:$0xff] %v16147_v17  ;;  %v7222_v37 = vld [vmem:[%s17109_s5 + $0x270] sm:$0xff]  ;;  %v7223_v63 = vld [vmem:[%s17109_s5 + $0x278] sm:$0xff]  ;;  %v16156_v17 = vpop.f32.mrb[82].mxu1 }
 0x5aa   :  { %v9675_v36 = vpop.eup %9674  ;;  %v5063_v55 = vmul.f32 0.5, %v4423_v3  ;;  %9686 = vtanh.f32 %v3183_v61  ;;  %v3193_v6 = vmul.f32 0.5, %v16136_v34  ;;  %v8347_v20 = vpack.c.bf16 %v7221_v32, %v7220_v62  ;;  %18106 = vst [vmem:[#allocation48_spill] sm:$0xff] %v16156_v17  ;;  %v18107_v62 = vld [vmem:[#allocation16_spill] sm:$0xff]  ;;  %v16163_v49 = vpop.f32.mrb[83].mxu1 }
 0x5ab   :  { %v6597_v8 = vadd.f32 %v6596_v11, %v5694_v30  ;;  %v5064_v48 = vmul.f32 0.5, %v4424_v22  ;;  %v4433_v23 = vadd.f32 1.0, %v9675_v36  ;;  %8344 = vmatpush3.bf16.msra.mxu0 %v8343_v15  ;;  %9688 = vtanh.f32 %v3184_v0 }
 0x5ac   :  { %v5703_v61 = vmul.f32 %v5063_v55, %v15999_v53  ;;  %8346 = vmatprep.subr.bf16.mxu0 %v8345_v21  ;;  %9690 = vtanh.f32 %v3193_v6  ;;  %v16161_v32 = vadd.f32 %v18107_v62, %v18066_v29  ;;  %v8349_v45 = vpack.c.bf16 %v7239_v56, %v7238_v44  ;;  %v18108_v53 = vld [vmem:[#allocation55_spill] sm:$0xff]  ;;  %v18109_v55 = vld [vmem:[#allocation56_spill] sm:$0xff] }
 0x5ad   :  { %v9677_v3 = vpop.eup %9676  ;;  %v5704_v11 = vmul.f32 %v5064_v48, %v16012_v38  ;;  %v5073_v30 = vmul.f32 0.5, %v4433_v23  ;;  %v8351_v15 = vpack.c.bf16 %v7223_v63, %v7222_v37  ;;  %v16169_v21 = vadd.f32 %v18108_v53, %v18064_v25  ;;  %v16176_v37 = vpop.f32.mrb[84].mxu1 }
 0x5ae   :  { %v4434_v22 = vadd.f32 1.0, %v9677_v3  ;;  %v9679_v0 = vpop.eup %9678  ;;  %v6561_v36 = vadd.f32 %v6560_v40, %v5703_v61  ;;  %v3194_v17 = vmul.f32 0.5, %v16161_v32  ;;  %v16173_v6 = vadd.f32 %v18109_v55, %v18066_v29  ;;  %18110 = vst [vmem:[#allocation42_spill] sm:$0xff] %v16176_v37  ;;  %v16180_v61 = vpop.f32.mrb[85].mxu1 }
 0x5af   :  { %v9681_v44 = vpop.eup %9680  ;;  %v6598_v56 = vadd.f32 %v6597_v8, %v5704_v11  ;;  %v5713_v62 = vmul.f32 %v5073_v30, %v16026_v2  ;;  %v4443_v23 = vadd.f32 1.0, %v9679_v0  ;;  %8348 = vmatpush3.bf16.msra.mxu0 %v8347_v20  ;;  %v3203_v48 = vmul.f32 0.5, %v16169_v21  ;;  %18111 = vst [vmem:[#allocation63_spill] sm:$0xff] %v16180_v61  ;;  %v7256_v20 = vld [vmem:[%s17109_s5 + $0x380] sm:$0xff] }
 0x5b0   :  { %v5074_v38 = vmul.f32 0.5, %v4434_v22  ;;  %v9683_v40 = vpop.eup %9682  ;;  %v4444_v63 = vadd.f32 1.0, %v9681_v44  ;;  %9692 = vtanh.f32 %v3194_v17  ;;  %8350 = vmatprep.subr.bf16.mxu0 %v8349_v45  ;;  %v3204_v3 = vmul.f32 0.5, %v16173_v6  ;;  %v7257_v45 = vld [vmem:[%s17109_s5 + $0x388] sm:$0xff]  ;;  %v16189_v17 = vpop.f32.mrb[86].mxu1 }
 0x5b1   :  { %v9685_v53 = vpop.eup %9684  ;;  %v6562_v55 = vadd.f32 %v6561_v36, %v5713_v62  ;;  %v5083_v2 = vmul.f32 0.5, %v4443_v23  ;;  %v4453_v11 = vadd.f32 1.0, %v9683_v40  ;;  %18112 = vst [vmem:[#allocation8_spill] sm:$0xff] %v16189_v17  ;;  %9694 = vtanh.f32 %v3203_v48  ;;  %v16193_v36 = vpop.f32.mrb[87].mxu1  ;;  %v7241_v23 = vld [vmem:[%s17109_s5 + $0x308] sm:$0xff] }
 0x5b2   :  { %v5714_v8 = vmul.f32 %v5074_v38, %v16049_v4  ;;  %v5084_v30 = vmul.f32 0.5, %v4444_v63  ;;  %v4454_v22 = vadd.f32 1.0, %v9685_v53  ;;  %v7338_v0 = vrot.slane %v16069_v10, %v18083_v59  ;;  %18113 = vst [vmem:[#allocation64_spill] sm:$0xff] %v16193_v36  ;;  %v7240_v38 = vld [vmem:[%s17109_s5 + $0x300] sm:$0xff]  ;;  %v16202_v40 = vpop.f32.mrb[88].mxu1  ;;  %v18115_v36 = vld [vmem:[#allocation46_spill] sm:$0xff] }
 0x5b3   :  { %v5723_v44 = vmul.f32 %v5083_v2, %v16074_v47  ;;  %v5093_v62 = vmul.f32 0.5, %v4453_v11  ;;  %8352 = vmatpush3.bf16.msra.mxu0 %v8351_v15  ;;  %9696 = vtanh.f32 %v3204_v3  ;;  %18114 = vst [vmem:[#allocation11_spill] sm:$0xff] %v16202_v40  ;;  %v16205_v47 = vpop.f32.mrb[89].mxu1  ;;  %v16210_v17 = vadd.f32 %v18115_v36, %v18064_v25 }
 0x5b4   :  { %v6599_v4 = vadd.f32 %v6598_v56, %v5714_v8  ;;  %v9687_v63 = vpop.eup %9686  ;;  %v5724_v48 = vmul.f32 %v5084_v30, %v16079_v41  ;;  %v5094_v53 = vmul.f32 0.5, %v4454_v22  ;;  %v7346_v56 = vcombine.high %v7338_v0, %v7338_v0  ;;  %v16212_v61 = vpop.f32.mrb[90].mxu1 }
 0x5b5   :  { %v8353_v8 = vpack.c.bf16 %v7257_v45, %v7256_v20  ;;  %v9689_v15 = vpop.eup %9688  ;;  %v6563_v3 = vadd.f32 %v6562_v55, %v5723_v44  ;;  %v5733_v2 = vmul.f32 %v5093_v62, %v16090_v12  ;;  %v4463_v11 = vadd.f32 1.0, %v9687_v63  ;;  %18116 = vst [vmem:[#allocation66_spill] sm:$0xff] %v16212_v61  ;;  %v7258_v55 = vld [vmem:[%s17109_s5 + $0x390] sm:$0xff]  ;;  %v7259_v12 = vld [vmem:[%s17109_s5 + $0x398] sm:$0xff]  ;;  %v16221_v45 = vpop.f32.mrb[91].mxu1 }
 0x5b6   :  { %v9691_v40 = vpop.eup %9690  ;;  %v6600_v37 = vadd.f32 %v6599_v4, %v5724_v48  ;;  %v5734_v41 = vmul.f32 %v5094_v53, %v16095_v5  ;;  %v4464_v30 = vadd.f32 1.0, %v9689_v15  ;;  %7570 = vmatprep.mubr.f32.mxu0 %v7346_v56  ;;  %v8355_v20 = vpack.c.bf16 %v7241_v23, %v7240_v38  ;;  %18117 = vst [vmem:[#allocation27_spill] sm:$0xff] %v16221_v45  ;;  %v7242_v5 = vld [vmem:[%s17109_s5 + $0x310] sm:$0xff]  ;;  %v7243_v62 = vld [vmem:[%s17109_s5 + $0x318] sm:$0xff]  ;;  %v16230_v38 = vpop.f32.mrb[92].mxu1 }
 0x5b7   :  { %8354 = vmatprep.subr.bf16.mxu0 %v8353_v8  ;;  %v6564_v22 = vadd.f32 %v6563_v3, %v5733_v2  ;;  %v5103_v36 = vmul.f32 0.5, %v4463_v11  ;;  %v4473_v44 = vadd.f32 1.0, %v9691_v40  ;;  %v3213_v4 = vmul.f32 0.5, %v16210_v17  ;;  %7571 = vmatmul.mubr.f32.vlgmr.msra.gmra.mrb[68].mxu0 %v7338_v0  ;;  %18118 = vst [vmem:[#allocation67_spill] sm:$0xff] %v16230_v38  ;;  %v18119_v48 = vld [vmem:[#allocation57_spill] sm:$0xff]  ;;  %v16238_v40 = vpop.f32.mrb[93].mxu1 }
 0x5b8   :  { %v6601_v23 = vadd.f32 %v6600_v37, %v5734_v41  ;;  %v5104_v63 = vmul.f32 0.5, %v4464_v30  ;;  %8356 = vmatpush3.bf16.msra.mxu0 %v8355_v20  ;;  %v16234_v53 = vadd.f32 %v18119_v48, %v18066_v29  ;;  %v7331_v0 = vcombine.high %v16069_v10, %v16069_v10  ;;  %18120 = vst [vmem:[#allocation26_spill] sm:$0xff] %v16238_v40  ;;  %v16241_v3 = vpop.f32.mrb[94].mxu1  ;;  %v7254_v40 = vld [vmem:[%s17109_s5 + $0x370] sm:$0xff] }
 0x5b9   :  { %v5743_v56 = vmul.f32 %v5103_v36, %v16120_v18  ;;  %v5113_v8 = vmul.f32 0.5, %v4473_v44  ;;  %9698 = vtanh.f32 %v3213_v4  ;;  %v8357_v15 = vpack.c.bf16 %v7259_v12, %v7258_v55  ;;  %18121 = vst [vmem:[#allocation29_spill] sm:$0xff] %v16241_v3  ;;  %v7260_v55 = vld [vmem:[%s17109_s5 + $0x3a0] sm:$0xff]  ;;  %v16259_v12 = vpop.f32.mrb[95].mxu1  ;;  %v7245_v4 = vld [vmem:[%s17109_s5 + $0x328] sm:$0xff] }
 0x5ba   :  { %v9693_v2 = vpop.eup %9692  ;;  %v5744_v37 = vmul.f32 %v5104_v63, %v16125_v26  ;;  %v3214_v11 = vmul.f32 0.5, %v16234_v53  ;;  %v16246_v41 = vrot.slane %v7331_v0, %v18083_v59  ;;  %v8359_v30 = vpack.c.bf16 %v7243_v62, %v7242_v5  ;;  %v7261_v26 = vld [vmem:[%s17109_s5 + $0x3a8] sm:$0xff]  ;;  %18122 = vst [vmem:[#allocation10_spill] sm:$0xff] %v16259_v12  ;;  %v7244_v44 = vld [vmem:[%s17109_s5 + $0x320] sm:$0xff]  ;;  %v16273_v5 = vpop.f32.mrb[96].mxu1 }
 0x5bb   :  { %v6565_v20 = vadd.f32 %v6564_v22, %v5743_v56  ;;  %v5753_v10 = vmul.f32 %v5113_v8, %v16136_v34  ;;  %v4474_v48 = vadd.f32 1.0, %v9693_v2  ;;  %8358 = vmatprep.subr.bf16.mxu0 %v8357_v15  ;;  %v16251_v18 = vadd.f32 %v15621_v51, %v18064_v25  ;;  %v9695_v36 = vpop.eup %9694  ;;  %18123 = vst [vmem:[#allocation68_spill] sm:$0xff] %v16273_v5  ;;  %v16279_v8 = vpop.f32.mrb[97].mxu1  ;;  %v7264_v59 = vld [vmem:[%s17109_s5 + $0x3c0] sm:$0xff]  ;;  %v18131_v5 = vld [vmem:[#allocation85_spill] sm:$0xff] }
 0x5bc   :  { %v6602_v22 = vadd.f32 %v6601_v23, %v5744_v37  ;;  %9700 = vtanh.f32 %v3214_v11  ;;  %v7347_v34 = vcombine.high %v16246_v41, %v16246_v41  ;;  %8360 = vmatpush3.bf16.msra.mxu0 %v8359_v30  ;;  %v16265_v51 = vadd.f32 %v15624_v52, %v18066_v29  ;;  %v7262_v52 = vld [vmem:[%s17109_s5 + $0x3b0] sm:$0xff]  ;;  %18124 = vst [vmem:[#allocation28_spill] sm:$0xff] %v16279_v8  ;;  %v7263_v30 = vld [vmem:[%s17109_s5 + $0x3b8] sm:$0xff]  ;;  %v7268_v8 = vld [vmem:[%s17109_s5 + $0x3e0] sm:$0xff] }
 0x5bd   :  { %v9697_v62 = vpop.eup %9696  ;;  %v6566_v23 = vadd.f32 %v6565_v20, %v5753_v10  ;;  %v5114_v63 = vmul.f32 0.5, %v4474_v48  ;;  %v4483_v0 = vadd.f32 1.0, %v9695_v36  ;;  %v3223_v56 = vmul.f32 0.5, %v16251_v18  ;;  %v7246_v20 = vld [vmem:[%s17109_s5 + $0x330] sm:$0xff]  ;;  %v7247_v10 = vld [vmem:[%s17109_s5 + $0x338] sm:$0xff]  ;;  %v7252_v3 = vld [vmem:[%s17109_s5 + $0x360] sm:$0xff] }
 0x5be   :  { %v4484_v15 = vadd.f32 1.0, %v9697_v62  ;;  %7640 = vmatprep.mubr.f32.mxu0 %v7347_v34  ;;  %v3224_v2 = vmul.f32 0.5, %v16265_v51  ;;  %v8361_v37 = vpack.c.bf16 %v7261_v26, %v7260_v55  ;;  %v16284_v11 = vadd.f32 %v15627_v9, %v18064_v25  ;;  %v18125_v34 = vld [vmem:[#allocation19_spill] sm:$0xff] }
 0x5bf   :  { %v5754_v48 = vmul.f32 %v5114_v63, %v16161_v32  ;;  %v5123_v36 = vmul.f32 0.5, %v4483_v0  ;;  %9702 = vtanh.f32 %v3223_v56  ;;  %v8363_v55 = vpack.c.bf16 %v7245_v4, %v7244_v44  ;;  %v7265_v32 = vld [vmem:[%s17109_s5 + $0x3c8] sm:$0xff] }
 0x5c0   :  { %v5124_v26 = vmul.f32 0.5, %v4484_v15  ;;  %9704 = vtanh.f32 %v3224_v2  ;;  %8362 = vmatprep.subr.bf16.mxu0 %v8361_v37  ;;  %v3233_v9 = vmul.f32 0.5, %v16284_v11  ;;  %v16299_v62 = vadd.f32 %v18125_v34, %v18066_v29  ;;  %v18126_v2 = vld [vmem:[#allocation58_spill] sm:$0xff]  ;;  %v7248_v34 = vld [vmem:[%s17109_s5 + $0x340] sm:$0xff] }
 0x5c1   :  { %v6603_v63 = vadd.f32 %v6602_v22, %v5754_v48  ;;  %v5763_v44 = vmul.f32 %v5123_v36, %v16169_v21  ;;  %8364 = vmatpush3.bf16.msra.mxu0 %v8363_v55  ;;  %v8365_v4 = vpack.c.bf16 %v7263_v30, %v7262_v52  ;;  %v8367_v0 = vpack.c.bf16 %v7247_v10, %v7246_v20  ;;  %v7249_v21 = vld [vmem:[%s17109_s5 + $0x348] sm:$0xff]  ;;  %v7266_v22 = vld [vmem:[%s17109_s5 + $0x3d0] sm:$0xff]  ;;  %v18127_v30 = vld [vmem:[#allocation59_spill] sm:$0xff] }
 0x5c2   :  { %v5764_v56 = vmul.f32 %v5124_v26, %v16173_v6  ;;  %9706 = vtanh.f32 %v3233_v9  ;;  %v3234_v15 = vmul.f32 0.5, %v16299_v62  ;;  %v16312_v37 = vadd.f32 %v18126_v2, %v18064_v25  ;;  %v18128_v48 = vld [vmem:[#allocation60_spill] sm:$0xff]  ;;  %v7267_v55 = vld [vmem:[%s17109_s5 + $0x3d8] sm:$0xff]  ;;  %v7250_v26 = vld [vmem:[%s17109_s5 + $0x350] sm:$0xff] }
 0x5c3   :  { %v9699_v6 = vpop.eup %9698  ;;  %v6567_v52 = vadd.f32 %v6566_v23, %v5763_v44  ;;  %8366 = vmatprep.subr.bf16.mxu0 %v8365_v4  ;;  %v16325_v20 = vadd.f32 %v18127_v30, %v18066_v29  ;;  %v8369_v10 = vpack.c.bf16 %v7265_v32, %v7264_v59  ;;  %v16329_v36 = vadd.f32 %v18128_v48, %v18064_v25  ;;  %v7251_v23 = vld [vmem:[%s17109_s5 + $0x358] sm:$0xff]  ;;  %v18129_v30 = vld [vmem:[#allocation84_spill] sm:$0xff] }
 0x5c4   :  { %v6604_v9 = vadd.f32 %v6603_v63, %v5764_v56  ;;  %v4493_v44 = vadd.f32 1.0, %v9699_v6  ;;  %9708 = vtanh.f32 %v3234_v15  ;;  %v3243_v59 = vmul.f32 0.5, %v16312_v37  ;;  %v7269_v63 = vld [vmem:[%s17109_s5 + $0x3e8] sm:$0xff]  ;;  %v16353_v56 = vpop.f32.mrb[98].mxu1 }
 0x5c5   :  { %8368 = vmatpush3.bf16.msra.mxu0 %v8367_v0  ;;  %v3244_v32 = vmul.f32 0.5, %v16325_v20  ;;  %v3253_v4 = vmul.f32 0.5, %v16329_v36  ;;  %v8371_v2 = vpack.c.bf16 %v7249_v21, %v7248_v34  ;;  %v16345_v48 = vadd.f32 %v18129_v30, %v18066_v29  ;;  %18130 = vst [vmem:[#allocation69_spill] sm:$0xff] %v16353_v56 }
 0x5c6   :  { %v9701_v0 = vpop.eup %9700  ;;  %v5133_v15 = vmul.f32 0.5, %v4493_v44  ;;  %9710 = vtanh.f32 %v3243_v59  ;;  %8370 = vmatprep.subr.bf16.mxu0 %v8369_v10  ;;  %v8373_v6 = vpack.c.bf16 %v7267_v55, %v7266_v22  ;;  %v8375_v34 = vpack.c.bf16 %v7251_v23, %v7250_v26  ;;  %v7253_v44 = vld [vmem:[%s17109_s5 + $0x368] sm:$0xff]  ;;  %v18132_v22 = vld [vmem:[#allocation86_spill] sm:$0xff] }
 0x5c7   :  { %v4494_v21 = vadd.f32 1.0, %v9701_v0  ;;  %9712 = vtanh.f32 %v3244_v32  ;;  %v3254_v30 = vmul.f32 0.5, %v16345_v48  ;;  %v16358_v12 = vadd.f32 %v18131_v5, %v18064_v25  ;;  %v18133_v32 = vld [vmem:[#allocation87_spill] sm:$0xff] }
 0x5c8   :  { %v5773_v10 = vmul.f32 %v5133_v15, %v16210_v17  ;;  %9714 = vtanh.f32 %v3253_v4  ;;  %v16369_v55 = vadd.f32 %v18132_v22, %v18066_v29  ;;  %v8377_v26 = vpack.c.bf16 %v7269_v63, %v7268_v8  ;;  %v7270_v17 = vld [vmem:[%s17109_s5 + $0x3f0] sm:$0xff]  ;;  %v7271_v4 = vld [vmem:[%s17109_s5 + $0x3f8] sm:$0xff]  ;;  %v16382_v15 = vpop.f32.mrb[99].mxu1 }
 0x5c9   :  { %v9703_v23 = vpop.eup %9702  ;;  %v5134_v59 = vmul.f32 0.5, %v4494_v21  ;;  %8372 = vmatpush3.bf16.msra.mxu0 %v8371_v2  ;;  %9716 = vtanh.f32 %v3254_v30  ;;  %v3263_v5 = vmul.f32 0.5, %v16358_v12  ;;  %v16374_v0 = vadd.f32 %v18133_v32, %v18064_v25  ;;  %18134 = vst [vmem:[#allocation50_spill] sm:$0xff] %v16382_v15  ;;  %v7255_v15 = vld [vmem:[%s17109_s5 + $0x378] sm:$0xff] }
 0x5ca   :  { %v9705_v8 = vpop.eup %9704  ;;  %v6568_v63 = vadd.f32 %v6567_v52, %v5773_v10  ;;  %v4503_v2 = vadd.f32 1.0, %v9703_v23  ;;  %8374 = vmatprep.subr.bf16.mxu0 %v8373_v6  ;;  %v3264_v21 = vmul.f32 0.5, %v16369_v55  ;;  %v8379_v30 = vpack.c.bf16 %v7253_v44, %v7252_v3  ;;  %v18135_v6 = vld [vmem:[#allocation88_spill] sm:$0xff] }
 0x5cb   :  { %v5774_v22 = vmul.f32 %v5134_v59, %v16234_v53  ;;  %v4504_v32 = vadd.f32 1.0, %v9705_v8  ;;  %9718 = vtanh.f32 %v3263_v5  ;;  %v3273_v56 = vmul.f32 0.5, %v16374_v0  ;;  %v16397_v5 = vpop.f32.mrb[100].mxu1 }
 0x5cc   :  { %v9707_v52 = vpop.eup %9706  ;;  %v5143_v10 = vmul.f32 0.5, %v4503_v2  ;;  %9720 = vtanh.f32 %v3264_v21  ;;  %v16395_v3 = vadd.f32 %v18135_v6, %v18066_v29  ;;  %v8381_v53 = vpack.c.bf16 %v7271_v4, %v7270_v17  ;;  %v18136_v21 = vld [vmem:[#allocation20_spill] sm:$0xff]  ;;  %v16405_v6 = vpop.f32.mrb[101].mxu1 }
 0x5cd   :  { %v6605_v44 = vadd.f32 %v6604_v9, %v5774_v22  ;;  %v5144_v23 = vmul.f32 0.5, %v4504_v32  ;;  %v4513_v59 = vadd.f32 1.0, %v9707_v52  ;;  %8376 = vmatpush3.bf16.msra.mxu0 %v8375_v34  ;;  %9722 = vtanh.f32 %v3273_v56  ;;  %v18137_v56 = vld [vmem:[#allocation89_spill] sm:$0xff]  ;;  %v16412_v22 = vpop.f32.mrb[102].mxu1 }
 0x5ce   :  { %v9709_v8 = vpop.eup %9708  ;;  %v5783_v38 = vmul.f32 %v5143_v10, %v16251_v18  ;;  %8378 = vmatprep.subr.bf16.mxu0 %v8377_v26  ;;  %v3274_v45 = vmul.f32 0.5, %v16395_v3  ;;  %v8383_v2 = vpack.c.bf16 %v7255_v15, %v7254_v40  ;;  %v16403_v61 = vadd.f32 %v18136_v21, %v18064_v25  ;;  %18138 = vst [vmem:[#allocation45_spill] sm:$0xff] %v16412_v22  ;;  %v18139_v15 = vld [vmem:[#allocation90_spill] sm:$0xff]  ;;  %v16419_v52 = vpop.f32.mrb[103].mxu1 }
 0x5cf   :  { %v5784_v9 = vmul.f32 %v5144_v23, %v16265_v51  ;;  %v5153_v17 = vmul.f32 0.5, %v4513_v59  ;;  %v4514_v34 = vadd.f32 1.0, %v9709_v8  ;;  %v16410_v4 = vadd.f32 %v18137_v56, %v18066_v29  ;;  %18140 = vst [vmem:[#allocation13_spill] sm:$0xff] %v16419_v52  ;;  %v16422_v21 = vpop.f32.mrb[104].mxu1 }
 0x5d0   :  { %v9711_v18 = vpop.eup %9710  ;;  %v6569_v26 = vadd.f32 %v6568_v63, %v5783_v38  ;;  %9724 = vtanh.f32 %v3274_v45  ;;  %v3283_v40 = vmul.f32 0.5, %v16403_v61  ;;  %v16417_v32 = vadd.f32 %v18139_v15, %v18064_v25  ;;  %18141 = vst [vmem:[#allocation72_spill] sm:$0xff] %v16422_v21  ;;  %v16426_v15 = vpop.f32.mrb[105].mxu1 }
 0x5d1   :  { %v9713_v51 = vpop.eup %9712  ;;  %v6606_v10 = vadd.f32 %v6605_v44, %v5784_v9  ;;  %v5793_v23 = vmul.f32 %v5153_v17, %v16284_v11  ;;  %v5154_v59 = vmul.f32 0.5, %v4514_v34  ;;  %v4523_v8 = vadd.f32 1.0, %v9711_v18  ;;  %8380 = vmatpush3.bf16.msra.mxu0 %v8379_v30  ;;  %18142 = vst [vmem:[#allocation73_spill] sm:$0xff] %v16426_v15  ;;  %v16429_v17 = vpop.f32.mrb[106].mxu1 }
 0x5d2   :  { %v9715_v56 = vpop.eup %9714  ;;  %v4524_v38 = vadd.f32 1.0, %v9713_v51  ;;  %8382 = vmatprep.subr.bf16.mxu0 %v8381_v53  ;;  %9726 = vtanh.f32 %v3283_v40  ;;  %v3284_v45 = vmul.f32 0.5, %v16410_v4  ;;  %v3293_v63 = vmul.f32 0.5, %v16417_v32  ;;  %v18143_v53 = vld [vmem:[#allocation23_spill] sm:$0xff]  ;;  %v16435_v40 = vpop.f32.mrb[107].mxu1 }
 0x5d3   :  { %v9717_v52 = vpop.eup %9716  ;;  %v6570_v22 = vadd.f32 %v6569_v26, %v5793_v23  ;;  %v5794_v44 = vmul.f32 %v5154_v59, %v16299_v62  ;;  %v5163_v11 = vmul.f32 0.5, %v4523_v8  ;;  %v4533_v9 = vadd.f32 1.0, %v9715_v56  ;;  %v16438_v62 = vpop.f32.mrb[108].mxu1 }
 0x5d4   :  { %v5164_v30 = vmul.f32 0.5, %v4524_v38  ;;  %v4534_v34 = vadd.f32 1.0, %v9717_v52  ;;  %9728 = vtanh.f32 %v3284_v45  ;;  %v16433_v18 = vadd.f32 %v18143_v53, %v18066_v29  ;;  %v16442_v38 = vpop.f32.mrb[109].mxu1 }
 0x5d5   :  { %v9719_v51 = vpop.eup %9718  ;;  %v6607_v21 = vadd.f32 %v6606_v10, %v5794_v44  ;;  %v5803_v15 = vmul.f32 %v5163_v11, %v16312_v37  ;;  %v5173_v26 = vmul.f32 0.5, %v4533_v9  ;;  %8384 = vmatpush3.bf16.msra.mxu0 %v8383_v2  ;;  %9730 = vtanh.f32 %v3293_v63  ;;  %v16449_v2 = vpop.f32.mrb[110].mxu1 }
 0x5d6   :  { %v9721_v23 = vpop.eup %9720  ;;  %v5804_v59 = vmul.f32 %v5164_v30, %v16325_v20  ;;  %v5174_v52 = vmul.f32 0.5, %v4534_v34  ;;  %v4543_v8 = vadd.f32 1.0, %v9719_v51  ;;  %v3294_v56 = vmul.f32 0.5, %v16433_v18  ;;  %v16453_v30 = vpop.f32.mrb[111].mxu1 }
 0x5d7   :  { %v9723_v45 = vpop.eup %9722  ;;  %v6571_v53 = vadd.f32 %v6570_v22, %v5803_v15  ;;  %v5813_v10 = vmul.f32 %v5173_v26, %v16329_v36  ;;  %v4544_v44 = vadd.f32 1.0, %v9721_v23  ;;  %v16447_v37 = vadd.f32 %v15791_v42, %v18064_v25  ;;  %v16456_v15 = vpop.f32.mrb[112].mxu1 }
 0x5d8   :  { %v6608_v63 = vadd.f32 %v6607_v21, %v5804_v59  ;;  %v5814_v20 = vmul.f32 %v5174_v52, %v16345_v48  ;;  %v5183_v11 = vmul.f32 0.5, %v4543_v8  ;;  %v4553_v9 = vadd.f32 1.0, %v9723_v45  ;;  %7641 = vmatmul.mubr.f32.vlgmr.msra.gmra.mrb[70].mxu0 %v16246_v41  ;;  %v16463_v23 = vpop.f32.mrb[113].mxu1 }
 0x5d9   :  { %v6572_v34 = vadd.f32 %v6571_v53, %v5813_v10  ;;  %v5184_v22 = vmul.f32 0.5, %v4544_v44  ;;  %9732 = vtanh.f32 %v3294_v56  ;;  %v3303_v36 = vmul.f32 0.5, %v16447_v37  ;;  %v16470_v8 = vpop.f32.mrb[114].mxu1 }
 0x5da   :  { %v9725_v42 = vpop.eup %9724  ;;  %v6609_v51 = vadd.f32 %v6608_v63, %v5814_v20  ;;  %v5823_v26 = vmul.f32 %v5183_v11, %v16358_v12  ;;  %v5193_v21 = vmul.f32 0.5, %v4553_v9  ;;  %v16461_v48 = vadd.f32 %v15797_v14, %v18066_v29  ;;  %v16478_v10 = vpop.f32.mrb[115].mxu1 }
 0x5db   :  { %v5824_v41 = vmul.f32 %v5184_v22, %v16369_v55  ;;  %v4554_v59 = vadd.f32 1.0, %v9725_v42  ;;  %9734 = vtanh.f32 %v3303_v36  ;;  %v16468_v52 = vadd.f32 %v15800_v27, %v18064_v25  ;;  %v16481_v20 = vpop.f32.mrb[116].mxu1 }
 0x5dc   :  { %v9727_v56 = vpop.eup %9726  ;;  %v6573_v45 = vadd.f32 %v6572_v34, %v5823_v26  ;;  %v5833_v12 = vmul.f32 %v5193_v21, %v16374_v0  ;;  %v3304_v53 = vmul.f32 0.5, %v16461_v48  ;;  %v16476_v14 = vadd.f32 %v15803_v58, %v18066_v29 }
 0x5dd   :  { %v6610_v55 = vadd.f32 %v6609_v51, %v5824_v41  ;;  %v5194_v44 = vmul.f32 0.5, %v4554_v59  ;;  %v4563_v63 = vadd.f32 1.0, %v9727_v56  ;;  %v3313_v27 = vmul.f32 0.5, %v16468_v52 }
 0x5de   :  { %v9729_v11 = vpop.eup %9728  ;;  %v6574_v9 = vadd.f32 %v6573_v45, %v5833_v12  ;;  %9736 = vtanh.f32 %v3304_v53  ;;  %v3314_v0 = vmul.f32 0.5, %v16476_v14  ;;  %v16486_v34 = vadd.f32 %v15808_v31, %v18064_v25 }
 0x5df   :  { %v9731_v58 = vpop.eup %9730  ;;  %v5834_v22 = vmul.f32 %v5194_v44, %v16395_v3  ;;  %v5203_v36 = vmul.f32 0.5, %v4563_v63  ;;  %v4564_v42 = vadd.f32 1.0, %v9729_v11  ;;  %9738 = vtanh.f32 %v3313_v27 }
 0x5e0   :  { %v4573_v51 = vadd.f32 1.0, %v9731_v58  ;;  %9740 = vtanh.f32 %v3314_v0  ;;  %v3323_v26 = vmul.f32 0.5, %v16486_v34  ;;  %v16492_v21 = vadd.f32 %v15812_v28, %v18066_v29 }
 0x5e1   :  { %v6611_v41 = vadd.f32 %v6610_v55, %v5834_v22  ;;  %v5843_v59 = vmul.f32 %v5203_v36, %v16403_v61  ;;  %v5204_v56 = vmul.f32 0.5, %v4564_v42  ;;  %v16497_v31 = vadd.f32 %v15817_v7, %v18064_v25 }
 0x5e2   :  { %v5213_v3 = vmul.f32 0.5, %v4573_v51  ;;  %9742 = vtanh.f32 %v3323_v26  ;;  %v3324_v45 = vmul.f32 0.5, %v16492_v21  ;;  %v16502_v12 = vadd.f32 %v15822_v13, %v18066_v29  ;;  %v18144_v26 = vld [vmem:[#allocation91_spill] sm:$0xff] }
 0x5e3   :  { %v9733_v53 = vpop.eup %9732  ;;  %v6575_v44 = vadd.f32 %v6574_v9, %v5843_v59  ;;  %v5844_v28 = vmul.f32 %v5204_v56, %v16410_v4  ;;  %v3333_v55 = vmul.f32 0.5, %v16497_v31  ;;  %v16508_v61 = vadd.f32 %v15828_v16, %v18064_v25  ;;  %v18145_v59 = vld [vmem:[#allocation22_spill] sm:$0xff] }
 0x5e4   :  { %v5853_v7 = vmul.f32 %v5213_v3, %v16417_v32  ;;  %v4574_v63 = vadd.f32 1.0, %v9733_v53  ;;  %9744 = vtanh.f32 %v3324_v45  ;;  %v3334_v27 = vmul.f32 0.5, %v16502_v12  ;;  %v16537_v53 = vpop.f32.mrb[117].mxu1 }
 0x5e5   :  { %v9735_v11 = vpop.eup %9734  ;;  %v6612_v0 = vadd.f32 %v6611_v41, %v5844_v28  ;;  %9746 = vtanh.f32 %v3333_v55  ;;  %v3343_v13 = vmul.f32 0.5, %v16508_v61  ;;  %v16515_v4 = vadd.f32 %v15840_v54, %v18066_v29 }
 0x5e6   :  { %v6576_v9 = vadd.f32 %v6575_v44, %v5853_v7  ;;  %v5214_v58 = vmul.f32 0.5, %v4574_v63  ;;  %v4583_v22 = vadd.f32 1.0, %v9735_v11  ;;  %9748 = vtanh.f32 %v3334_v27 }
 0x5e7   :  { %9750 = vtanh.f32 %v3343_v13  ;;  %v3344_v16 = vmul.f32 0.5, %v16515_v4  ;;  %v16520_v32 = vadd.f32 %v15857_v46, %v18064_v25  ;;  %v16524_v36 = vadd.f32 %v15871_v50, %v18066_v29 }
 0x5e8   :  { %v9737_v42 = vpop.eup %9736  ;;  %v5854_v51 = vmul.f32 %v5214_v58, %v16433_v18  ;;  %v5223_v54 = vmul.f32 0.5, %v4583_v22  ;;  %v16529_v41 = vadd.f32 %v18144_v26, %v18064_v25  ;;  %v16533_v56 = vadd.f32 %v18145_v59, %v18066_v29 }
 0x5e9   :  { %v9739_v3 = vpop.eup %9738  ;;  %v4584_v45 = vadd.f32 1.0, %v9737_v42  ;;  %9752 = vtanh.f32 %v3344_v16  ;;  %v3353_v46 = vmul.f32 0.5, %v16520_v32  ;;  %v3354_v50 = vmul.f32 0.5, %v16524_v36  ;;  %v18146_v16 = vld [vmem:[#allocation25_spill] sm:$0xff] }
 0x5ea   :  { %v9741_v44 = vpop.eup %9740  ;;  %v6613_v18 = vadd.f32 %v6612_v0, %v5854_v51  ;;  %v5863_v28 = vmul.f32 %v5223_v54, %v16447_v37  ;;  %v4593_v55 = vadd.f32 1.0, %v9739_v3  ;;  %v3363_v7 = vmul.f32 0.5, %v16529_v41  ;;  %v18147_v3 = vld [vmem:[#allocation7_spill] sm:$0xff] }
 0x5eb   :  { %v5224_v63 = vmul.f32 0.5, %v4584_v45  ;;  %v4594_v27 = vadd.f32 1.0, %v9741_v44  ;;  %9754 = vtanh.f32 %v3353_v46  ;;  %v3364_v11 = vmul.f32 0.5, %v16533_v56  ;;  %v16553_v45 = vpop.f32.mrb[118].mxu1 }
 0x5ec   :  { %v9743_v13 = vpop.eup %9742  ;;  %v6577_v58 = vadd.f32 %v6576_v9, %v5863_v28  ;;  %v5233_v22 = vmul.f32 0.5, %v4593_v55  ;;  %9756 = vtanh.f32 %v3354_v50  ;;  %v16544_v42 = vadd.f32 %v18146_v16, %v18064_v25  ;;  %v16556_v55 = vpop.f32.mrb[119].mxu1 }
 0x5ed   :  { %v5864_v0 = vmul.f32 %v5224_v63, %v16461_v48  ;;  %v5234_v51 = vmul.f32 0.5, %v4594_v27  ;;  %v4603_v37 = vadd.f32 1.0, %v9743_v13  ;;  %9758 = vtanh.f32 %v3363_v7 }
 0x5ee   :  { %v9745_v54 = vpop.eup %9744  ;;  %v5873_v26 = vmul.f32 %v5233_v22, %v16468_v52  ;;  %9760 = vtanh.f32 %v3364_v11  ;;  %v3373_v59 = vmul.f32 0.5, %v16544_v42  ;;  %v16551_v9 = vadd.f32 %v18147_v3, %v18066_v29  ;;  %v16559_v11 = vpop.f32.mrb[120].mxu1 }
 0x5ef   :  { %v9747_v46 = vpop.eup %9746  ;;  %v6614_v50 = vadd.f32 %v6613_v18, %v5864_v0  ;;  %v5874_v44 = vmul.f32 %v5234_v51, %v16476_v14  ;;  %v5243_v48 = vmul.f32 0.5, %v4603_v37  ;;  %v4604_v28 = vadd.f32 1.0, %v9745_v54  ;;  %v16562_v0 = vpop.f32.mrb[121].mxu1 }
 0x5f0   :  { %v9749_v7 = vpop.eup %9748  ;;  %v6578_v63 = vadd.f32 %v6577_v58, %v5873_v26  ;;  %v4613_v52 = vadd.f32 1.0, %v9747_v46  ;;  %9762 = vtanh.f32 %v3373_v59  ;;  %v3374_v27 = vmul.f32 0.5, %v16551_v9  ;;  %v16568_v37 = vpop.f32.mrb[122].mxu1 }
 0x5f1   :  { %v9751_v13 = vpop.eup %9750  ;;  %v6615_v22 = vadd.f32 %v6614_v50, %v5874_v44  ;;  %v5883_v16 = vmul.f32 %v5243_v48, %v16486_v34  ;;  %v5244_v3 = vmul.f32 0.5, %v4604_v28  ;;  %v4614_v18 = vadd.f32 1.0, %v9749_v7  ;;  %18148 = vst [vmem:[#allocation93_spill] sm:$0xff] %v16568_v37  ;;  %v16575_v50 = vpop.f32.mrb[123].mxu1 }
 0x5f2   :  { %v5253_v14 = vmul.f32 0.5, %v4613_v52  ;;  %v4623_v51 = vadd.f32 1.0, %v9751_v13  ;;  %9764 = vtanh.f32 %v3374_v27  ;;  %v16566_v58 = vadd.f32 %v15924_v24, %v18064_v25  ;;  %18149 = vst [vmem:[#allocation94_spill] sm:$0xff] %v16575_v50  ;;  %v16579_v7 = vpop.f32.mrb[124].mxu1 }
 0x5f3   :  { %v9753_v54 = vpop.eup %9752  ;;  %v6579_v26 = vadd.f32 %v6578_v63, %v5883_v16  ;;  %v5884_v59 = vmul.f32 %v5244_v3, %v16492_v21  ;;  %v5254_v46 = vmul.f32 0.5, %v4614_v18  ;;  %v16573_v34 = vadd.f32 %v15927_v35, %v18066_v29  ;;  %18150 = vst [vmem:[#allocation31_spill] sm:$0xff] %v16579_v7  ;;  %v16587_v13 = vpop.f32.mrb[125].mxu1 }
 0x5f4   :  { %v5893_v44 = vmul.f32 %v5253_v14, %v16497_v31  ;;  %v5263_v48 = vmul.f32 0.5, %v4623_v51  ;;  %v4624_v28 = vadd.f32 1.0, %v9753_v54  ;;  %v3383_v24 = vmul.f32 0.5, %v16566_v58  ;;  %18151 = vst [vmem:[#allocation74_spill] sm:$0xff] %v16587_v13  ;;  %v16590_v51 = vpop.f32.mrb[126].mxu1 }
 0x5f5   :  { %v9755_v52 = vpop.eup %9754  ;;  %v6616_v27 = vadd.f32 %v6615_v22, %v5884_v59  ;;  %v5894_v63 = vmul.f32 %v5254_v46, %v16502_v12  ;;  %v3384_v21 = vmul.f32 0.5, %v16573_v34  ;;  %v16585_v35 = vadd.f32 %v15930_v1, %v18064_v25 }
 0x5f6   :  { %v9757_v16 = vpop.eup %9756  ;;  %v6580_v31 = vadd.f32 %v6579_v26, %v5893_v44  ;;  %v5903_v3 = vmul.f32 %v5263_v48, %v16508_v61  ;;  %v5264_v18 = vmul.f32 0.5, %v4624_v28  ;;  %v4633_v14 = vadd.f32 1.0, %v9755_v52 }
 0x5f7   :  { %v9759_v54 = vpop.eup %9758  ;;  %v6617_v22 = vadd.f32 %v6616_v27, %v5894_v63  ;;  %v4634_v59 = vadd.f32 1.0, %v9757_v16  ;;  %9766 = vtanh.f32 %v3383_v24  ;;  %v3393_v12 = vmul.f32 0.5, %v16585_v35 }
 0x5f8   :  { %v9761_v46 = vpop.eup %9760  ;;  %v6581_v7 = vadd.f32 %v6580_v31, %v5903_v3  ;;  %v5904_v1 = vmul.f32 %v5264_v18, %v16515_v4  ;;  %v5273_v50 = vmul.f32 0.5, %v4633_v14  ;;  %v4643_v13 = vadd.f32 1.0, %v9759_v54 }
 0x5f9   :  { %v5274_v37 = vmul.f32 0.5, %v4634_v59  ;;  %v4644_v26 = vadd.f32 1.0, %v9761_v46  ;;  %9768 = vtanh.f32 %v3384_v21  ;;  %v16596_v61 = vadd.f32 %v15933_v43, %v18066_v29 }
 0x5fa   :  { %v9763_v44 = vpop.eup %9762  ;;  %v6618_v48 = vadd.f32 %v6617_v22, %v5904_v1  ;;  %v5913_v28 = vmul.f32 %v5273_v50, %v16520_v32  ;;  %v5283_v24 = vmul.f32 0.5, %v4643_v13  ;;  %9770 = vtanh.f32 %v3393_v12  ;;  %v18152_v22 = vld [vmem:[#allocation61_spill] sm:$0xff] }
 0x5fb   :  { %v5914_v52 = vmul.f32 %v5274_v37, %v16524_v36  ;;  %v5284_v27 = vmul.f32 0.5, %v4644_v26  ;;  %v4653_v63 = vadd.f32 1.0, %v9763_v44  ;;  %v3394_v4 = vmul.f32 0.5, %v16596_v61 }
 0x5fc   :  { %v9765_v16 = vpop.eup %9764  ;;  %v6582_v31 = vadd.f32 %v6581_v7, %v5913_v28  ;;  %v5923_v21 = vmul.f32 %v5283_v24, %v16529_v41  ;;  %v16604_v43 = vadd.f32 %v15952_v57, %v18064_v25  ;;  %v16608_v3 = vadd.f32 %v15964_v33, %v18066_v29  ;;  %v18153_v24 = vld [vmem:[#allocation62_spill] sm:$0xff] }
 0x5fd   :  { %v6619_v32 = vadd.f32 %v6618_v48, %v5914_v52  ;;  %v5924_v50 = vmul.f32 %v5284_v27, %v16533_v56  ;;  %v5293_v36 = vmul.f32 0.5, %v4653_v63  ;;  %v4654_v37 = vadd.f32 1.0, %v9765_v16  ;;  %v16639_v27 = vpop.f32.mrb[127].mxu1  ;;  %v18154_v16 = vld [vmem:[#allocation6_spill] sm:$0xff] }
 0x5fe   :  { %v6583_v13 = vadd.f32 %v6582_v31, %v5923_v21  ;;  %9772 = vtanh.f32 %v3394_v4  ;;  %v3403_v18 = vmul.f32 0.5, %v16604_v43  ;;  %v3404_v7 = vmul.f32 0.5, %v16608_v3 }
 0x5ff   :  { %v6620_v41 = vadd.f32 %v6619_v32, %v5924_v50  ;;  %v5933_v14 = vmul.f32 %v5293_v36, %v16544_v42  ;;  %v5294_v57 = vmul.f32 0.5, %v4654_v37  ;;  %v16616_v54 = vadd.f32 %v15969_v39, %v18064_v25 }
 0x600   :  { %9774 = vtanh.f32 %v3403_v18  ;;  %v16620_v33 = vadd.f32 %v15982_v19, %v18066_v29  ;;  %v16624_v56 = vadd.f32 %v15985_v60, %v18064_v25  ;;  %v16628_v59 = vadd.f32 %v18152_v22, %v18066_v29 }
 0x601   :  { %v9767_v12 = vpop.eup %9766  ;;  %v6584_v42 = vadd.f32 %v6583_v13, %v5933_v14  ;;  %v5934_v46 = vmul.f32 %v5294_v57, %v16551_v9  ;;  %9776 = vtanh.f32 %v3404_v7  ;;  %v3413_v39 = vmul.f32 0.5, %v16616_v54 }
 0x602   :  { %v4663_v1 = vadd.f32 1.0, %v9767_v12  ;;  %v3414_v26 = vmul.f32 0.5, %v16620_v33  ;;  %v3423_v19 = vmul.f32 0.5, %v16624_v56  ;;  %v3424_v44 = vmul.f32 0.5, %v16628_v59  ;;  %v18155_v12 = vld [vmem:[#allocation38_spill] sm:$0xff] }
 0x603   :  { %v9769_v60 = vpop.eup %9768  ;;  %v6585_v48 = vrot.slane %v6584_v42, 4  ;;  %v6621_v28 = vadd.f32 %v6620_v41, %v5934_v46  ;;  %9778 = vtanh.f32 %v3413_v39  ;;  %v16637_v52 = vadd.f32 %v18153_v24, %v18064_v25  ;;  %v18156_v46 = vld [vmem:[#allocation24_spill] sm:$0xff] }
 0x604   :  { %v9771_v9 = vpop.eup %9770  ;;  %v5303_v63 = vmul.f32 0.5, %v4663_v1  ;;  %v4664_v4 = vadd.f32 1.0, %v9769_v60  ;;  %9780 = vtanh.f32 %v3414_v26  ;;  %v16643_v31 = vadd.f32 %v18154_v16, %v18066_v29 }
 0x605   :  { %v6586_v21 = vadd.f32 %v6585_v48, %v6584_v42  ;;  %v6622_v32 = vrot.slane %v6621_v28, 4  ;;  %v4673_v50 = vadd.f32 1.0, %v9771_v9  ;;  %9782 = vtanh.f32 %v3423_v19  ;;  %v18157_v48 = vld [vmem:[#allocation70_spill] sm:$0xff] }
 0x606   :  { %v5943_v36 = vmul.f32 %v5303_v63, %v16566_v58  ;;  %v5304_v37 = vmul.f32 0.5, %v4664_v4  ;;  %9784 = vtanh.f32 %v3424_v44  ;;  %v3433_v13 = vmul.f32 0.5, %v16637_v52 }
 0x607   :  { %v6587_v18 = vrot.slane %v6586_v21, 2  ;;  %v6623_v7 = vadd.f32 %v6622_v32, %v6621_v28  ;;  %v5313_v41 = vmul.f32 0.5, %v4673_v50  ;;  %v3434_v14 = vmul.f32 0.5, %v16643_v31 }
 0x608   :  { %v9773_v57 = vpop.eup %9772  ;;  %v5944_v22 = vmul.f32 %v5304_v37, %v16573_v34  ;;  %9786 = vtanh.f32 %v3433_v13  ;;  %v16651_v42 = vadd.f32 %v18155_v12, %v18064_v25  ;;  %v16655_v58 = vadd.f32 %v18156_v46, %v18066_v29 }
 0x609   :  { %v6588_v39 = vadd.f32 %v6587_v18, %v6586_v21  ;;  %v6624_v1 = vrot.slane %v6623_v7, 2  ;;  %v5953_v26 = vmul.f32 %v5313_v41, %v16585_v35  ;;  %v4674_v19 = vadd.f32 1.0, %v9773_v57 }
 0x60a   :  { %v9775_v44 = vpop.eup %9774  ;;  %9788 = vtanh.f32 %v3434_v14  ;;  %v3443_v60 = vmul.f32 0.5, %v16651_v42  ;;  %v3444_v34 = vmul.f32 0.5, %v16655_v58  ;;  %v16662_v28 = vadd.f32 %v18157_v48, %v18064_v25 }
 0x60b   :  { %v9777_v24 = vpop.eup %9776  ;;  %v6589_v9 = vrot.slane %v6588_v39, 1  ;;  %v6625_v63 = vadd.f32 %v6624_v1, %v6623_v7  ;;  %v6924_v4 = vadd.f32 %v5953_v26, %v5943_v36  ;;  %v5314_v16 = vmul.f32 0.5, %v4674_v19  ;;  %v18159_v26 = vld [vmem:[#allocation9_spill] sm:$0xff] }
 0x60c   :  { %v4683_v21 = vadd.f32 1.0, %v9775_v44  ;;  %v4684_v32 = vadd.f32 1.0, %v9777_v24  ;;  %9790 = vtanh.f32 %v3443_v60  ;;  %v3453_v35 = vmul.f32 0.5, %v16662_v28 }
 0x60d   :  { %v9779_v50 = vpop.eup %9778  ;;  %v16665_v37 = vadd.f32 %v6589_v9, %v6588_v39  ;;  %v6626_v13 = vrot.slane %v6625_v63, 1  ;;  %v5954_v18 = vmul.f32 %v5314_v16, %v16596_v61  ;;  %9792 = vtanh.f32 %v3444_v34 }
 0x60e   :  { %v9781_v41 = vpop.eup %9780  ;;  %v5323_v14 = vmul.f32 0.5, %v4683_v21  ;;  %v5324_v57 = vmul.f32 0.5, %v4684_v32  ;;  %v4693_v12 = vadd.f32 1.0, %v9779_v50  ;;  %9794 = vtanh.f32 %v3453_v35 }
 0x60f   :  { %v9783_v7 = vpop.eup %9782  ;;  %v16668_v36 = vadd.f32 %v6626_v13, %v6625_v63  ;;  %v6961_v46 = vadd.f32 %v5954_v18, %v5944_v22  ;;  %v4694_v1 = vadd.f32 1.0, %v9781_v41  ;;  %v16672_v19 = vadd.f32 %v18159_v26, %v18066_v29  ;;  %v18161_v26 = vld [vmem:[#allocation54_spill] sm:$0xff] }
 0x610   :  { %v9785_v39 = vpop.eup %9784  ;;  %v5963_v44 = vmul.f32 %v5323_v14, %v16604_v43  ;;  %v5964_v61 = vmul.f32 %v5324_v57, %v16608_v3  ;;  %v5333_v60 = vmul.f32 0.5, %v4693_v12  ;;  %v4703_v34 = vadd.f32 1.0, %v9783_v7  ;;  %v18160_v14 = vld [vmem:[#allocation49_spill] sm:$0xff] }
 0x611   :  { %18158 = vst [vmem:[#allocation80_spill] sm:$0xff] %v16668_v36  ;;  %v5334_v24 = vmul.f32 0.5, %v4694_v1  ;;  %v4704_v9 = vadd.f32 1.0, %v9785_v39  ;;  %v3454_v63 = vmul.f32 0.5, %v16672_v19  ;;  %v16684_v57 = vadd.f32 %v18160_v14, %v18064_v25 }
 0x612   :  { %v9787_v22 = vpop.eup %9786  ;;  %v6925_v16 = vadd.f32 %v6924_v4, %v5963_v44  ;;  %v6962_v21 = vadd.f32 %v6961_v46, %v5964_v61  ;;  %v5973_v32 = vmul.f32 %v5333_v60, %v16616_v54  ;;  %v5343_v35 = vmul.f32 0.5, %v4703_v34 }
 0x613   :  { %v5974_v50 = vmul.f32 %v5334_v24, %v16620_v33  ;;  %v5344_v43 = vmul.f32 0.5, %v4704_v9  ;;  %v4713_v13 = vadd.f32 1.0, %v9787_v22  ;;  %9796 = vtanh.f32 %v3454_v63 }
 0x614   :  { %v9789_v3 = vpop.eup %9788  ;;  %v6926_v18 = vadd.f32 %v6925_v16, %v5973_v32  ;;  %v5983_v41 = vmul.f32 %v5343_v35, %v16624_v56  ;;  %v3463_v33 = vmul.f32 0.5, %v16684_v57  ;;  %v16690_v39 = vadd.f32 %v18161_v26, %v18066_v29  ;;  %v18162_v56 = vld [vmem:[#allocation48_spill] sm:$0xff] }
 0x615   :  { %v6963_v12 = vadd.f32 %v6962_v21, %v5974_v50  ;;  %v5984_v4 = vmul.f32 %v5344_v43, %v16628_v59  ;;  %v5353_v7 = vmul.f32 0.5, %v4713_v13  ;;  %v4714_v46 = vadd.f32 1.0, %v9789_v3 }
 0x616   :  { %v9791_v54 = vpop.eup %9790  ;;  %v6927_v1 = vadd.f32 %v6926_v18, %v5983_v41  ;;  %v16694_v44 = vadd.f32 %v18162_v56, %v18064_v25  ;;  %9798 = vtanh.f32 %v3463_v33  ;;  %v3464_v22 = vmul.f32 0.5, %v16690_v39 }
 0x617   :  { %v9793_v61 = vpop.eup %9792  ;;  %v6964_v60 = vadd.f32 %v6963_v12, %v5984_v4  ;;  %v5993_v34 = vmul.f32 %v5353_v7, %v16637_v52  ;;  %v5354_v24 = vmul.f32 0.5, %v4714_v46  ;;  %v4723_v59 = vadd.f32 1.0, %v9791_v54  ;;  %v18163_v52 = vld [vmem:[#allocation42_spill] sm:$0xff]  ;;  %v18164_v7 = vld [vmem:[#allocation63_spill] sm:$0xff] }
 0x618   :  { %v9795_v9 = vpop.eup %9794  ;;  %v4724_v63 = vadd.f32 1.0, %v9793_v61  ;;  %v3473_v16 = vmul.f32 0.5, %v16694_v44  ;;  %9800 = vtanh.f32 %v3464_v22  ;;  %v16702_v13 = vadd.f32 %v16163_v49, %v18066_v29 }
 0x619   :  { %v6928_v21 = vadd.f32 %v6927_v1, %v5993_v34  ;;  %v5994_v32 = vmul.f32 %v5354_v24, %v16643_v31  ;;  %v5363_v35 = vmul.f32 0.5, %v4723_v59  ;;  %v4733_v50 = vadd.f32 1.0, %v9795_v9  ;;  %v18165_v1 = vld [vmem:[#allocation8_spill] sm:$0xff] }
 0x61a   :  { %v5364_v43 = vmul.f32 0.5, %v4724_v63  ;;  %v16706_v3 = vadd.f32 %v18163_v52, %v18064_v25  ;;  %9802 = vtanh.f32 %v3473_v16  ;;  %v3474_v31 = vmul.f32 0.5, %v16702_v13 }
 0x61b   :  { %v6965_v18 = vadd.f32 %v6964_v60, %v5994_v32  ;;  %v6003_v41 = vmul.f32 %v5363_v35, %v16651_v42  ;;  %v5373_v14 = vmul.f32 0.5, %v4733_v50  ;;  %v16714_v46 = vadd.f32 %v18164_v7, %v18066_v29  ;;  %v18166_v42 = vld [vmem:[#allocation64_spill] sm:$0xff]  ;;  %v18167_v60 = vld [vmem:[#allocation11_spill] sm:$0xff] }
 0x61c   :  { %v6004_v12 = vmul.f32 %v5364_v43, %v16655_v58  ;;  %v3483_v4 = vmul.f32 0.5, %v16706_v3  ;;  %v16719_v33 = vadd.f32 %v18165_v1, %v18064_v25  ;;  %v16723_v26 = vadd.f32 %v18166_v42, %v18066_v29  ;;  %v18169_v35 = vld [vmem:[#allocation27_spill] sm:$0xff] }
 0x61d   :  { %v6929_v49 = vadd.f32 %v6928_v21, %v6003_v41  ;;  %v6013_v54 = vmul.f32 %v5373_v14, %v16662_v28  ;;  %v9797_v58 = vpop.eup %9796  ;;  %9804 = vtanh.f32 %v3474_v31  ;;  %v3484_v61 = vmul.f32 0.5, %v16714_v46  ;;  %v18168_v21 = vld [vmem:[#allocation66_spill] sm:$0xff] }
 0x61e   :  { %v6966_v56 = vadd.f32 %v6965_v18, %v6004_v12  ;;  %v16728_v34 = vadd.f32 %v18167_v60, %v18064_v25  ;;  %v4734_v59 = vadd.f32 1.0, %v9797_v58  ;;  %9806 = vtanh.f32 %v3483_v4  ;;  %v18170_v18 = vld [vmem:[#allocation67_spill] sm:$0xff] }
 0x61f   :  { %v6930_v24 = vadd.f32 %v6929_v49, %v6013_v54  ;;  %v3493_v28 = vmul.f32 0.5, %v16719_v33  ;;  %9808 = vtanh.f32 %v3484_v61  ;;  %v3494_v9 = vmul.f32 0.5, %v16723_v26 }
 0x620   :  { %v3503_v63 = vmul.f32 0.5, %v16728_v34  ;;  %v16735_v22 = vadd.f32 %v16205_v47, %v18066_v29  ;;  %v5374_v16 = vmul.f32 0.5, %v4734_v59  ;;  %v16739_v32 = vadd.f32 %v18168_v21, %v18064_v25  ;;  %v9799_v43 = vpop.eup %9798  ;;  %v18171_v47 = vld [vmem:[#allocation26_spill] sm:$0xff] }
 0x621   :  { %9810 = vtanh.f32 %v3493_v28  ;;  %v16743_v50 = vadd.f32 %v18169_v35, %v18066_v29  ;;  %v16748_v41 = vadd.f32 %v18170_v18, %v18064_v25  ;;  %v16752_v14 = vadd.f32 %v18171_v47, %v18066_v29  ;;  %v18174_v35 = vld [vmem:[#allocation68_spill] sm:$0xff] }
 0x622   :  { %9812 = vtanh.f32 %v3494_v9  ;;  %v3504_v52 = vmul.f32 0.5, %v16735_v22  ;;  %v6014_v12 = vmul.f32 %v5374_v16, %v16672_v19  ;;  %v4743_v31 = vadd.f32 1.0, %v9799_v43  ;;  %v9801_v7 = vpop.eup %9800  ;;  %v18172_v19 = vld [vmem:[#allocation29_spill] sm:$0xff]  ;;  %v18173_v9 = vld [vmem:[#allocation10_spill] sm:$0xff] }
 0x623   :  { %9814 = vtanh.f32 %v3503_v63  ;;  %v3513_v4 = vmul.f32 0.5, %v16739_v32  ;;  %v3514_v49 = vmul.f32 0.5, %v16743_v50  ;;  %v3523_v54 = vmul.f32 0.5, %v16748_v41 }
 0x624   :  { %9816 = vtanh.f32 %v3504_v52  ;;  %v3524_v1 = vmul.f32 0.5, %v16752_v14  ;;  %v9803_v42 = vpop.eup %9802  ;;  %v6967_v58 = vadd.f32 %v6966_v56, %v6014_v12  ;;  %v5383_v61 = vmul.f32 0.5, %v4743_v31 }
 0x625   :  { %v4744_v60 = vadd.f32 1.0, %v9801_v7  ;;  %9818 = vtanh.f32 %v3513_v4  ;;  %v4753_v59 = vadd.f32 1.0, %v9803_v42  ;;  %v16761_v28 = vadd.f32 %v18172_v19, %v18064_v25 }
 0x626   :  { %9820 = vtanh.f32 %v3514_v49  ;;  %v16765_v63 = vadd.f32 %v18173_v9, %v18066_v29  ;;  %v6023_v16 = vmul.f32 %v5383_v61, %v16684_v57  ;;  %v16770_v56 = vadd.f32 %v18174_v35, %v18064_v25  ;;  %v18175_v61 = vld [vmem:[#allocation28_spill] sm:$0xff] }
 0x627   :  { %v5384_v21 = vmul.f32 0.5, %v4744_v60  ;;  %9822 = vtanh.f32 %v3523_v54  ;;  %v9805_v43 = vpop.eup %9804  ;;  %v5393_v52 = vmul.f32 0.5, %v4753_v59  ;;  %v3533_v18 = vmul.f32 0.5, %v16761_v28 }
 0x628   :  { %9824 = vtanh.f32 %v3524_v1  ;;  %v3534_v47 = vmul.f32 0.5, %v16765_v63  ;;  %v9807_v12 = vpop.eup %9806  ;;  %v6931_v31 = vadd.f32 %v6930_v24, %v6023_v16  ;;  %v4754_v7 = vadd.f32 1.0, %v9805_v43 }
 0x629   :  { %v6024_v4 = vmul.f32 %v5384_v21, %v16690_v39  ;;  %v3543_v57 = vmul.f32 0.5, %v16770_v56  ;;  %v9809_v49 = vpop.eup %9808  ;;  %v6033_v54 = vmul.f32 %v5393_v52, %v16694_v44  ;;  %v4763_v42 = vadd.f32 1.0, %v9807_v12 }
 0x62a   :  { %9826 = vtanh.f32 %v3533_v18  ;;  %v16779_v60 = vadd.f32 %v18175_v61, %v18066_v29  ;;  %v5394_v19 = vmul.f32 0.5, %v4754_v7  ;;  %v4764_v9 = vadd.f32 1.0, %v9809_v49 }
 0x62b   :  { %v9811_v1 = vpop.eup %9810  ;;  %v6968_v59 = vadd.f32 %v6967_v58, %v6024_v4  ;;  %9828 = vtanh.f32 %v3534_v47  ;;  %v6932_v16 = vadd.f32 %v6931_v31, %v6033_v54  ;;  %v5403_v39 = vmul.f32 0.5, %v4763_v42  ;;  %v18176_v4 = vld [vmem:[#allocation69_spill] sm:$0xff] }
 0x62c   :  { %v9813_v24 = vpop.eup %9812  ;;  %v4773_v21 = vadd.f32 1.0, %v9811_v1  ;;  %9830 = vtanh.f32 %v3543_v57  ;;  %v6034_v43 = vmul.f32 %v5394_v19, %v16702_v13  ;;  %v5404_v44 = vmul.f32 0.5, %v4764_v9 }
 0x62d   :  { %v9815_v35 = vpop.eup %9814  ;;  %v4774_v52 = vadd.f32 1.0, %v9813_v24  ;;  %v3544_v18 = vmul.f32 0.5, %v16779_v60  ;;  %v6043_v61 = vmul.f32 %v5403_v39, %v16706_v3  ;;  %v16786_v47 = vadd.f32 %v18176_v4, %v18064_v25 }
 0x62e   :  { %v9817_v12 = vpop.eup %9816  ;;  %v5413_v48 = vmul.f32 0.5, %v4773_v21  ;;  %v4783_v58 = vadd.f32 1.0, %v9815_v35  ;;  %v6969_v7 = vadd.f32 %v6968_v59, %v6034_v43  ;;  %v6044_v57 = vmul.f32 %v5404_v44, %v16714_v46 }
 0x62f   :  { %v9819_v31 = vpop.eup %9818  ;;  %v5414_v49 = vmul.f32 0.5, %v4774_v52  ;;  %v4784_v54 = vadd.f32 1.0, %v9817_v12  ;;  %v6933_v42 = vadd.f32 %v6932_v16, %v6043_v61  ;;  %9832 = vtanh.f32 %v3544_v18 }
 0x630   :  { %v9821_v13 = vpop.eup %9820  ;;  %v6053_v1 = vmul.f32 %v5413_v48, %v16719_v33  ;;  %v5423_v19 = vmul.f32 0.5, %v4783_v58  ;;  %v4793_v9 = vadd.f32 1.0, %v9819_v31  ;;  %v6970_v3 = vadd.f32 %v6969_v7, %v6044_v57 }
 0x631   :  { %v9823_v24 = vpop.eup %9822  ;;  %v6054_v39 = vmul.f32 %v5414_v49, %v16723_v26  ;;  %v5424_v21 = vmul.f32 0.5, %v4784_v54  ;;  %v4794_v35 = vadd.f32 1.0, %v9821_v13 }
 0x632   :  { %v9825_v4 = vpop.eup %9824  ;;  %v6934_v36 = vadd.f32 %v6933_v42, %v6053_v1  ;;  %v6063_v59 = vmul.f32 %v5423_v19, %v16728_v34  ;;  %v5433_v43 = vmul.f32 0.5, %v4793_v9  ;;  %v4803_v46 = vadd.f32 1.0, %v9823_v24  ;;  %v18177_v24 = vld [vmem:[#allocation50_spill] sm:$0xff] }
 0x633   :  { %v6971_v44 = vadd.f32 %v6970_v3, %v6054_v39  ;;  %v6064_v52 = vmul.f32 %v5424_v21, %v16735_v22  ;;  %v5434_v16 = vmul.f32 0.5, %v4794_v35  ;;  %v4804_v12 = vadd.f32 1.0, %v9825_v4 }
 0x634   :  { %v9827_v48 = vpop.eup %9826  ;;  %v6935_v33 = vadd.f32 %v6934_v36, %v6063_v59  ;;  %v6073_v61 = vmul.f32 %v5433_v43, %v16739_v32  ;;  %v5443_v58 = vmul.f32 0.5, %v4803_v46  ;;  %v3553_v22 = vmul.f32 0.5, %v16786_v47  ;;  %v18178_v59 = vld [vmem:[#allocation45_spill] sm:$0xff] }
 0x635   :  { %v9829_v26 = vpop.eup %9828  ;;  %v6972_v31 = vadd.f32 %v6971_v44, %v6064_v52  ;;  %v6074_v7 = vmul.f32 %v5434_v16, %v16743_v50  ;;  %v5444_v57 = vmul.f32 0.5, %v4804_v12  ;;  %v4813_v49 = vadd.f32 1.0, %v9827_v48 }
 0x636   :  { %v9831_v34 = vpop.eup %9830  ;;  %v6936_v54 = vadd.f32 %v6935_v33, %v6073_v61  ;;  %v6083_v13 = vmul.f32 %v5443_v58, %v16748_v41  ;;  %v4814_v42 = vadd.f32 1.0, %v9829_v26  ;;  %9834 = vtanh.f32 %v3553_v22  ;;  %v18180_v33 = vld [vmem:[#allocation72_spill] sm:$0xff]  ;;  %v18181_v58 = vld [vmem:[#allocation73_spill] sm:$0xff] }
 0x637   :  { %v6973_v1 = vadd.f32 %v6972_v31, %v6074_v7  ;;  %v6084_v36 = vmul.f32 %v5444_v57, %v16752_v14  ;;  %v5453_v19 = vmul.f32 0.5, %v4813_v49  ;;  %v4823_v32 = vadd.f32 1.0, %v9831_v34 }
 0x638   :  { %v6937_v9 = vadd.f32 %v6936_v54, %v6083_v13  ;;  %v5454_v18 = vmul.f32 0.5, %v4814_v42  ;;  %v16800_v50 = vadd.f32 %v18177_v24, %v18066_v29  ;;  %v16805_v41 = vadd.f32 %v16397_v5, %v18064_v25  ;;  %v18179_v5 = vld [vmem:[#allocation13_spill] sm:$0xff] }
 0x639   :  { %v6974_v3 = vadd.f32 %v6973_v1, %v6084_v36  ;;  %v6093_v39 = vmul.f32 %v5453_v19, %v16761_v28  ;;  %v5463_v21 = vmul.f32 0.5, %v4823_v32  ;;  %v16811_v4 = vadd.f32 %v16405_v6, %v18066_v29 }
 0x63a   :  { %v6094_v35 = vmul.f32 %v5454_v18, %v16765_v63  ;;  %v3554_v14 = vmul.f32 0.5, %v16800_v50  ;;  %v16815_v43 = vadd.f32 %v18178_v59, %v18064_v25  ;;  %v3563_v44 = vmul.f32 0.5, %v16805_v41 }
 0x63b   :  { %v6938_v46 = vadd.f32 %v6937_v9, %v6093_v39  ;;  %v6103_v28 = vmul.f32 %v5463_v21, %v16770_v56  ;;  %v16821_v52 = vadd.f32 %v18179_v5, %v18066_v29  ;;  %v3564_v16 = vmul.f32 0.5, %v16811_v4  ;;  %v9833_v56 = vpop.eup %9832 }
 0x63c   :  { %v6975_v63 = vadd.f32 %v6974_v3, %v6094_v35  ;;  %9836 = vtanh.f32 %v3554_v14  ;;  %v3573_v6 = vmul.f32 0.5, %v16815_v43  ;;  %v16828_v61 = vadd.f32 %v18180_v33, %v18064_v25 }
 0x63d   :  { %v6939_v12 = vadd.f32 %v6938_v46, %v6103_v28  ;;  %9838 = vtanh.f32 %v3563_v44  ;;  %v3574_v48 = vmul.f32 0.5, %v16821_v52  ;;  %v16832_v26 = vadd.f32 %v18181_v58, %v18066_v29 }
 0x63e   :  { %9840 = vtanh.f32 %v3564_v16  ;;  %v16836_v31 = vadd.f32 %v16429_v17, %v18064_v25  ;;  %v16840_v7 = vadd.f32 %v16435_v40, %v18066_v29  ;;  %v4824_v57 = vadd.f32 1.0, %v9833_v56 }
 0x63f   :  { %9842 = vtanh.f32 %v3573_v6  ;;  %v3583_v49 = vmul.f32 0.5, %v16828_v61  ;;  %v16845_v34 = vadd.f32 %v16438_v62, %v18064_v25  ;;  %v3584_v54 = vmul.f32 0.5, %v16832_v26 }
 0x640   :  { %9844 = vtanh.f32 %v3574_v48  ;;  %v3593_v13 = vmul.f32 0.5, %v16836_v31  ;;  %v3594_v17 = vmul.f32 0.5, %v16840_v7  ;;  %v5464_v42 = vmul.f32 0.5, %v4824_v57  ;;  %v9835_v1 = vpop.eup %9834 }
 0x641   :  { %9846 = vtanh.f32 %v3583_v49  ;;  %v3603_v40 = vmul.f32 0.5, %v16845_v34  ;;  %v16853_v22 = vadd.f32 %v16442_v38, %v18066_v29  ;;  %v16857_v62 = vadd.f32 %v16449_v2, %v18064_v25 }
 0x642   :  { %9848 = vtanh.f32 %v3584_v54  ;;  %v16861_v36 = vadd.f32 %v16453_v30, %v18066_v29  ;;  %v16865_v19 = vadd.f32 %v16456_v15, %v18064_v25  ;;  %v6104_v32 = vmul.f32 %v5464_v42, %v16779_v60 }
 0x643   :  { %v4833_v9 = vadd.f32 1.0, %v9835_v1  ;;  %9850 = vtanh.f32 %v3593_v13  ;;  %v3604_v38 = vmul.f32 0.5, %v16853_v22  ;;  %v3613_v18 = vmul.f32 0.5, %v16857_v62 }
 0x644   :  { %9852 = vtanh.f32 %v3594_v17  ;;  %v3614_v2 = vmul.f32 0.5, %v16861_v36  ;;  %v3623_v24 = vmul.f32 0.5, %v16865_v19  ;;  %v6976_v3 = vadd.f32 %v6975_v63, %v6104_v32 }
 0x645   :  { %v5473_v30 = vmul.f32 0.5, %v4833_v9  ;;  %9854 = vtanh.f32 %v3603_v40  ;;  %v16874_v15 = vadd.f32 %v16463_v23, %v18066_v29  ;;  %v16878_v60 = vadd.f32 %v16470_v8, %v18064_v25 }
 0x646   :  { %v9837_v39 = vpop.eup %9836  ;;  %9856 = vtanh.f32 %v3604_v38  ;;  %v16882_v21 = vadd.f32 %v16478_v10, %v18066_v29  ;;  %v16886_v35 = vadd.f32 %v16481_v20, %v18064_v25 }
 0x647   :  { %v9839_v14 = vpop.eup %9838  ;;  %v6113_v59 = vmul.f32 %v5473_v30, %v16786_v47  ;;  %v4834_v46 = vadd.f32 1.0, %v9837_v39  ;;  %9858 = vtanh.f32 %v3613_v18  ;;  %v3624_v23 = vmul.f32 0.5, %v16874_v15 }
 0x648   :  { %v9841_v28 = vpop.eup %9840  ;;  %v4843_v44 = vadd.f32 1.0, %v9839_v14  ;;  %9860 = vtanh.f32 %v3614_v2  ;;  %v3633_v8 = vmul.f32 0.5, %v16878_v60  ;;  %v3634_v5 = vmul.f32 0.5, %v16882_v21 }
 0x649   :  { %v9843_v10 = vpop.eup %9842  ;;  %v6940_v63 = vadd.f32 %v6939_v12, %v6113_v59  ;;  %v5474_v16 = vmul.f32 0.5, %v4834_v46  ;;  %v4844_v6 = vadd.f32 1.0, %v9841_v28  ;;  %9862 = vtanh.f32 %v3623_v24 }
 0x64a   :  { %v9845_v20 = vpop.eup %9844  ;;  %v5483_v48 = vmul.f32 0.5, %v4843_v44  ;;  %v4853_v33 = vadd.f32 1.0, %v9843_v10  ;;  %9864 = vtanh.f32 %v3624_v23  ;;  %v16893_v47 = vmul.f32 0.5, %v16886_v35 }
 0x64b   :  { %v9847_v56 = vpop.eup %9846  ;;  %v6114_v58 = vmul.f32 %v5474_v16, %v16800_v50  ;;  %v5484_v57 = vmul.f32 0.5, %v4844_v6  ;;  %v4854_v49 = vadd.f32 1.0, %v9845_v20  ;;  %9866 = vtanh.f32 %v3633_v8 }
 0x64c   :  { %v9849_v54 = vpop.eup %9848  ;;  %v6123_v13 = vmul.f32 %v5483_v48, %v16805_v41  ;;  %v5493_v12 = vmul.f32 0.5, %v4853_v33  ;;  %v4863_v17 = vadd.f32 1.0, %v9847_v56  ;;  %9868 = vtanh.f32 %v3634_v5 }
 0x64d   :  { %v9851_v42 = vpop.eup %9850  ;;  %v6977_v40 = vadd.f32 %v6976_v3, %v6114_v58  ;;  %v6124_v1 = vmul.f32 %v5484_v57, %v16811_v4  ;;  %v5494_v32 = vmul.f32 0.5, %v4854_v49  ;;  %v4864_v9 = vadd.f32 1.0, %v9849_v54 }
 0x64e   :  { %v9853_v38 = vpop.eup %9852  ;;  %v6941_v18 = vadd.f32 %v6940_v63, %v6123_v13  ;;  %v6133_v2 = vmul.f32 %v5493_v12, %v16815_v43  ;;  %v5503_v50 = vmul.f32 0.5, %v4863_v17  ;;  %v4873_v24 = vadd.f32 1.0, %v9851_v42 }
 0x64f   :  { %v9855_v30 = vpop.eup %9854  ;;  %v6978_v39 = vadd.f32 %v6977_v40, %v6124_v1  ;;  %v6134_v14 = vmul.f32 %v5494_v32, %v16821_v52  ;;  %v5504_v41 = vmul.f32 0.5, %v4864_v9  ;;  %v4874_v59 = vadd.f32 1.0, %v9853_v38 }
 0x650   :  { %v9857_v46 = vpop.eup %9856  ;;  %v6942_v23 = vadd.f32 %v6941_v18, %v6133_v2  ;;  %v6143_v3 = vmul.f32 %v5503_v50, %v16828_v61  ;;  %v5513_v28 = vmul.f32 0.5, %v4873_v24  ;;  %v4883_v4 = vadd.f32 1.0, %v9855_v30 }
 0x651   :  { %v9859_v44 = vpop.eup %9858  ;;  %v6979_v8 = vadd.f32 %v6978_v39, %v6134_v14  ;;  %v6144_v5 = vmul.f32 %v5504_v41, %v16832_v26  ;;  %v5514_v10 = vmul.f32 0.5, %v4874_v59  ;;  %v4884_v43 = vadd.f32 1.0, %v9857_v46 }
 0x652   :  { %v9861_v63 = vpop.eup %9860  ;;  %v6943_v16 = vadd.f32 %v6942_v23, %v6143_v3  ;;  %v6153_v6 = vmul.f32 %v5513_v28, %v16836_v31  ;;  %v5523_v20 = vmul.f32 0.5, %v4883_v4  ;;  %v4893_v52 = vadd.f32 1.0, %v9859_v44  ;;  %v18182_v4 = vld [vmem:[#allocation93_spill] sm:$0xff] }
 0x653   :  { %v9863_v48 = vpop.eup %9862  ;;  %v6980_v33 = vadd.f32 %v6979_v8, %v6144_v5  ;;  %v6154_v56 = vmul.f32 %v5514_v10, %v16840_v7  ;;  %v5524_v58 = vmul.f32 0.5, %v4884_v43  ;;  %v4894_v61 = vadd.f32 1.0, %v9861_v63  ;;  %v18183_v8 = vld [vmem:[#allocation94_spill] sm:$0xff]  ;;  %v18184_v10 = vld [vmem:[#allocation31_spill] sm:$0xff]  ;;  %v7289_v63 = vld [vmem:[%s17109_s5 + $0x488] sm:$0xff] }
 0x654   :  { %v9865_v57 = vpop.eup %9864  ;;  %v6944_v49 = vadd.f32 %v6943_v16, %v6153_v6  ;;  %v6163_v54 = vmul.f32 %v5523_v20, %v16845_v34  ;;  %v5533_v13 = vmul.f32 0.5, %v4893_v52  ;;  %v4903_v26 = vadd.f32 1.0, %v9863_v48  ;;  %v7288_v43 = vld [vmem:[%s17109_s5 + $0x480] sm:$0xff]  ;;  %v18185_v20 = vld [vmem:[#allocation74_spill] sm:$0xff] }
 0x655   :  { %v9867_v12 = vpop.eup %9866  ;;  %v6981_v17 = vadd.f32 %v6980_v33, %v6154_v56  ;;  %v6164_v42 = vmul.f32 %v5524_v58, %v16853_v22  ;;  %v5534_v40 = vmul.f32 0.5, %v4894_v61  ;;  %v4904_v31 = vadd.f32 1.0, %v9865_v57  ;;  %v7272_v16 = vld [vmem:[%s17109_s5 + $0x400] sm:$0xff]  ;;  %v7273_v33 = vld [vmem:[%s17109_s5 + $0x408] sm:$0xff]  ;;  %v7290_v56 = vld [vmem:[%s17109_s5 + $0x490] sm:$0xff] }
 0x656   :  { %v9869_v1 = vpop.eup %9868  ;;  %v6945_v32 = vadd.f32 %v6944_v49, %v6163_v54  ;;  %v6173_v9 = vmul.f32 %v5533_v13, %v16857_v62  ;;  %v5543_v38 = vmul.f32 0.5, %v4903_v26  ;;  %v4913_v7 = vadd.f32 1.0, %v9867_v12  ;;  %v7291_v58 = vld [vmem:[%s17109_s5 + $0x498] sm:$0xff]  ;;  %v7274_v54 = vld [vmem:[%s17109_s5 + $0x410] sm:$0xff] }
 0x657   :  { %v6982_v18 = vadd.f32 %v6981_v17, %v6164_v42  ;;  %v6174_v2 = vmul.f32 %v5534_v40, %v16861_v36  ;;  %v5544_v50 = vmul.f32 0.5, %v4904_v31  ;;  %v4914_v24 = vadd.f32 1.0, %v9869_v1  ;;  %v7275_v13 = vld [vmem:[%s17109_s5 + $0x418] sm:$0xff] }
 0x658   :  { %v6946_v34 = vadd.f32 %v6945_v32, %v6173_v9  ;;  %v6183_v30 = vmul.f32 %v5543_v38, %v16865_v19  ;;  %v5553_v39 = vmul.f32 0.5, %v4913_v7  ;;  %9870 = vtanh.f32 %v16893_v47  ;;  %v7276_v38 = vld [vmem:[%s17109_s5 + $0x420] sm:$0xff]  ;;  %v7277_v7 = vld [vmem:[%s17109_s5 + $0x428] sm:$0xff] }
 0x659   :  { %v6983_v22 = vadd.f32 %v6982_v18, %v6174_v2  ;;  %v6184_v14 = vmul.f32 %v5544_v50, %v16874_v15  ;;  %v5554_v41 = vmul.f32 0.5, %v4914_v24  ;;  %v16913_v62 = vadd.f32 %v16537_v53, %v18066_v29  ;;  %v7294_v18 = vld [vmem:[%s17109_s5 + $0x4b0] sm:$0xff]  ;;  %v7295_v2 = vld [vmem:[%s17109_s5 + $0x4b8] sm:$0xff] }
 0x65a   :  { %v6947_v59 = vadd.f32 %v6946_v34, %v6183_v30  ;;  %v6193_v46 = vmul.f32 %v5553_v39, %v16878_v60  ;;  %v16918_v36 = vadd.f32 %v16553_v45, %v18064_v25  ;;  %v16922_v19 = vadd.f32 %v16556_v55, %v18066_v29  ;;  %v7278_v34 = vld [vmem:[%s17109_s5 + $0x430] sm:$0xff] }
 0x65b   :  { %v6984_v47 = vadd.f32 %v6983_v22, %v6184_v14  ;;  %v6194_v23 = vmul.f32 %v5554_v41, %v16882_v21  ;;  %v3644_v15 = vmul.f32 0.5, %v16913_v62  ;;  %v16928_v53 = vadd.f32 %v16559_v11, %v18064_v25  ;;  %v7279_v14 = vld [vmem:[%s17109_s5 + $0x438] sm:$0xff]  ;;  %v7296_v41 = vld [vmem:[%s17109_s5 + $0x4c0] sm:$0xff] }
 0x65c   :  { %v16930_v3 = vadd.f32 %v6947_v59, %v6193_v46  ;;  %v3653_v60 = vmul.f32 0.5, %v16918_v36  ;;  %v3654_v45 = vmul.f32 0.5, %v16922_v19  ;;  %v16936_v28 = vadd.f32 %v16562_v0, %v18066_v29 }
 0x65d   :  { %v16938_v55 = vadd.f32 %v6984_v47, %v6194_v23  ;;  %9872 = vtanh.f32 %v3644_v15  ;;  %v3663_v21 = vmul.f32 0.5, %v16928_v53  ;;  %v16943_v44 = vadd.f32 %v18182_v4, %v18064_v25  ;;  %v7280_v15 = vld [vmem:[%s17109_s5 + $0x440] sm:$0xff] }
 0x65e   :  { %9874 = vtanh.f32 %v3653_v60  ;;  %v3664_v11 = vmul.f32 0.5, %v16936_v28  ;;  %v16948_v5 = vadd.f32 %v18183_v8, %v18066_v29  ;;  %v16952_v0 = vadd.f32 %v18184_v10, %v18064_v25  ;;  %v7281_v60 = vld [vmem:[%s17109_s5 + $0x448] sm:$0xff] }
 0x65f   :  { %9876 = vtanh.f32 %v3654_v45  ;;  %v3673_v6 = vmul.f32 0.5, %v16943_v44  ;;  %v16966_v52 = vadd.f32 %v18185_v20, %v18066_v29  ;;  %v16970_v48 = vadd.f32 %v16590_v51, %v18064_v25 }
 0x660   :  { %9878 = vtanh.f32 %v3663_v21  ;;  %v3674_v61 = vmul.f32 0.5, %v16948_v5  ;;  %v3683_v57 = vmul.f32 0.5, %v16952_v0  ;;  %v16985_v25 = vadd.f32 %v16639_v27, %v18066_v29  ;;  %v7292_v29 = vld [vmem:[%s17109_s5 + $0x4a0] sm:$0xff]  ;;  %v7293_v27 = vld [vmem:[%s17109_s5 + $0x4a8] sm:$0xff] }
 0x661   :  { %9880 = vtanh.f32 %v3664_v11  ;;  %v3684_v51 = vmul.f32 0.5, %v16966_v52  ;;  %v8385_v49 = vpack.c.bf16 %v7289_v63, %v7288_v43  ;;  %v3693_v12 = vmul.f32 0.5, %v16970_v48  ;;  %v7298_v11 = vld [vmem:[%s17109_s5 + $0x4d0] sm:$0xff] }
 0x662   :  { %v9871_v26 = vpop.eup %9870  ;;  %9882 = vtanh.f32 %v3673_v6  ;;  %v8387_v17 = vpack.c.bf16 %v7273_v33, %v7272_v16  ;;  %v8389_v42 = vpack.c.bf16 %v7291_v58, %v7290_v56  ;;  %v3694_v31 = vmul.f32 0.5, %v16985_v25 }
 0x663   :  { %v4923_v40 = vadd.f32 1.0, %v9871_v26  ;;  %9884 = vtanh.f32 %v3674_v61  ;;  %8386 = vmatprep.subr.bf16.mxu0 %v8385_v49  ;;  %v8391_v1 = vpack.c.bf16 %v7275_v13, %v7274_v54  ;;  %v8393_v9 = vpack.c.bf16 %v7293_v27, %v7292_v29 }
 0x664   :  { %9886 = vtanh.f32 %v3683_v57  ;;  %8388 = vmatpush3.bf16.msra.mxu0 %v8387_v17  ;;  %v8395_v22 = vpack.c.bf16 %v7277_v7, %v7276_v38  ;;  %v8397_v23 = vpack.c.bf16 %v7295_v2, %v7294_v18  ;;  %v8399_v63 = vpack.c.bf16 %v7279_v14, %v7278_v34 }
 0x665   :  { %v5563_v32 = vmul.f32 0.5, %v4923_v40  ;;  %9888 = vtanh.f32 %v3684_v51  ;;  %8390 = vmatprep.subr.bf16.mxu0 %v8389_v42  ;;  %v8403_v58 = vpack.c.bf16 %v7281_v60, %v7280_v15  ;;  %v7284_v60 = vld [vmem:[%s17109_s5 + $0x460] sm:$0xff] }
 0x666   :  { %9890 = vtanh.f32 %v3693_v12 }
 0x667   :  { %v9873_v50 = vpop.eup %9872  ;;  %v6203_v24 = vmul.f32 %v5563_v32, %v16886_v35  ;;  %9892 = vtanh.f32 %v3694_v31  ;;  %v7297_v35 = vld [vmem:[%s17109_s5 + $0x4c8] sm:$0xff] }
 0x668   :  { %v9875_v30 = vpop.eup %9874  ;;  %v4924_v39 = vadd.f32 1.0, %v9873_v50  ;;  %8392 = vmatpush3.bf16.msra.mxu0 %v8391_v1  ;;  %v8401_v16 = vpack.c.bf16 %v7297_v35, %v7296_v41  ;;  %v7283_v50 = vld [vmem:[%s17109_s5 + $0x458] sm:$0xff] }
 0x669   :  { %v9877_v59 = vpop.eup %9876  ;;  %v6949_v46 = vadd.f32 %v16930_v3, %v6203_v24  ;;  %v4933_v47 = vadd.f32 1.0, %v9875_v30  ;;  %8394 = vmatprep.subr.bf16.mxu0 %v8393_v9  ;;  %v7299_v3 = vld [vmem:[%s17109_s5 + $0x4d8] sm:$0xff] }
 0x66a   :  { %v9879_v45 = vpop.eup %9878  ;;  %v5564_v21 = vmul.f32 0.5, %v4924_v39  ;;  %v4934_v4 = vadd.f32 1.0, %v9877_v59  ;;  %v8405_v54 = vpack.c.bf16 %v7299_v3, %v7298_v11  ;;  %v7301_v39 = vld [vmem:[%s17109_s5 + $0x4e8] sm:$0xff] }
 0x66b   :  { %v9881_v8 = vpop.eup %9880  ;;  %v5573_v10 = vmul.f32 0.5, %v4933_v47  ;;  %v4943_v43 = vadd.f32 1.0, %v9879_v45 }
 0x66c   :  { %v9883_v6 = vpop.eup %9882  ;;  %v6204_v20 = vmul.f32 %v5564_v21, %v16913_v62  ;;  %v5574_v33 = vmul.f32 0.5, %v4934_v4  ;;  %v4944_v56 = vadd.f32 1.0, %v9881_v8  ;;  %8396 = vmatpush3.bf16.msra.mxu0 %v8395_v22 }
 0x66d   :  { %v9885_v61 = vpop.eup %9884  ;;  %v6213_v57 = vmul.f32 %v5573_v10, %v16918_v36  ;;  %v5583_v51 = vmul.f32 0.5, %v4943_v43  ;;  %v4953_v49 = vadd.f32 1.0, %v9883_v6  ;;  %8398 = vmatprep.subr.bf16.mxu0 %v8397_v23  ;;  %v7286_v43 = vld [vmem:[%s17109_s5 + $0x470] sm:$0xff] }
 0x66e   :  { %v9887_v13 = vpop.eup %9886  ;;  %v6986_v26 = vadd.f32 %v16938_v55, %v6204_v20  ;;  %v6214_v12 = vmul.f32 %v5574_v33, %v16922_v19  ;;  %v5584_v17 = vmul.f32 0.5, %v4944_v56  ;;  %v4954_v42 = vadd.f32 1.0, %v9885_v61 }
 0x66f   :  { %v9889_v29 = vpop.eup %9888  ;;  %v6950_v62 = vadd.f32 %v6949_v46, %v6213_v57  ;;  %v6223_v27 = vmul.f32 %v5583_v51, %v16928_v53  ;;  %v5593_v40 = vmul.f32 0.5, %v4953_v49  ;;  %v4963_v31 = vadd.f32 1.0, %v9887_v13  ;;  %v7282_v53 = vld [vmem:[%s17109_s5 + $0x450] sm:$0xff] }
 0x670   :  { %v9891_v1 = vpop.eup %9890  ;;  %v6987_v32 = vadd.f32 %v6986_v26, %v6214_v12  ;;  %v6224_v36 = vmul.f32 %v5584_v17, %v16936_v28  ;;  %v5594_v9 = vmul.f32 0.5, %v4954_v42  ;;  %v4964_v38 = vadd.f32 1.0, %v9889_v29  ;;  %8400 = vmatpush3.bf16.msra.mxu0 %v8399_v63  ;;  %v18186_v26 = vld [vmem:[#allocation71_spill] sm:$0xff]  ;;  %v18187_v17 = vld [vmem:[#allocation80_spill] sm:$0xff] }
 0x671   :  { %v9893_v7 = vpop.eup %9892  ;;  %v6951_v18 = vadd.f32 %v6950_v62, %v6223_v27  ;;  %v6233_v55 = vmul.f32 %v5593_v40, %v16943_v44  ;;  %v5603_v19 = vmul.f32 0.5, %v4963_v31  ;;  %v4973_v2 = vadd.f32 1.0, %v9891_v1  ;;  %8402 = vmatprep.subr.bf16.mxu0 %v8401_v16  ;;  %v7300_v44 = vld [vmem:[%s17109_s5 + $0x4e0] sm:$0xff] }
 0x672   :  { %v6988_v24 = vadd.f32 %v6987_v32, %v6224_v36  ;;  %v6234_v28 = vmul.f32 %v5594_v9, %v16948_v5  ;;  %v5604_v34 = vmul.f32 0.5, %v4964_v38  ;;  %v4974_v30 = vadd.f32 1.0, %v9893_v7  ;;  %v6257_v32 = vld [vmem:[#allocation2 + $0x10] sm:$0xf]  ;;  %v18189_v38 = vld [vmem:[#allocation47_spill] sm:$0xff] }
 0x673   :  { %v6952_v22 = vadd.f32 %v6951_v18, %v6233_v55  ;;  %v6243_v14 = vmul.f32 %v5603_v19, %v16952_v0  ;;  %v5613_v41 = vmul.f32 0.5, %v4973_v2  ;;  %v8407_v5 = vpack.c.bf16 %v7283_v50, %v7282_v53  ;;  %v7285_v0 = vld [vmem:[%s17109_s5 + $0x468] sm:$0xff] }
 0x674   :  { %v6989_v35 = vadd.f32 %v6988_v24, %v6234_v28  ;;  %v6244_v59 = vmul.f32 %v5604_v34, %v16966_v52  ;;  %v5614_v46 = vmul.f32 0.5, %v4974_v30  ;;  %8404 = vmatpush3.bf16.msra.mxu0 %v8403_v58  ;;  %v8409_v15 = vpack.c.bf16 %v7301_v39, %v7300_v44  ;;  %v7302_v52 = vld [vmem:[%s17109_s5 + $0x4f0] sm:$0xff] }
 0x675   :  { %v6953_v47 = vadd.f32 %v6952_v22, %v6243_v14  ;;  %v6253_v23 = vmul.f32 %v5613_v41, %v16970_v48  ;;  %8406 = vmatprep.subr.bf16.mxu0 %v8405_v54  ;;  %v7303_v48 = vld [vmem:[%s17109_s5 + $0x4f8] sm:$0xff]  ;;  %v8411_v3 = vpack.c.bf16 %v7285_v0, %v7284_v60  ;;  %v18188_v42 = vcombine.low %v16665_v37, %v18187_v17 }
 0x676   :  { %v6990_v45 = vadd.f32 %v6989_v35, %v6244_v59  ;;  %v6254_v21 = vmul.f32 %v5614_v46, %v16985_v25  ;;  %v8413_v10 = vpack.c.bf16 %v7303_v48, %v7302_v52  ;;  %v7287_v25 = vld [vmem:[%s17109_s5 + $0x478] sm:$0xff]  ;;  %s9923_s5 = smov [#allocation3]  }
 0x677   :  { %v6954_v4 = vadd.f32 %v6953_v47, %v6253_v23  ;;  %v8415_v20 = vpack.c.bf16 %v7287_v25, %v7286_v43  ;;  %v7059_v29 = vrot.slane %v18188_v42, %v18186_v26  ;;  %s7723_s24 = sshll.u32 %s9923_s5, 4  ;;  %s7724_s24 = int_to_ptr.vmem [resolvable:$true] %s7723_s24 }
 0x678   :  { %v6991_v11 = vadd.f32 %v6990_v45, %v6254_v21  ;;  %8408 = vmatpush3.bf16.msra.mxu0 %v8407_v5  ;;  %s9896_s25 = scalar_lea.vmem %s7724_s24, 32  ;;  %p9901_p1 = scmp.lt.s32.totalorder %s7724_s24, %s7724_s24 }
 0x679   :  { %v6955_v8 = vrot.slane %v6954_v4, 4  ;;  %8410 = vmatprep.subr.bf16.mxu0 %v8409_v15  ;;  %p9897_p0 = scmp.ne.s32.totalorder %s7724_s24, %s9896_s25  ;;  %p9902_p2 = scmp.lt.s32.totalorder %s9896_s25, %s9896_s25 }
 0x67a   :  { %v6992_v63 = vrot.slane %v6991_v11, 4 }
 0x67b   :  { %v6956_v16 = vadd.f32 %v6955_v8, %v6954_v4  ;;  %p9903_p3 = por %p9902_p2, %p9901_p1 }
 0x67c   :  { %v6993_v6 = vadd.f32 %v6992_v63, %v6991_v11  ;;  %8412 = vmatpush3.bf16.msra.mxu0 %v8411_v3 }
 0x67d   :  { %v6957_v33 = vrot.slane %v6956_v16, 2  ;;  %8414 = vmatprep.subr.bf16.mxu0 %v8413_v10  ;;  %p9904_p4 = pnand %p9903_p3, %p9897_p0 }
 0x67e   :  { %v6994_v56 = vrot.slane %v6993_v6, 2 }
 0x67f   :  { %v6958_v58 = vadd.f32 %v6957_v33, %v6956_v16 }
 0x680   :  { %v6995_v61 = vadd.f32 %v6994_v56, %v6993_v6  ;;  %8416 = vmatpush3.bf16.msra.mxu0 %v8415_v20 }
 0x681   :  { %v6959_v57 = vrot.slane %v6958_v58, 1 }
 0x682   :  { %v6996_v51 = vrot.slane %v6995_v61, 1 }
 0x683   :  { %v6960_v49 = vadd.f32 %v6959_v57, %v6958_v58 }
 0x684   :  { %v6997_v54 = vadd.f32 %v6996_v51, %v6995_v61 }
 0x686   :  { %v7094_v13 = vcombine.low %v6960_v49, %v6997_v54 }
 0x688   :  { %v7101_v12 = vrot.slane %v7094_v13, %v18186_v26 }
 0x68a   :  { %v7124_v62 = vrot.slane %v7101_v12, 7  ;;  %v8116_v27 = vpop.f32.mrb[68].mxu0 }
 0x68b   :  { %v8117_v40 = vpop.f32.mrb[69].mxu0 }
 0x68c   :  { %v7125_v31 = vsel %vm7107_vm1, %v7124_v62, %v7059_v29  ;;  %v8118_v1 = vadd.f32 %v8117_v40, %v8116_v27 }
 0x68d   :  { %v7126_v36 = vsel %vm7109_vm2, %v7124_v62, %v7125_v31 }
 0x68e   :  { %v7127_v9 = vsel %vm7111_vm3, %v7124_v62, %v7126_v36  ;;  %v7573_v7 = vadd.f32 %v8118_v1, %v18189_v38 }
 0x68f   :  { %v7128_v18 = vsel %vm7113_vm4, %v7124_v62, %v7127_v9 }
 0x690   :  { %v7134_v55 = vadd.f32 %v7128_v18, %v6257_v32 }
 0x692   :  { %7137 = vst [vmem:[#allocation2 + $0x10] sm:$0xf] %v7134_v55 }
 0x699   :  { %v7979_v19 = vld.sshfl [vmem:[#allocation2 + $0x10] sm:$0x33 pattern:$0x76325410] }
 0x69a   :  { %v7355_v37 = vcombine.high %v7979_v19, %v7979_v19 }
 0x69c   :  { %7710 = vmatprep.mubr.f32.mxu0 %v7355_v37 }
 0x69d   :  { %7711 = vmatmul.mubr.f32.vlgmr.msra.gmra.mrb[72].mxu0 %v7979_v19 }
 0x6ab   :  { %v8151_v2 = vpop.f32.mrb[70].mxu0 }
 0x6ac   :  { %v8152_v53 = vpop.f32.mrb[71].mxu0 }
 0x6ad   :  { %v8153_v50 = vadd.f32 %v8152_v53, %v8151_v2 }
 0x6af   :  { %v7643_v24 = vadd.f32 %v8153_v50, %v7573_v7 }
 0x770   :  { %v8186_v28 = vpop.f32.mrb[72].mxu0 }
 0x771   :  { %v8187_v34 = vpop.f32.mrb[73].mxu0 }
 0x772   :  { %v8188_v30 = vadd.f32 %v8187_v34, %v8186_v28 }
 0x774   :  { %v7713_v44 = vadd.f32 %v8188_v30, %v7643_v24 }
 0x776   :  { %7716 = vst [vmem:[#allocation3] sm:$0x3] %v7713_v44 }
 0x777   :  { %9907 = shalt.err (!%p9904_p4)
}
 0x778   :  { %s9908_s27 = scalar_lea.hbm %s17111_s7, 32 }
 0x779   :  { %p9909_p5 = scmp.ne.s32.totalorder %s17111_s7, %s9908_s27  ;;  %p9912_p6 = scmp.lt.u32.totalorder %s9908_s27, %s17111_s7 }
 0x77b   :  { %p9914_p7 = pnand %p9912_p6, %p9909_p5 }
 0x77d   :  { %9917 = shalt.err (!%p9914_p7)
}
 0x77e   :  { %7726 = dma.vmem_to_hbm [thread:$0]  %s7724_s24, 32, %s17111_s7, [#allocation4]  }
 0x77f   :  { %9918 = dma.done.wait [#allocation4], 32  }
 0x780   :  { %9919 = vsyncadd [#allocation4], 4294967264 }
 0x781   :  { %7730 = vsyncpa [#allocation4], 1 }

</bundles_post_ra>
